<compile_context>
chip_gen: v7x
topology: tpu7x:2x2x1
jax: 0.10.0
libtpu: 0.0.40
codegen_flags: <defaults>
</compile_context>

<pallas_src>
import math

import jax
import jax.numpy as jnp
from jax.experimental import pallas as pl
from jax.experimental.pallas import tpu as pltpu

VMEM_SPEC = pl.BlockSpec(memory_space=pltpu.MemorySpace.VMEM)
OUT_PAD = 128  # lane-dense padded width for the final (dout=3) projection


def _layernorm(x, gamma, beta, eps=1e-5):
    mu = jnp.mean(x, axis=-1, keepdims=True)
    xc = x - mu
    var = jnp.mean(xc * xc, axis=-1, keepdims=True)
    inv = jax.lax.rsqrt(var + eps)
    return xc * inv * gamma + beta


def make_fused_forward_kernel(nblocks, nhead, mm_dtype):
    """Entire forward: in_layer -> nblocks encoder layers -> out_layer."""

    def kernel(x_ref, in_w_ref, in_b_ref,
               wqkv_ref, bqkv_ref, wo_ref, wff_ref, vecs_ref,
               out_w_ref, out_b_ref, o_ref):
        # ---- input linear (weights pre-transposed to (in, out)) -------------
        h = (jnp.dot(x_ref[...].astype(mm_dtype), in_w_ref[...],
                     preferred_element_type=jnp.float32) + in_b_ref[...])
        # TODO(synk): nn.Dropout layers are identity here (eval/inference mode).

        # ---- encoder blocks (static unroll; everything stays in VMEM) -------
        for blk in range(nblocks):
            # packed per-block row vectors: [b_o, b1, b2, g1, be1, g2, be2]
            b_o = vecs_ref[blk, 0]
            b1 = vecs_ref[blk, 1]
            b2 = vecs_ref[blk, 2]
            g1 = vecs_ref[blk, 3]
            be1 = vecs_ref[blk, 4]
            g2 = vecs_ref[blk, 5]
            be2 = vecs_ref[blk, 6]

            hb = h.astype(mm_dtype)  # one cast feeds all projections this block

            # Self-attention: head split lives in the weights; each head is a
            # chain of direct 2-D MXU matmuls (no activation slicing / stack /
            # concat).  The output projection contracts (head, hd) by
            # accumulating per-head (N, d) contributions.
            attn = None
            for head in range(nhead):
                def proj(which, _head=head):
                    idx = which * nhead + _head
                    return (jnp.dot(hb, wqkv_ref[blk, idx],
                                    preferred_element_type=jnp.float32)
                            + bqkv_ref[blk, idx])

                q = proj(0)  # (N, hd); 1/sqrt(hd) already folded into W_q, b_q
                k = proj(1)
                v = proj(2)

                s = jnp.einsum('qe,ke->qk', q, k,
                               preferred_element_type=jnp.float32)   # (N, N)
                s = s - jnp.max(s, axis=-1, keepdims=True)
                p = jnp.exp(s)
                # approx reciprocal (EUP slot); ~2^-12 rel. error, fine for
                # inference — use an exact divide if bit-parity is required.
                p = p * pl.reciprocal(jnp.sum(p, axis=-1, keepdims=True),
                                      approx=True)
                ctx = jnp.dot(p, v, preferred_element_type=jnp.float32)  # (N, hd)
                hproj = jnp.dot(ctx.astype(mm_dtype), wo_ref[blk, head],
                                preferred_element_type=jnp.float32)      # (N, D)
                attn = hproj if attn is None else attn + hproj
            attn = attn + b_o

            # post-norm residual 1
            h = _layernorm(h + attn, g1, be1)

            # feed-forward (ReLU), dim_feedforward == d_model in this module
            ff = (jnp.dot(h.astype(mm_dtype), wff_ref[blk, 0],
                          preferred_element_type=jnp.float32) + b1)
            ff = jnp.maximum(ff, 0.0)
            ff = (jnp.dot(ff.astype(mm_dtype), wff_ref[blk, 1],
                          preferred_element_type=jnp.float32) + b2)

            # post-norm residual 2
            h = _layernorm(h + ff, g2, be2)

        # ---- output linear into a lane-dense zero-padded slab ----------------
        o_ref[...] = (jnp.dot(h.astype(out_w_ref.dtype), out_w_ref[...],
                              preferred_element_type=jnp.float32) + out_b_ref[...])

    return kernel


def fog_transformer_encoder_forward(x, params, cfg):
    d_in = cfg["window_size"] * 3
    h = x.reshape(-1, d_in).astype(jnp.float32)   # PyTorch x.view(-1, window_size*3)
    n = h.shape[0]

    args = (
        h,
        params["in_w"], params["in_b"],
        params["w_qkv"], params["b_qkv"],
        params["w_o"], params["w_ff"], params["vecs"],
        params["out_w"], params["out_b"],
    )
    y_padded = pl.pallas_call(
        make_fused_forward_kernel(cfg["model_nblocks"], cfg["model_nhead"],
                                  params["in_w"].dtype),
        out_shape=jax.ShapeDtypeStruct((n, OUT_PAD), jnp.float32),
        in_specs=[VMEM_SPEC] * len(args),
        out_specs=VMEM_SPEC,
    )(*args)
    # slice the lane-dense slab down to the real 3 output features
    return y_padded[:, :3]


# ---------------------------------------------------------------------------
# Parameter construction (deterministic, synthetic).
#   * Matmul weights are stored pre-transposed (in_features, out_features) and
#     in bf16 (f32 accumulate in-kernel); biases / LayerNorm params stay f32.
#   * QKV / output-projection weights are stored head-major so the head split
#     never touches activations.  The 1/sqrt(head_dim) softmax scale is folded
#     into W_q and b_q.
#   * Tiny per-block row vectors are packed into one (nblocks, 7, 1, d) array.
# ---------------------------------------------------------------------------
def init_params(cfg, key, matmul_dtype=jnp.bfloat16):
    d_in = cfg["window_size"] * 3
    d = cfg["model_hidden"]
    nhead = cfg["model_nhead"]
    hd = d // nhead
    dff = d  # dim_feedforward == d_model in the original module (do not "fix")
    nblocks = cfg["model_nblocks"]
    scale = 1.0 / math.sqrt(hd)

    keys = jax.random.split(key, 16)
    kit = iter(keys)

    def w(shape):
        return 0.02 * jax.random.normal(next(kit), shape, jnp.float32)

    # head-major QKV weights/biases, softmax scale folded into the Q projection
    w_qkv = w((nblocks, 3, nhead, d, hd))
    b_qkv = w((nblocks, 3, nhead, 1, hd))
    w_qkv = w_qkv.at[:, 0].multiply(scale)
    b_qkv = b_qkv.at[:, 0].multiply(scale)
    w_qkv = w_qkv.reshape(nblocks, 3 * nhead, d, hd)
    b_qkv = b_qkv.reshape(nblocks, 3 * nhead, 1, hd)

    w_o = w((nblocks, nhead, hd, d))          # per-head rows of the out proj
    w_ff = w((nblocks, 2, d, dff))            # [W1, W2] stacked (dff == d)

    b_o = w((nblocks, 1, d))
    b1 = w((nblocks, 1, d))
    b2 = w((nblocks, 1, d))
    g1 = jnp.ones((nblocks, 1, d), jnp.float32)
    be1 = jnp.zeros((nblocks, 1, d), jnp.float32)
    g2 = jnp.ones((nblocks, 1, d), jnp.float32)
    be2 = jnp.zeros((nblocks, 1, d), jnp.float32)
    vecs = jnp.stack([b_o, b1, b2, g1, be1, g2, be2], axis=1)  # (nblocks, 7, 1, d)

    # out_layer_finetune: real shape (d, 3); zero-padded to (d, OUT_PAD) so the
    # kernel's stored output is lane-dense; padding columns are exactly zero and
    # are sliced off in the wrapper.
    out_w = jnp.zeros((d, OUT_PAD), jnp.float32).at[:, :3].set(w((d, 3)))
    out_b = jnp.zeros((1, OUT_PAD), jnp.float32).at[:, :3].set(w((1, 3)))

    return {
        "in_w": w((d_in, d)).astype(matmul_dtype),
        "in_b": w((1, d)),
        "w_qkv": w_qkv.astype(matmul_dtype),
        "b_qkv": b_qkv,
        "w_o": w_o.astype(matmul_dtype),
        "w_ff": w_ff.astype(matmul_dtype),
        "vecs": vecs,
        "out_w": out_w.astype(matmul_dtype),
        "out_b": out_b,
    }


if __name__ == "__main__":
    cfg = {
        "model_dropout": 0.1,
        "model_hidden": 32,
        "model_nblocks": 2,
        "model_nhead": 4,
        "window_size": 16,
        "window_future": 4,
    }
    key = jax.random.PRNGKey(0)
    k_x, k_p = jax.random.split(key)
    # 128 windows per call -> every matmul has a full 128-row M dimension.
    x = jax.random.normal(k_x, (128, cfg["window_size"], 3), jnp.float32)
    params = init_params(cfg, k_p)

    out = fog_transformer_encoder_forward(x, params, cfg)
    out = jax.block_until_ready(out)
    assert out.shape == (128, 3), out.shape
    print("KERNEL_OK")
</pallas_src>

<mosaic_0001>
module attributes {stable_mosaic.version = 11 : i64} {
  func.func @kernel(%arg0: memref<128x48xf32, #tpu.memory_space<vmem>>, %arg1: memref<48x32xbf16, #tpu.memory_space<vmem>>, %arg2: memref<1x32xf32, #tpu.memory_space<vmem>>, %arg3: memref<2x12x32x8xbf16, #tpu.memory_space<vmem>>, %arg4: memref<2x12x1x8xf32, #tpu.memory_space<vmem>>, %arg5: memref<2x4x8x32xbf16, #tpu.memory_space<vmem>>, %arg6: memref<2x2x32x32xbf16, #tpu.memory_space<vmem>>, %arg7: memref<2x7x1x32xf32, #tpu.memory_space<vmem>>, %arg8: memref<32x128xbf16, #tpu.memory_space<vmem>>, %arg9: memref<1x128xf32, #tpu.memory_space<vmem>>, %arg10: memref<128x128xf32, #tpu.memory_space<vmem>>) attributes {dimension_semantics = [], scalar_prefetch = 0 : i64, scratch_operands = 0 : i64, tpu.core_type = #tpu.core_type<tc>} {
    %c0 = arith.constant 0 : index
    %c0_0 = arith.constant 0 : index
    %0 = vector.load %arg0[%c0, %c0_0] : memref<128x48xf32, #tpu.memory_space<vmem>>, vector<128x48xf32>
    %1 = arith.truncf %0 : vector<128x48xf32> to vector<128x48xbf16>
    %c0_1 = arith.constant 0 : index
    %c0_2 = arith.constant 0 : index
    %2 = vector.load %arg1[%c0_1, %c0_2] : memref<48x32xbf16, #tpu.memory_space<vmem>>, vector<48x32xbf16>
    %cst = arith.constant dense<0.000000e+00> : vector<128x32xf32>
    %3 = tpu.matmul %1, %2, %cst {dimension_numbers = #tpu.dot_dimension_numbers<[1], [0], [0], [1], [0, 0, 1, 1], [], []>} : vector<128x48xbf16>, vector<48x32xbf16>, vector<128x32xf32> -> vector<128x32xf32>
    %c0_3 = arith.constant 0 : index
    %c0_4 = arith.constant 0 : index
    %4 = vector.load %arg2[%c0_3, %c0_4] : memref<1x32xf32, #tpu.memory_space<vmem>>, vector<1x32xf32>
    %5 = vector.broadcast %4 : vector<1x32xf32> to vector<128x32xf32>
    %6 = arith.addf %3, %5 : vector<128x32xf32>
    %c0_5 = arith.constant 0 : index
    %c0_6 = arith.constant 0 : index
    %c0_7 = arith.constant 0 : index
    %c0_8 = arith.constant 0 : index
    %7 = vector.load %arg7[%c0_5, %c0_6, %c0_7, %c0_8] : memref<2x7x1x32xf32, #tpu.memory_space<vmem>>, vector<1x1x1x32xf32>
    %8 = vector.shape_cast %7 : vector<1x1x1x32xf32> to vector<1x32xf32>
    %c0_9 = arith.constant 0 : index
    %c1 = arith.constant 1 : index
    %c0_10 = arith.constant 0 : index
    %c0_11 = arith.constant 0 : index
    %9 = vector.load %arg7[%c0_9, %c1, %c0_10, %c0_11] : memref<2x7x1x32xf32, #tpu.memory_space<vmem>>, vector<1x1x1x32xf32>
    %10 = vector.shape_cast %9 : vector<1x1x1x32xf32> to vector<1x32xf32>
    %c0_12 = arith.constant 0 : index
    %c2 = arith.constant 2 : index
    %c0_13 = arith.constant 0 : index
    %c0_14 = arith.constant 0 : index
    %11 = vector.load %arg7[%c0_12, %c2, %c0_13, %c0_14] : memref<2x7x1x32xf32, #tpu.memory_space<vmem>>, vector<1x1x1x32xf32>
    %12 = vector.shape_cast %11 : vector<1x1x1x32xf32> to vector<1x32xf32>
    %c0_15 = arith.constant 0 : index
    %c3 = arith.constant 3 : index
    %c0_16 = arith.constant 0 : index
    %c0_17 = arith.constant 0 : index
    %13 = vector.load %arg7[%c0_15, %c3, %c0_16, %c0_17] : memref<2x7x1x32xf32, #tpu.memory_space<vmem>>, vector<1x1x1x32xf32>
    %14 = vector.shape_cast %13 : vector<1x1x1x32xf32> to vector<1x32xf32>
    %c0_18 = arith.constant 0 : index
    %c4 = arith.constant 4 : index
    %c0_19 = arith.constant 0 : index
    %c0_20 = arith.constant 0 : index
    %15 = vector.load %arg7[%c0_18, %c4, %c0_19, %c0_20] : memref<2x7x1x32xf32, #tpu.memory_space<vmem>>, vector<1x1x1x32xf32>
    %16 = vector.shape_cast %15 : vector<1x1x1x32xf32> to vector<1x32xf32>
    %c0_21 = arith.constant 0 : index
    %c5 = arith.constant 5 : index
    %c0_22 = arith.constant 0 : index
    %c0_23 = arith.constant 0 : index
    %17 = vector.load %arg7[%c0_21, %c5, %c0_22, %c0_23] : memref<2x7x1x32xf32, #tpu.memory_space<vmem>>, vector<1x1x1x32xf32>
    %18 = vector.shape_cast %17 : vector<1x1x1x32xf32> to vector<1x32xf32>
    %c0_24 = arith.constant 0 : index
    %c6 = arith.constant 6 : index
    %c0_25 = arith.constant 0 : index
    %c0_26 = arith.constant 0 : index
    %19 = vector.load %arg7[%c0_24, %c6, %c0_25, %c0_26] : memref<2x7x1x32xf32, #tpu.memory_space<vmem>>, vector<1x1x1x32xf32>
    %20 = vector.shape_cast %19 : vector<1x1x1x32xf32> to vector<1x32xf32>
    %21 = arith.truncf %6 : vector<128x32xf32> to vector<128x32xbf16>
    %c0_27 = arith.constant 0 : index
    %c0_28 = arith.constant 0 : index
    %c0_29 = arith.constant 0 : index
    %c0_30 = arith.constant 0 : index
    %22 = vector.load %arg3[%c0_27, %c0_28, %c0_29, %c0_30] : memref<2x12x32x8xbf16, #tpu.memory_space<vmem>>, vector<1x1x32x8xbf16>
    %23 = vector.shape_cast %22 : vector<1x1x32x8xbf16> to vector<32x8xbf16>
    %cst_31 = arith.constant dense<0.000000e+00> : vector<128x8xf32>
    %24 = tpu.matmul %21, %23, %cst_31 {dimension_numbers = #tpu.dot_dimension_numbers<[1], [0], [0], [1], [0, 0, 1, 1], [], []>} : vector<128x32xbf16>, vector<32x8xbf16>, vector<128x8xf32> -> vector<128x8xf32>
    %c0_32 = arith.constant 0 : index
    %c0_33 = arith.constant 0 : index
    %c0_34 = arith.constant 0 : index
    %c0_35 = arith.constant 0 : index
    %25 = vector.load %arg4[%c0_32, %c0_33, %c0_34, %c0_35] : memref<2x12x1x8xf32, #tpu.memory_space<vmem>>, vector<1x1x1x8xf32>
    %26 = vector.shape_cast %25 : vector<1x1x1x8xf32> to vector<1x8xf32>
    %27 = vector.broadcast %26 : vector<1x8xf32> to vector<128x8xf32>
    %28 = arith.addf %24, %27 : vector<128x8xf32>
    %c0_36 = arith.constant 0 : index
    %c4_37 = arith.constant 4 : index
    %c0_38 = arith.constant 0 : index
    %c0_39 = arith.constant 0 : index
    %29 = vector.load %arg3[%c0_36, %c4_37, %c0_38, %c0_39] : memref<2x12x32x8xbf16, #tpu.memory_space<vmem>>, vector<1x1x32x8xbf16>
    %30 = vector.shape_cast %29 : vector<1x1x32x8xbf16> to vector<32x8xbf16>
    %cst_40 = arith.constant dense<0.000000e+00> : vector<128x8xf32>
    %31 = tpu.matmul %21, %30, %cst_40 {dimension_numbers = #tpu.dot_dimension_numbers<[1], [0], [0], [1], [0, 0, 1, 1], [], []>} : vector<128x32xbf16>, vector<32x8xbf16>, vector<128x8xf32> -> vector<128x8xf32>
    %c0_41 = arith.constant 0 : index
    %c4_42 = arith.constant 4 : index
    %c0_43 = arith.constant 0 : index
    %c0_44 = arith.constant 0 : index
    %32 = vector.load %arg4[%c0_41, %c4_42, %c0_43, %c0_44] : memref<2x12x1x8xf32, #tpu.memory_space<vmem>>, vector<1x1x1x8xf32>
    %33 = vector.shape_cast %32 : vector<1x1x1x8xf32> to vector<1x8xf32>
    %34 = vector.broadcast %33 : vector<1x8xf32> to vector<128x8xf32>
    %35 = arith.addf %31, %34 : vector<128x8xf32>
    %c0_45 = arith.constant 0 : index
    %c8 = arith.constant 8 : index
    %c0_46 = arith.constant 0 : index
    %c0_47 = arith.constant 0 : index
    %36 = vector.load %arg3[%c0_45, %c8, %c0_46, %c0_47] : memref<2x12x32x8xbf16, #tpu.memory_space<vmem>>, vector<1x1x32x8xbf16>
    %37 = vector.shape_cast %36 : vector<1x1x32x8xbf16> to vector<32x8xbf16>
    %cst_48 = arith.constant dense<0.000000e+00> : vector<128x8xf32>
    %38 = tpu.matmul %21, %37, %cst_48 {dimension_numbers = #tpu.dot_dimension_numbers<[1], [0], [0], [1], [0, 0, 1, 1], [], []>} : vector<128x32xbf16>, vector<32x8xbf16>, vector<128x8xf32> -> vector<128x8xf32>
    %c0_49 = arith.constant 0 : index
    %c8_50 = arith.constant 8 : index
    %c0_51 = arith.constant 0 : index
    %c0_52 = arith.constant 0 : index
    %39 = vector.load %arg4[%c0_49, %c8_50, %c0_51, %c0_52] : memref<2x12x1x8xf32, #tpu.memory_space<vmem>>, vector<1x1x1x8xf32>
    %40 = vector.shape_cast %39 : vector<1x1x1x8xf32> to vector<1x8xf32>
    %41 = vector.broadcast %40 : vector<1x8xf32> to vector<128x8xf32>
    %42 = arith.addf %38, %41 : vector<128x8xf32>
    "tpu.trace_start"() <{level = 10 : i32, message = "qe,ke->qk"}> : () -> ()
    %cst_53 = arith.constant dense<0.000000e+00> : vector<128x128xf32>
    %43 = tpu.matmul %28, %35, %cst_53 {dimension_numbers = #tpu.dot_dimension_numbers<[1], [1], [0], [0], [0, 0, 1, 0], [], []>} : vector<128x8xf32>, vector<128x8xf32>, vector<128x128xf32> -> vector<128x128xf32>
    "tpu.trace_stop"() : () -> ()
    %cst_54 = arith.constant dense<0xFF800000> : vector<128xf32>
    %44 = vector.multi_reduction <maximumf>, %43, %cst_54 [1] : vector<128x128xf32> to vector<128xf32>
    %45 = vector.shape_cast %44 : vector<128xf32> to vector<128x1xf32>
    %46 = vector.broadcast %45 : vector<128x1xf32> to vector<128x128xf32>
    %47 = arith.subf %43, %46 : vector<128x128xf32>
    %48 = math.exp %47 : vector<128x128xf32>
    %cst_55 = arith.constant dense<0.000000e+00> : vector<128xf32>
    %49 = vector.multi_reduction <add>, %48, %cst_55 [1] : vector<128x128xf32> to vector<128xf32>
    %50 = vector.shape_cast %49 : vector<128xf32> to vector<128x1xf32>
    %51 = tpu.reciprocal %50 {approx = true} : vector<128x1xf32> -> vector<128x1xf32>
    %52 = vector.broadcast %51 : vector<128x1xf32> to vector<128x128xf32>
    %53 = arith.mulf %48, %52 : vector<128x128xf32>
    %cst_56 = arith.constant dense<0.000000e+00> : vector<128x8xf32>
    %54 = tpu.matmul %53, %42, %cst_56 {dimension_numbers = #tpu.dot_dimension_numbers<[1], [0], [0], [1], [0, 0, 1, 1], [], []>} : vector<128x128xf32>, vector<128x8xf32>, vector<128x8xf32> -> vector<128x8xf32>
    %55 = arith.truncf %54 : vector<128x8xf32> to vector<128x8xbf16>
    %c0_57 = arith.constant 0 : index
    %c0_58 = arith.constant 0 : index
    %c0_59 = arith.constant 0 : index
    %c0_60 = arith.constant 0 : index
    %56 = vector.load %arg5[%c0_57, %c0_58, %c0_59, %c0_60] : memref<2x4x8x32xbf16, #tpu.memory_space<vmem>>, vector<1x1x8x32xbf16>
    %57 = vector.shape_cast %56 : vector<1x1x8x32xbf16> to vector<8x32xbf16>
    %cst_61 = arith.constant dense<0.000000e+00> : vector<128x32xf32>
    %58 = tpu.matmul %55, %57, %cst_61 {dimension_numbers = #tpu.dot_dimension_numbers<[1], [0], [0], [1], [0, 0, 1, 1], [], []>} : vector<128x8xbf16>, vector<8x32xbf16>, vector<128x32xf32> -> vector<128x32xf32>
    %c0_62 = arith.constant 0 : index
    %c1_63 = arith.constant 1 : index
    %c0_64 = arith.constant 0 : index
    %c0_65 = arith.constant 0 : index
    %59 = vector.load %arg3[%c0_62, %c1_63, %c0_64, %c0_65] : memref<2x12x32x8xbf16, #tpu.memory_space<vmem>>, vector<1x1x32x8xbf16>
    %60 = vector.shape_cast %59 : vector<1x1x32x8xbf16> to vector<32x8xbf16>
    %cst_66 = arith.constant dense<0.000000e+00> : vector<128x8xf32>
    %61 = tpu.matmul %21, %60, %cst_66 {dimension_numbers = #tpu.dot_dimension_numbers<[1], [0], [0], [1], [0, 0, 1, 1], [], []>} : vector<128x32xbf16>, vector<32x8xbf16>, vector<128x8xf32> -> vector<128x8xf32>
    %c0_67 = arith.constant 0 : index
    %c1_68 = arith.constant 1 : index
    %c0_69 = arith.constant 0 : index
    %c0_70 = arith.constant 0 : index
    %62 = vector.load %arg4[%c0_67, %c1_68, %c0_69, %c0_70] : memref<2x12x1x8xf32, #tpu.memory_space<vmem>>, vector<1x1x1x8xf32>
    %63 = vector.shape_cast %62 : vector<1x1x1x8xf32> to vector<1x8xf32>
    %64 = vector.broadcast %63 : vector<1x8xf32> to vector<128x8xf32>
    %65 = arith.addf %61, %64 : vector<128x8xf32>
    %c0_71 = arith.constant 0 : index
    %c5_72 = arith.constant 5 : index
    %c0_73 = arith.constant 0 : index
    %c0_74 = arith.constant 0 : index
    %66 = vector.load %arg3[%c0_71, %c5_72, %c0_73, %c0_74] : memref<2x12x32x8xbf16, #tpu.memory_space<vmem>>, vector<1x1x32x8xbf16>
    %67 = vector.shape_cast %66 : vector<1x1x32x8xbf16> to vector<32x8xbf16>
    %cst_75 = arith.constant dense<0.000000e+00> : vector<128x8xf32>
    %68 = tpu.matmul %21, %67, %cst_75 {dimension_numbers = #tpu.dot_dimension_numbers<[1], [0], [0], [1], [0, 0, 1, 1], [], []>} : vector<128x32xbf16>, vector<32x8xbf16>, vector<128x8xf32> -> vector<128x8xf32>
    %c0_76 = arith.constant 0 : index
    %c5_77 = arith.constant 5 : index
    %c0_78 = arith.constant 0 : index
    %c0_79 = arith.constant 0 : index
    %69 = vector.load %arg4[%c0_76, %c5_77, %c0_78, %c0_79] : memref<2x12x1x8xf32, #tpu.memory_space<vmem>>, vector<1x1x1x8xf32>
    %70 = vector.shape_cast %69 : vector<1x1x1x8xf32> to vector<1x8xf32>
    %71 = vector.broadcast %70 : vector<1x8xf32> to vector<128x8xf32>
    %72 = arith.addf %68, %71 : vector<128x8xf32>
    %c0_80 = arith.constant 0 : index
    %c9 = arith.constant 9 : index
    %c0_81 = arith.constant 0 : index
    %c0_82 = arith.constant 0 : index
    %73 = vector.load %arg3[%c0_80, %c9, %c0_81, %c0_82] : memref<2x12x32x8xbf16, #tpu.memory_space<vmem>>, vector<1x1x32x8xbf16>
    %74 = vector.shape_cast %73 : vector<1x1x32x8xbf16> to vector<32x8xbf16>
    %cst_83 = arith.constant dense<0.000000e+00> : vector<128x8xf32>
    %75 = tpu.matmul %21, %74, %cst_83 {dimension_numbers = #tpu.dot_dimension_numbers<[1], [0], [0], [1], [0, 0, 1, 1], [], []>} : vector<128x32xbf16>, vector<32x8xbf16>, vector<128x8xf32> -> vector<128x8xf32>
    %c0_84 = arith.constant 0 : index
    %c9_85 = arith.constant 9 : index
    %c0_86 = arith.constant 0 : index
    %c0_87 = arith.constant 0 : index
    %76 = vector.load %arg4[%c0_84, %c9_85, %c0_86, %c0_87] : memref<2x12x1x8xf32, #tpu.memory_space<vmem>>, vector<1x1x1x8xf32>
    %77 = vector.shape_cast %76 : vector<1x1x1x8xf32> to vector<1x8xf32>
    %78 = vector.broadcast %77 : vector<1x8xf32> to vector<128x8xf32>
    %79 = arith.addf %75, %78 : vector<128x8xf32>
    "tpu.trace_start"() <{level = 10 : i32, message = "qe,ke->qk"}> : () -> ()
    %cst_88 = arith.constant dense<0.000000e+00> : vector<128x128xf32>
    %80 = tpu.matmul %65, %72, %cst_88 {dimension_numbers = #tpu.dot_dimension_numbers<[1], [1], [0], [0], [0, 0, 1, 0], [], []>} : vector<128x8xf32>, vector<128x8xf32>, vector<128x128xf32> -> vector<128x128xf32>
    "tpu.trace_stop"() : () -> ()
    %cst_89 = arith.constant dense<0xFF800000> : vector<128xf32>
    %81 = vector.multi_reduction <maximumf>, %80, %cst_89 [1] : vector<128x128xf32> to vector<128xf32>
    %82 = vector.shape_cast %81 : vector<128xf32> to vector<128x1xf32>
    %83 = vector.broadcast %82 : vector<128x1xf32> to vector<128x128xf32>
    %84 = arith.subf %80, %83 : vector<128x128xf32>
    %85 = math.exp %84 : vector<128x128xf32>
    %cst_90 = arith.constant dense<0.000000e+00> : vector<128xf32>
    %86 = vector.multi_reduction <add>, %85, %cst_90 [1] : vector<128x128xf32> to vector<128xf32>
    %87 = vector.shape_cast %86 : vector<128xf32> to vector<128x1xf32>
    %88 = tpu.reciprocal %87 {approx = true} : vector<128x1xf32> -> vector<128x1xf32>
    %89 = vector.broadcast %88 : vector<128x1xf32> to vector<128x128xf32>
    %90 = arith.mulf %85, %89 : vector<128x128xf32>
    %cst_91 = arith.constant dense<0.000000e+00> : vector<128x8xf32>
    %91 = tpu.matmul %90, %79, %cst_91 {dimension_numbers = #tpu.dot_dimension_numbers<[1], [0], [0], [1], [0, 0, 1, 1], [], []>} : vector<128x128xf32>, vector<128x8xf32>, vector<128x8xf32> -> vector<128x8xf32>
    %92 = arith.truncf %91 : vector<128x8xf32> to vector<128x8xbf16>
    %c0_92 = arith.constant 0 : index
    %c1_93 = arith.constant 1 : index
    %c0_94 = arith.constant 0 : index
    %c0_95 = arith.constant 0 : index
    %93 = vector.load %arg5[%c0_92, %c1_93, %c0_94, %c0_95] : memref<2x4x8x32xbf16, #tpu.memory_space<vmem>>, vector<1x1x8x32xbf16>
    %94 = vector.shape_cast %93 : vector<1x1x8x32xbf16> to vector<8x32xbf16>
    %cst_96 = arith.constant dense<0.000000e+00> : vector<128x32xf32>
    %95 = tpu.matmul %92, %94, %cst_96 {dimension_numbers = #tpu.dot_dimension_numbers<[1], [0], [0], [1], [0, 0, 1, 1], [], []>} : vector<128x8xbf16>, vector<8x32xbf16>, vector<128x32xf32> -> vector<128x32xf32>
    %96 = arith.addf %58, %95 : vector<128x32xf32>
    %c0_97 = arith.constant 0 : index
    %c2_98 = arith.constant 2 : index
    %c0_99 = arith.constant 0 : index
    %c0_100 = arith.constant 0 : index
    %97 = vector.load %arg3[%c0_97, %c2_98, %c0_99, %c0_100] : memref<2x12x32x8xbf16, #tpu.memory_space<vmem>>, vector<1x1x32x8xbf16>
    %98 = vector.shape_cast %97 : vector<1x1x32x8xbf16> to vector<32x8xbf16>
    %cst_101 = arith.constant dense<0.000000e+00> : vector<128x8xf32>
    %99 = tpu.matmul %21, %98, %cst_101 {dimension_numbers = #tpu.dot_dimension_numbers<[1], [0], [0], [1], [0, 0, 1, 1], [], []>} : vector<128x32xbf16>, vector<32x8xbf16>, vector<128x8xf32> -> vector<128x8xf32>
    %c0_102 = arith.constant 0 : index
    %c2_103 = arith.constant 2 : index
    %c0_104 = arith.constant 0 : index
    %c0_105 = arith.constant 0 : index
    %100 = vector.load %arg4[%c0_102, %c2_103, %c0_104, %c0_105] : memref<2x12x1x8xf32, #tpu.memory_space<vmem>>, vector<1x1x1x8xf32>
    %101 = vector.shape_cast %100 : vector<1x1x1x8xf32> to vector<1x8xf32>
    %102 = vector.broadcast %101 : vector<1x8xf32> to vector<128x8xf32>
    %103 = arith.addf %99, %102 : vector<128x8xf32>
    %c0_106 = arith.constant 0 : index
    %c6_107 = arith.constant 6 : index
    %c0_108 = arith.constant 0 : index
    %c0_109 = arith.constant 0 : index
    %104 = vector.load %arg3[%c0_106, %c6_107, %c0_108, %c0_109] : memref<2x12x32x8xbf16, #tpu.memory_space<vmem>>, vector<1x1x32x8xbf16>
    %105 = vector.shape_cast %104 : vector<1x1x32x8xbf16> to vector<32x8xbf16>
    %cst_110 = arith.constant dense<0.000000e+00> : vector<128x8xf32>
    %106 = tpu.matmul %21, %105, %cst_110 {dimension_numbers = #tpu.dot_dimension_numbers<[1], [0], [0], [1], [0, 0, 1, 1], [], []>} : vector<128x32xbf16>, vector<32x8xbf16>, vector<128x8xf32> -> vector<128x8xf32>
    %c0_111 = arith.constant 0 : index
    %c6_112 = arith.constant 6 : index
    %c0_113 = arith.constant 0 : index
    %c0_114 = arith.constant 0 : index
    %107 = vector.load %arg4[%c0_111, %c6_112, %c0_113, %c0_114] : memref<2x12x1x8xf32, #tpu.memory_space<vmem>>, vector<1x1x1x8xf32>
    %108 = vector.shape_cast %107 : vector<1x1x1x8xf32> to vector<1x8xf32>
    %109 = vector.broadcast %108 : vector<1x8xf32> to vector<128x8xf32>
    %110 = arith.addf %106, %109 : vector<128x8xf32>
    %c0_115 = arith.constant 0 : index
    %c10 = arith.constant 10 : index
    %c0_116 = arith.constant 0 : index
    %c0_117 = arith.constant 0 : index
    %111 = vector.load %arg3[%c0_115, %c10, %c0_116, %c0_117] : memref<2x12x32x8xbf16, #tpu.memory_space<vmem>>, vector<1x1x32x8xbf16>
    %112 = vector.shape_cast %111 : vector<1x1x32x8xbf16> to vector<32x8xbf16>
    %cst_118 = arith.constant dense<0.000000e+00> : vector<128x8xf32>
    %113 = tpu.matmul %21, %112, %cst_118 {dimension_numbers = #tpu.dot_dimension_numbers<[1], [0], [0], [1], [0, 0, 1, 1], [], []>} : vector<128x32xbf16>, vector<32x8xbf16>, vector<128x8xf32> -> vector<128x8xf32>
    %c0_119 = arith.constant 0 : index
    %c10_120 = arith.constant 10 : index
    %c0_121 = arith.constant 0 : index
    %c0_122 = arith.constant 0 : index
    %114 = vector.load %arg4[%c0_119, %c10_120, %c0_121, %c0_122] : memref<2x12x1x8xf32, #tpu.memory_space<vmem>>, vector<1x1x1x8xf32>
    %115 = vector.shape_cast %114 : vector<1x1x1x8xf32> to vector<1x8xf32>
    %116 = vector.broadcast %115 : vector<1x8xf32> to vector<128x8xf32>
    %117 = arith.addf %113, %116 : vector<128x8xf32>
    "tpu.trace_start"() <{level = 10 : i32, message = "qe,ke->qk"}> : () -> ()
    %cst_123 = arith.constant dense<0.000000e+00> : vector<128x128xf32>
    %118 = tpu.matmul %103, %110, %cst_123 {dimension_numbers = #tpu.dot_dimension_numbers<[1], [1], [0], [0], [0, 0, 1, 0], [], []>} : vector<128x8xf32>, vector<128x8xf32>, vector<128x128xf32> -> vector<128x128xf32>
    "tpu.trace_stop"() : () -> ()
    %cst_124 = arith.constant dense<0xFF800000> : vector<128xf32>
    %119 = vector.multi_reduction <maximumf>, %118, %cst_124 [1] : vector<128x128xf32> to vector<128xf32>
    %120 = vector.shape_cast %119 : vector<128xf32> to vector<128x1xf32>
    %121 = vector.broadcast %120 : vector<128x1xf32> to vector<128x128xf32>
    %122 = arith.subf %118, %121 : vector<128x128xf32>
    %123 = math.exp %122 : vector<128x128xf32>
    %cst_125 = arith.constant dense<0.000000e+00> : vector<128xf32>
    %124 = vector.multi_reduction <add>, %123, %cst_125 [1] : vector<128x128xf32> to vector<128xf32>
    %125 = vector.shape_cast %124 : vector<128xf32> to vector<128x1xf32>
    %126 = tpu.reciprocal %125 {approx = true} : vector<128x1xf32> -> vector<128x1xf32>
    %127 = vector.broadcast %126 : vector<128x1xf32> to vector<128x128xf32>
    %128 = arith.mulf %123, %127 : vector<128x128xf32>
    %cst_126 = arith.constant dense<0.000000e+00> : vector<128x8xf32>
    %129 = tpu.matmul %128, %117, %cst_126 {dimension_numbers = #tpu.dot_dimension_numbers<[1], [0], [0], [1], [0, 0, 1, 1], [], []>} : vector<128x128xf32>, vector<128x8xf32>, vector<128x8xf32> -> vector<128x8xf32>
    %130 = arith.truncf %129 : vector<128x8xf32> to vector<128x8xbf16>
    %c0_127 = arith.constant 0 : index
    %c2_128 = arith.constant 2 : index
    %c0_129 = arith.constant 0 : index
    %c0_130 = arith.constant 0 : index
    %131 = vector.load %arg5[%c0_127, %c2_128, %c0_129, %c0_130] : memref<2x4x8x32xbf16, #tpu.memory_space<vmem>>, vector<1x1x8x32xbf16>
    %132 = vector.shape_cast %131 : vector<1x1x8x32xbf16> to vector<8x32xbf16>
    %cst_131 = arith.constant dense<0.000000e+00> : vector<128x32xf32>
    %133 = tpu.matmul %130, %132, %cst_131 {dimension_numbers = #tpu.dot_dimension_numbers<[1], [0], [0], [1], [0, 0, 1, 1], [], []>} : vector<128x8xbf16>, vector<8x32xbf16>, vector<128x32xf32> -> vector<128x32xf32>
    %134 = arith.addf %96, %133 : vector<128x32xf32>
    %c0_132 = arith.constant 0 : index
    %c3_133 = arith.constant 3 : index
    %c0_134 = arith.constant 0 : index
    %c0_135 = arith.constant 0 : index
    %135 = vector.load %arg3[%c0_132, %c3_133, %c0_134, %c0_135] : memref<2x12x32x8xbf16, #tpu.memory_space<vmem>>, vector<1x1x32x8xbf16>
    %136 = vector.shape_cast %135 : vector<1x1x32x8xbf16> to vector<32x8xbf16>
    %cst_136 = arith.constant dense<0.000000e+00> : vector<128x8xf32>
    %137 = tpu.matmul %21, %136, %cst_136 {dimension_numbers = #tpu.dot_dimension_numbers<[1], [0], [0], [1], [0, 0, 1, 1], [], []>} : vector<128x32xbf16>, vector<32x8xbf16>, vector<128x8xf32> -> vector<128x8xf32>
    %c0_137 = arith.constant 0 : index
    %c3_138 = arith.constant 3 : index
    %c0_139 = arith.constant 0 : index
    %c0_140 = arith.constant 0 : index
    %138 = vector.load %arg4[%c0_137, %c3_138, %c0_139, %c0_140] : memref<2x12x1x8xf32, #tpu.memory_space<vmem>>, vector<1x1x1x8xf32>
    %139 = vector.shape_cast %138 : vector<1x1x1x8xf32> to vector<1x8xf32>
    %140 = vector.broadcast %139 : vector<1x8xf32> to vector<128x8xf32>
    %141 = arith.addf %137, %140 : vector<128x8xf32>
    %c0_141 = arith.constant 0 : index
    %c7 = arith.constant 7 : index
    %c0_142 = arith.constant 0 : index
    %c0_143 = arith.constant 0 : index
    %142 = vector.load %arg3[%c0_141, %c7, %c0_142, %c0_143] : memref<2x12x32x8xbf16, #tpu.memory_space<vmem>>, vector<1x1x32x8xbf16>
    %143 = vector.shape_cast %142 : vector<1x1x32x8xbf16> to vector<32x8xbf16>
    %cst_144 = arith.constant dense<0.000000e+00> : vector<128x8xf32>
    %144 = tpu.matmul %21, %143, %cst_144 {dimension_numbers = #tpu.dot_dimension_numbers<[1], [0], [0], [1], [0, 0, 1, 1], [], []>} : vector<128x32xbf16>, vector<32x8xbf16>, vector<128x8xf32> -> vector<128x8xf32>
    %c0_145 = arith.constant 0 : index
    %c7_146 = arith.constant 7 : index
    %c0_147 = arith.constant 0 : index
    %c0_148 = arith.constant 0 : index
    %145 = vector.load %arg4[%c0_145, %c7_146, %c0_147, %c0_148] : memref<2x12x1x8xf32, #tpu.memory_space<vmem>>, vector<1x1x1x8xf32>
    %146 = vector.shape_cast %145 : vector<1x1x1x8xf32> to vector<1x8xf32>
    %147 = vector.broadcast %146 : vector<1x8xf32> to vector<128x8xf32>
    %148 = arith.addf %144, %147 : vector<128x8xf32>
    %c0_149 = arith.constant 0 : index
    %c11 = arith.constant 11 : index
    %c0_150 = arith.constant 0 : index
    %c0_151 = arith.constant 0 : index
    %149 = vector.load %arg3[%c0_149, %c11, %c0_150, %c0_151] : memref<2x12x32x8xbf16, #tpu.memory_space<vmem>>, vector<1x1x32x8xbf16>
    %150 = vector.shape_cast %149 : vector<1x1x32x8xbf16> to vector<32x8xbf16>
    %cst_152 = arith.constant dense<0.000000e+00> : vector<128x8xf32>
    %151 = tpu.matmul %21, %150, %cst_152 {dimension_numbers = #tpu.dot_dimension_numbers<[1], [0], [0], [1], [0, 0, 1, 1], [], []>} : vector<128x32xbf16>, vector<32x8xbf16>, vector<128x8xf32> -> vector<128x8xf32>
    %c0_153 = arith.constant 0 : index
    %c11_154 = arith.constant 11 : index
    %c0_155 = arith.constant 0 : index
    %c0_156 = arith.constant 0 : index
    %152 = vector.load %arg4[%c0_153, %c11_154, %c0_155, %c0_156] : memref<2x12x1x8xf32, #tpu.memory_space<vmem>>, vector<1x1x1x8xf32>
    %153 = vector.shape_cast %152 : vector<1x1x1x8xf32> to vector<1x8xf32>
    %154 = vector.broadcast %153 : vector<1x8xf32> to vector<128x8xf32>
    %155 = arith.addf %151, %154 : vector<128x8xf32>
    "tpu.trace_start"() <{level = 10 : i32, message = "qe,ke->qk"}> : () -> ()
    %cst_157 = arith.constant dense<0.000000e+00> : vector<128x128xf32>
    %156 = tpu.matmul %141, %148, %cst_157 {dimension_numbers = #tpu.dot_dimension_numbers<[1], [1], [0], [0], [0, 0, 1, 0], [], []>} : vector<128x8xf32>, vector<128x8xf32>, vector<128x128xf32> -> vector<128x128xf32>
    "tpu.trace_stop"() : () -> ()
    %cst_158 = arith.constant dense<0xFF800000> : vector<128xf32>
    %157 = vector.multi_reduction <maximumf>, %156, %cst_158 [1] : vector<128x128xf32> to vector<128xf32>
    %158 = vector.shape_cast %157 : vector<128xf32> to vector<128x1xf32>
    %159 = vector.broadcast %158 : vector<128x1xf32> to vector<128x128xf32>
    %160 = arith.subf %156, %159 : vector<128x128xf32>
    %161 = math.exp %160 : vector<128x128xf32>
    %cst_159 = arith.constant dense<0.000000e+00> : vector<128xf32>
    %162 = vector.multi_reduction <add>, %161, %cst_159 [1] : vector<128x128xf32> to vector<128xf32>
    %163 = vector.shape_cast %162 : vector<128xf32> to vector<128x1xf32>
    %164 = tpu.reciprocal %163 {approx = true} : vector<128x1xf32> -> vector<128x1xf32>
    %165 = vector.broadcast %164 : vector<128x1xf32> to vector<128x128xf32>
    %166 = arith.mulf %161, %165 : vector<128x128xf32>
    %cst_160 = arith.constant dense<0.000000e+00> : vector<128x8xf32>
    %167 = tpu.matmul %166, %155, %cst_160 {dimension_numbers = #tpu.dot_dimension_numbers<[1], [0], [0], [1], [0, 0, 1, 1], [], []>} : vector<128x128xf32>, vector<128x8xf32>, vector<128x8xf32> -> vector<128x8xf32>
    %168 = arith.truncf %167 : vector<128x8xf32> to vector<128x8xbf16>
    %c0_161 = arith.constant 0 : index
    %c3_162 = arith.constant 3 : index
    %c0_163 = arith.constant 0 : index
    %c0_164 = arith.constant 0 : index
    %169 = vector.load %arg5[%c0_161, %c3_162, %c0_163, %c0_164] : memref<2x4x8x32xbf16, #tpu.memory_space<vmem>>, vector<1x1x8x32xbf16>
    %170 = vector.shape_cast %169 : vector<1x1x8x32xbf16> to vector<8x32xbf16>
    %cst_165 = arith.constant dense<0.000000e+00> : vector<128x32xf32>
    %171 = tpu.matmul %168, %170, %cst_165 {dimension_numbers = #tpu.dot_dimension_numbers<[1], [0], [0], [1], [0, 0, 1, 1], [], []>} : vector<128x8xbf16>, vector<8x32xbf16>, vector<128x32xf32> -> vector<128x32xf32>
    %172 = arith.addf %134, %171 : vector<128x32xf32>
    %173 = vector.broadcast %8 : vector<1x32xf32> to vector<128x32xf32>
    %174 = arith.addf %172, %173 : vector<128x32xf32>
    %175 = arith.addf %6, %174 : vector<128x32xf32>
    %cst_166 = arith.constant dense<0.000000e+00> : vector<128xf32>
    %176 = vector.multi_reduction <add>, %175, %cst_166 [1] : vector<128x32xf32> to vector<128xf32>
    %177 = vector.shape_cast %176 : vector<128xf32> to vector<128x1xf32>
    %cst_167 = arith.constant 3.200000e+01 : f32
    %178 = vector.broadcast %cst_167 : f32 to vector<128x1xf32>
    %179 = arith.divf %177, %178 : vector<128x1xf32>
    %180 = vector.broadcast %179 : vector<128x1xf32> to vector<128x32xf32>
    %181 = arith.subf %175, %180 : vector<128x32xf32>
    %182 = arith.mulf %181, %181 : vector<128x32xf32>
    %cst_168 = arith.constant dense<0.000000e+00> : vector<128xf32>
    %183 = vector.multi_reduction <add>, %182, %cst_168 [1] : vector<128x32xf32> to vector<128xf32>
    %184 = vector.shape_cast %183 : vector<128xf32> to vector<128x1xf32>
    %cst_169 = arith.constant 3.200000e+01 : f32
    %185 = vector.broadcast %cst_169 : f32 to vector<128x1xf32>
    %186 = arith.divf %184, %185 : vector<128x1xf32>
    %cst_170 = arith.constant 9.99999974E-6 : f32
    %187 = vector.broadcast %cst_170 : f32 to vector<128x1xf32>
    %188 = arith.addf %186, %187 : vector<128x1xf32>
    %189 = math.rsqrt %188 : vector<128x1xf32>
    %190 = vector.broadcast %189 : vector<128x1xf32> to vector<128x32xf32>
    %191 = arith.mulf %181, %190 : vector<128x32xf32>
    %192 = vector.broadcast %14 : vector<1x32xf32> to vector<128x32xf32>
    %193 = arith.mulf %191, %192 : vector<128x32xf32>
    %194 = vector.broadcast %16 : vector<1x32xf32> to vector<128x32xf32>
    %195 = arith.addf %193, %194 : vector<128x32xf32>
    %196 = arith.truncf %195 : vector<128x32xf32> to vector<128x32xbf16>
    %c0_171 = arith.constant 0 : index
    %c0_172 = arith.constant 0 : index
    %c0_173 = arith.constant 0 : index
    %c0_174 = arith.constant 0 : index
    %197 = vector.load %arg6[%c0_171, %c0_172, %c0_173, %c0_174] : memref<2x2x32x32xbf16, #tpu.memory_space<vmem>>, vector<1x1x32x32xbf16>
    %198 = vector.shape_cast %197 : vector<1x1x32x32xbf16> to vector<32x32xbf16>
    %cst_175 = arith.constant dense<0.000000e+00> : vector<128x32xf32>
    %199 = tpu.matmul %196, %198, %cst_175 {dimension_numbers = #tpu.dot_dimension_numbers<[1], [0], [0], [1], [0, 0, 1, 1], [], []>} : vector<128x32xbf16>, vector<32x32xbf16>, vector<128x32xf32> -> vector<128x32xf32>
    %200 = vector.broadcast %10 : vector<1x32xf32> to vector<128x32xf32>
    %201 = arith.addf %199, %200 : vector<128x32xf32>
    %cst_176 = arith.constant 0.000000e+00 : f32
    %202 = vector.broadcast %cst_176 : f32 to vector<128x32xf32>
    %203 = arith.maximumf %201, %202 : vector<128x32xf32>
    %204 = arith.truncf %203 : vector<128x32xf32> to vector<128x32xbf16>
    %c0_177 = arith.constant 0 : index
    %c1_178 = arith.constant 1 : index
    %c0_179 = arith.constant 0 : index
    %c0_180 = arith.constant 0 : index
    %205 = vector.load %arg6[%c0_177, %c1_178, %c0_179, %c0_180] : memref<2x2x32x32xbf16, #tpu.memory_space<vmem>>, vector<1x1x32x32xbf16>
    %206 = vector.shape_cast %205 : vector<1x1x32x32xbf16> to vector<32x32xbf16>
    %cst_181 = arith.constant dense<0.000000e+00> : vector<128x32xf32>
    %207 = tpu.matmul %204, %206, %cst_181 {dimension_numbers = #tpu.dot_dimension_numbers<[1], [0], [0], [1], [0, 0, 1, 1], [], []>} : vector<128x32xbf16>, vector<32x32xbf16>, vector<128x32xf32> -> vector<128x32xf32>
    %208 = vector.broadcast %12 : vector<1x32xf32> to vector<128x32xf32>
    %209 = arith.addf %207, %208 : vector<128x32xf32>
    %210 = arith.addf %195, %209 : vector<128x32xf32>
    %cst_182 = arith.constant dense<0.000000e+00> : vector<128xf32>
    %211 = vector.multi_reduction <add>, %210, %cst_182 [1] : vector<128x32xf32> to vector<128xf32>
    %212 = vector.shape_cast %211 : vector<128xf32> to vector<128x1xf32>
    %cst_183 = arith.constant 3.200000e+01 : f32
    %213 = vector.broadcast %cst_183 : f32 to vector<128x1xf32>
    %214 = arith.divf %212, %213 : vector<128x1xf32>
    %215 = vector.broadcast %214 : vector<128x1xf32> to vector<128x32xf32>
    %216 = arith.subf %210, %215 : vector<128x32xf32>
    %217 = arith.mulf %216, %216 : vector<128x32xf32>
    %cst_184 = arith.constant dense<0.000000e+00> : vector<128xf32>
    %218 = vector.multi_reduction <add>, %217, %cst_184 [1] : vector<128x32xf32> to vector<128xf32>
    %219 = vector.shape_cast %218 : vector<128xf32> to vector<128x1xf32>
    %cst_185 = arith.constant 3.200000e+01 : f32
    %220 = vector.broadcast %cst_185 : f32 to vector<128x1xf32>
    %221 = arith.divf %219, %220 : vector<128x1xf32>
    %cst_186 = arith.constant 9.99999974E-6 : f32
    %222 = vector.broadcast %cst_186 : f32 to vector<128x1xf32>
    %223 = arith.addf %221, %222 : vector<128x1xf32>
    %224 = math.rsqrt %223 : vector<128x1xf32>
    %225 = vector.broadcast %224 : vector<128x1xf32> to vector<128x32xf32>
    %226 = arith.mulf %216, %225 : vector<128x32xf32>
    %227 = vector.broadcast %18 : vector<1x32xf32> to vector<128x32xf32>
    %228 = arith.mulf %226, %227 : vector<128x32xf32>
    %229 = vector.broadcast %20 : vector<1x32xf32> to vector<128x32xf32>
    %230 = arith.addf %228, %229 : vector<128x32xf32>
    %c1_187 = arith.constant 1 : index
    %c0_188 = arith.constant 0 : index
    %c0_189 = arith.constant 0 : index
    %c0_190 = arith.constant 0 : index
    %231 = vector.load %arg7[%c1_187, %c0_188, %c0_189, %c0_190] : memref<2x7x1x32xf32, #tpu.memory_space<vmem>>, vector<1x1x1x32xf32>
    %232 = vector.shape_cast %231 : vector<1x1x1x32xf32> to vector<1x32xf32>
    %c1_191 = arith.constant 1 : index
    %c1_192 = arith.constant 1 : index
    %c0_193 = arith.constant 0 : index
    %c0_194 = arith.constant 0 : index
    %233 = vector.load %arg7[%c1_191, %c1_192, %c0_193, %c0_194] : memref<2x7x1x32xf32, #tpu.memory_space<vmem>>, vector<1x1x1x32xf32>
    %234 = vector.shape_cast %233 : vector<1x1x1x32xf32> to vector<1x32xf32>
    %c1_195 = arith.constant 1 : index
    %c2_196 = arith.constant 2 : index
    %c0_197 = arith.constant 0 : index
    %c0_198 = arith.constant 0 : index
    %235 = vector.load %arg7[%c1_195, %c2_196, %c0_197, %c0_198] : memref<2x7x1x32xf32, #tpu.memory_space<vmem>>, vector<1x1x1x32xf32>
    %236 = vector.shape_cast %235 : vector<1x1x1x32xf32> to vector<1x32xf32>
    %c1_199 = arith.constant 1 : index
    %c3_200 = arith.constant 3 : index
    %c0_201 = arith.constant 0 : index
    %c0_202 = arith.constant 0 : index
    %237 = vector.load %arg7[%c1_199, %c3_200, %c0_201, %c0_202] : memref<2x7x1x32xf32, #tpu.memory_space<vmem>>, vector<1x1x1x32xf32>
    %238 = vector.shape_cast %237 : vector<1x1x1x32xf32> to vector<1x32xf32>
    %c1_203 = arith.constant 1 : index
    %c4_204 = arith.constant 4 : index
    %c0_205 = arith.constant 0 : index
    %c0_206 = arith.constant 0 : index
    %239 = vector.load %arg7[%c1_203, %c4_204, %c0_205, %c0_206] : memref<2x7x1x32xf32, #tpu.memory_space<vmem>>, vector<1x1x1x32xf32>
    %240 = vector.shape_cast %239 : vector<1x1x1x32xf32> to vector<1x32xf32>
    %c1_207 = arith.constant 1 : index
    %c5_208 = arith.constant 5 : index
    %c0_209 = arith.constant 0 : index
    %c0_210 = arith.constant 0 : index
    %241 = vector.load %arg7[%c1_207, %c5_208, %c0_209, %c0_210] : memref<2x7x1x32xf32, #tpu.memory_space<vmem>>, vector<1x1x1x32xf32>
    %242 = vector.shape_cast %241 : vector<1x1x1x32xf32> to vector<1x32xf32>
    %c1_211 = arith.constant 1 : index
    %c6_212 = arith.constant 6 : index
    %c0_213 = arith.constant 0 : index
    %c0_214 = arith.constant 0 : index
    %243 = vector.load %arg7[%c1_211, %c6_212, %c0_213, %c0_214] : memref<2x7x1x32xf32, #tpu.memory_space<vmem>>, vector<1x1x1x32xf32>
    %244 = vector.shape_cast %243 : vector<1x1x1x32xf32> to vector<1x32xf32>
    %245 = arith.truncf %230 : vector<128x32xf32> to vector<128x32xbf16>
    %c1_215 = arith.constant 1 : index
    %c0_216 = arith.constant 0 : index
    %c0_217 = arith.constant 0 : index
    %c0_218 = arith.constant 0 : index
    %246 = vector.load %arg3[%c1_215, %c0_216, %c0_217, %c0_218] : memref<2x12x32x8xbf16, #tpu.memory_space<vmem>>, vector<1x1x32x8xbf16>
    %247 = vector.shape_cast %246 : vector<1x1x32x8xbf16> to vector<32x8xbf16>
    %cst_219 = arith.constant dense<0.000000e+00> : vector<128x8xf32>
    %248 = tpu.matmul %245, %247, %cst_219 {dimension_numbers = #tpu.dot_dimension_numbers<[1], [0], [0], [1], [0, 0, 1, 1], [], []>} : vector<128x32xbf16>, vector<32x8xbf16>, vector<128x8xf32> -> vector<128x8xf32>
    %c1_220 = arith.constant 1 : index
    %c0_221 = arith.constant 0 : index
    %c0_222 = arith.constant 0 : index
    %c0_223 = arith.constant 0 : index
    %249 = vector.load %arg4[%c1_220, %c0_221, %c0_222, %c0_223] : memref<2x12x1x8xf32, #tpu.memory_space<vmem>>, vector<1x1x1x8xf32>
    %250 = vector.shape_cast %249 : vector<1x1x1x8xf32> to vector<1x8xf32>
    %251 = vector.broadcast %250 : vector<1x8xf32> to vector<128x8xf32>
    %252 = arith.addf %248, %251 : vector<128x8xf32>
    %c1_224 = arith.constant 1 : index
    %c4_225 = arith.constant 4 : index
    %c0_226 = arith.constant 0 : index
    %c0_227 = arith.constant 0 : index
    %253 = vector.load %arg3[%c1_224, %c4_225, %c0_226, %c0_227] : memref<2x12x32x8xbf16, #tpu.memory_space<vmem>>, vector<1x1x32x8xbf16>
    %254 = vector.shape_cast %253 : vector<1x1x32x8xbf16> to vector<32x8xbf16>
    %cst_228 = arith.constant dense<0.000000e+00> : vector<128x8xf32>
    %255 = tpu.matmul %245, %254, %cst_228 {dimension_numbers = #tpu.dot_dimension_numbers<[1], [0], [0], [1], [0, 0, 1, 1], [], []>} : vector<128x32xbf16>, vector<32x8xbf16>, vector<128x8xf32> -> vector<128x8xf32>
    %c1_229 = arith.constant 1 : index
    %c4_230 = arith.constant 4 : index
    %c0_231 = arith.constant 0 : index
    %c0_232 = arith.constant 0 : index
    %256 = vector.load %arg4[%c1_229, %c4_230, %c0_231, %c0_232] : memref<2x12x1x8xf32, #tpu.memory_space<vmem>>, vector<1x1x1x8xf32>
    %257 = vector.shape_cast %256 : vector<1x1x1x8xf32> to vector<1x8xf32>
    %258 = vector.broadcast %257 : vector<1x8xf32> to vector<128x8xf32>
    %259 = arith.addf %255, %258 : vector<128x8xf32>
    %c1_233 = arith.constant 1 : index
    %c8_234 = arith.constant 8 : index
    %c0_235 = arith.constant 0 : index
    %c0_236 = arith.constant 0 : index
    %260 = vector.load %arg3[%c1_233, %c8_234, %c0_235, %c0_236] : memref<2x12x32x8xbf16, #tpu.memory_space<vmem>>, vector<1x1x32x8xbf16>
    %261 = vector.shape_cast %260 : vector<1x1x32x8xbf16> to vector<32x8xbf16>
    %cst_237 = arith.constant dense<0.000000e+00> : vector<128x8xf32>
    %262 = tpu.matmul %245, %261, %cst_237 {dimension_numbers = #tpu.dot_dimension_numbers<[1], [0], [0], [1], [0, 0, 1, 1], [], []>} : vector<128x32xbf16>, vector<32x8xbf16>, vector<128x8xf32> -> vector<128x8xf32>
    %c1_238 = arith.constant 1 : index
    %c8_239 = arith.constant 8 : index
    %c0_240 = arith.constant 0 : index
    %c0_241 = arith.constant 0 : index
    %263 = vector.load %arg4[%c1_238, %c8_239, %c0_240, %c0_241] : memref<2x12x1x8xf32, #tpu.memory_space<vmem>>, vector<1x1x1x8xf32>
    %264 = vector.shape_cast %263 : vector<1x1x1x8xf32> to vector<1x8xf32>
    %265 = vector.broadcast %264 : vector<1x8xf32> to vector<128x8xf32>
    %266 = arith.addf %262, %265 : vector<128x8xf32>
    "tpu.trace_start"() <{level = 10 : i32, message = "qe,ke->qk"}> : () -> ()
    %cst_242 = arith.constant dense<0.000000e+00> : vector<128x128xf32>
    %267 = tpu.matmul %252, %259, %cst_242 {dimension_numbers = #tpu.dot_dimension_numbers<[1], [1], [0], [0], [0, 0, 1, 0], [], []>} : vector<128x8xf32>, vector<128x8xf32>, vector<128x128xf32> -> vector<128x128xf32>
    "tpu.trace_stop"() : () -> ()
    %cst_243 = arith.constant dense<0xFF800000> : vector<128xf32>
    %268 = vector.multi_reduction <maximumf>, %267, %cst_243 [1] : vector<128x128xf32> to vector<128xf32>
    %269 = vector.shape_cast %268 : vector<128xf32> to vector<128x1xf32>
    %270 = vector.broadcast %269 : vector<128x1xf32> to vector<128x128xf32>
    %271 = arith.subf %267, %270 : vector<128x128xf32>
    %272 = math.exp %271 : vector<128x128xf32>
    %cst_244 = arith.constant dense<0.000000e+00> : vector<128xf32>
    %273 = vector.multi_reduction <add>, %272, %cst_244 [1] : vector<128x128xf32> to vector<128xf32>
    %274 = vector.shape_cast %273 : vector<128xf32> to vector<128x1xf32>
    %275 = tpu.reciprocal %274 {approx = true} : vector<128x1xf32> -> vector<128x1xf32>
    %276 = vector.broadcast %275 : vector<128x1xf32> to vector<128x128xf32>
    %277 = arith.mulf %272, %276 : vector<128x128xf32>
    %cst_245 = arith.constant dense<0.000000e+00> : vector<128x8xf32>
    %278 = tpu.matmul %277, %266, %cst_245 {dimension_numbers = #tpu.dot_dimension_numbers<[1], [0], [0], [1], [0, 0, 1, 1], [], []>} : vector<128x128xf32>, vector<128x8xf32>, vector<128x8xf32> -> vector<128x8xf32>
    %279 = arith.truncf %278 : vector<128x8xf32> to vector<128x8xbf16>
    %c1_246 = arith.constant 1 : index
    %c0_247 = arith.constant 0 : index
    %c0_248 = arith.constant 0 : index
    %c0_249 = arith.constant 0 : index
    %280 = vector.load %arg5[%c1_246, %c0_247, %c0_248, %c0_249] : memref<2x4x8x32xbf16, #tpu.memory_space<vmem>>, vector<1x1x8x32xbf16>
    %281 = vector.shape_cast %280 : vector<1x1x8x32xbf16> to vector<8x32xbf16>
    %cst_250 = arith.constant dense<0.000000e+00> : vector<128x32xf32>
    %282 = tpu.matmul %279, %281, %cst_250 {dimension_numbers = #tpu.dot_dimension_numbers<[1], [0], [0], [1], [0, 0, 1, 1], [], []>} : vector<128x8xbf16>, vector<8x32xbf16>, vector<128x32xf32> -> vector<128x32xf32>
    %c1_251 = arith.constant 1 : index
    %c1_252 = arith.constant 1 : index
    %c0_253 = arith.constant 0 : index
    %c0_254 = arith.constant 0 : index
    %283 = vector.load %arg3[%c1_251, %c1_252, %c0_253, %c0_254] : memref<2x12x32x8xbf16, #tpu.memory_space<vmem>>, vector<1x1x32x8xbf16>
    %284 = vector.shape_cast %283 : vector<1x1x32x8xbf16> to vector<32x8xbf16>
    %cst_255 = arith.constant dense<0.000000e+00> : vector<128x8xf32>
    %285 = tpu.matmul %245, %284, %cst_255 {dimension_numbers = #tpu.dot_dimension_numbers<[1], [0], [0], [1], [0, 0, 1, 1], [], []>} : vector<128x32xbf16>, vector<32x8xbf16>, vector<128x8xf32> -> vector<128x8xf32>
    %c1_256 = arith.constant 1 : index
    %c1_257 = arith.constant 1 : index
    %c0_258 = arith.constant 0 : index
    %c0_259 = arith.constant 0 : index
    %286 = vector.load %arg4[%c1_256, %c1_257, %c0_258, %c0_259] : memref<2x12x1x8xf32, #tpu.memory_space<vmem>>, vector<1x1x1x8xf32>
    %287 = vector.shape_cast %286 : vector<1x1x1x8xf32> to vector<1x8xf32>
    %288 = vector.broadcast %287 : vector<1x8xf32> to vector<128x8xf32>
    %289 = arith.addf %285, %288 : vector<128x8xf32>
    %c1_260 = arith.constant 1 : index
    %c5_261 = arith.constant 5 : index
    %c0_262 = arith.constant 0 : index
    %c0_263 = arith.constant 0 : index
    %290 = vector.load %arg3[%c1_260, %c5_261, %c0_262, %c0_263] : memref<2x12x32x8xbf16, #tpu.memory_space<vmem>>, vector<1x1x32x8xbf16>
    %291 = vector.shape_cast %290 : vector<1x1x32x8xbf16> to vector<32x8xbf16>
    %cst_264 = arith.constant dense<0.000000e+00> : vector<128x8xf32>
    %292 = tpu.matmul %245, %291, %cst_264 {dimension_numbers = #tpu.dot_dimension_numbers<[1], [0], [0], [1], [0, 0, 1, 1], [], []>} : vector<128x32xbf16>, vector<32x8xbf16>, vector<128x8xf32> -> vector<128x8xf32>
    %c1_265 = arith.constant 1 : index
    %c5_266 = arith.constant 5 : index
    %c0_267 = arith.constant 0 : index
    %c0_268 = arith.constant 0 : index
    %293 = vector.load %arg4[%c1_265, %c5_266, %c0_267, %c0_268] : memref<2x12x1x8xf32, #tpu.memory_space<vmem>>, vector<1x1x1x8xf32>
    %294 = vector.shape_cast %293 : vector<1x1x1x8xf32> to vector<1x8xf32>
    %295 = vector.broadcast %294 : vector<1x8xf32> to vector<128x8xf32>
    %296 = arith.addf %292, %295 : vector<128x8xf32>
    %c1_269 = arith.constant 1 : index
    %c9_270 = arith.constant 9 : index
    %c0_271 = arith.constant 0 : index
    %c0_272 = arith.constant 0 : index
    %297 = vector.load %arg3[%c1_269, %c9_270, %c0_271, %c0_272] : memref<2x12x32x8xbf16, #tpu.memory_space<vmem>>, vector<1x1x32x8xbf16>
    %298 = vector.shape_cast %297 : vector<1x1x32x8xbf16> to vector<32x8xbf16>
    %cst_273 = arith.constant dense<0.000000e+00> : vector<128x8xf32>
    %299 = tpu.matmul %245, %298, %cst_273 {dimension_numbers = #tpu.dot_dimension_numbers<[1], [0], [0], [1], [0, 0, 1, 1], [], []>} : vector<128x32xbf16>, vector<32x8xbf16>, vector<128x8xf32> -> vector<128x8xf32>
    %c1_274 = arith.constant 1 : index
    %c9_275 = arith.constant 9 : index
    %c0_276 = arith.constant 0 : index
    %c0_277 = arith.constant 0 : index
    %300 = vector.load %arg4[%c1_274, %c9_275, %c0_276, %c0_277] : memref<2x12x1x8xf32, #tpu.memory_space<vmem>>, vector<1x1x1x8xf32>
    %301 = vector.shape_cast %300 : vector<1x1x1x8xf32> to vector<1x8xf32>
    %302 = vector.broadcast %301 : vector<1x8xf32> to vector<128x8xf32>
    %303 = arith.addf %299, %302 : vector<128x8xf32>
    "tpu.trace_start"() <{level = 10 : i32, message = "qe,ke->qk"}> : () -> ()
    %cst_278 = arith.constant dense<0.000000e+00> : vector<128x128xf32>
    %304 = tpu.matmul %289, %296, %cst_278 {dimension_numbers = #tpu.dot_dimension_numbers<[1], [1], [0], [0], [0, 0, 1, 0], [], []>} : vector<128x8xf32>, vector<128x8xf32>, vector<128x128xf32> -> vector<128x128xf32>
    "tpu.trace_stop"() : () -> ()
    %cst_279 = arith.constant dense<0xFF800000> : vector<128xf32>
    %305 = vector.multi_reduction <maximumf>, %304, %cst_279 [1] : vector<128x128xf32> to vector<128xf32>
    %306 = vector.shape_cast %305 : vector<128xf32> to vector<128x1xf32>
    %307 = vector.broadcast %306 : vector<128x1xf32> to vector<128x128xf32>
    %308 = arith.subf %304, %307 : vector<128x128xf32>
    %309 = math.exp %308 : vector<128x128xf32>
    %cst_280 = arith.constant dense<0.000000e+00> : vector<128xf32>
    %310 = vector.multi_reduction <add>, %309, %cst_280 [1] : vector<128x128xf32> to vector<128xf32>
    %311 = vector.shape_cast %310 : vector<128xf32> to vector<128x1xf32>
    %312 = tpu.reciprocal %311 {approx = true} : vector<128x1xf32> -> vector<128x1xf32>
    %313 = vector.broadcast %312 : vector<128x1xf32> to vector<128x128xf32>
    %314 = arith.mulf %309, %313 : vector<128x128xf32>
    %cst_281 = arith.constant dense<0.000000e+00> : vector<128x8xf32>
    %315 = tpu.matmul %314, %303, %cst_281 {dimension_numbers = #tpu.dot_dimension_numbers<[1], [0], [0], [1], [0, 0, 1, 1], [], []>} : vector<128x128xf32>, vector<128x8xf32>, vector<128x8xf32> -> vector<128x8xf32>
    %316 = arith.truncf %315 : vector<128x8xf32> to vector<128x8xbf16>
    %c1_282 = arith.constant 1 : index
    %c1_283 = arith.constant 1 : index
    %c0_284 = arith.constant 0 : index
    %c0_285 = arith.constant 0 : index
    %317 = vector.load %arg5[%c1_282, %c1_283, %c0_284, %c0_285] : memref<2x4x8x32xbf16, #tpu.memory_space<vmem>>, vector<1x1x8x32xbf16>
    %318 = vector.shape_cast %317 : vector<1x1x8x32xbf16> to vector<8x32xbf16>
    %cst_286 = arith.constant dense<0.000000e+00> : vector<128x32xf32>
    %319 = tpu.matmul %316, %318, %cst_286 {dimension_numbers = #tpu.dot_dimension_numbers<[1], [0], [0], [1], [0, 0, 1, 1], [], []>} : vector<128x8xbf16>, vector<8x32xbf16>, vector<128x32xf32> -> vector<128x32xf32>
    %320 = arith.addf %282, %319 : vector<128x32xf32>
    %c1_287 = arith.constant 1 : index
    %c2_288 = arith.constant 2 : index
    %c0_289 = arith.constant 0 : index
    %c0_290 = arith.constant 0 : index
    %321 = vector.load %arg3[%c1_287, %c2_288, %c0_289, %c0_290] : memref<2x12x32x8xbf16, #tpu.memory_space<vmem>>, vector<1x1x32x8xbf16>
    %322 = vector.shape_cast %321 : vector<1x1x32x8xbf16> to vector<32x8xbf16>
    %cst_291 = arith.constant dense<0.000000e+00> : vector<128x8xf32>
    %323 = tpu.matmul %245, %322, %cst_291 {dimension_numbers = #tpu.dot_dimension_numbers<[1], [0], [0], [1], [0, 0, 1, 1], [], []>} : vector<128x32xbf16>, vector<32x8xbf16>, vector<128x8xf32> -> vector<128x8xf32>
    %c1_292 = arith.constant 1 : index
    %c2_293 = arith.constant 2 : index
    %c0_294 = arith.constant 0 : index
    %c0_295 = arith.constant 0 : index
    %324 = vector.load %arg4[%c1_292, %c2_293, %c0_294, %c0_295] : memref<2x12x1x8xf32, #tpu.memory_space<vmem>>, vector<1x1x1x8xf32>
    %325 = vector.shape_cast %324 : vector<1x1x1x8xf32> to vector<1x8xf32>
    %326 = vector.broadcast %325 : vector<1x8xf32> to vector<128x8xf32>
    %327 = arith.addf %323, %326 : vector<128x8xf32>
    %c1_296 = arith.constant 1 : index
    %c6_297 = arith.constant 6 : index
    %c0_298 = arith.constant 0 : index
    %c0_299 = arith.constant 0 : index
    %328 = vector.load %arg3[%c1_296, %c6_297, %c0_298, %c0_299] : memref<2x12x32x8xbf16, #tpu.memory_space<vmem>>, vector<1x1x32x8xbf16>
    %329 = vector.shape_cast %328 : vector<1x1x32x8xbf16> to vector<32x8xbf16>
    %cst_300 = arith.constant dense<0.000000e+00> : vector<128x8xf32>
    %330 = tpu.matmul %245, %329, %cst_300 {dimension_numbers = #tpu.dot_dimension_numbers<[1], [0], [0], [1], [0, 0, 1, 1], [], []>} : vector<128x32xbf16>, vector<32x8xbf16>, vector<128x8xf32> -> vector<128x8xf32>
    %c1_301 = arith.constant 1 : index
    %c6_302 = arith.constant 6 : index
    %c0_303 = arith.constant 0 : index
    %c0_304 = arith.constant 0 : index
    %331 = vector.load %arg4[%c1_301, %c6_302, %c0_303, %c0_304] : memref<2x12x1x8xf32, #tpu.memory_space<vmem>>, vector<1x1x1x8xf32>
    %332 = vector.shape_cast %331 : vector<1x1x1x8xf32> to vector<1x8xf32>
    %333 = vector.broadcast %332 : vector<1x8xf32> to vector<128x8xf32>
    %334 = arith.addf %330, %333 : vector<128x8xf32>
    %c1_305 = arith.constant 1 : index
    %c10_306 = arith.constant 10 : index
    %c0_307 = arith.constant 0 : index
    %c0_308 = arith.constant 0 : index
    %335 = vector.load %arg3[%c1_305, %c10_306, %c0_307, %c0_308] : memref<2x12x32x8xbf16, #tpu.memory_space<vmem>>, vector<1x1x32x8xbf16>
    %336 = vector.shape_cast %335 : vector<1x1x32x8xbf16> to vector<32x8xbf16>
    %cst_309 = arith.constant dense<0.000000e+00> : vector<128x8xf32>
    %337 = tpu.matmul %245, %336, %cst_309 {dimension_numbers = #tpu.dot_dimension_numbers<[1], [0], [0], [1], [0, 0, 1, 1], [], []>} : vector<128x32xbf16>, vector<32x8xbf16>, vector<128x8xf32> -> vector<128x8xf32>
    %c1_310 = arith.constant 1 : index
    %c10_311 = arith.constant 10 : index
    %c0_312 = arith.constant 0 : index
    %c0_313 = arith.constant 0 : index
    %338 = vector.load %arg4[%c1_310, %c10_311, %c0_312, %c0_313] : memref<2x12x1x8xf32, #tpu.memory_space<vmem>>, vector<1x1x1x8xf32>
    %339 = vector.shape_cast %338 : vector<1x1x1x8xf32> to vector<1x8xf32>
    %340 = vector.broadcast %339 : vector<1x8xf32> to vector<128x8xf32>
    %341 = arith.addf %337, %340 : vector<128x8xf32>
    "tpu.trace_start"() <{level = 10 : i32, message = "qe,ke->qk"}> : () -> ()
    %cst_314 = arith.constant dense<0.000000e+00> : vector<128x128xf32>
    %342 = tpu.matmul %327, %334, %cst_314 {dimension_numbers = #tpu.dot_dimension_numbers<[1], [1], [0], [0], [0, 0, 1, 0], [], []>} : vector<128x8xf32>, vector<128x8xf32>, vector<128x128xf32> -> vector<128x128xf32>
    "tpu.trace_stop"() : () -> ()
    %cst_315 = arith.constant dense<0xFF800000> : vector<128xf32>
    %343 = vector.multi_reduction <maximumf>, %342, %cst_315 [1] : vector<128x128xf32> to vector<128xf32>
    %344 = vector.shape_cast %343 : vector<128xf32> to vector<128x1xf32>
    %345 = vector.broadcast %344 : vector<128x1xf32> to vector<128x128xf32>
    %346 = arith.subf %342, %345 : vector<128x128xf32>
    %347 = math.exp %346 : vector<128x128xf32>
    %cst_316 = arith.constant dense<0.000000e+00> : vector<128xf32>
    %348 = vector.multi_reduction <add>, %347, %cst_316 [1] : vector<128x128xf32> to vector<128xf32>
    %349 = vector.shape_cast %348 : vector<128xf32> to vector<128x1xf32>
    %350 = tpu.reciprocal %349 {approx = true} : vector<128x1xf32> -> vector<128x1xf32>
    %351 = vector.broadcast %350 : vector<128x1xf32> to vector<128x128xf32>
    %352 = arith.mulf %347, %351 : vector<128x128xf32>
    %cst_317 = arith.constant dense<0.000000e+00> : vector<128x8xf32>
    %353 = tpu.matmul %352, %341, %cst_317 {dimension_numbers = #tpu.dot_dimension_numbers<[1], [0], [0], [1], [0, 0, 1, 1], [], []>} : vector<128x128xf32>, vector<128x8xf32>, vector<128x8xf32> -> vector<128x8xf32>
    %354 = arith.truncf %353 : vector<128x8xf32> to vector<128x8xbf16>
    %c1_318 = arith.constant 1 : index
    %c2_319 = arith.constant 2 : index
    %c0_320 = arith.constant 0 : index
    %c0_321 = arith.constant 0 : index
    %355 = vector.load %arg5[%c1_318, %c2_319, %c0_320, %c0_321] : memref<2x4x8x32xbf16, #tpu.memory_space<vmem>>, vector<1x1x8x32xbf16>
    %356 = vector.shape_cast %355 : vector<1x1x8x32xbf16> to vector<8x32xbf16>
    %cst_322 = arith.constant dense<0.000000e+00> : vector<128x32xf32>
    %357 = tpu.matmul %354, %356, %cst_322 {dimension_numbers = #tpu.dot_dimension_numbers<[1], [0], [0], [1], [0, 0, 1, 1], [], []>} : vector<128x8xbf16>, vector<8x32xbf16>, vector<128x32xf32> -> vector<128x32xf32>
    %358 = arith.addf %320, %357 : vector<128x32xf32>
    %c1_323 = arith.constant 1 : index
    %c3_324 = arith.constant 3 : index
    %c0_325 = arith.constant 0 : index
    %c0_326 = arith.constant 0 : index
    %359 = vector.load %arg3[%c1_323, %c3_324, %c0_325, %c0_326] : memref<2x12x32x8xbf16, #tpu.memory_space<vmem>>, vector<1x1x32x8xbf16>
    %360 = vector.shape_cast %359 : vector<1x1x32x8xbf16> to vector<32x8xbf16>
    %cst_327 = arith.constant dense<0.000000e+00> : vector<128x8xf32>
    %361 = tpu.matmul %245, %360, %cst_327 {dimension_numbers = #tpu.dot_dimension_numbers<[1], [0], [0], [1], [0, 0, 1, 1], [], []>} : vector<128x32xbf16>, vector<32x8xbf16>, vector<128x8xf32> -> vector<128x8xf32>
    %c1_328 = arith.constant 1 : index
    %c3_329 = arith.constant 3 : index
    %c0_330 = arith.constant 0 : index
    %c0_331 = arith.constant 0 : index
    %362 = vector.load %arg4[%c1_328, %c3_329, %c0_330, %c0_331] : memref<2x12x1x8xf32, #tpu.memory_space<vmem>>, vector<1x1x1x8xf32>
    %363 = vector.shape_cast %362 : vector<1x1x1x8xf32> to vector<1x8xf32>
    %364 = vector.broadcast %363 : vector<1x8xf32> to vector<128x8xf32>
    %365 = arith.addf %361, %364 : vector<128x8xf32>
    %c1_332 = arith.constant 1 : index
    %c7_333 = arith.constant 7 : index
    %c0_334 = arith.constant 0 : index
    %c0_335 = arith.constant 0 : index
    %366 = vector.load %arg3[%c1_332, %c7_333, %c0_334, %c0_335] : memref<2x12x32x8xbf16, #tpu.memory_space<vmem>>, vector<1x1x32x8xbf16>
    %367 = vector.shape_cast %366 : vector<1x1x32x8xbf16> to vector<32x8xbf16>
    %cst_336 = arith.constant dense<0.000000e+00> : vector<128x8xf32>
    %368 = tpu.matmul %245, %367, %cst_336 {dimension_numbers = #tpu.dot_dimension_numbers<[1], [0], [0], [1], [0, 0, 1, 1], [], []>} : vector<128x32xbf16>, vector<32x8xbf16>, vector<128x8xf32> -> vector<128x8xf32>
    %c1_337 = arith.constant 1 : index
    %c7_338 = arith.constant 7 : index
    %c0_339 = arith.constant 0 : index
    %c0_340 = arith.constant 0 : index
    %369 = vector.load %arg4[%c1_337, %c7_338, %c0_339, %c0_340] : memref<2x12x1x8xf32, #tpu.memory_space<vmem>>, vector<1x1x1x8xf32>
    %370 = vector.shape_cast %369 : vector<1x1x1x8xf32> to vector<1x8xf32>
    %371 = vector.broadcast %370 : vector<1x8xf32> to vector<128x8xf32>
    %372 = arith.addf %368, %371 : vector<128x8xf32>
    %c1_341 = arith.constant 1 : index
    %c11_342 = arith.constant 11 : index
    %c0_343 = arith.constant 0 : index
    %c0_344 = arith.constant 0 : index
    %373 = vector.load %arg3[%c1_341, %c11_342, %c0_343, %c0_344] : memref<2x12x32x8xbf16, #tpu.memory_space<vmem>>, vector<1x1x32x8xbf16>
    %374 = vector.shape_cast %373 : vector<1x1x32x8xbf16> to vector<32x8xbf16>
    %cst_345 = arith.constant dense<0.000000e+00> : vector<128x8xf32>
    %375 = tpu.matmul %245, %374, %cst_345 {dimension_numbers = #tpu.dot_dimension_numbers<[1], [0], [0], [1], [0, 0, 1, 1], [], []>} : vector<128x32xbf16>, vector<32x8xbf16>, vector<128x8xf32> -> vector<128x8xf32>
    %c1_346 = arith.constant 1 : index
    %c11_347 = arith.constant 11 : index
    %c0_348 = arith.constant 0 : index
    %c0_349 = arith.constant 0 : index
    %376 = vector.load %arg4[%c1_346, %c11_347, %c0_348, %c0_349] : memref<2x12x1x8xf32, #tpu.memory_space<vmem>>, vector<1x1x1x8xf32>
    %377 = vector.shape_cast %376 : vector<1x1x1x8xf32> to vector<1x8xf32>
    %378 = vector.broadcast %377 : vector<1x8xf32> to vector<128x8xf32>
    %379 = arith.addf %375, %378 : vector<128x8xf32>
    "tpu.trace_start"() <{level = 10 : i32, message = "qe,ke->qk"}> : () -> ()
    %cst_350 = arith.constant dense<0.000000e+00> : vector<128x128xf32>
    %380 = tpu.matmul %365, %372, %cst_350 {dimension_numbers = #tpu.dot_dimension_numbers<[1], [1], [0], [0], [0, 0, 1, 0], [], []>} : vector<128x8xf32>, vector<128x8xf32>, vector<128x128xf32> -> vector<128x128xf32>
    "tpu.trace_stop"() : () -> ()
    %cst_351 = arith.constant dense<0xFF800000> : vector<128xf32>
    %381 = vector.multi_reduction <maximumf>, %380, %cst_351 [1] : vector<128x128xf32> to vector<128xf32>
    %382 = vector.shape_cast %381 : vector<128xf32> to vector<128x1xf32>
    %383 = vector.broadcast %382 : vector<128x1xf32> to vector<128x128xf32>
    %384 = arith.subf %380, %383 : vector<128x128xf32>
    %385 = math.exp %384 : vector<128x128xf32>
    %cst_352 = arith.constant dense<0.000000e+00> : vector<128xf32>
    %386 = vector.multi_reduction <add>, %385, %cst_352 [1] : vector<128x128xf32> to vector<128xf32>
    %387 = vector.shape_cast %386 : vector<128xf32> to vector<128x1xf32>
    %388 = tpu.reciprocal %387 {approx = true} : vector<128x1xf32> -> vector<128x1xf32>
    %389 = vector.broadcast %388 : vector<128x1xf32> to vector<128x128xf32>
    %390 = arith.mulf %385, %389 : vector<128x128xf32>
    %cst_353 = arith.constant dense<0.000000e+00> : vector<128x8xf32>
    %391 = tpu.matmul %390, %379, %cst_353 {dimension_numbers = #tpu.dot_dimension_numbers<[1], [0], [0], [1], [0, 0, 1, 1], [], []>} : vector<128x128xf32>, vector<128x8xf32>, vector<128x8xf32> -> vector<128x8xf32>
    %392 = arith.truncf %391 : vector<128x8xf32> to vector<128x8xbf16>
    %c1_354 = arith.constant 1 : index
    %c3_355 = arith.constant 3 : index
    %c0_356 = arith.constant 0 : index
    %c0_357 = arith.constant 0 : index
    %393 = vector.load %arg5[%c1_354, %c3_355, %c0_356, %c0_357] : memref<2x4x8x32xbf16, #tpu.memory_space<vmem>>, vector<1x1x8x32xbf16>
    %394 = vector.shape_cast %393 : vector<1x1x8x32xbf16> to vector<8x32xbf16>
    %cst_358 = arith.constant dense<0.000000e+00> : vector<128x32xf32>
    %395 = tpu.matmul %392, %394, %cst_358 {dimension_numbers = #tpu.dot_dimension_numbers<[1], [0], [0], [1], [0, 0, 1, 1], [], []>} : vector<128x8xbf16>, vector<8x32xbf16>, vector<128x32xf32> -> vector<128x32xf32>
    %396 = arith.addf %358, %395 : vector<128x32xf32>
    %397 = vector.broadcast %232 : vector<1x32xf32> to vector<128x32xf32>
    %398 = arith.addf %396, %397 : vector<128x32xf32>
    %399 = arith.addf %230, %398 : vector<128x32xf32>
    %cst_359 = arith.constant dense<0.000000e+00> : vector<128xf32>
    %400 = vector.multi_reduction <add>, %399, %cst_359 [1] : vector<128x32xf32> to vector<128xf32>
    %401 = vector.shape_cast %400 : vector<128xf32> to vector<128x1xf32>
    %cst_360 = arith.constant 3.200000e+01 : f32
    %402 = vector.broadcast %cst_360 : f32 to vector<128x1xf32>
    %403 = arith.divf %401, %402 : vector<128x1xf32>
    %404 = vector.broadcast %403 : vector<128x1xf32> to vector<128x32xf32>
    %405 = arith.subf %399, %404 : vector<128x32xf32>
    %406 = arith.mulf %405, %405 : vector<128x32xf32>
    %cst_361 = arith.constant dense<0.000000e+00> : vector<128xf32>
    %407 = vector.multi_reduction <add>, %406, %cst_361 [1] : vector<128x32xf32> to vector<128xf32>
    %408 = vector.shape_cast %407 : vector<128xf32> to vector<128x1xf32>
    %cst_362 = arith.constant 3.200000e+01 : f32
    %409 = vector.broadcast %cst_362 : f32 to vector<128x1xf32>
    %410 = arith.divf %408, %409 : vector<128x1xf32>
    %cst_363 = arith.constant 9.99999974E-6 : f32
    %411 = vector.broadcast %cst_363 : f32 to vector<128x1xf32>
    %412 = arith.addf %410, %411 : vector<128x1xf32>
    %413 = math.rsqrt %412 : vector<128x1xf32>
    %414 = vector.broadcast %413 : vector<128x1xf32> to vector<128x32xf32>
    %415 = arith.mulf %405, %414 : vector<128x32xf32>
    %416 = vector.broadcast %238 : vector<1x32xf32> to vector<128x32xf32>
    %417 = arith.mulf %415, %416 : vector<128x32xf32>
    %418 = vector.broadcast %240 : vector<1x32xf32> to vector<128x32xf32>
    %419 = arith.addf %417, %418 : vector<128x32xf32>
    %420 = arith.truncf %419 : vector<128x32xf32> to vector<128x32xbf16>
    %c1_364 = arith.constant 1 : index
    %c0_365 = arith.constant 0 : index
    %c0_366 = arith.constant 0 : index
    %c0_367 = arith.constant 0 : index
    %421 = vector.load %arg6[%c1_364, %c0_365, %c0_366, %c0_367] : memref<2x2x32x32xbf16, #tpu.memory_space<vmem>>, vector<1x1x32x32xbf16>
    %422 = vector.shape_cast %421 : vector<1x1x32x32xbf16> to vector<32x32xbf16>
    %cst_368 = arith.constant dense<0.000000e+00> : vector<128x32xf32>
    %423 = tpu.matmul %420, %422, %cst_368 {dimension_numbers = #tpu.dot_dimension_numbers<[1], [0], [0], [1], [0, 0, 1, 1], [], []>} : vector<128x32xbf16>, vector<32x32xbf16>, vector<128x32xf32> -> vector<128x32xf32>
    %424 = vector.broadcast %234 : vector<1x32xf32> to vector<128x32xf32>
    %425 = arith.addf %423, %424 : vector<128x32xf32>
    %cst_369 = arith.constant 0.000000e+00 : f32
    %426 = vector.broadcast %cst_369 : f32 to vector<128x32xf32>
    %427 = arith.maximumf %425, %426 : vector<128x32xf32>
    %428 = arith.truncf %427 : vector<128x32xf32> to vector<128x32xbf16>
    %c1_370 = arith.constant 1 : index
    %c1_371 = arith.constant 1 : index
    %c0_372 = arith.constant 0 : index
    %c0_373 = arith.constant 0 : index
    %429 = vector.load %arg6[%c1_370, %c1_371, %c0_372, %c0_373] : memref<2x2x32x32xbf16, #tpu.memory_space<vmem>>, vector<1x1x32x32xbf16>
    %430 = vector.shape_cast %429 : vector<1x1x32x32xbf16> to vector<32x32xbf16>
    %cst_374 = arith.constant dense<0.000000e+00> : vector<128x32xf32>
    %431 = tpu.matmul %428, %430, %cst_374 {dimension_numbers = #tpu.dot_dimension_numbers<[1], [0], [0], [1], [0, 0, 1, 1], [], []>} : vector<128x32xbf16>, vector<32x32xbf16>, vector<128x32xf32> -> vector<128x32xf32>
    %432 = vector.broadcast %236 : vector<1x32xf32> to vector<128x32xf32>
    %433 = arith.addf %431, %432 : vector<128x32xf32>
    %434 = arith.addf %419, %433 : vector<128x32xf32>
    %cst_375 = arith.constant dense<0.000000e+00> : vector<128xf32>
    %435 = vector.multi_reduction <add>, %434, %cst_375 [1] : vector<128x32xf32> to vector<128xf32>
    %436 = vector.shape_cast %435 : vector<128xf32> to vector<128x1xf32>
    %cst_376 = arith.constant 3.200000e+01 : f32
    %437 = vector.broadcast %cst_376 : f32 to vector<128x1xf32>
    %438 = arith.divf %436, %437 : vector<128x1xf32>
    %439 = vector.broadcast %438 : vector<128x1xf32> to vector<128x32xf32>
    %440 = arith.subf %434, %439 : vector<128x32xf32>
    %441 = arith.mulf %440, %440 : vector<128x32xf32>
    %cst_377 = arith.constant dense<0.000000e+00> : vector<128xf32>
    %442 = vector.multi_reduction <add>, %441, %cst_377 [1] : vector<128x32xf32> to vector<128xf32>
    %443 = vector.shape_cast %442 : vector<128xf32> to vector<128x1xf32>
    %cst_378 = arith.constant 3.200000e+01 : f32
    %444 = vector.broadcast %cst_378 : f32 to vector<128x1xf32>
    %445 = arith.divf %443, %444 : vector<128x1xf32>
    %cst_379 = arith.constant 9.99999974E-6 : f32
    %446 = vector.broadcast %cst_379 : f32 to vector<128x1xf32>
    %447 = arith.addf %445, %446 : vector<128x1xf32>
    %448 = math.rsqrt %447 : vector<128x1xf32>
    %449 = vector.broadcast %448 : vector<128x1xf32> to vector<128x32xf32>
    %450 = arith.mulf %440, %449 : vector<128x32xf32>
    %451 = vector.broadcast %242 : vector<1x32xf32> to vector<128x32xf32>
    %452 = arith.mulf %450, %451 : vector<128x32xf32>
    %453 = vector.broadcast %244 : vector<1x32xf32> to vector<128x32xf32>
    %454 = arith.addf %452, %453 : vector<128x32xf32>
    %455 = arith.truncf %454 : vector<128x32xf32> to vector<128x32xbf16>
    %c0_380 = arith.constant 0 : index
    %c0_381 = arith.constant 0 : index
    %456 = vector.load %arg8[%c0_380, %c0_381] : memref<32x128xbf16, #tpu.memory_space<vmem>>, vector<32x128xbf16>
    %cst_382 = arith.constant dense<0.000000e+00> : vector<128x128xf32>
    %457 = tpu.matmul %455, %456, %cst_382 {dimension_numbers = #tpu.dot_dimension_numbers<[1], [0], [0], [1], [0, 0, 1, 1], [], []>} : vector<128x32xbf16>, vector<32x128xbf16>, vector<128x128xf32> -> vector<128x128xf32>
    %c0_383 = arith.constant 0 : index
    %c0_384 = arith.constant 0 : index
    %458 = vector.load %arg9[%c0_383, %c0_384] : memref<1x128xf32, #tpu.memory_space<vmem>>, vector<1x128xf32>
    %459 = vector.broadcast %458 : vector<1x128xf32> to vector<128x128xf32>
    %460 = arith.addf %457, %459 : vector<128x128xf32>
    %c0_385 = arith.constant 0 : index
    %c0_386 = arith.constant 0 : index
    %461 = vector.load %arg10[%c0_385, %c0_386] : memref<128x128xf32, #tpu.memory_space<vmem>>, vector<128x128xf32>
    tpu.vector_store %arg10[%c0_385, %c0_386], %460 {strides = array<i32>} : memref<128x128xf32, #tpu.memory_space<vmem>>, vector<128x128xf32>,
    return
  }
}

</mosaic_0001>

<bundles_post_ra>
// kernel: tpu_custom_call.1
= control target key start
LH: loop header
LB: loop body
LE: loop exit
PB: predicated region body
PF: predicated region fallthrough
CT: control target
= control target key end

     0   :  { %vm92_vm0 = vcmask 392192   ;;  %s19415_s0 = inlined_call_operand.vmem [shape: f32[128,48], index: 0, kind: input, shape index: {}]   ;;  %s19416_s1 = inlined_call_operand.vmem [shape: bf16[48,32], index: 1, kind: input, shape index: {}]   ;;  %s19417_s2 = inlined_call_operand.vmem [shape: f32[1,32], index: 2, kind: input, shape index: {}]   ;;  %s19418_s3 = inlined_call_operand.vmem [shape: bf16[2,12,32,8], index: 3, kind: input, shape index: {}]   ;;  %s19419_s4 = inlined_call_operand.vmem [shape: f32[2,12,1,8], index: 4, kind: input, shape index: {}]   ;;  %s19420_s5 = inlined_call_operand.vmem [shape: bf16[2,4,8,32], index: 5, kind: input, shape index: {}]   ;;  %s19421_s6 = inlined_call_operand.vmem [shape: bf16[2,2,32,32], index: 6, kind: input, shape index: {}]   ;;  %s19422_s7 = inlined_call_operand.vmem [shape: f32[2,7,1,32], index: 7, kind: input, shape index: {}]   ;;  %s19423_s8 = inlined_call_operand.vmem [shape: bf16[32,128], index: 8, kind: input, shape index: {}]   ;;  %s19424_s9 = inlined_call_operand.vmem [shape: f32[1,128], index: 9, kind: input, shape index: {}]   ;;  %s19425_s10 = inlined_call_operand.hbm [shape: f32[128,128], index: 10, kind: output, shape index: {}]  }
   0x1   :  { %v14631_v0 = vld [vmem:[%s19416_s1] sm:$0xff]   ;;  %v14632_v1 = vld [vmem:[%s19416_s1 + $0x8] sm:$0xff]   ;;  %v14633_v4 = vld [vmem:[%s19416_s1 + $0x10] sm:$0xff]  }
   0x2   :  { %12242 = vmatprep.subr.bf16.mxu0 %v14631_v0  ;;  %v37_v2 = vld [vmem:[%s19415_s0] sm:$0xff]  ;;  %v38_v3 = vld [vmem:[%s19415_s0 + $0x8] sm:$0xff]  ;;  %v39_v6 = vld [vmem:[%s19415_s0 + $0x10] sm:$0xff] }
   0x3   :  { %12243 = vmatpush3.bf16.msra.mxu0 %v14631_v0  ;;  %v53_v5 = vpack.c.bf16 %v38_v3, %v37_v2  ;;  %v40_v7 = vld [vmem:[%s19415_s0 + $0x18] sm:$0xff]  ;;  %v41_v8 = vld [vmem:[%s19415_s0 + $0x20] sm:$0xff]  ;;  %v42_v9 = vld [vmem:[%s19415_s0 + $0x28] sm:$0xff] }
   0x4   :  { %12244 = vmatprep.subr.bf16.mxu0 %v14632_v1  ;;  %v54_v10 = vpack.c.bf16 %v40_v7, %v39_v6  ;;  %v55_v11 = vpack.c.bf16 %v42_v9, %v41_v8  ;;  %v43_v12 = vld [vmem:[%s19415_s0 + $0x30] sm:$0xff]  ;;  %v44_v13 = vld [vmem:[%s19415_s0 + $0x38] sm:$0xff]  ;;  %v45_v14 = vld [vmem:[%s19415_s0 + $0x40] sm:$0xff] }
   0x5   :  { %12248 = vmatprep.mubr.msk.bf16.mxu0 %vm92_vm0, %v53_v5  ;;  %v46_v15 = vld [vmem:[%s19415_s0 + $0x48] sm:$0xff]  ;;  %v56_v16 = vpack.c.bf16 %v44_v13, %v43_v12  ;;  %v47_v18 = vld [vmem:[%s19415_s0 + $0x50] sm:$0xff]  ;;  %v48_v19 = vld [vmem:[%s19415_s0 + $0x58] sm:$0xff] }
   0x6   :  { %v57_v17 = vpack.c.bf16 %v46_v15, %v45_v14  ;;  %v49_v20 = vld [vmem:[%s19415_s0 + $0x60] sm:$0xff]  ;;  %v50_v21 = vld [vmem:[%s19415_s0 + $0x68] sm:$0xff]  ;;  %v58_v22 = vpack.c.bf16 %v48_v19, %v47_v18  ;;  %v51_v24 = vld [vmem:[%s19415_s0 + $0x70] sm:$0xff] }
   0x7   :  { %12245 = vmatpush3.bf16.msra.mxu0 %v14632_v1  ;;  %v59_v23 = vpack.c.bf16 %v50_v21, %v49_v20  ;;  %v52_v25 = vld [vmem:[%s19415_s0 + $0x78] sm:$0xff] }
   0x8   :  { %12246 = vmatprep.subr.bf16.mxu0 %v14633_v4  ;;  %v60_v26 = vpack.c.bf16 %v52_v25, %v51_v24 }
   0xb   :  { %12247 = vmatpush3.bf16.msra.mxu0 %v14633_v4 }
   0xe   :  { %12249 = vmatmul.mubr.msk.bf16.vlgmr.msra.gmra.mrb[0].mxu0 %vm92_vm0, %v54_v10 }
   0xf   :  { %12252 = vmatprep.mubr.msk.bf16.mxu0 %vm92_vm0, %v55_v11 }
  0x16   :  { %12253 = vmatmul.mubr.msk.bf16.gmra.mrb[4].mxu0 %vm92_vm0, %v56_v16 }
  0x17   :  { %12256 = vmatprep.mubr.msk.bf16.mxu0 %vm92_vm0, %v57_v17 }
  0x1e   :  { %12257 = vmatmul.mubr.msk.bf16.gmra.mrb[8].mxu0 %vm92_vm0, %v58_v22 }
  0x1f   :  { %12260 = vmatprep.mubr.msk.bf16.mxu0 %vm92_vm0, %v59_v23 }
  0x26   :  { %12261 = vmatmul.mubr.msk.bf16.gmra.mrb[12].mxu0 %vm92_vm0, %v60_v26 }
  0x27   :  { %15 = vsyncpa [#allocation3], 0  ;;  %v14634_v27 = vld [vmem:[%s19418_s3] sm:$0xff]   ;;  %v14636_v29 = vld [vmem:[%s19418_s3 + $0x8] sm:$0xff]   ;;  %vm258_vm1 = vcmask 261120   ;;  %vm624_vm2 = vcmask 64512  }
  0x28   :  { %v14635_v28 = vld [vmem:[%s19418_s3 + $0x80] sm:$0xff]   ;;  %12264 = vmatprep.subr.bf16.mxu1 %v14634_v27  ;;  %v14637_v30 = vld [vmem:[%s19418_s3 + $0x88] sm:$0xff]   ;;  %vm15690_vm3 = vmpackc.low %vm624_vm2, %vm624_vm2  ;;  %vm2094_vm4 = vcmask 1043456  }
  0x29   :  { %12304 = vmatprep.subr.bf16.mxu0 %v14635_v28  ;;  %12265 = vmatpush3.bf16.msra.mxu1 %v14634_v27  ;;  %v14638_v31 = vld [vmem:[%s19418_s3 + $0x40] sm:$0xff]   ;;  %v14639_v43 = vld [vmem:[%s19418_s3 + $0x48] sm:$0xff]  }
  0x2a   :  { %12305 = vmatpush3.bf16.msra.mxu0 %v14635_v28  ;;  %12266 = vmatprep.subr.bf16.mxu1 %v14636_v29  ;;  %v10549_v33 = vld [vmem:[%s19417_s2] ss:$0 sm:$0xff]  ;;  %v15620_v13 = vld [vmem:[%s19419_s4 + $0x8] ss:$0 sm:$0xff] }
  0x2b   :  { %12306 = vmatprep.subr.bf16.mxu0 %v14637_v30  ;;  %v15615_v10 = vld [vmem:[%s19419_s4] ss:$0 sm:$0xff] }
  0x2d   :  { %12267 = vmatpush3.bf16.msra.mxu1 %v14636_v29 }
  0x2e   :  { %12307 = vmatpush3.bf16.msra.mxu0 %v14637_v30  ;;  %12284 = vmatprep.subr.bf16.mxu1 %v14638_v31 }
  0xe1   :  { %v12250_v32 = vpop.f32.mrb[0].mxu0 }
  0xe2   :  { %v151_v34 = vpop.f32.mrb[1].mxu0  ;;  %v15503_v40 = vadd.f32 %v12250_v32, %v10549_v33 }
  0xe3   :  { %v12251_v35 = vpop.f32.mrb[2].mxu0  ;;  %v15499_v38 = vadd.f32 %v10549_v33, %v151_v34 }
  0xe4   :  { %v15497_v36 = vadd.f32 %v12251_v35, %v10549_v33  ;;  %v154_v37 = vpop.f32.mrb[3].mxu0  ;;  %19487 = vst [vmem:[#allocation8_spill] sm:$0xff] %v15503_v40 }
  0xe5   :  { %19485 = vst [vmem:[#allocation6_spill] sm:$0xff] %v15499_v38  ;;  %v15501_v39 = vadd.f32 %v10549_v33, %v154_v37 }
  0xe6   :  { %19484 = vst [vmem:[#allocation5_spill] sm:$0xff] %v15497_v36  ;;  %v15511_v42 = vpack.c.bf16 %v15497_v36, %v15503_v40 }
  0xe7   :  { %19486 = vst [vmem:[#allocation7_spill] sm:$0xff] %v15501_v39  ;;  %v15507_v41 = vpack.c.bf16 %v15501_v39, %v15499_v38 }
  0xe9   :  { %v12254_v44 = vpop.f32.mrb[4].mxu0  ;;  %12268 = vmatprep.mubr.msk.bf16.mxu1 %vm258_vm1, %v15507_v41  ;;  %12308 = vmatprep.mubr.msk.bf16.mxu0 %vm258_vm1, %v15507_v41 }
  0xea   :  { %v167_v45 = vpop.f32.mrb[5].mxu0  ;;  %12269 = vmatmul.mubr.msk.bf16.vlgmr.msra.gmra.mrb[0].mxu1 %vm258_vm1, %v15511_v42  ;;  %12309 = vmatmul.mubr.msk.bf16.vlgmr.msra.gmra.mrb[16].mxu0 %vm258_vm1, %v15511_v42  ;;  %v15530_v51 = vadd.f32 %v12254_v44, %v10549_v33 }
  0xeb   :  { %v12255_v46 = vpop.f32.mrb[6].mxu0  ;;  %12285 = vmatpush3.bf16.msra.mxu1 %v14638_v31  ;;  %v15526_v49 = vadd.f32 %v10549_v33, %v167_v45 }
  0xec   :  { %v15524_v47 = vadd.f32 %v12255_v46, %v10549_v33  ;;  %v170_v48 = vpop.f32.mrb[7].mxu0  ;;  %12286 = vmatprep.subr.bf16.mxu1 %v14639_v43  ;;  %19491 = vst [vmem:[#allocation12_spill] sm:$0xff] %v15530_v51 }
  0xed   :  { %19489 = vst [vmem:[#allocation10_spill] sm:$0xff] %v15526_v49  ;;  %v15528_v50 = vadd.f32 %v10549_v33, %v170_v48 }
  0xee   :  { %19488 = vst [vmem:[#allocation9_spill] sm:$0xff] %v15524_v47  ;;  %v15538_v53 = vpack.c.bf16 %v15524_v47, %v15530_v51 }
  0xef   :  { %19490 = vst [vmem:[#allocation11_spill] sm:$0xff] %v15528_v50  ;;  %v15534_v52 = vpack.c.bf16 %v15528_v50, %v15526_v49  ;;  %12287 = vmatpush3.bf16.msra.mxu1 %v14639_v43 }
  0xf1   :  { %v12258_v54 = vpop.f32.mrb[8].mxu0  ;;  %12272 = vmatprep.mubr.msk.bf16.mxu1 %vm258_vm1, %v15534_v52  ;;  %12312 = vmatprep.mubr.msk.bf16.mxu0 %vm258_vm1, %v15534_v52 }
  0xf2   :  { %v183_v55 = vpop.f32.mrb[9].mxu0  ;;  %12273 = vmatmul.mubr.msk.bf16.gmra.mrb[4].mxu1 %vm258_vm1, %v15538_v53  ;;  %12313 = vmatmul.mubr.msk.bf16.gmra.mrb[20].mxu0 %vm258_vm1, %v15538_v53  ;;  %v15554_v61 = vadd.f32 %v12258_v54, %v10549_v33 }
  0xf3   :  { %v12259_v56 = vpop.f32.mrb[10].mxu0  ;;  %v15550_v59 = vadd.f32 %v10549_v33, %v183_v55 }
  0xf4   :  { %v15548_v57 = vadd.f32 %v12259_v56, %v10549_v33  ;;  %v186_v58 = vpop.f32.mrb[11].mxu0  ;;  %19495 = vst [vmem:[#allocation16_spill] sm:$0xff] %v15554_v61 }
  0xf5   :  { %19493 = vst [vmem:[#allocation14_spill] sm:$0xff] %v15550_v59  ;;  %v15552_v60 = vadd.f32 %v10549_v33, %v186_v58 }
  0xf6   :  { %19492 = vst [vmem:[#allocation13_spill] sm:$0xff] %v15548_v57  ;;  %v15562_v63 = vpack.c.bf16 %v15548_v57, %v15554_v61 }
  0xf7   :  { %19494 = vst [vmem:[#allocation15_spill] sm:$0xff] %v15552_v60  ;;  %v15558_v62 = vpack.c.bf16 %v15552_v60, %v15550_v59 }
  0xf9   :  { %v12262_v0 = vpop.f32.mrb[12].mxu0  ;;  %12276 = vmatprep.mubr.msk.bf16.mxu1 %vm258_vm1, %v15558_v62  ;;  %12316 = vmatprep.mubr.msk.bf16.mxu0 %vm258_vm1, %v15558_v62 }
  0xfa   :  { %v199_v1 = vpop.f32.mrb[13].mxu0  ;;  %12277 = vmatmul.mubr.msk.bf16.gmra.mrb[8].mxu1 %vm258_vm1, %v15562_v63  ;;  %12317 = vmatmul.mubr.msk.bf16.gmra.mrb[24].mxu0 %vm258_vm1, %v15562_v63  ;;  %v15578_v7 = vadd.f32 %v12262_v0, %v10549_v33 }
  0xfb   :  { %v12263_v2 = vpop.f32.mrb[14].mxu0  ;;  %v15574_v5 = vadd.f32 %v10549_v33, %v199_v1 }
  0xfc   :  { %v15572_v3 = vadd.f32 %v12263_v2, %v10549_v33  ;;  %v202_v4 = vpop.f32.mrb[15].mxu0  ;;  %19499 = vst [vmem:[#allocation20_spill] sm:$0xff] %v15578_v7 }
  0xfd   :  { %19497 = vst [vmem:[#allocation18_spill] sm:$0xff] %v15574_v5  ;;  %v15576_v6 = vadd.f32 %v10549_v33, %v202_v4 }
  0xfe   :  { %19496 = vst [vmem:[#allocation17_spill] sm:$0xff] %v15572_v3  ;;  %v15586_v9 = vpack.c.bf16 %v15572_v3, %v15578_v7 }
  0xff   :  { %19498 = vst [vmem:[#allocation19_spill] sm:$0xff] %v15576_v6  ;;  %v15582_v8 = vpack.c.bf16 %v15576_v6, %v15574_v5 }
 0x101   :  { %12280 = vmatprep.mubr.msk.bf16.mxu1 %vm258_vm1, %v15582_v8  ;;  %12320 = vmatprep.mubr.msk.bf16.mxu0 %vm258_vm1, %v15582_v8 }
 0x102   :  { %12281 = vmatmul.mubr.msk.bf16.gmra.mrb[12].mxu1 %vm258_vm1, %v15586_v9  ;;  %12321 = vmatmul.mubr.msk.bf16.gmra.mrb[28].mxu0 %vm258_vm1, %v15586_v9 }
 0x103   :  { %12288 = vmatprep.mubr.msk.bf16.mxu1 %vm258_vm1, %v15507_v41 }
 0x10a   :  { %12289 = vmatmul.mubr.msk.bf16.vlgmr.msra.gmra.mrb[16].mxu1 %vm258_vm1, %v15511_v42 }
 0x10b   :  { %12292 = vmatprep.mubr.msk.bf16.mxu1 %vm258_vm1, %v15534_v52 }
 0x112   :  { %12293 = vmatmul.mubr.msk.bf16.gmra.mrb[20].mxu1 %vm258_vm1, %v15538_v53 }
 0x113   :  { %12296 = vmatprep.mubr.msk.bf16.mxu1 %vm258_vm1, %v15558_v62 }
 0x11a   :  { %12297 = vmatmul.mubr.msk.bf16.gmra.mrb[24].mxu1 %vm258_vm1, %v15562_v63 }
 0x11b   :  { %12300 = vmatprep.mubr.msk.bf16.mxu1 %vm258_vm1, %v15582_v8 }
 0x122   :  { %12301 = vmatmul.mubr.msk.bf16.gmra.mrb[28].mxu1 %vm258_vm1, %v15586_v9 }
 0x1bd   :  { %v12270_v11 = vpop.f32.mrb[0].mxu1  ;;  %v12310_v12 = vpop.f32.mrb[16].mxu0 }
 0x1be   :  { %v15623_v14 = vadd.f32 %v12270_v11, %v15615_v10  ;;  %v317_v15 = vpop.f32.mrb[1].mxu1  ;;  %v561_v16 = vpop.f32.mrb[17].mxu0  ;;  %v570_v23 = vadd.f32 %v12310_v12, %v15620_v13 }
 0x1bf   :  { %v318_v17 = vadd.f32 %v15615_v10, %v317_v15  ;;  %v12271_v18 = vpop.f32.mrb[2].mxu1  ;;  %v12311_v19 = vpop.f32.mrb[18].mxu0  ;;  %v562_v26 = vadd.f32 %v15620_v13, %v561_v16 }
 0x1c0   :  { %v15627_v20 = vadd.f32 %v12271_v18, %v15615_v10  ;;  %v320_v21 = vpop.f32.mrb[3].mxu1  ;;  %v564_v22 = vpop.f32.mrb[19].mxu0  ;;  %v573_v24 = vadd.f32 %v12311_v19, %v15620_v13 }
 0x1c1   :  { %v15632_v25 = vadd.f32 %v15615_v10, %v320_v21  ;;  %12356 = vmatprep.mubr.msk.f32.mxu1 %vm624_vm2, %v318_v17  ;;  %v565_v27 = vadd.f32 %v15620_v13, %v564_v22 }
 0x1c2   :  { %v13936_v28 = vpack.c.bf16 %v573_v24, %v570_v23 }
 0x1c3   :  { %v13932_v29 = vpack.c.bf16 %v565_v27, %v562_v26 }
 0x1c5   :  { %v12274_v30 = vpop.f32.mrb[4].mxu1  ;;  %v12314_v31 = vpop.f32.mrb[20].mxu0  ;;  %13933 = vmatprep.subr.bf16.mxu0 %v13932_v29 }
 0x1c6   :  { %v15638_v32 = vadd.f32 %v12274_v30, %v15615_v10  ;;  %v333_v33 = vpop.f32.mrb[5].mxu1  ;;  %v577_v34 = vpop.f32.mrb[21].mxu0  ;;  %13935 = vmatpush3.bf16.msra.mxu0 %v13932_v29  ;;  %v586_v48 = vadd.f32 %v12314_v31, %v15620_v13 }
 0x1c7   :  { %v15641_v35 = vadd.f32 %v15615_v10, %v333_v33  ;;  %v12275_v37 = vpop.f32.mrb[6].mxu1  ;;  %v12315_v43 = vpop.f32.mrb[22].mxu0  ;;  %13937 = vmatprep.subr.bf16.mxu0 %v13936_v28  ;;  %v578_v56 = vadd.f32 %v15620_v13, %v577_v34 }
 0x1c8   :  { %v15644_v44 = vadd.f32 %v12275_v37, %v15615_v10  ;;  %v336_v45 = vpop.f32.mrb[7].mxu1  ;;  %v580_v46 = vpop.f32.mrb[23].mxu0  ;;  %v589_v54 = vadd.f32 %v12315_v43, %v15620_v13 }
 0x1c9   :  { %v15649_v55 = vadd.f32 %v15615_v10, %v336_v45  ;;  %v581_v58 = vadd.f32 %v15620_v13, %v580_v46 }
 0x1ca   :  { %13939 = vmatpush3.bf16.msra.mxu0 %v13936_v28  ;;  %v13944_v0 = vpack.c.bf16 %v589_v54, %v586_v48 }
 0x1cb   :  { %v13940_v1 = vpack.c.bf16 %v581_v58, %v578_v56 }
 0x1cd   :  { %v12278_v2 = vpop.f32.mrb[8].mxu1  ;;  %v12318_v4 = vpop.f32.mrb[24].mxu0  ;;  %13941 = vmatprep.subr.bf16.mxu0 %v13940_v1 }
 0x1ce   :  { %v15654_v11 = vadd.f32 %v12278_v2, %v15615_v10  ;;  %v349_v12 = vpop.f32.mrb[9].mxu1  ;;  %v593_v15 = vpop.f32.mrb[25].mxu0  ;;  %13943 = vmatpush3.bf16.msra.mxu0 %v13940_v1  ;;  %v602_v23 = vadd.f32 %v12318_v4, %v15620_v13 }
 0x1cf   :  { %v15657_v16 = vadd.f32 %v15615_v10, %v349_v12  ;;  %v12279_v17 = vpop.f32.mrb[10].mxu1  ;;  %v12319_v18 = vpop.f32.mrb[26].mxu0  ;;  %13945 = vmatprep.subr.bf16.mxu0 %v13944_v0  ;;  %v594_v27 = vadd.f32 %v15620_v13, %v593_v15 }
 0x1d0   :  { %v15660_v19 = vadd.f32 %v12279_v17, %v15615_v10  ;;  %v352_v21 = vpop.f32.mrb[11].mxu1  ;;  %v596_v22 = vpop.f32.mrb[27].mxu0  ;;  %v605_v24 = vadd.f32 %v12319_v18, %v15620_v13 }
 0x1d1   :  { %v15665_v26 = vadd.f32 %v15615_v10, %v352_v21  ;;  %v597_v28 = vadd.f32 %v15620_v13, %v596_v22  ;;  %v10583_v21 = vld [vmem:[%s19419_s4 + $0x4] ss:$0 sm:$0xff] }
 0x1d2   :  { %13947 = vmatpush3.bf16.msra.mxu0 %v13944_v0  ;;  %v13952_v29 = vpack.c.bf16 %v605_v24, %v602_v23 }
 0x1d3   :  { %v13948_v30 = vpack.c.bf16 %v597_v28, %v594_v27 }
 0x1d5   :  { %v12282_v31 = vpop.f32.mrb[12].mxu1  ;;  %v12322_v33 = vpop.f32.mrb[28].mxu0  ;;  %13949 = vmatprep.subr.bf16.mxu0 %v13948_v30 }
 0x1d6   :  { %v15670_v34 = vadd.f32 %v12282_v31, %v15615_v10  ;;  %v365_v37 = vpop.f32.mrb[13].mxu1  ;;  %v609_v43 = vpop.f32.mrb[29].mxu0  ;;  %13951 = vmatpush3.bf16.msra.mxu0 %v13948_v30  ;;  %v618_v0 = vadd.f32 %v12322_v33, %v15620_v13 }
 0x1d7   :  { %v15673_v45 = vadd.f32 %v15615_v10, %v365_v37  ;;  %v12283_v46 = vpop.f32.mrb[14].mxu1  ;;  %v12323_v48 = vpop.f32.mrb[30].mxu0  ;;  %13953 = vmatprep.subr.bf16.mxu0 %v13952_v29  ;;  %v610_v4 = vadd.f32 %v15620_v13, %v609_v43 }
 0x1d8   :  { %v15676_v54 = vadd.f32 %v12283_v46, %v15615_v10  ;;  %v368_v56 = vpop.f32.mrb[15].mxu1  ;;  %v612_v58 = vpop.f32.mrb[31].mxu0  ;;  %v621_v1 = vadd.f32 %v12323_v48, %v15620_v13 }
 0x1d9   :  { %v15681_v2 = vadd.f32 %v15615_v10, %v368_v56  ;;  %v613_v12 = vadd.f32 %v15620_v13, %v612_v58 }
 0x1da   :  { %13955 = vmatpush3.bf16.msra.mxu0 %v13952_v29  ;;  %v13960_v15 = vpack.c.bf16 %v621_v1, %v618_v0 }
 0x1db   :  { %v13956_v17 = vpack.c.bf16 %v613_v12, %v610_v4 }
 0x1dd   :  { %v12290_v18 = vpop.f32.mrb[16].mxu1  ;;  %13957 = vmatprep.subr.bf16.mxu0 %v13956_v17 }
 0x1de   :  { %v439_v22 = vpop.f32.mrb[17].mxu1  ;;  %13959 = vmatpush3.bf16.msra.mxu0 %v13956_v17  ;;  %v448_v24 = vadd.f32 %v12290_v18, %v10583_v21 }
 0x1df   :  { %v12291_v23 = vpop.f32.mrb[18].mxu1  ;;  %13961 = vmatprep.subr.bf16.mxu0 %v13960_v15  ;;  %v440_v28 = vadd.f32 %v10583_v21, %v439_v22 }
 0x1e0   :  { %v451_v10 = vadd.f32 %v12291_v23, %v10583_v21  ;;  %v442_v27 = vpop.f32.mrb[19].mxu1 }
 0x1e1   :  { %v443_v30 = vadd.f32 %v10583_v21, %v442_v27 }
 0x1e2   :  { %v13890_v31 = vpack.c.bf16 %v451_v10, %v448_v24  ;;  %13963 = vmatpush3.bf16.msra.mxu0 %v13960_v15 }
 0x1e3   :  { %v13884_v29 = vpack.c.bf16 %v443_v30, %v440_v28 }
 0x1e5   :  { %v12294_v33 = vpop.f32.mrb[20].mxu1  ;;  %13886 = vmatprep.subr.msk.bf16.mxu1 %vm15690_vm3, %v13884_v29 }
 0x1e6   :  { %v455_v37 = vpop.f32.mrb[21].mxu1  ;;  %13889 = vmatpush3.bf16.xpose.msk.msra.mxu1 %vm15690_vm3, %v13884_v29  ;;  %v464_v46 = vadd.f32 %v12294_v33, %v10583_v21 }
 0x1e7   :  { %v12295_v43 = vpop.f32.mrb[22].mxu1  ;;  %13892 = vmatprep.subr.msk.bf16.mxu1 %vm15690_vm3, %v13890_v31  ;;  %v456_v58 = vadd.f32 %v10583_v21, %v455_v37 }
 0x1e8   :  { %v467_v48 = vadd.f32 %v12295_v43, %v10583_v21  ;;  %v458_v56 = vpop.f32.mrb[23].mxu1 }
 0x1e9   :  { %v459_v0 = vadd.f32 %v10583_v21, %v458_v56 }
 0x1ea   :  { %v13902_v1 = vpack.c.bf16 %v467_v48, %v464_v46 }
 0x1eb   :  { %v13896_v4 = vpack.c.bf16 %v459_v0, %v456_v58  ;;  %v14641_v0 = vld [vmem:[%s19418_s3 + $0x58] sm:$0xff]  }
 0x1ed   :  { %v12298_v12 = vpop.f32.mrb[24].mxu1 }
 0x1ee   :  { %v471_v15 = vpop.f32.mrb[25].mxu1  ;;  %13895 = vmatpush3.bf16.xpose.msk.msra.mxu1 %vm15690_vm3, %v13890_v31  ;;  %v480_v18 = vadd.f32 %v12298_v12, %v10583_v21  ;;  %v10663_v12 = vld [vmem:[%s19419_s4 + $0x5] ss:$0 sm:$0xff] }
 0x1ef   :  { %v12299_v17 = vpop.f32.mrb[26].mxu1  ;;  %13898 = vmatprep.subr.msk.bf16.mxu1 %vm15690_vm3, %v13896_v4  ;;  %v472_v24 = vadd.f32 %v10583_v21, %v471_v15 }
 0x1f0   :  { %v483_v22 = vadd.f32 %v12299_v17, %v10583_v21  ;;  %v474_v23 = vpop.f32.mrb[27].mxu1 }
 0x1f1   :  { %v475_v10 = vadd.f32 %v10583_v21, %v474_v23 }
 0x1f2   :  { %v13914_v27 = vpack.c.bf16 %v483_v22, %v480_v18 }
 0x1f3   :  { %v13908_v28 = vpack.c.bf16 %v475_v10, %v472_v24 }
 0x1f5   :  { %v12302_v30 = vpop.f32.mrb[28].mxu1 }
 0x1f6   :  { %v487_v29 = vpop.f32.mrb[29].mxu1  ;;  %13901 = vmatpush3.bf16.xpose.msk.msra.mxu1 %vm15690_vm3, %v13896_v4  ;;  %v496_v31 = vadd.f32 %v12302_v30, %v10583_v21 }
 0x1f7   :  { %v12303_v33 = vpop.f32.mrb[30].mxu1  ;;  %13904 = vmatprep.subr.msk.bf16.mxu1 %vm15690_vm3, %v13902_v1  ;;  %v488_v46 = vadd.f32 %v10583_v21, %v487_v29 }
 0x1f8   :  { %v499_v37 = vadd.f32 %v12303_v33, %v10583_v21  ;;  %v490_v43 = vpop.f32.mrb[31].mxu1 }
 0x1f9   :  { %v491_v48 = vadd.f32 %v10583_v21, %v490_v43  ;;  %v14640_v21 = vld [vmem:[%s19418_s3 + $0x50] sm:$0xff]  }
 0x1fa   :  { %v13926_v56 = vpack.c.bf16 %v499_v37, %v496_v31 }
 0x1fb   :  { %v13920_v58 = vpack.c.bf16 %v491_v48, %v488_v46 }
 0x1fe   :  { %13907 = vmatpush3.bf16.xpose.msk.msra.mxu1 %vm15690_vm3, %v13902_v1 }
 0x1ff   :  { %13910 = vmatprep.subr.msk.bf16.mxu1 %vm15690_vm3, %v13908_v28 }
 0x206   :  { %13913 = vmatpush3.bf16.xpose.msk.msra.mxu1 %vm15690_vm3, %v13908_v28 }
 0x207   :  { %13916 = vmatprep.subr.msk.bf16.mxu1 %vm15690_vm3, %v13914_v27 }
 0x20e   :  { %13919 = vmatpush3.bf16.xpose.msk.msra.mxu1 %vm15690_vm3, %v13914_v27 }
 0x20f   :  { %13922 = vmatprep.subr.msk.bf16.mxu1 %vm15690_vm3, %v13920_v58 }
 0x216   :  { %13925 = vmatpush3.bf16.xpose.msk.msra.mxu1 %vm15690_vm3, %v13920_v58 }
 0x217   :  { %13928 = vmatprep.subr.msk.bf16.mxu1 %vm15690_vm3, %v13926_v56 }
 0x21e   :  { %13931 = vmatpush3.bf16.xpose.msk.msra.mxu1 %vm15690_vm3, %v13926_v56 }
 0x21f   :  { %12456 = vmatprep.subr.bf16.mxu1 %v14640_v21 }
 0x225   :  { %12357 = vmatmul.mubr.msk.f32.vlgmr.msra.gmra.mrb[32].mxu1 %vm624_vm2, %v15632_v25 }
 0x226   :  { %12359 = vmatprep.mubr.msk.f32.mxu1 %vm624_vm2, %v15623_v14  ;;  %12457 = vmatpush3.bf16.msra.mxu1 %v14640_v21 }
 0x227   :  { %12458 = vmatprep.subr.bf16.mxu1 %v14641_v0 }
 0x229   :  { %12360 = vmatmul.mubr.msk.f32.gmra.mrb[34].mxu1 %vm624_vm2, %v15627_v20 }
 0x22a   :  { %12362 = vmatprep.mubr.msk.f32.mxu1 %vm624_vm2, %v15641_v35  ;;  %12459 = vmatpush3.bf16.msra.mxu1 %v14641_v0 }
 0x22d   :  { %12363 = vmatmul.mubr.msk.f32.gmra.mrb[36].mxu1 %vm624_vm2, %v15649_v55 }
 0x22e   :  { %12365 = vmatprep.mubr.msk.f32.mxu1 %vm624_vm2, %v15638_v32 }
 0x231   :  { %12366 = vmatmul.mubr.msk.f32.gmra.mrb[38].mxu1 %vm624_vm2, %v15644_v44 }
 0x232   :  { %12368 = vmatprep.mubr.msk.f32.mxu1 %vm624_vm2, %v15657_v16 }
 0x235   :  { %12369 = vmatmul.mubr.msk.f32.gmra.mrb[40].mxu1 %vm624_vm2, %v15665_v26 }
 0x236   :  { %12371 = vmatprep.mubr.msk.f32.mxu1 %vm624_vm2, %v15654_v11 }
 0x239   :  { %12372 = vmatmul.mubr.msk.f32.gmra.mrb[42].mxu1 %vm624_vm2, %v15660_v19 }
 0x23a   :  { %12374 = vmatprep.mubr.msk.f32.mxu1 %vm624_vm2, %v15673_v45 }
 0x23d   :  { %12375 = vmatmul.mubr.msk.f32.gmra.mrb[44].mxu1 %vm624_vm2, %v15681_v2 }
 0x23e   :  { %12377 = vmatprep.mubr.msk.f32.mxu1 %vm624_vm2, %v15670_v34 }
 0x241   :  { %12378 = vmatmul.mubr.msk.f32.gmra.mrb[46].mxu1 %vm624_vm2, %v15676_v54 }
 0x242   :  { %12460 = vmatprep.mubr.msk.bf16.mxu1 %vm258_vm1, %v15507_v41 }
 0x245   :  { %12461 = vmatmul.mubr.msk.bf16.vlgmr.msra.gmra.mrb[48].mxu1 %vm258_vm1, %v15511_v42 }
 0x246   :  { %12464 = vmatprep.mubr.msk.bf16.mxu1 %vm258_vm1, %v15534_v52 }
 0x24d   :  { %12465 = vmatmul.mubr.msk.bf16.gmra.mrb[52].mxu1 %vm258_vm1, %v15538_v53 }
 0x24e   :  { %12468 = vmatprep.mubr.msk.bf16.mxu1 %vm258_vm1, %v15558_v62 }
 0x255   :  { %12469 = vmatmul.mubr.msk.bf16.gmra.mrb[56].mxu1 %vm258_vm1, %v15562_v63 }
 0x256   :  { %12472 = vmatprep.mubr.msk.bf16.mxu1 %vm258_vm1, %v15582_v8 }
 0x25d   :  { %12473 = vmatmul.mubr.msk.bf16.gmra.mrb[60].mxu1 %vm258_vm1, %v15586_v9 }
 0x2f8   :  { %v15778_v14 = vpop.f32.mrb[32].mxu1 }
 0x2f9   :  { %v15780_v20 = vpop.f32.mrb[33].mxu1 }
 0x2fa   :  { %866 = vmax.xlane.f32.xlu0 %v15780_v20 }
 0x2fc   :  { %v15783_v25 = vpop.f32.mrb[34].mxu1 }
 0x2fd   :  { %v15785_v32 = vpop.f32.mrb[35].mxu1 }
 0x2fe   :  { %868 = vmax.xlane.f32.xlu0 %v15778_v14  ;;  %870 = vmax.xlane.f32.xlu1 %v15785_v32 }
 0x300   :  { %v15789_v35 = vpop.f32.mrb[36].mxu1 }
 0x301   :  { %v15791_v44 = vpop.f32.mrb[37].mxu1 }
 0x302   :  { %872 = vmax.xlane.f32.xlu1 %v15783_v25  ;;  %874 = vmax.xlane.f32.xlu0 %v15791_v44 }
 0x304   :  { %v15795_v55 = vpop.f32.mrb[38].mxu1 }
 0x305   :  { %v15797_v11 = vpop.f32.mrb[39].mxu1 }
 0x306   :  { %876 = vmax.xlane.f32.xlu1 %v15789_v35  ;;  %878 = vmax.xlane.f32.xlu0 %v15797_v11 }
 0x308   :  { %v15801_v16 = vpop.f32.mrb[40].mxu1 }
 0x309   :  { %v15803_v19 = vpop.f32.mrb[41].mxu1 }
 0x30a   :  { %880 = vmax.xlane.f32.xlu1 %v15795_v55  ;;  %882 = vmax.xlane.f32.xlu0 %v15803_v19 }
 0x30c   :  { %v15807_v26 = vpop.f32.mrb[42].mxu1 }
 0x30d   :  { %v15809_v34 = vpop.f32.mrb[43].mxu1 }
 0x30e   :  { %884 = vmax.xlane.f32.xlu1 %v15801_v16  ;;  %886 = vmax.xlane.f32.xlu0 %v15809_v34 }
 0x310   :  { %v15813_v45 = vpop.f32.mrb[44].mxu1 }
 0x311   :  { %v15815_v54 = vpop.f32.mrb[45].mxu1 }
 0x312   :  { %888 = vmax.xlane.f32.xlu1 %v15807_v26  ;;  %890 = vmax.xlane.f32.xlu0 %v15815_v54 }
 0x314   :  { %v15819_v2 = vpop.f32.mrb[46].mxu1 }
 0x315   :  { %v15821_v1 = vpop.f32.mrb[47].mxu1 }
 0x316   :  { %892 = vmax.xlane.f32.xlu1 %v15813_v45  ;;  %894 = vmax.xlane.f32.xlu0 %v15821_v1 }
 0x318   :  { %v12462_v4 = vpop.f32.mrb[48].mxu1 }
 0x319   :  { %v1345_v15 = vpop.f32.mrb[49].mxu1  ;;  %v1354_v18 = vadd.f32 %v12462_v4, %v10663_v12 }
 0x31a   :  { %896 = vmax.xlane.f32.xlu1 %v15819_v2  ;;  %v12463_v17 = vpop.f32.mrb[50].mxu1  ;;  %v1346_v24 = vadd.f32 %v10663_v12, %v1345_v15 }
 0x31b   :  { %v1357_v22 = vadd.f32 %v12463_v17, %v10663_v12  ;;  %v1348_v23 = vpop.f32.mrb[51].mxu1 }
 0x31c   :  { %v1349_v10 = vadd.f32 %v10663_v12, %v1348_v23 }
 0x31d   :  { %v13970_v27 = vpack.c.bf16 %v1357_v22, %v1354_v18 }
 0x31e   :  { %v13964_v28 = vpack.c.bf16 %v1349_v10, %v1346_v24 }
 0x320   :  { %v12466_v30 = vpop.f32.mrb[52].mxu1  ;;  %13966 = vmatprep.subr.msk.bf16.mxu1 %vm15690_vm3, %v13964_v28 }
 0x321   :  { %v1361_v29 = vpop.f32.mrb[53].mxu1  ;;  %13969 = vmatpush3.bf16.xpose.msk.msra.mxu1 %vm15690_vm3, %v13964_v28  ;;  %v1370_v31 = vadd.f32 %v12466_v30, %v10663_v12 }
 0x322   :  { %v12467_v33 = vpop.f32.mrb[54].mxu1  ;;  %13972 = vmatprep.subr.msk.bf16.mxu1 %vm15690_vm3, %v13970_v27  ;;  %v1362_v46 = vadd.f32 %v10663_v12, %v1361_v29 }
 0x323   :  { %v1373_v37 = vadd.f32 %v12467_v33, %v10663_v12  ;;  %v1364_v43 = vpop.f32.mrb[55].mxu1 }
 0x324   :  { %v1365_v48 = vadd.f32 %v10663_v12, %v1364_v43 }
 0x325   :  { %v13982_v56 = vpack.c.bf16 %v1373_v37, %v1370_v31 }
 0x326   :  { %v13976_v58 = vpack.c.bf16 %v1365_v48, %v1362_v46 }
 0x328   :  { %v12470_v21 = vpop.f32.mrb[56].mxu1 }
 0x329   :  { %v1377_v0 = vpop.f32.mrb[57].mxu1  ;;  %13975 = vmatpush3.bf16.xpose.msk.msra.mxu1 %vm15690_vm3, %v13970_v27  ;;  %v1386_v15 = vadd.f32 %v12470_v21, %v10663_v12 }
 0x32a   :  { %v12471_v4 = vpop.f32.mrb[58].mxu1  ;;  %13978 = vmatprep.subr.msk.bf16.mxu1 %vm15690_vm3, %v13976_v58  ;;  %v1378_v22 = vadd.f32 %v10663_v12, %v1377_v0 }
 0x32b   :  { %v1389_v17 = vadd.f32 %v12471_v4, %v10663_v12  ;;  %v1380_v18 = vpop.f32.mrb[59].mxu1 }
 0x32c   :  { %v1381_v23 = vadd.f32 %v10663_v12, %v1380_v18 }
 0x32d   :  { %v13994_v24 = vpack.c.bf16 %v1389_v17, %v1386_v15 }
 0x32e   :  { %v13988_v10 = vpack.c.bf16 %v1381_v23, %v1378_v22 }
 0x330   :  { %v12474_v28 = vpop.f32.mrb[60].mxu1 }
 0x331   :  { %v1393_v30 = vpop.f32.mrb[61].mxu1  ;;  %13981 = vmatpush3.bf16.xpose.msk.msra.mxu1 %vm15690_vm3, %v13976_v58  ;;  %v1402_v27 = vadd.f32 %v12474_v28, %v10663_v12 }
 0x332   :  { %v12475_v29 = vpop.f32.mrb[62].mxu1  ;;  %13984 = vmatprep.subr.msk.bf16.mxu1 %vm15690_vm3, %v13982_v56  ;;  %v1394_v37 = vadd.f32 %v10663_v12, %v1393_v30 }
 0x333   :  { %v1405_v33 = vadd.f32 %v12475_v29, %v10663_v12  ;;  %v1396_v31 = vpop.f32.mrb[63].mxu1 }
 0x334   :  { %v1397_v43 = vadd.f32 %v10663_v12, %v1396_v31 }
 0x335   :  { %v14006_v46 = vpack.c.bf16 %v1405_v33, %v1402_v27 }
 0x336   :  { %v14000_v48 = vpack.c.bf16 %v1397_v43, %v1394_v37 }
 0x339   :  { %13987 = vmatpush3.bf16.xpose.msk.msra.mxu1 %vm15690_vm3, %v13982_v56 }
 0x33a   :  { %13990 = vmatprep.subr.msk.bf16.mxu1 %vm15690_vm3, %v13988_v10 }
 0x341   :  { %13993 = vmatpush3.bf16.xpose.msk.msra.mxu1 %vm15690_vm3, %v13988_v10 }
 0x342   :  { %13996 = vmatprep.subr.msk.bf16.mxu1 %vm15690_vm3, %v13994_v24 }
 0x349   :  { %13999 = vmatpush3.bf16.xpose.msk.msra.mxu1 %vm15690_vm3, %v13994_v24 }
 0x34a   :  { %14002 = vmatprep.subr.msk.bf16.mxu1 %vm15690_vm3, %v14000_v48 }
 0x351   :  { %14005 = vmatpush3.bf16.xpose.msk.msra.mxu1 %vm15690_vm3, %v14000_v48 }
 0x352   :  { %14008 = vmatprep.subr.msk.bf16.mxu1 %vm15690_vm3, %v14006_v46 }
 0x359   :  { %14011 = vmatpush3.bf16.xpose.msk.msra.mxu1 %vm15690_vm3, %v14006_v46 }
 0x387   :  { %v867_v12 = vpop.xlane.xlu0 %866 }
 0x388   :  { %v898_v56 = vsub.f32 %v15780_v20, %v867_v12 }
 0x38a   :  { %v914_v58 = vmul.f32 1.442695, %v898_v56 }
 0x38b   :  { %v869_v21 = vpop.xlane.xlu0 %868  ;;  %v871_v0 = vpop.xlane.xlu1 %870 }
 0x38c   :  { %14692 = vpow2.f32 %v914_v58  ;;  %v899_v4 = vsub.f32 %v15778_v14, %v869_v21  ;;  %v900_v15 = vsub.f32 %v15785_v32, %v871_v0 }
 0x38e   :  { %v916_v17 = vmul.f32 1.442695, %v899_v4  ;;  %v918_v18 = vmul.f32 1.442695, %v900_v15 }
 0x38f   :  { %v873_v22 = vpop.xlane.xlu1 %872  ;;  %v875_v23 = vpop.xlane.xlu0 %874 }
 0x390   :  { %14694 = vpow2.f32 %v916_v17  ;;  %v901_v24 = vsub.f32 %v15783_v25, %v873_v22  ;;  %v902_v10 = vsub.f32 %v15791_v44, %v875_v23 }
 0x391   :  { %14696 = vpow2.f32 %v918_v18 }
 0x392   :  { %v920_v28 = vmul.f32 1.442695, %v901_v24  ;;  %v922_v20 = vmul.f32 1.442695, %v902_v10 }
 0x393   :  { %v877_v30 = vpop.xlane.xlu1 %876  ;;  %v879_v29 = vpop.xlane.xlu0 %878 }
 0x394   :  { %14698 = vpow2.f32 %v920_v28  ;;  %v903_v27 = vsub.f32 %v15789_v35, %v877_v30  ;;  %v904_v14 = vsub.f32 %v15797_v11, %v879_v29 }
 0x395   :  { %14700 = vpow2.f32 %v922_v20 }
 0x396   :  { %v15868_v32 = vpop.eup %14692  ;;  %v924_v33 = vmul.f32 1.442695, %v903_v27  ;;  %v926_v31 = vmul.f32 1.442695, %v904_v14 }
 0x397   :  { %v881_v37 = vpop.xlane.xlu1 %880  ;;  %v883_v43 = vpop.xlane.xlu0 %882  ;;  %946 = vadd.xlane.f32.xlu0 %v15868_v32 }
 0x398   :  { %14702 = vpow2.f32 %v924_v33  ;;  %v905_v25 = vsub.f32 %v15795_v55, %v881_v37  ;;  %v906_v44 = vsub.f32 %v15803_v19, %v883_v43 }
 0x399   :  { %14704 = vpow2.f32 %v926_v31 }
 0x39a   :  { %v15873_v46 = vpop.eup %14694  ;;  %v928_v35 = vmul.f32 1.442695, %v905_v25  ;;  %v930_v48 = vmul.f32 1.442695, %v906_v44 }
 0x39b   :  { %v15875_v11 = vpop.eup %14696  ;;  %v885_v12 = vpop.xlane.xlu1 %884  ;;  %948 = vadd.xlane.f32.xlu1 %v15873_v46 }
 0x39c   :  { %v887_v56 = vpop.xlane.xlu0 %886  ;;  %14706 = vpow2.f32 %v928_v35  ;;  %v907_v58 = vsub.f32 %v15801_v16, %v885_v12  ;;  %950 = vadd.xlane.f32.xlu0 %v15875_v11  ;;  %v14642_v35 = vld [vmem:[%s19418_s3 + $0x10] sm:$0xff]  }
 0x39d   :  { %v908_v21 = vsub.f32 %v15809_v34, %v887_v56  ;;  %14708 = vpow2.f32 %v930_v48  ;;  %12436 = vmatprep.subr.bf16.mxu0 %v14642_v35 }
 0x39e   :  { %v15881_v55 = vpop.eup %14698  ;;  %v932_v19 = vmul.f32 1.442695, %v907_v58 }
 0x39f   :  { %v934_v0 = vmul.f32 1.442695, %v908_v21  ;;  %v15883_v4 = vpop.eup %14700  ;;  %v889_v15 = vpop.xlane.xlu1 %888  ;;  %952 = vadd.xlane.f32.xlu1 %v15881_v55 }
 0x3a0   :  { %v891_v17 = vpop.xlane.xlu0 %890  ;;  %14710 = vpow2.f32 %v932_v19  ;;  %v909_v18 = vsub.f32 %v15807_v26, %v889_v15  ;;  %954 = vadd.xlane.f32.xlu0 %v15883_v4 }
 0x3a1   :  { %v910_v16 = vsub.f32 %v15815_v54, %v891_v17  ;;  %14712 = vpow2.f32 %v934_v0 }
 0x3a2   :  { %v15889_v34 = vpop.eup %14702  ;;  %v936_v22 = vmul.f32 1.442695, %v909_v18 }
 0x3a3   :  { %v938_v23 = vmul.f32 1.442695, %v910_v16  ;;  %v15891_v24 = vpop.eup %14704  ;;  %v893_v10 = vpop.xlane.xlu1 %892  ;;  %956 = vadd.xlane.f32.xlu1 %v15889_v34 }
 0x3a4   :  { %v895_v28 = vpop.xlane.xlu0 %894  ;;  %14714 = vpow2.f32 %v936_v22  ;;  %v911_v20 = vsub.f32 %v15813_v45, %v893_v10  ;;  %958 = vadd.xlane.f32.xlu0 %v15891_v24  ;;  %v14643_v10 = vld [vmem:[%s19418_s3 + $0x18] sm:$0xff]  }
 0x3a5   :  { %v912_v26 = vsub.f32 %v15821_v1, %v895_v28  ;;  %14716 = vpow2.f32 %v938_v23 }
 0x3a6   :  { %v15897_v54 = vpop.eup %14706  ;;  %v940_v30 = vmul.f32 1.442695, %v911_v20 }
 0x3a7   :  { %v942_v29 = vmul.f32 1.442695, %v912_v26  ;;  %v15899_v27 = vpop.eup %14708  ;;  %960 = vadd.xlane.f32.xlu1 %v15897_v54  ;;  %v897_v14 = vpop.xlane.xlu1 %896 }
 0x3a8   :  { %14718 = vpow2.f32 %v940_v30  ;;  %v913_v33 = vsub.f32 %v15819_v2, %v897_v14  ;;  %962 = vadd.xlane.f32.xlu0 %v15899_v27 }
 0x3a9   :  { %14720 = vpow2.f32 %v942_v29 }
 0x3aa   :  { %v15904_v45 = vpop.eup %14710  ;;  %v944_v31 = vmul.f32 1.442695, %v913_v33 }
 0x3ab   :  { %v15906_v1 = vpop.eup %14712  ;;  %964 = vadd.xlane.f32.xlu1 %v15904_v45 }
 0x3ac   :  { %14722 = vpow2.f32 %v944_v31  ;;  %966 = vadd.xlane.f32.xlu0 %v15906_v1 }
 0x3ae   :  { %v15910_v37 = vpop.eup %14714 }
 0x3af   :  { %v15912_v43 = vpop.eup %14716  ;;  %968 = vadd.xlane.f32.xlu1 %v15910_v37 }
 0x3b0   :  { %970 = vadd.xlane.f32.xlu0 %v15912_v43 }
 0x3b2   :  { %v15916_v2 = vpop.eup %14718 }
 0x3b3   :  { %v15918_v25 = vpop.eup %14720  ;;  %972 = vadd.xlane.f32.xlu1 %v15916_v2 }
 0x3b4   :  { %974 = vadd.xlane.f32.xlu0 %v15918_v25 }
 0x3b6   :  { %v15922_v44 = vpop.eup %14722 }
 0x3b7   :  { %976 = vadd.xlane.f32.xlu1 %v15922_v44 }
 0x424   :  { %v947_v48 = vpop.xlane.xlu0 %946 }
 0x425   :  { %14724 = vrcp.f32 %v947_v48 }
 0x428   :  { %v949_v12 = vpop.xlane.xlu1 %948 }
 0x429   :  { %14726 = vrcp.f32 %v949_v12  ;;  %v951_v56 = vpop.xlane.xlu0 %950 }
 0x42a   :  { %14728 = vrcp.f32 %v951_v56 }
 0x42c   :  { %v953_v58 = vpop.xlane.xlu1 %952 }
 0x42d   :  { %14730 = vrcp.f32 %v953_v58  ;;  %v955_v21 = vpop.xlane.xlu0 %954 }
 0x42e   :  { %14732 = vrcp.f32 %v955_v21 }
 0x42f   :  { %v14725_v19 = vpop.eup %14724 }
 0x430   :  { %v957_v0 = vpop.xlane.xlu1 %956  ;;  %v994_v15 = vmul.f32 %v14725_v19, %v15868_v32 }
 0x431   :  { %14734 = vrcp.f32 %v957_v0  ;;  %v959_v17 = vpop.xlane.xlu0 %958 }
 0x432   :  { %14736 = vrcp.f32 %v959_v17  ;;  %12412 = vmatprep.mubr.f32.mxu0 %v994_v15 }
 0x433   :  { %v14727_v18 = vpop.eup %14726 }
 0x434   :  { %v14729_v16 = vpop.eup %14728  ;;  %v961_v22 = vpop.xlane.xlu1 %960  ;;  %v995_v23 = vmul.f32 %v14727_v18, %v15873_v46  ;;  %v14644_v46 = vld [vmem:[%s19418_s3 + $0x90] sm:$0xff]  }
 0x435   :  { %14738 = vrcp.f32 %v961_v22  ;;  %v963_v28 = vpop.xlane.xlu0 %962  ;;  %v996_v20 = vmul.f32 %v14729_v16, %v15875_v11 }
 0x436   :  { %14740 = vrcp.f32 %v963_v28  ;;  %12413 = vmatmul.mubr.f32.vlgmr.msra.gmra.mrb[32].mxu0 %v995_v23 }
 0x437   :  { %v14731_v32 = vpop.eup %14730  ;;  %12415 = vmatprep.mubr.f32.mxu0 %v996_v20  ;;  %12437 = vmatpush3.bf16.msra.mxu0 %v14642_v35 }
 0x438   :  { %v14733_v26 = vpop.eup %14732  ;;  %v965_v30 = vpop.xlane.xlu1 %964  ;;  %v997_v29 = vmul.f32 %v14731_v32, %v15881_v55  ;;  %12438 = vmatprep.subr.bf16.mxu0 %v14643_v10 }
 0x439   :  { %14742 = vrcp.f32 %v965_v30  ;;  %v967_v14 = vpop.xlane.xlu0 %966  ;;  %v998_v33 = vmul.f32 %v14733_v26, %v15883_v4 }
 0x43a   :  { %14744 = vrcp.f32 %v967_v14  ;;  %12416 = vmatmul.mubr.f32.gmra.mrb[34].mxu0 %v997_v29 }
 0x43b   :  { %v14735_v11 = vpop.eup %14734  ;;  %12418 = vmatprep.mubr.f32.mxu0 %v998_v33  ;;  %12439 = vmatpush3.bf16.msra.mxu0 %v14643_v10 }
 0x43c   :  { %v14737_v31 = vpop.eup %14736  ;;  %v969_v35 = vpop.xlane.xlu1 %968  ;;  %v999_v48 = vmul.f32 %v14735_v11, %v15889_v34  ;;  %12476 = vmatprep.subr.bf16.mxu0 %v14644_v46 }
 0x43d   :  { %14746 = vrcp.f32 %v969_v35  ;;  %v971_v55 = vpop.xlane.xlu0 %970  ;;  %v1000_v12 = vmul.f32 %v14737_v31, %v15891_v24 }
 0x43e   :  { %14748 = vrcp.f32 %v971_v55  ;;  %12419 = vmatmul.mubr.f32.gmra.mrb[36].mxu0 %v999_v48 }
 0x43f   :  { %v14739_v56 = vpop.eup %14738  ;;  %12421 = vmatprep.mubr.f32.mxu0 %v1000_v12 }
 0x440   :  { %v14741_v58 = vpop.eup %14740  ;;  %v973_v4 = vpop.xlane.xlu1 %972  ;;  %v1001_v21 = vmul.f32 %v14739_v56, %v15897_v54 }
 0x441   :  { %14750 = vrcp.f32 %v973_v4  ;;  %v975_v19 = vpop.xlane.xlu0 %974  ;;  %v1002_v0 = vmul.f32 %v14741_v58, %v15899_v27 }
 0x442   :  { %14752 = vrcp.f32 %v975_v19  ;;  %12422 = vmatmul.mubr.f32.gmra.mrb[38].mxu0 %v1001_v21  ;;  %v10744_v19 = vld [vmem:[%s19419_s4 + $0x2] ss:$0 sm:$0xff] }
 0x443   :  { %v14743_v34 = vpop.eup %14742  ;;  %12424 = vmatprep.mubr.f32.mxu0 %v1002_v0 }
 0x444   :  { %v14745_v15 = vpop.eup %14744  ;;  %v977_v17 = vpop.xlane.xlu1 %976  ;;  %v1003_v24 = vmul.f32 %v14743_v34, %v15904_v45 }
 0x445   :  { %14754 = vrcp.f32 %v977_v17  ;;  %v1004_v18 = vmul.f32 %v14745_v15, %v15906_v1  ;;  %v10647_v17 = vld [vmem:[%s19419_s4 + $0x1] ss:$0 sm:$0xff] }
 0x446   :  { %12425 = vmatmul.mubr.f32.gmra.mrb[40].mxu0 %v1003_v24 }
 0x447   :  { %v14747_v16 = vpop.eup %14746  ;;  %12427 = vmatprep.mubr.f32.mxu0 %v1004_v18 }
 0x448   :  { %v14749_v22 = vpop.eup %14748  ;;  %v1005_v54 = vmul.f32 %v14747_v16, %v15910_v37  ;;  %v14645_v37 = vld [vmem:[%s19418_s3 + $0x98] sm:$0xff]  }
 0x449   :  { %v1006_v23 = vmul.f32 %v14749_v22, %v15912_v43  ;;  %v14646_v43 = vld [vmem:[%s19418_s3 + $0x20] sm:$0xff]  }
 0x44a   :  { %12428 = vmatmul.mubr.f32.gmra.mrb[42].mxu0 %v1005_v54  ;;  %12644 = vmatprep.subr.bf16.mxu1 %v14646_v43 }
 0x44b   :  { %v14751_v27 = vpop.eup %14750  ;;  %12430 = vmatprep.mubr.f32.mxu0 %v1006_v23 }
 0x44c   :  { %v14753_v10 = vpop.eup %14752  ;;  %v1007_v28 = vmul.f32 %v14751_v27, %v15916_v2  ;;  %v14647_v27 = vld [vmem:[%s19418_s3 + $0x28] sm:$0xff]  }
 0x44d   :  { %v1008_v20 = vmul.f32 %v14753_v10, %v15918_v25 }
 0x44e   :  { %12431 = vmatmul.mubr.f32.gmra.mrb[44].mxu0 %v1007_v28 }
 0x44f   :  { %v14755_v45 = vpop.eup %14754  ;;  %12433 = vmatprep.mubr.f32.mxu0 %v1008_v20 }
 0x450   :  { %v1009_v1 = vmul.f32 %v14755_v45, %v15922_v44  ;;  %v14648_v45 = vld [vmem:[%s19418_s3 + $0x60] sm:$0xff]  }
 0x452   :  { %12434 = vmatmul.mubr.f32.gmra.mrb[46].mxu0 %v1009_v1 }
 0x453   :  { %12440 = vmatprep.mubr.msk.bf16.mxu0 %vm258_vm1, %v15507_v41 }
 0x456   :  { %12441 = vmatmul.mubr.msk.bf16.vlgmr.msra.gmra.mrb[48].mxu0 %vm258_vm1, %v15511_v42 }
 0x457   :  { %12444 = vmatprep.mubr.msk.bf16.mxu0 %vm258_vm1, %v15534_v52  ;;  %12477 = vmatpush3.bf16.msra.mxu0 %v14644_v46 }
 0x458   :  { %12478 = vmatprep.subr.bf16.mxu0 %v14645_v37 }
 0x45b   :  { %12479 = vmatpush3.bf16.msra.mxu0 %v14645_v37 }
 0x45e   :  { %12445 = vmatmul.mubr.msk.bf16.gmra.mrb[52].mxu0 %vm258_vm1, %v15538_v53 }
 0x45f   :  { %12448 = vmatprep.mubr.msk.bf16.mxu0 %vm258_vm1, %v15558_v62 }
 0x466   :  { %12449 = vmatmul.mubr.msk.bf16.gmra.mrb[56].mxu0 %vm258_vm1, %v15562_v63 }
 0x467   :  { %12452 = vmatprep.mubr.msk.bf16.mxu0 %vm258_vm1, %v15582_v8 }
 0x46e   :  { %12453 = vmatmul.mubr.msk.bf16.gmra.mrb[60].mxu0 %vm258_vm1, %v15586_v9 }
 0x46f   :  { %12480 = vmatprep.mubr.msk.bf16.mxu0 %vm258_vm1, %v15507_v41 }
 0x476   :  { %12481 = vmatmul.mubr.msk.bf16.vlgmr.msra.gmra.mrb[64].mxu0 %vm258_vm1, %v15511_v42 }
 0x477   :  { %12484 = vmatprep.mubr.msk.bf16.mxu0 %vm258_vm1, %v15534_v52 }
 0x47e   :  { %12485 = vmatmul.mubr.msk.bf16.gmra.mrb[68].mxu0 %vm258_vm1, %v15538_v53 }
 0x47f   :  { %12488 = vmatprep.mubr.msk.bf16.mxu0 %vm258_vm1, %v15558_v62 }
 0x486   :  { %12489 = vmatmul.mubr.msk.bf16.gmra.mrb[72].mxu0 %vm258_vm1, %v15562_v63 }
 0x487   :  { %12492 = vmatprep.mubr.msk.bf16.mxu0 %vm258_vm1, %v15582_v8 }
 0x48e   :  { %12493 = vmatmul.mubr.msk.bf16.gmra.mrb[76].mxu0 %vm258_vm1, %v15586_v9 }
 0x509   :  { %v15988_v2 = vpop.f32.mrb[32].mxu0 }
 0x50a   :  { %v15990_v25 = vpop.f32.mrb[33].mxu0 }
 0x50d   :  { %v15994_v32 = vpop.f32.mrb[34].mxu0 }
 0x50e   :  { %v15996_v26 = vpop.f32.mrb[35].mxu0 }
 0x50f   :  { %19502 = vst [vmem:[#allocation21_spill] sm:$0xff] %v15996_v26 }
 0x511   :  { %v16000_v29 = vpop.f32.mrb[36].mxu0 }
 0x512   :  { %19503 = vst [vmem:[#allocation22_spill] sm:$0xff] %v16000_v29  ;;  %v16002_v46 = vpop.f32.mrb[37].mxu0 }
 0x513   :  { %19504 = vst [vmem:[#allocation23_spill] sm:$0xff] %v16002_v46 }
 0x515   :  { %v16006_v33 = vpop.f32.mrb[38].mxu0 }
 0x516   :  { %19505 = vst [vmem:[#allocation24_spill] sm:$0xff] %v16006_v33  ;;  %v16008_v11 = vpop.f32.mrb[39].mxu0 }
 0x517   :  { %19506 = vst [vmem:[#allocation25_spill] sm:$0xff] %v16008_v11 }
 0x519   :  { %v16012_v35 = vpop.f32.mrb[40].mxu0 }
 0x51a   :  { %19507 = vst [vmem:[#allocation26_spill] sm:$0xff] %v16012_v35  ;;  %v16014_v48 = vpop.f32.mrb[41].mxu0 }
 0x51b   :  { %19508 = vst [vmem:[#allocation27_spill] sm:$0xff] %v16014_v48 }
 0x51d   :  { %v16018_v12 = vpop.f32.mrb[42].mxu0 }
 0x51e   :  { %19509 = vst [vmem:[#allocation28_spill] sm:$0xff] %v16018_v12  ;;  %v16020_v56 = vpop.f32.mrb[43].mxu0 }
 0x51f   :  { %19510 = vst [vmem:[#allocation29_spill] sm:$0xff] %v16020_v56 }
 0x521   :  { %v16024_v4 = vpop.f32.mrb[44].mxu0 }
 0x522   :  { %19511 = vst [vmem:[#allocation30_spill] sm:$0xff] %v16024_v4  ;;  %v16026_v21 = vpop.f32.mrb[45].mxu0 }
 0x523   :  { %19512 = vst [vmem:[#allocation31_spill] sm:$0xff] %v16026_v21 }
 0x525   :  { %v16030_v0 = vpop.f32.mrb[46].mxu0 }
 0x526   :  { %19513 = vst [vmem:[#allocation32_spill] sm:$0xff] %v16030_v0  ;;  %v16032_v34 = vpop.f32.mrb[47].mxu0 }
 0x527   :  { %19514 = vst [vmem:[#allocation33_spill] sm:$0xff] %v16032_v34 }
 0x529   :  { %v12442_v24 = vpop.f32.mrb[48].mxu0 }
 0x52a   :  { %v1223_v18 = vpop.f32.mrb[49].mxu0  ;;  %v1232_v10 = vadd.f32 %v12442_v24, %v10647_v17 }
 0x52b   :  { %v1224_v16 = vadd.f32 %v10647_v17, %v1223_v18  ;;  %v12443_v22 = vpop.f32.mrb[50].mxu0 }
 0x52c   :  { %v1226_v54 = vpop.f32.mrb[51].mxu0  ;;  %v1235_v28 = vadd.f32 %v12443_v22, %v10647_v17 }
 0x52d   :  { %v1227_v23 = vadd.f32 %v10647_v17, %v1226_v54  ;;  %12528 = vmatprep.mubr.msk.f32.mxu1 %vm624_vm2, %v1224_v16 }
 0x52f   :  { %12529 = vmatmul.mubr.msk.f32.vlgmr.msra.gmra.mrb[64].mxu1 %vm624_vm2, %v1227_v23 }
 0x530   :  { %12531 = vmatprep.mubr.msk.f32.mxu1 %vm624_vm2, %v1232_v10  ;;  %12645 = vmatpush3.bf16.msra.mxu1 %v14646_v43 }
 0x531   :  { %v12446_v20 = vpop.f32.mrb[52].mxu0  ;;  %12646 = vmatprep.subr.bf16.mxu1 %v14647_v27 }
 0x532   :  { %v1239_v1 = vpop.f32.mrb[53].mxu0  ;;  %v1248_v54 = vadd.f32 %v12446_v20, %v10647_v17 }
 0x533   :  { %v1240_v37 = vadd.f32 %v10647_v17, %v1239_v1  ;;  %v12447_v18 = vpop.f32.mrb[54].mxu0  ;;  %12532 = vmatmul.mubr.msk.f32.gmra.mrb[66].mxu1 %vm624_vm2, %v1235_v28 }
 0x534   :  { %v1242_v16 = vpop.f32.mrb[55].mxu0  ;;  %12647 = vmatpush3.bf16.msra.mxu1 %v14647_v27  ;;  %v1251_v43 = vadd.f32 %v12447_v18, %v10647_v17 }
 0x535   :  { %v1243_v24 = vadd.f32 %v10647_v17, %v1242_v16  ;;  %12534 = vmatprep.mubr.msk.f32.mxu1 %vm624_vm2, %v1240_v37  ;;  %12664 = vmatprep.subr.bf16.mxu1 %v14648_v45 }
 0x537   :  { %12535 = vmatmul.mubr.msk.f32.gmra.mrb[68].mxu1 %vm624_vm2, %v1243_v24 }
 0x538   :  { %12537 = vmatprep.mubr.msk.f32.mxu1 %vm624_vm2, %v1248_v54 }
 0x539   :  { %v12450_v22 = vpop.f32.mrb[56].mxu0 }
 0x53a   :  { %v1255_v23 = vpop.f32.mrb[57].mxu0  ;;  %v1264_v27 = vadd.f32 %v12450_v22, %v10647_v17 }
 0x53b   :  { %v1256_v10 = vadd.f32 %v10647_v17, %v1255_v23  ;;  %v12451_v15 = vpop.f32.mrb[58].mxu0  ;;  %12538 = vmatmul.mubr.msk.f32.gmra.mrb[70].mxu1 %vm624_vm2, %v1251_v43 }
 0x53c   :  { %v1258_v1 = vpop.f32.mrb[59].mxu0  ;;  %v1267_v20 = vadd.f32 %v12451_v15, %v10647_v17  ;;  %v10679_v15 = vld [vmem:[%s19419_s4 + $0x9] ss:$0 sm:$0xff] }
 0x53d   :  { %v1259_v28 = vadd.f32 %v10647_v17, %v1258_v1  ;;  %12540 = vmatprep.mubr.msk.f32.mxu1 %vm624_vm2, %v1256_v10 }
 0x53f   :  { %12541 = vmatmul.mubr.msk.f32.gmra.mrb[72].mxu1 %vm624_vm2, %v1259_v28 }
 0x540   :  { %12543 = vmatprep.mubr.msk.f32.mxu1 %vm624_vm2, %v1264_v27 }
 0x541   :  { %v12454_v37 = vpop.f32.mrb[60].mxu0 }
 0x542   :  { %v1271_v16 = vpop.f32.mrb[61].mxu0  ;;  %v1280_v43 = vadd.f32 %v12454_v37, %v10647_v17 }
 0x543   :  { %v1272_v24 = vadd.f32 %v10647_v17, %v1271_v16  ;;  %v12455_v18 = vpop.f32.mrb[62].mxu0  ;;  %12544 = vmatmul.mubr.msk.f32.gmra.mrb[74].mxu1 %vm624_vm2, %v1267_v20 }
 0x544   :  { %v1274_v54 = vpop.f32.mrb[63].mxu0  ;;  %v1283_v22 = vadd.f32 %v12455_v18, %v10647_v17 }
 0x545   :  { %v1275_v23 = vadd.f32 %v10647_v17, %v1274_v54  ;;  %12546 = vmatprep.mubr.msk.f32.mxu1 %vm624_vm2, %v1272_v24  ;;  %v14649_v17 = vld [vmem:[%s19418_s3 + $0x68] sm:$0xff]  }
 0x547   :  { %12547 = vmatmul.mubr.msk.f32.gmra.mrb[76].mxu1 %vm624_vm2, %v1275_v23 }
 0x548   :  { %12549 = vmatprep.mubr.msk.f32.mxu1 %vm624_vm2, %v1280_v43 }
 0x549   :  { %v12482_v10 = vpop.f32.mrb[64].mxu0 }
 0x54a   :  { %v1467_v1 = vpop.f32.mrb[65].mxu0  ;;  %v1476_v27 = vadd.f32 %v12482_v10, %v10679_v15 }
 0x54b   :  { %v12483_v28 = vpop.f32.mrb[66].mxu0  ;;  %12550 = vmatmul.mubr.msk.f32.gmra.mrb[78].mxu1 %vm624_vm2, %v1283_v22  ;;  %v1468_v37 = vadd.f32 %v10679_v15, %v1467_v1 }
 0x54c   :  { %v1479_v20 = vadd.f32 %v12483_v28, %v10679_v15  ;;  %v1470_v16 = vpop.f32.mrb[67].mxu0  ;;  %12648 = vmatprep.mubr.msk.bf16.mxu1 %vm258_vm1, %v15507_v41 }
 0x54d   :  { %v1471_v24 = vadd.f32 %v10679_v15, %v1470_v16 }
 0x54e   :  { %v14016_v18 = vpack.c.bf16 %v1479_v20, %v1476_v27 }
 0x54f   :  { %12649 = vmatmul.mubr.msk.bf16.vlgmr.msra.gmra.mrb[80].mxu1 %vm258_vm1, %v15511_v42  ;;  %v14012_v54 = vpack.c.bf16 %v1471_v24, %v1468_v37 }
 0x550   :  { %12652 = vmatprep.mubr.msk.bf16.mxu1 %vm258_vm1, %v15534_v52  ;;  %12665 = vmatpush3.bf16.msra.mxu1 %v14648_v45 }
 0x551   :  { %v12486_v23 = vpop.f32.mrb[68].mxu0  ;;  %14013 = vmatprep.subr.bf16.mxu0 %v14012_v54  ;;  %12666 = vmatprep.subr.bf16.mxu1 %v14649_v17 }
 0x552   :  { %v1483_v43 = vpop.f32.mrb[69].mxu0  ;;  %14015 = vmatpush3.bf16.msra.mxu0 %v14012_v54  ;;  %v1492_v10 = vadd.f32 %v12486_v23, %v10679_v15 }
 0x553   :  { %v12487_v22 = vpop.f32.mrb[70].mxu0  ;;  %14017 = vmatprep.subr.bf16.mxu0 %v14016_v18  ;;  %v1484_v27 = vadd.f32 %v10679_v15, %v1483_v43 }
 0x554   :  { %v1495_v1 = vadd.f32 %v12487_v22, %v10679_v15  ;;  %v1486_v28 = vpop.f32.mrb[71].mxu0  ;;  %12667 = vmatpush3.bf16.msra.mxu1 %v14649_v17 }
 0x555   :  { %v1487_v20 = vadd.f32 %v10679_v15, %v1486_v28 }
 0x556   :  { %14019 = vmatpush3.bf16.msra.mxu0 %v14016_v18  ;;  %v14024_v16 = vpack.c.bf16 %v1495_v1, %v1492_v10 }
 0x557   :  { %12653 = vmatmul.mubr.msk.bf16.gmra.mrb[84].mxu1 %vm258_vm1, %v15538_v53  ;;  %v14020_v37 = vpack.c.bf16 %v1487_v20, %v1484_v27 }
 0x558   :  { %12656 = vmatprep.mubr.msk.bf16.mxu1 %vm258_vm1, %v15558_v62 }
 0x559   :  { %v12490_v45 = vpop.f32.mrb[72].mxu0  ;;  %14021 = vmatprep.subr.bf16.mxu0 %v14020_v37 }
 0x55a   :  { %v1499_v24 = vpop.f32.mrb[73].mxu0  ;;  %14023 = vmatpush3.bf16.msra.mxu0 %v14020_v37  ;;  %v1508_v23 = vadd.f32 %v12490_v45, %v10679_v15 }
 0x55b   :  { %v12491_v54 = vpop.f32.mrb[74].mxu0  ;;  %14025 = vmatprep.subr.bf16.mxu0 %v14024_v16  ;;  %v1500_v43 = vadd.f32 %v10679_v15, %v1499_v24 }
 0x55c   :  { %v1511_v22 = vadd.f32 %v12491_v54, %v10679_v15  ;;  %v1502_v17 = vpop.f32.mrb[75].mxu0 }
 0x55d   :  { %v1503_v28 = vadd.f32 %v10679_v15, %v1502_v17 }
 0x55e   :  { %14027 = vmatpush3.bf16.msra.mxu0 %v14024_v16  ;;  %v14032_v18 = vpack.c.bf16 %v1511_v22, %v1508_v23 }
 0x55f   :  { %12657 = vmatmul.mubr.msk.bf16.gmra.mrb[88].mxu1 %vm258_vm1, %v15562_v63  ;;  %v14028_v10 = vpack.c.bf16 %v1503_v28, %v1500_v43 }
 0x560   :  { %12660 = vmatprep.mubr.msk.bf16.mxu1 %vm258_vm1, %v15582_v8 }
 0x561   :  { %v12494_v1 = vpop.f32.mrb[76].mxu0  ;;  %14029 = vmatprep.subr.bf16.mxu0 %v14028_v10 }
 0x562   :  { %v1515_v27 = vpop.f32.mrb[77].mxu0  ;;  %14031 = vmatpush3.bf16.msra.mxu0 %v14028_v10  ;;  %v1524_v37 = vadd.f32 %v12494_v1, %v10679_v15 }
 0x563   :  { %v12495_v20 = vpop.f32.mrb[78].mxu0  ;;  %14033 = vmatprep.subr.bf16.mxu0 %v14032_v18  ;;  %v1516_v24 = vadd.f32 %v10679_v15, %v1515_v27 }
 0x564   :  { %v1527_v45 = vadd.f32 %v12495_v20, %v10679_v15  ;;  %v1518_v54 = vpop.f32.mrb[79].mxu0 }
 0x565   :  { %v1519_v17 = vadd.f32 %v10679_v15, %v1518_v54 }
 0x566   :  { %14035 = vmatpush3.bf16.msra.mxu0 %v14032_v18  ;;  %v14040_v16 = vpack.c.bf16 %v1527_v45, %v1524_v37 }
 0x567   :  { %12661 = vmatmul.mubr.msk.bf16.gmra.mrb[92].mxu1 %vm258_vm1, %v15586_v9  ;;  %v14036_v23 = vpack.c.bf16 %v1519_v17, %v1516_v24 }
 0x568   :  { %12668 = vmatprep.mubr.msk.bf16.mxu1 %vm258_vm1, %v15507_v41 }
 0x569   :  { %14037 = vmatprep.subr.bf16.mxu0 %v14036_v23 }
 0x56a   :  { %14039 = vmatpush3.bf16.msra.mxu0 %v14036_v23 }
 0x56b   :  { %14041 = vmatprep.subr.bf16.mxu0 %v14040_v16 }
 0x56e   :  { %14043 = vmatpush3.bf16.msra.mxu0 %v14040_v16 }
 0x56f   :  { %12669 = vmatmul.mubr.msk.bf16.vlgmr.msra.gmra.mrb[96].mxu1 %vm258_vm1, %v15511_v42 }
 0x570   :  { %12672 = vmatprep.mubr.msk.bf16.mxu1 %vm258_vm1, %v15534_v52 }
 0x577   :  { %12673 = vmatmul.mubr.msk.bf16.gmra.mrb[100].mxu1 %vm258_vm1, %v15538_v53 }
 0x578   :  { %12676 = vmatprep.mubr.msk.bf16.mxu1 %vm258_vm1, %v15558_v62 }
 0x57f   :  { %12677 = vmatmul.mubr.msk.bf16.gmra.mrb[104].mxu1 %vm258_vm1, %v15562_v63 }
 0x580   :  { %12680 = vmatprep.mubr.msk.bf16.mxu1 %vm258_vm1, %v15582_v8 }
 0x587   :  { %12681 = vmatmul.mubr.msk.bf16.gmra.mrb[108].mxu1 %vm258_vm1, %v15586_v9 }
 0x602   :  { %v16099_v15 = vpop.f32.mrb[64].mxu1 }
 0x603   :  { %1773 = vmax.xlane.f32.xlu1 %v16099_v15  ;;  %v16102_v22 = vpop.f32.mrb[65].mxu1 }
 0x604   :  { %1771 = vmax.xlane.f32.xlu0 %v16102_v22 }
 0x606   :  { %v16105_v43 = vpop.f32.mrb[66].mxu1 }
 0x607   :  { %1777 = vmax.xlane.f32.xlu1 %v16105_v43  ;;  %v16108_v28 = vpop.f32.mrb[67].mxu1 }
 0x608   :  { %1775 = vmax.xlane.f32.xlu0 %v16108_v28 }
 0x60a   :  { %v16111_v18 = vpop.f32.mrb[68].mxu1 }
 0x60b   :  { %1781 = vmax.xlane.f32.xlu1 %v16111_v18  ;;  %v16114_v10 = vpop.f32.mrb[69].mxu1 }
 0x60c   :  { %1779 = vmax.xlane.f32.xlu0 %v16114_v10 }
 0x60e   :  { %v16117_v1 = vpop.f32.mrb[70].mxu1 }
 0x60f   :  { %1785 = vmax.xlane.f32.xlu1 %v16117_v1  ;;  %v16120_v27 = vpop.f32.mrb[71].mxu1 }
 0x610   :  { %1783 = vmax.xlane.f32.xlu0 %v16120_v27 }
 0x612   :  { %v16123_v20 = vpop.f32.mrb[72].mxu1 }
 0x613   :  { %1789 = vmax.xlane.f32.xlu1 %v16123_v20  ;;  %v16126_v37 = vpop.f32.mrb[73].mxu1 }
 0x614   :  { %1787 = vmax.xlane.f32.xlu0 %v16126_v37 }
 0x616   :  { %v16129_v45 = vpop.f32.mrb[74].mxu1 }
 0x617   :  { %1793 = vmax.xlane.f32.xlu1 %v16129_v45  ;;  %v16132_v54 = vpop.f32.mrb[75].mxu1 }
 0x618   :  { %1791 = vmax.xlane.f32.xlu0 %v16132_v54 }
 0x61a   :  { %v16135_v24 = vpop.f32.mrb[76].mxu1 }
 0x61b   :  { %1797 = vmax.xlane.f32.xlu1 %v16135_v24  ;;  %v16138_v17 = vpop.f32.mrb[77].mxu1 }
 0x61c   :  { %1795 = vmax.xlane.f32.xlu0 %v16138_v17 }
 0x61e   :  { %v16141_v16 = vpop.f32.mrb[78].mxu1 }
 0x61f   :  { %1801 = vmax.xlane.f32.xlu1 %v16141_v16  ;;  %v16144_v23 = vpop.f32.mrb[79].mxu1 }
 0x620   :  { %1799 = vmax.xlane.f32.xlu0 %v16144_v23 }
 0x622   :  { %v12650_v58 = vpop.f32.mrb[80].mxu1 }
 0x623   :  { %v16150_v55 = vadd.f32 %v12650_v58, %v10744_v19  ;;  %v2378_v31 = vpop.f32.mrb[81].mxu1 }
 0x624   :  { %v2379_v14 = vadd.f32 %v10744_v19, %v2378_v31  ;;  %v12651_v30 = vpop.f32.mrb[82].mxu1 }
 0x625   :  { %v16152_v44 = vadd.f32 %v12651_v30, %v10744_v19  ;;  %v2381_v3 = vpop.f32.mrb[83].mxu1 }
 0x626   :  { %v16154_v6 = vadd.f32 %v10744_v19, %v2381_v3  ;;  %12736 = vmatprep.mubr.msk.f32.mxu1 %vm624_vm2, %v2379_v14 }
 0x62a   :  { %v12654_v7 = vpop.f32.mrb[84].mxu1 }
 0x62b   :  { %v16157_v5 = vadd.f32 %v12654_v7, %v10744_v19  ;;  %v2394_v57 = vpop.f32.mrb[85].mxu1 }
 0x62c   :  { %v16159_v60 = vadd.f32 %v10744_v19, %v2394_v57  ;;  %v12655_v61 = vpop.f32.mrb[86].mxu1 }
 0x62d   :  { %v16161_v59 = vadd.f32 %v12655_v61, %v10744_v19  ;;  %v2397_v58 = vpop.f32.mrb[87].mxu1 }
 0x62e   :  { %v16163_v47 = vadd.f32 %v10744_v19, %v2397_v58 }
 0x632   :  { %v12658_v31 = vpop.f32.mrb[88].mxu1 }
 0x633   :  { %v16165_v30 = vadd.f32 %v12658_v31, %v10744_v19  ;;  %v2410_v50 = vpop.f32.mrb[89].mxu1 }
 0x634   :  { %v16167_v3 = vadd.f32 %v10744_v19, %v2410_v50  ;;  %v12659_v51 = vpop.f32.mrb[90].mxu1 }
 0x635   :  { %v16169_v14 = vadd.f32 %v12659_v51, %v10744_v19  ;;  %v2413_v7 = vpop.f32.mrb[91].mxu1  ;;  %v10760_v51 = vld [vmem:[%s19419_s4 + $0x6] ss:$0 sm:$0xff] }
 0x636   :  { %v16171_v49 = vadd.f32 %v10744_v19, %v2413_v7 }
 0x63a   :  { %v12662_v57 = vpop.f32.mrb[92].mxu1 }
 0x63b   :  { %v16173_v36 = vadd.f32 %v12662_v57, %v10744_v19  ;;  %v2426_v61 = vpop.f32.mrb[93].mxu1 }
 0x63c   :  { %v16175_v39 = vadd.f32 %v10744_v19, %v2426_v61  ;;  %v12663_v58 = vpop.f32.mrb[94].mxu1 }
 0x63d   :  { %v16177_v40 = vadd.f32 %v12663_v58, %v10744_v19  ;;  %v2429_v31 = vpop.f32.mrb[95].mxu1 }
 0x63e   :  { %v16179_v38 = vadd.f32 %v10744_v19, %v2429_v31 }
 0x642   :  { %v12670_v50 = vpop.f32.mrb[96].mxu1 }
 0x643   :  { %v2500_v34 = vpop.f32.mrb[97].mxu1  ;;  %v2509_v0 = vadd.f32 %v12670_v50, %v10760_v51 }
 0x644   :  { %v12671_v7 = vpop.f32.mrb[98].mxu1  ;;  %v2501_v4 = vadd.f32 %v10760_v51, %v2500_v34 }
 0x645   :  { %v2512_v21 = vadd.f32 %v12671_v7, %v10760_v51  ;;  %v2503_v57 = vpop.f32.mrb[99].mxu1 }
 0x646   :  { %v2504_v56 = vadd.f32 %v10760_v51, %v2503_v57 }
 0x647   :  { %v14050_v61 = vpack.c.bf16 %v2512_v21, %v2509_v0 }
 0x648   :  { %v14044_v12 = vpack.c.bf16 %v2504_v56, %v2501_v4 }
 0x64a   :  { %v12674_v48 = vpop.f32.mrb[100].mxu1  ;;  %14046 = vmatprep.subr.msk.bf16.mxu1 %vm15690_vm3, %v14044_v12 }
 0x64b   :  { %v2516_v19 = vpop.f32.mrb[101].mxu1  ;;  %14049 = vmatpush3.bf16.xpose.msk.msra.mxu1 %vm15690_vm3, %v14044_v12  ;;  %v2525_v31 = vadd.f32 %v12674_v48, %v10760_v51 }
 0x64c   :  { %v12675_v58 = vpop.f32.mrb[102].mxu1  ;;  %14052 = vmatprep.subr.msk.bf16.mxu1 %vm15690_vm3, %v14050_v61  ;;  %v2517_v35 = vadd.f32 %v10760_v51, %v2516_v19 }
 0x64d   :  { %v2528_v50 = vadd.f32 %v12675_v58, %v10760_v51  ;;  %v2519_v7 = vpop.f32.mrb[103].mxu1 }
 0x64e   :  { %v2520_v34 = vadd.f32 %v10760_v51, %v2519_v7 }
 0x64f   :  { %v14062_v57 = vpack.c.bf16 %v2528_v50, %v2525_v31 }
 0x650   :  { %v14056_v21 = vpack.c.bf16 %v2520_v34, %v2517_v35 }
 0x652   :  { %v12678_v56 = vpop.f32.mrb[104].mxu1 }
 0x653   :  { %v2532_v4 = vpop.f32.mrb[105].mxu1  ;;  %14055 = vmatpush3.bf16.xpose.msk.msra.mxu1 %vm15690_vm3, %v14050_v61  ;;  %v2541_v12 = vadd.f32 %v12678_v56, %v10760_v51 }
 0x654   :  { %v12679_v0 = vpop.f32.mrb[106].mxu1  ;;  %14058 = vmatprep.subr.msk.bf16.mxu1 %vm15690_vm3, %v14056_v21  ;;  %v2533_v46 = vadd.f32 %v10760_v51, %v2532_v4 }
 0x655   :  { %v2544_v11 = vadd.f32 %v12679_v0, %v10760_v51  ;;  %v2535_v33 = vpop.f32.mrb[107].mxu1 }
 0x656   :  { %v2536_v48 = vadd.f32 %v10760_v51, %v2535_v33 }
 0x657   :  { %v14074_v58 = vpack.c.bf16 %v2544_v11, %v2541_v12 }
 0x658   :  { %v14068_v29 = vpack.c.bf16 %v2536_v48, %v2533_v46  ;;  %v14650_v46 = vld [vmem:[%s19418_s3 + $0x30] sm:$0xff]  }
 0x65a   :  { %v12682_v19 = vpop.f32.mrb[108].mxu1 }
 0x65b   :  { %v2548_v7 = vpop.f32.mrb[109].mxu1  ;;  %14061 = vmatpush3.bf16.xpose.msk.msra.mxu1 %vm15690_vm3, %v14056_v21  ;;  %v2557_v61 = vadd.f32 %v12682_v19, %v10760_v51 }
 0x65c   :  { %v12683_v35 = vpop.f32.mrb[110].mxu1  ;;  %14064 = vmatprep.subr.msk.bf16.mxu1 %vm15690_vm3, %v14062_v57  ;;  %v2549_v34 = vadd.f32 %v10760_v51, %v2548_v7 }
 0x65d   :  { %v2560_v31 = vadd.f32 %v12683_v35, %v10760_v51  ;;  %v2551_v50 = vpop.f32.mrb[111].mxu1 }
 0x65e   :  { %v2552_v56 = vadd.f32 %v10760_v51, %v2551_v50 }
 0x65f   :  { %v14086_v0 = vpack.c.bf16 %v2560_v31, %v2557_v61 }
 0x660   :  { %v14080_v26 = vpack.c.bf16 %v2552_v56, %v2549_v34 }
 0x663   :  { %14067 = vmatpush3.bf16.xpose.msk.msra.mxu1 %vm15690_vm3, %v14062_v57 }
 0x664   :  { %14070 = vmatprep.subr.msk.bf16.mxu1 %vm15690_vm3, %v14068_v29 }
 0x66b   :  { %14073 = vmatpush3.bf16.xpose.msk.msra.mxu1 %vm15690_vm3, %v14068_v29  ;;  %v14651_v29 = vld [vmem:[%s19418_s3 + $0x38] sm:$0xff]  }
 0x66c   :  { %14076 = vmatprep.subr.msk.bf16.mxu1 %vm15690_vm3, %v14074_v58 }
 0x673   :  { %14079 = vmatpush3.bf16.xpose.msk.msra.mxu1 %vm15690_vm3, %v14074_v58 }
 0x674   :  { %14082 = vmatprep.subr.msk.bf16.mxu1 %vm15690_vm3, %v14080_v26 }
 0x67b   :  { %14085 = vmatpush3.bf16.xpose.msk.msra.mxu1 %vm15690_vm3, %v14080_v26  ;;  %v16229_v26 = vld [vmem:[%s19418_s3 + $0xb0] sm:$0xff]  }
 0x67c   :  { %14088 = vmatprep.subr.msk.bf16.mxu1 %vm15690_vm3, %v14086_v0 }
 0x683   :  { %14091 = vmatpush3.bf16.xpose.msk.msra.mxu1 %vm15690_vm3, %v14086_v0 }
 0x684   :  { %12834 = vmatprep.subr.bf16.mxu1 %v14650_v46 }
 0x68a   :  { %12737 = vmatmul.mubr.msk.f32.vlgmr.msra.gmra.mrb[112].mxu1 %vm624_vm2, %v16154_v6 }
 0x68b   :  { %12739 = vmatprep.mubr.msk.f32.mxu1 %vm624_vm2, %v16150_v55  ;;  %12835 = vmatpush3.bf16.msra.mxu1 %v14650_v46 }
 0x68c   :  { %12836 = vmatprep.subr.bf16.mxu1 %v14651_v29 }
 0x68e   :  { %12740 = vmatmul.mubr.msk.f32.gmra.mrb[114].mxu1 %vm624_vm2, %v16152_v44 }
 0x68f   :  { %12742 = vmatprep.mubr.msk.f32.mxu1 %vm624_vm2, %v16159_v60  ;;  %12837 = vmatpush3.bf16.msra.mxu1 %v14651_v29 }
 0x690   :  { %v1774_v33 = vpop.xlane.xlu1 %1773  ;;  %12874 = vmatprep.subr.bf16.mxu1 %v16229_v26 }
 0x691   :  { %v1804_v6 = vsub.f32 %v16099_v15, %v1774_v33  ;;  %v1772_v11 = vpop.xlane.xlu0 %1771 }
 0x692   :  { %v1803_v55 = vsub.f32 %v16102_v22, %v1772_v11  ;;  %12743 = vmatmul.mubr.msk.f32.gmra.mrb[116].mxu1 %vm624_vm2, %v16163_v47 }
 0x693   :  { %v1821_v51 = vmul.f32 1.442695, %v1804_v6  ;;  %12745 = vmatprep.mubr.msk.f32.mxu1 %vm624_vm2, %v16157_v5 }
 0x694   :  { %v1819_v44 = vmul.f32 1.442695, %v1803_v55  ;;  %v1778_v57 = vpop.xlane.xlu1 %1777 }
 0x695   :  { %14756 = vpow2.f32 %v1821_v51  ;;  %v1806_v60 = vsub.f32 %v16105_v43, %v1778_v57  ;;  %v1776_v21 = vpop.xlane.xlu0 %1775 }
 0x696   :  { %14758 = vpow2.f32 %v1819_v44  ;;  %v1805_v4 = vsub.f32 %v16108_v28, %v1776_v21  ;;  %12746 = vmatmul.mubr.msk.f32.gmra.mrb[118].mxu1 %vm624_vm2, %v16161_v59 }
 0x697   :  { %v1825_v15 = vmul.f32 1.442695, %v1806_v60  ;;  %12748 = vmatprep.mubr.msk.f32.mxu1 %vm624_vm2, %v16167_v3 }
 0x698   :  { %v1823_v47 = vmul.f32 1.442695, %v1805_v4  ;;  %v1782_v22 = vpop.xlane.xlu1 %1781 }
 0x699   :  { %14760 = vpow2.f32 %v1825_v15  ;;  %v1808_v5 = vsub.f32 %v16111_v18, %v1782_v22  ;;  %v1780_v12 = vpop.xlane.xlu0 %1779 }
 0x69a   :  { %14762 = vpow2.f32 %v1823_v47  ;;  %v1807_v43 = vsub.f32 %v16114_v10, %v1780_v12  ;;  %12749 = vmatmul.mubr.msk.f32.gmra.mrb[120].mxu1 %vm624_vm2, %v16171_v49 }
 0x69b   :  { %v1829_v28 = vmul.f32 1.442695, %v1808_v5  ;;  %12751 = vmatprep.mubr.msk.f32.mxu1 %vm624_vm2, %v16165_v30 }
 0x69c   :  { %v1827_v59 = vmul.f32 1.442695, %v1807_v43  ;;  %v1786_v48 = vpop.xlane.xlu1 %1785 }
 0x69d   :  { %14764 = vpow2.f32 %v1829_v28  ;;  %v1810_v3 = vsub.f32 %v16117_v1, %v1786_v48  ;;  %v1784_v58 = vpop.xlane.xlu0 %1783 }
 0x69e   :  { %14766 = vpow2.f32 %v1827_v59  ;;  %v1809_v18 = vsub.f32 %v16120_v27, %v1784_v58  ;;  %12752 = vmatmul.mubr.msk.f32.gmra.mrb[122].mxu1 %vm624_vm2, %v16169_v14 }
 0x69f   :  { %v16258_v10 = vpop.eup %14756  ;;  %v1833_v19 = vmul.f32 1.442695, %v1810_v3  ;;  %12754 = vmatprep.mubr.msk.f32.mxu1 %vm624_vm2, %v16175_v39 }
 0x6a0   :  { %v16262_v49 = vpop.eup %14758  ;;  %v1831_v30 = vmul.f32 1.442695, %v1809_v18  ;;  %v1790_v7 = vpop.xlane.xlu1 %1789  ;;  %1853 = vadd.xlane.f32.xlu1 %v16258_v10 }
 0x6a1   :  { %14768 = vpow2.f32 %v1833_v19  ;;  %v1812_v1 = vsub.f32 %v16123_v20, %v1790_v7  ;;  %v1788_v35 = vpop.xlane.xlu0 %1787  ;;  %1851 = vadd.xlane.f32.xlu0 %v16262_v49 }
 0x6a2   :  { %14770 = vpow2.f32 %v1831_v30  ;;  %v1811_v27 = vsub.f32 %v16126_v37, %v1788_v35  ;;  %12755 = vmatmul.mubr.msk.f32.gmra.mrb[124].mxu1 %vm624_vm2, %v16179_v38 }
 0x6a3   :  { %v16270_v14 = vpop.eup %14760  ;;  %v1837_v39 = vmul.f32 1.442695, %v1812_v1  ;;  %12757 = vmatprep.mubr.msk.f32.mxu1 %vm624_vm2, %v16173_v36 }
 0x6a4   :  { %v16274_v61 = vpop.eup %14762  ;;  %v1835_v31 = vmul.f32 1.442695, %v1811_v27  ;;  %v1794_v50 = vpop.xlane.xlu1 %1793  ;;  %1857 = vadd.xlane.f32.xlu1 %v16270_v14 }
 0x6a5   :  { %14772 = vpow2.f32 %v1837_v39  ;;  %v1814_v20 = vsub.f32 %v16129_v45, %v1794_v50  ;;  %v1792_v34 = vpop.xlane.xlu0 %1791  ;;  %1855 = vadd.xlane.f32.xlu0 %v16274_v61  ;;  %v14653_v45 = vld [vmem:[%s19418_s3 + $0xb8] sm:$0xff]  }
 0x6a6   :  { %14774 = vpow2.f32 %v1835_v31  ;;  %v1813_v38 = vsub.f32 %v16132_v54, %v1792_v34  ;;  %12758 = vmatmul.mubr.msk.f32.gmra.mrb[126].mxu1 %vm624_vm2, %v16177_v40 }
 0x6a7   :  { %v16282_v37 = vpop.eup %14764  ;;  %v1841_v36 = vmul.f32 1.442695, %v1814_v20  ;;  %12838 = vmatprep.mubr.msk.bf16.mxu1 %vm258_vm1, %v15507_v41 }
 0x6a8   :  { %v16286_v56 = vpop.eup %14766  ;;  %v1839_v0 = vmul.f32 1.442695, %v1813_v38  ;;  %v1798_v46 = vpop.xlane.xlu1 %1797  ;;  %1861 = vadd.xlane.f32.xlu1 %v16282_v37 }
 0x6a9   :  { %14776 = vpow2.f32 %v1841_v36  ;;  %v1816_v54 = vsub.f32 %v16135_v24, %v1798_v46  ;;  %v1796_v40 = vpop.xlane.xlu0 %1795  ;;  %1859 = vadd.xlane.f32.xlu0 %v16286_v56 }
 0x6aa   :  { %14778 = vpow2.f32 %v1839_v0  ;;  %v1815_v29 = vsub.f32 %v16138_v17, %v1796_v40  ;;  %12839 = vmatmul.mubr.msk.bf16.vlgmr.msra.gmra.mrb[128].mxu1 %vm258_vm1, %v15511_v42 }
 0x6ab   :  { %v16297_v33 = vpop.eup %14768  ;;  %v1845_v6 = vmul.f32 1.442695, %v1816_v54  ;;  %12842 = vmatprep.mubr.msk.bf16.mxu1 %vm258_vm1, %v15534_v52  ;;  %12875 = vmatpush3.bf16.msra.mxu1 %v16229_v26 }
 0x6ac   :  { %v16302_v11 = vpop.eup %14770  ;;  %v1843_v24 = vmul.f32 1.442695, %v1815_v29  ;;  %1865 = vadd.xlane.f32.xlu1 %v16297_v33  ;;  %v1802_v55 = vpop.xlane.xlu1 %1801  ;;  %12876 = vmatprep.subr.bf16.mxu1 %v14653_v45 }
 0x6ad   :  { %14780 = vpow2.f32 %v1845_v6  ;;  %v1818_v17 = vsub.f32 %v16141_v16, %v1802_v55  ;;  %1863 = vadd.xlane.f32.xlu0 %v16302_v11  ;;  %v1800_v51 = vpop.xlane.xlu0 %1799 }
 0x6ae   :  { %14782 = vpow2.f32 %v1843_v24  ;;  %v1817_v44 = vsub.f32 %v16144_v23, %v1800_v51 }
 0x6af   :  { %v16308_v57 = vpop.eup %14772  ;;  %v1849_v60 = vmul.f32 1.442695, %v1818_v17  ;;  %12877 = vmatpush3.bf16.msra.mxu1 %v14653_v45 }
 0x6b0   :  { %v16310_v26 = vpop.eup %14774  ;;  %v1847_v21 = vmul.f32 1.442695, %v1817_v44  ;;  %1869 = vadd.xlane.f32.xlu1 %v16308_v57 }
 0x6b1   :  { %14784 = vpow2.f32 %v1849_v60  ;;  %1867 = vadd.xlane.f32.xlu0 %v16310_v26 }
 0x6b2   :  { %14786 = vpow2.f32 %v1847_v21  ;;  %12843 = vmatmul.mubr.msk.bf16.gmra.mrb[132].mxu1 %vm258_vm1, %v15538_v53 }
 0x6b3   :  { %v16316_v16 = vpop.eup %14776  ;;  %12846 = vmatprep.mubr.msk.bf16.mxu1 %vm258_vm1, %v15558_v62 }
 0x6b4   :  { %v16320_v23 = vpop.eup %14778  ;;  %1873 = vadd.xlane.f32.xlu1 %v16316_v16 }
 0x6b5   :  { %1871 = vadd.xlane.f32.xlu0 %v16320_v23 }
 0x6b7   :  { %v16324_v4 = vpop.eup %14780 }
 0x6b8   :  { %v16326_v15 = vpop.eup %14782  ;;  %1877 = vadd.xlane.f32.xlu1 %v16324_v4 }
 0x6b9   :  { %1875 = vadd.xlane.f32.xlu0 %v16326_v15 }
 0x6ba   :  { %12847 = vmatmul.mubr.msk.bf16.gmra.mrb[136].mxu1 %vm258_vm1, %v15562_v63 }
 0x6bb   :  { %v16332_v47 = vpop.eup %14784  ;;  %12850 = vmatprep.mubr.msk.bf16.mxu1 %vm258_vm1, %v15582_v8 }
 0x6bc   :  { %v16336_v22 = vpop.eup %14786  ;;  %1881 = vadd.xlane.f32.xlu1 %v16332_v47 }
 0x6bd   :  { %1879 = vadd.xlane.f32.xlu0 %v16336_v22 }
 0x6c2   :  { %12851 = vmatmul.mubr.msk.bf16.gmra.mrb[140].mxu1 %vm258_vm1, %v15586_v9 }
 0x6c3   :  { %12878 = vmatprep.mubr.msk.bf16.mxu1 %vm258_vm1, %v15507_v41 }
 0x6ca   :  { %12879 = vmatmul.mubr.msk.bf16.vlgmr.msra.gmra.mrb[144].mxu1 %vm258_vm1, %v15511_v42 }
 0x6cb   :  { %12882 = vmatprep.mubr.msk.bf16.mxu1 %vm258_vm1, %v15534_v52 }
 0x6d2   :  { %12883 = vmatmul.mubr.msk.bf16.gmra.mrb[148].mxu1 %vm258_vm1, %v15538_v53 }
 0x6d3   :  { %12886 = vmatprep.mubr.msk.bf16.mxu1 %vm258_vm1, %v15558_v62 }
 0x6da   :  { %12887 = vmatmul.mubr.msk.bf16.gmra.mrb[152].mxu1 %vm258_vm1, %v15562_v63 }
 0x6db   :  { %12890 = vmatprep.mubr.msk.bf16.mxu1 %vm258_vm1, %v15582_v8 }
 0x6e2   :  { %12891 = vmatmul.mubr.msk.bf16.gmra.mrb[156].mxu1 %vm258_vm1, %v15586_v9 }
 0x72d   :  { %v1854_v5 = vpop.xlane.xlu1 %1853 }
 0x72e   :  { %14788 = vrcp.f32 %v1854_v5  ;;  %v1852_v12 = vpop.xlane.xlu0 %1851 }
 0x72f   :  { %14790 = vrcp.f32 %v1852_v12 }
 0x731   :  { %v1858_v43 = vpop.xlane.xlu1 %1857 }
 0x732   :  { %14792 = vrcp.f32 %v1858_v43  ;;  %v1856_v28 = vpop.xlane.xlu0 %1855 }
 0x733   :  { %14794 = vrcp.f32 %v1856_v28 }
 0x735   :  { %v1862_v59 = vpop.xlane.xlu1 %1861 }
 0x736   :  { %14796 = vrcp.f32 %v1862_v59  ;;  %v1860_v48 = vpop.xlane.xlu0 %1859 }
 0x737   :  { %14798 = vrcp.f32 %v1860_v48 }
 0x738   :  { %v14789_v3 = vpop.eup %14788 }
 0x739   :  { %v14791_v58 = vpop.eup %14790  ;;  %v1866_v18 = vpop.xlane.xlu1 %1865  ;;  %v1900_v7 = vmul.f32 %v14789_v3, %v16258_v10 }
 0x73a   :  { %14800 = vrcp.f32 %v1866_v18  ;;  %v1864_v19 = vpop.xlane.xlu0 %1863  ;;  %v1899_v30 = vmul.f32 %v14791_v58, %v16262_v49 }
 0x73b   :  { %14802 = vrcp.f32 %v1864_v19 }
 0x73c   :  { %v14793_v1 = vpop.eup %14792  ;;  %12584 = vmatprep.mubr.f32.mxu0 %v1899_v30 }
 0x73d   :  { %v14795_v35 = vpop.eup %14794  ;;  %v1870_v27 = vpop.xlane.xlu1 %1869  ;;  %12585 = vmatmul.mubr.f32.vlgmr.msra.gmra.mrb[80].mxu0 %v1900_v7  ;;  %v1902_v50 = vmul.f32 %v14793_v1, %v16270_v14  ;;  %v16425_v1 = vld [vmem:[%s19419_s4 + $0x3] ss:$0 sm:$0xff] }
 0x73e   :  { %14804 = vrcp.f32 %v1870_v27  ;;  %v1868_v39 = vpop.xlane.xlu0 %1867  ;;  %v1901_v31 = vmul.f32 %v14795_v35, %v16274_v61  ;;  %v10722_v35 = vld [vmem:[%s19420_s5 + $0x4] sm:$0xf] }
 0x73f   :  { %14806 = vrcp.f32 %v1868_v39  ;;  %14620 = vmatprep.subr.msk.bf16.mxu0 %vm2094_vm4, %v10722_v35  ;;  %v2096_v39 = vsel %vm2094_vm4, %v10722_v35, 0  ;;  %v10865_v35 = vld [vmem:[%s19419_s4 + $0xb] ss:$0 sm:$0xff] }
 0x740   :  { %v14797_v20 = vpop.eup %14796  ;;  %12587 = vmatprep.mubr.f32.mxu0 %v1901_v31  ;;  %12609 = vmatpush3.bf16.msra.mxu0 %v2096_v39 }
 0x741   :  { %v14799_v34 = vpop.eup %14798  ;;  %v1874_v38 = vpop.xlane.xlu1 %1873  ;;  %12588 = vmatmul.mubr.f32.gmra.mrb[82].mxu0 %v1902_v50  ;;  %v1904_v36 = vmul.f32 %v14797_v20, %v16282_v37 }
 0x742   :  { %14808 = vrcp.f32 %v1874_v38  ;;  %v1872_v49 = vpop.xlane.xlu0 %1871  ;;  %v1903_v10 = vmul.f32 %v14799_v34, %v16286_v56 }
 0x743   :  { %14810 = vrcp.f32 %v1872_v49 }
 0x744   :  { %v14801_v0 = vpop.eup %14800  ;;  %12590 = vmatprep.mubr.f32.mxu0 %v1903_v10 }
 0x745   :  { %v14803_v46 = vpop.eup %14802  ;;  %v1878_v45 = vpop.xlane.xlu1 %1877  ;;  %12591 = vmatmul.mubr.f32.gmra.mrb[84].mxu0 %v1904_v36  ;;  %v1906_v54 = vmul.f32 %v14801_v0, %v16297_v33 }
 0x746   :  { %14812 = vrcp.f32 %v1878_v45  ;;  %v1876_v61 = vpop.xlane.xlu0 %1875  ;;  %v1905_v14 = vmul.f32 %v14803_v46, %v16302_v11 }
 0x747   :  { %14814 = vrcp.f32 %v1876_v61 }
 0x748   :  { %v14805_v40 = vpop.eup %14804  ;;  %12593 = vmatprep.mubr.f32.mxu0 %v1905_v14 }
 0x749   :  { %v14807_v29 = vpop.eup %14806  ;;  %v1882_v6 = vpop.xlane.xlu1 %1881  ;;  %12594 = vmatmul.mubr.f32.gmra.mrb[86].mxu0 %v1906_v54  ;;  %v1908_v24 = vmul.f32 %v14805_v40, %v16308_v57 }
 0x74a   :  { %14816 = vrcp.f32 %v1882_v6  ;;  %v1880_v56 = vpop.xlane.xlu0 %1879  ;;  %v1907_v37 = vmul.f32 %v14807_v29, %v16310_v26 }
 0x74b   :  { %14818 = vrcp.f32 %v1880_v56 }
 0x74c   :  { %v14809_v55 = vpop.eup %14808  ;;  %12596 = vmatprep.mubr.f32.mxu0 %v1907_v37 }
 0x74d   :  { %v14811_v17 = vpop.eup %14810  ;;  %12597 = vmatmul.mubr.f32.gmra.mrb[88].mxu0 %v1908_v24  ;;  %v1910_v33 = vmul.f32 %v14809_v55, %v16316_v16 }
 0x74e   :  { %v1909_v11 = vmul.f32 %v14811_v17, %v16320_v23 }
 0x750   :  { %v14813_v51 = vpop.eup %14812  ;;  %12599 = vmatprep.mubr.f32.mxu0 %v1909_v11 }
 0x751   :  { %v14815_v44 = vpop.eup %14814  ;;  %12600 = vmatmul.mubr.f32.gmra.mrb[90].mxu0 %v1910_v33  ;;  %v1912_v21 = vmul.f32 %v14813_v51, %v16324_v4 }
 0x752   :  { %v1911_v60 = vmul.f32 %v14815_v44, %v16326_v15 }
 0x754   :  { %v14817_v26 = vpop.eup %14816  ;;  %12602 = vmatprep.mubr.f32.mxu0 %v1911_v60 }
 0x755   :  { %v14819_v5 = vpop.eup %14818  ;;  %12603 = vmatmul.mubr.f32.gmra.mrb[92].mxu0 %v1912_v21  ;;  %v1914_v12 = vmul.f32 %v14817_v26, %v16332_v47 }
 0x756   :  { %v1913_v57 = vmul.f32 %v14819_v5, %v16336_v22  ;;  %v16479_v5 = vld [vmem:[%s19420_s5] sm:$0xf] }
 0x757   :  { %14621 = vmatprep.subr.msk.bf16.mxu0 %vm2094_vm4, %v16479_v5 }
 0x758   :  { %12605 = vmatprep.mubr.f32.mxu0 %v1913_v57 }
 0x759   :  { %12606 = vmatmul.mubr.f32.gmra.mrb[94].mxu0 %v1914_v12 }
 0x75d   :  { %v16374_v23 = vpop.f32.mrb[112].mxu1 }
 0x75e   :  { %2928 = vmax.xlane.f32.xlu1 %v16374_v23  ;;  %v16377_v16 = vpop.f32.mrb[113].mxu1 }
 0x75f   :  { %2926 = vmax.xlane.f32.xlu0 %v16377_v16 }
 0x761   :  { %v16380_v15 = vpop.f32.mrb[114].mxu1 }
 0x762   :  { %2932 = vmax.xlane.f32.xlu1 %v16380_v15  ;;  %v16383_v4 = vpop.f32.mrb[115].mxu1 }
 0x763   :  { %2930 = vmax.xlane.f32.xlu0 %v16383_v4 }
 0x765   :  { %v16386_v22 = vpop.f32.mrb[116].mxu1 }
 0x766   :  { %2936 = vmax.xlane.f32.xlu1 %v16386_v22  ;;  %v16389_v47 = vpop.f32.mrb[117].mxu1 }
 0x767   :  { %2934 = vmax.xlane.f32.xlu0 %v16389_v47 }
 0x769   :  { %v16392_v43 = vpop.f32.mrb[118].mxu1 }
 0x76a   :  { %2940 = vmax.xlane.f32.xlu1 %v16392_v43  ;;  %v16395_v28 = vpop.f32.mrb[119].mxu1 }
 0x76b   :  { %2938 = vmax.xlane.f32.xlu0 %v16395_v28 }
 0x76d   :  { %v16398_v59 = vpop.f32.mrb[120].mxu1 }
 0x76e   :  { %2944 = vmax.xlane.f32.xlu1 %v16398_v59  ;;  %v16401_v48 = vpop.f32.mrb[121].mxu1 }
 0x76f   :  { %2942 = vmax.xlane.f32.xlu0 %v16401_v48 }
 0x771   :  { %v16404_v3 = vpop.f32.mrb[122].mxu1 }
 0x772   :  { %2948 = vmax.xlane.f32.xlu1 %v16404_v3  ;;  %v16407_v58 = vpop.f32.mrb[123].mxu1 }
 0x773   :  { %2946 = vmax.xlane.f32.xlu0 %v16407_v58 }
 0x775   :  { %v16410_v18 = vpop.f32.mrb[124].mxu1 }
 0x776   :  { %2952 = vmax.xlane.f32.xlu1 %v16410_v18  ;;  %v16413_v19 = vpop.f32.mrb[125].mxu1 }
 0x777   :  { %2950 = vmax.xlane.f32.xlu0 %v16413_v19 }
 0x779   :  { %v16416_v30 = vpop.f32.mrb[126].mxu1 }
 0x77a   :  { %2956 = vmax.xlane.f32.xlu1 %v16416_v30  ;;  %v16419_v7 = vpop.f32.mrb[127].mxu1 }
 0x77b   :  { %2954 = vmax.xlane.f32.xlu0 %v16419_v7 }
 0x77d   :  { %v12840_v27 = vpop.f32.mrb[128].mxu1 }
 0x77e   :  { %v16433_v31 = vadd.f32 %v12840_v27, %v16425_v1  ;;  %v16435_v50 = vpop.f32.mrb[129].mxu1 }
 0x77f   :  { %v12841_v20 = vpop.f32.mrb[130].mxu1 }
 0x780   :  { %v16438_v34 = vadd.f32 %v12841_v20, %v16425_v1  ;;  %v3427_v38 = vpop.f32.mrb[131].mxu1 }
 0x781   :  { %v16441_v49 = vadd.f32 %v16425_v1, %v3427_v38 }
 0x785   :  { %v12844_v10 = vpop.f32.mrb[132].mxu1 }
 0x786   :  { %v16444_v36 = vadd.f32 %v12844_v10, %v16425_v1  ;;  %v3440_v0 = vpop.f32.mrb[133].mxu1 }
 0x787   :  { %v16447_v46 = vadd.f32 %v16425_v1, %v3440_v0  ;;  %v12845_v45 = vpop.f32.mrb[134].mxu1 }
 0x788   :  { %v16450_v61 = vadd.f32 %v12845_v45, %v16425_v1  ;;  %v3443_v14 = vpop.f32.mrb[135].mxu1 }
 0x789   :  { %v16453_v54 = vadd.f32 %v16425_v1, %v3443_v14 }
 0x78d   :  { %v12848_v40 = vpop.f32.mrb[136].mxu1 }
 0x78e   :  { %v16456_v29 = vadd.f32 %v12848_v40, %v16425_v1  ;;  %v3456_v6 = vpop.f32.mrb[137].mxu1 }
 0x78f   :  { %v16459_v56 = vadd.f32 %v16425_v1, %v3456_v6  ;;  %v12849_v37 = vpop.f32.mrb[138].mxu1 }
 0x790   :  { %v16462_v24 = vadd.f32 %v12849_v37, %v16425_v1  ;;  %v3459_v55 = vpop.f32.mrb[139].mxu1 }
 0x791   :  { %v16465_v17 = vadd.f32 %v16425_v1, %v3459_v55 }
 0x795   :  { %v12852_v11 = vpop.f32.mrb[140].mxu1 }
 0x796   :  { %v16468_v33 = vadd.f32 %v12852_v11, %v16425_v1  ;;  %v3472_v51 = vpop.f32.mrb[141].mxu1 }
 0x797   :  { %v16471_v44 = vadd.f32 %v16425_v1, %v3472_v51  ;;  %v12853_v60 = vpop.f32.mrb[142].mxu1 }
 0x798   :  { %19515 = vst [vmem:[#allocation34_spill] sm:$0xff] %v16468_v33  ;;  %v16474_v21 = vadd.f32 %v12853_v60, %v16425_v1  ;;  %v3475_v26 = vpop.f32.mrb[143].mxu1 }
 0x799   :  { %v16482_v57 = vadd.f32 %v16425_v1, %v3475_v26 }
 0x79a   :  { %19516 = vst [vmem:[#allocation35_spill] sm:$0xff] %v16474_v21 }
 0x79b   :  { %19517 = vst [vmem:[#allocation36_spill] sm:$0xff] %v16482_v57 }
 0x79d   :  { %v12880_v12 = vpop.f32.mrb[144].mxu1 }
 0x79e   :  { %v3668_v27 = vpop.f32.mrb[145].mxu1  ;;  %v3677_v20 = vadd.f32 %v12880_v12, %v10865_v35 }
 0x79f   :  { %v12881_v39 = vpop.f32.mrb[146].mxu1  ;;  %v3669_v0 = vadd.f32 %v10865_v35, %v3668_v27 }
 0x7a0   :  { %v3680_v38 = vadd.f32 %v12881_v39, %v10865_v35  ;;  %v3671_v10 = vpop.f32.mrb[147].mxu1 }
 0x7a1   :  { %v3672_v45 = vadd.f32 %v10865_v35, %v3671_v10 }
 0x7a2   :  { %v14176_v14 = vpack.c.bf16 %v3680_v38, %v3677_v20 }
 0x7a3   :  { %v14172_v40 = vpack.c.bf16 %v3672_v45, %v3669_v0 }
 0x7a5   :  { %v12884_v6 = vpop.f32.mrb[148].mxu1  ;;  %14173 = vmatprep.subr.bf16.mxu1 %v14172_v40 }
 0x7a6   :  { %v3684_v37 = vpop.f32.mrb[149].mxu1  ;;  %14175 = vmatpush3.bf16.msra.mxu1 %v14172_v40  ;;  %v3693_v11 = vadd.f32 %v12884_v6, %v10865_v35 }
 0x7a7   :  { %v12885_v55 = vpop.f32.mrb[150].mxu1  ;;  %14177 = vmatprep.subr.bf16.mxu1 %v14176_v14  ;;  %v3685_v26 = vadd.f32 %v10865_v35, %v3684_v37 }
 0x7a8   :  { %v3696_v51 = vadd.f32 %v12885_v55, %v10865_v35  ;;  %v3687_v60 = vpop.f32.mrb[151].mxu1 }
 0x7a9   :  { %v3688_v21 = vadd.f32 %v10865_v35, %v3687_v60 }
 0x7aa   :  { %v14184_v33 = vpack.c.bf16 %v3696_v51, %v3693_v11  ;;  %14179 = vmatpush3.bf16.msra.mxu1 %v14176_v14 }
 0x7ab   :  { %v14180_v12 = vpack.c.bf16 %v3688_v21, %v3685_v26 }
 0x7ad   :  { %v12888_v39 = vpop.f32.mrb[152].mxu1  ;;  %14181 = vmatprep.subr.bf16.mxu1 %v14180_v12 }
 0x7ae   :  { %v3700_v27 = vpop.f32.mrb[153].mxu1  ;;  %14183 = vmatpush3.bf16.msra.mxu1 %v14180_v12  ;;  %v3709_v38 = vadd.f32 %v12888_v39, %v10865_v35 }
 0x7af   :  { %v12889_v20 = vpop.f32.mrb[154].mxu1  ;;  %14185 = vmatprep.subr.bf16.mxu1 %v14184_v33  ;;  %v3701_v45 = vadd.f32 %v10865_v35, %v3700_v27 }
 0x7b0   :  { %v3712_v10 = vadd.f32 %v12889_v20, %v10865_v35  ;;  %v3703_v0 = vpop.f32.mrb[155].mxu1 }
 0x7b1   :  { %v3704_v40 = vadd.f32 %v10865_v35, %v3703_v0 }
 0x7b2   :  { %v14192_v57 = vpack.c.bf16 %v3712_v10, %v3709_v38  ;;  %14187 = vmatpush3.bf16.msra.mxu1 %v14184_v33 }
 0x7b3   :  { %v14188_v6 = vpack.c.bf16 %v3704_v40, %v3701_v45 }
 0x7b5   :  { %v12892_v55 = vpop.f32.mrb[156].mxu1  ;;  %14189 = vmatprep.subr.bf16.mxu1 %v14188_v6 }
 0x7b6   :  { %v3716_v37 = vpop.f32.mrb[157].mxu1  ;;  %14191 = vmatpush3.bf16.msra.mxu1 %v14188_v6  ;;  %v3725_v21 = vadd.f32 %v12892_v55, %v10865_v35 }
 0x7b7   :  { %v12893_v14 = vpop.f32.mrb[158].mxu1  ;;  %14193 = vmatprep.subr.bf16.mxu1 %v14192_v57  ;;  %v3717_v60 = vadd.f32 %v10865_v35, %v3716_v37 }
 0x7b8   :  { %v3728_v11 = vadd.f32 %v12893_v14, %v10865_v35  ;;  %v3719_v51 = vpop.f32.mrb[159].mxu1 }
 0x7b9   :  { %v3720_v26 = vadd.f32 %v10865_v35, %v3719_v51 }
 0x7ba   :  { %v14200_v12 = vpack.c.bf16 %v3728_v11, %v3725_v21  ;;  %14195 = vmatpush3.bf16.msra.mxu1 %v14192_v57 }
 0x7bb   :  { %v14196_v39 = vpack.c.bf16 %v3720_v26, %v3717_v60 }
 0x7bd   :  { %14197 = vmatprep.subr.bf16.mxu1 %v14196_v39 }
 0x7be   :  { %14199 = vmatpush3.bf16.msra.mxu1 %v14196_v39 }
 0x7bf   :  { %14201 = vmatprep.subr.bf16.mxu1 %v14200_v12 }
 0x7c2   :  { %14203 = vmatpush3.bf16.msra.mxu1 %v14200_v12 }
 0x7eb   :  { %v2929_v33 = vpop.xlane.xlu1 %2928 }
 0x7ec   :  { %v2959_v27 = vsub.f32 %v16374_v23, %v2929_v33  ;;  %v2927_v20 = vpop.xlane.xlu0 %2926 }
 0x7ed   :  { %v2958_v38 = vsub.f32 %v16377_v16, %v2927_v20 }
 0x7ee   :  { %v2976_v10 = vmul.f32 1.442695, %v2959_v27 }
 0x7ef   :  { %v2974_v0 = vmul.f32 1.442695, %v2958_v38  ;;  %v2933_v45 = vpop.xlane.xlu1 %2932 }
 0x7f0   :  { %14820 = vpow2.f32 %v2976_v10  ;;  %v2961_v40 = vsub.f32 %v16380_v15, %v2933_v45  ;;  %v2931_v35 = vpop.xlane.xlu0 %2930 }
 0x7f1   :  { %14822 = vpow2.f32 %v2974_v0  ;;  %v2960_v57 = vsub.f32 %v16383_v4, %v2931_v35 }
 0x7f2   :  { %v2980_v6 = vmul.f32 1.442695, %v2961_v40 }
 0x7f3   :  { %v2978_v55 = vmul.f32 1.442695, %v2960_v57  ;;  %v2937_v37 = vpop.xlane.xlu1 %2936 }
 0x7f4   :  { %14824 = vpow2.f32 %v2980_v6  ;;  %v2963_v14 = vsub.f32 %v16386_v22, %v2937_v37  ;;  %v2935_v23 = vpop.xlane.xlu0 %2934 }
 0x7f5   :  { %14826 = vpow2.f32 %v2978_v55  ;;  %v2962_v16 = vsub.f32 %v16389_v47, %v2935_v23 }
 0x7f6   :  { %v2984_v21 = vmul.f32 1.442695, %v2963_v14 }
 0x7f7   :  { %v2982_v11 = vmul.f32 1.442695, %v2962_v16  ;;  %v2941_v51 = vpop.xlane.xlu1 %2940 }
 0x7f8   :  { %14828 = vpow2.f32 %v2984_v21  ;;  %v2965_v15 = vsub.f32 %v16392_v43, %v2941_v51  ;;  %v2939_v60 = vpop.xlane.xlu0 %2938 }
 0x7f9   :  { %14830 = vpow2.f32 %v2982_v11  ;;  %v2964_v4 = vsub.f32 %v16395_v28, %v2939_v60 }
 0x7fa   :  { %v16497_v26 = vpop.eup %14820  ;;  %v2988_v12 = vmul.f32 1.442695, %v2965_v15 }
 0x7fb   :  { %v16499_v39 = vpop.eup %14822  ;;  %v2986_v22 = vmul.f32 1.442695, %v2964_v4  ;;  %v2945_v33 = vpop.xlane.xlu1 %2944  ;;  %3008 = vadd.xlane.f32.xlu1 %v16497_v26 }
 0x7fc   :  { %14832 = vpow2.f32 %v2988_v12  ;;  %v2967_v47 = vsub.f32 %v16398_v59, %v2945_v33  ;;  %v2943_v27 = vpop.xlane.xlu0 %2942  ;;  %3006 = vadd.xlane.f32.xlu0 %v16499_v39 }
 0x7fd   :  { %14834 = vpow2.f32 %v2986_v22  ;;  %v2966_v43 = vsub.f32 %v16401_v48, %v2943_v27 }
 0x7fe   :  { %v16505_v20 = vpop.eup %14824  ;;  %v2992_v28 = vmul.f32 1.442695, %v2967_v47 }
 0x7ff   :  { %v16507_v38 = vpop.eup %14826  ;;  %v2990_v10 = vmul.f32 1.442695, %v2966_v43  ;;  %v2949_v0 = vpop.xlane.xlu1 %2948  ;;  %3012 = vadd.xlane.f32.xlu1 %v16505_v20 }
 0x800   :  { %14836 = vpow2.f32 %v2992_v28  ;;  %v2969_v45 = vsub.f32 %v16404_v3, %v2949_v0  ;;  %v2947_v40 = vpop.xlane.xlu0 %2946  ;;  %3010 = vadd.xlane.f32.xlu0 %v16507_v38 }
 0x801   :  { %14838 = vpow2.f32 %v2990_v10  ;;  %v2968_v59 = vsub.f32 %v16407_v58, %v2947_v40  ;;  %v2220_v40 = vsel %vm2094_vm4, %v16479_v5, 0 }
 0x802   :  { %v16513_v35 = vpop.eup %14828  ;;  %v2996_v48 = vmul.f32 1.442695, %v2969_v45 }
 0x803   :  { %v16515_v57 = vpop.eup %14830  ;;  %v2994_v6 = vmul.f32 1.442695, %v2968_v59  ;;  %v2953_v55 = vpop.xlane.xlu1 %2952  ;;  %3016 = vadd.xlane.f32.xlu1 %v16513_v35  ;;  %v14654_v59 = vld [vmem:[%s19418_s3 + $0xa0] sm:$0xff]  }
 0x804   :  { %14840 = vpow2.f32 %v2996_v48  ;;  %v2971_v37 = vsub.f32 %v16410_v18, %v2953_v55  ;;  %v2951_v14 = vpop.xlane.xlu0 %2950  ;;  %3014 = vadd.xlane.f32.xlu0 %v16515_v57 }
 0x805   :  { %14842 = vpow2.f32 %v2994_v6  ;;  %v2970_v3 = vsub.f32 %v16413_v19, %v2951_v14 }
 0x806   :  { %v16521_v23 = vpop.eup %14832  ;;  %v3000_v58 = vmul.f32 1.442695, %v2971_v37 }
 0x807   :  { %v16523_v16 = vpop.eup %14834  ;;  %v2998_v21 = vmul.f32 1.442695, %v2970_v3  ;;  %3020 = vadd.xlane.f32.xlu1 %v16521_v23  ;;  %v2957_v11 = vpop.xlane.xlu1 %2956 }
 0x808   :  { %14844 = vpow2.f32 %v3000_v58  ;;  %v2973_v51 = vsub.f32 %v16416_v30, %v2957_v11  ;;  %3018 = vadd.xlane.f32.xlu0 %v16523_v16  ;;  %v2955_v18 = vpop.xlane.xlu0 %2954 }
 0x809   :  { %14846 = vpow2.f32 %v2998_v21  ;;  %v2972_v15 = vsub.f32 %v16419_v7, %v2955_v18 }
 0x80a   :  { %v16529_v60 = vpop.eup %14836  ;;  %v3004_v19 = vmul.f32 1.442695, %v2973_v51 }
 0x80b   :  { %v16531_v4 = vpop.eup %14838  ;;  %v3002_v12 = vmul.f32 1.442695, %v2972_v15  ;;  %3024 = vadd.xlane.f32.xlu1 %v16529_v60 }
 0x80c   :  { %14848 = vpow2.f32 %v3004_v19  ;;  %3022 = vadd.xlane.f32.xlu0 %v16531_v4 }
 0x80d   :  { %14850 = vpow2.f32 %v3002_v12 }
 0x80e   :  { %v16535_v22 = vpop.eup %14840 }
 0x80f   :  { %v16537_v30 = vpop.eup %14842  ;;  %3028 = vadd.xlane.f32.xlu1 %v16535_v22 }
 0x810   :  { %v12586_v33 = vpop.f32.mrb[80].mxu0  ;;  %3026 = vadd.xlane.f32.xlu0 %v16537_v30 }
 0x811   :  { %v1981_v7 = vpop.f32.mrb[81].mxu0 }
 0x812   :  { %v16541_v47 = vpop.eup %14844  ;;  %v2060_v27 = vpack.c.bf16 %v12586_v33, %v1981_v7 }
 0x813   :  { %v16543_v43 = vpop.eup %14846  ;;  %3032 = vadd.xlane.f32.xlu1 %v16541_v47 }
 0x814   :  { %v12589_v28 = vpop.f32.mrb[82].mxu0  ;;  %12610 = vmatprep.mubr.msk.bf16.mxu0 %vm624_vm2, %v2060_v27  ;;  %3030 = vadd.xlane.f32.xlu0 %v16543_v43 }
 0x815   :  { %v1991_v10 = vpop.f32.mrb[83].mxu0 }
 0x816   :  { %v16548_v0 = vpop.eup %14848  ;;  %v2061_v45 = vpack.c.bf16 %v12589_v28, %v1991_v10  ;;  %v19518_v10 = vpack.c.bf16 %v15988_v2, %v15990_v25  ;;  %v19524_v2 = vld [vmem:[#allocation24_spill] sm:$0xff]  ;;  %v19525_v25 = vld [vmem:[#allocation25_spill] sm:$0xff] }
 0x817   :  { %v16555_v48 = vpop.eup %14850  ;;  %3036 = vadd.xlane.f32.xlu1 %v16548_v0 }
 0x818   :  { %v12592_v6 = vpop.f32.mrb[84].mxu0  ;;  %12611 = vmatmul.mubr.msk.bf16.vlgmr.msra.gmra.mrb[96].mxu0 %vm624_vm2, %v2061_v45  ;;  %3034 = vadd.xlane.f32.xlu0 %v16555_v48  ;;  %v14655_v45 = vld [vmem:[%s19418_s3 + $0xa8] sm:$0xff]  }
 0x819   :  { %v2001_v55 = vpop.f32.mrb[85].mxu0  ;;  %12627 = vmatpush3.bf16.msra.mxu0 %v2220_v40  ;;  %v19519_v40 = vld [vmem:[#allocation21_spill] sm:$0xff] }
 0x81a   :  { %v2062_v37 = vpack.c.bf16 %v12592_v6, %v2001_v55  ;;  %12684 = vmatprep.subr.bf16.mxu0 %v14654_v59  ;;  %v19520_v6 = vpack.c.bf16 %v15994_v32, %v19519_v40  ;;  %v19521_v55 = vld [vmem:[#allocation22_spill] sm:$0xff]  ;;  %v19530_v32 = vld [vmem:[#allocation28_spill] sm:$0xff] }
 0x81c   :  { %v12595_v14 = vpop.f32.mrb[86].mxu0  ;;  %12614 = vmatprep.mubr.msk.bf16.mxu0 %vm624_vm2, %v2062_v37  ;;  %v19522_v37 = vld [vmem:[#allocation23_spill] sm:$0xff] }
 0x81d   :  { %v2011_v5 = vpop.f32.mrb[87].mxu0 }
 0x81e   :  { %v2063_v3 = vpack.c.bf16 %v12595_v14, %v2011_v5  ;;  %v19523_v14 = vpack.c.bf16 %v19521_v55, %v19522_v37  ;;  %v19526_v5 = vpack.c.bf16 %v19524_v2, %v19525_v25 }
 0x820   :  { %v12598_v58 = vpop.f32.mrb[88].mxu0  ;;  %12615 = vmatmul.mubr.msk.bf16.gmra.mrb[100].mxu0 %vm624_vm2, %v2063_v3  ;;  %v19527_v3 = vld [vmem:[#allocation26_spill] sm:$0xff] }
 0x821   :  { %v2021_v21 = vpop.f32.mrb[89].mxu0 }
 0x822   :  { %v2064_v11 = vpack.c.bf16 %v12598_v58, %v2021_v21  ;;  %v19528_v58 = vld [vmem:[#allocation27_spill] sm:$0xff] }
 0x823   :  { %v19529_v21 = vpack.c.bf16 %v19527_v3, %v19528_v58 }
 0x824   :  { %v12601_v51 = vpop.f32.mrb[90].mxu0  ;;  %12618 = vmatprep.mubr.msk.bf16.mxu0 %vm624_vm2, %v2064_v11  ;;  %v19531_v11 = vld [vmem:[#allocation29_spill] sm:$0xff] }
 0x825   :  { %v2031_v18 = vpop.f32.mrb[91].mxu0 }
 0x826   :  { %v2065_v15 = vpack.c.bf16 %v12601_v51, %v2031_v18  ;;  %v19532_v51 = vpack.c.bf16 %v19530_v32, %v19531_v11  ;;  %v19533_v18 = vld [vmem:[#allocation30_spill] sm:$0xff] }
 0x828   :  { %v12604_v19 = vpop.f32.mrb[92].mxu0  ;;  %12619 = vmatmul.mubr.msk.bf16.gmra.mrb[104].mxu0 %vm624_vm2, %v2065_v15  ;;  %v19534_v15 = vld [vmem:[#allocation31_spill] sm:$0xff] }
 0x829   :  { %v2041_v12 = vpop.f32.mrb[93].mxu0 }
 0x82a   :  { %v2066_v33 = vpack.c.bf16 %v12604_v19, %v2041_v12  ;;  %v19536_v19 = vld [vmem:[#allocation32_spill] sm:$0xff]  ;;  %v19537_v12 = vld [vmem:[#allocation33_spill] sm:$0xff] }
 0x82c   :  { %v12607_v7 = vpop.f32.mrb[94].mxu0  ;;  %12622 = vmatprep.mubr.msk.bf16.mxu0 %vm624_vm2, %v2066_v33  ;;  %v19538_v33 = vpack.c.bf16 %v19536_v19, %v19537_v12 }
 0x82d   :  { %v2051_v27 = vpop.f32.mrb[95].mxu0 }
 0x82e   :  { %v2067_v28 = vpack.c.bf16 %v12607_v7, %v2051_v27 }
 0x830   :  { %12623 = vmatmul.mubr.msk.bf16.gmra.mrb[108].mxu0 %vm624_vm2, %v2067_v28 }
 0x831   :  { %12628 = vmatprep.mubr.msk.bf16.mxu0 %vm624_vm2, %v19518_v10 }
 0x838   :  { %12629 = vmatmul.mubr.msk.bf16.vlgmr.msra.gmra.mrb[96].mxu0 %vm624_vm2, %v19520_v6 }
 0x839   :  { %12632 = vmatprep.mubr.msk.bf16.mxu0 %vm624_vm2, %v19523_v14  ;;  %12685 = vmatpush3.bf16.msra.mxu0 %v14654_v59  ;;  %v19535_v59 = vpack.c.bf16 %v19533_v18, %v19534_v15 }
 0x83a   :  { %12686 = vmatprep.subr.bf16.mxu0 %v14655_v45 }
 0x83d   :  { %12687 = vmatpush3.bf16.msra.mxu0 %v14655_v45  ;;  %v10776_v45 = vld [vmem:[%s19419_s4 + $0xa] ss:$0 sm:$0xff] }
 0x840   :  { %12633 = vmatmul.mubr.msk.bf16.gmra.mrb[100].mxu0 %vm624_vm2, %v19526_v5 }
 0x841   :  { %12636 = vmatprep.mubr.msk.bf16.mxu0 %vm624_vm2, %v19529_v21 }
 0x848   :  { %12637 = vmatmul.mubr.msk.bf16.gmra.mrb[104].mxu0 %vm624_vm2, %v19532_v51 }
 0x849   :  { %12640 = vmatprep.mubr.msk.bf16.mxu0 %vm624_vm2, %v19535_v59 }
 0x850   :  { %12641 = vmatmul.mubr.msk.bf16.gmra.mrb[108].mxu0 %vm624_vm2, %v19538_v33 }
 0x851   :  { %12688 = vmatprep.mubr.msk.bf16.mxu0 %vm258_vm1, %v15507_v41 }
 0x858   :  { %12689 = vmatmul.mubr.msk.bf16.vlgmr.msra.gmra.mrb[112].mxu0 %vm258_vm1, %v15511_v42 }
 0x859   :  { %12692 = vmatprep.mubr.msk.bf16.mxu0 %vm258_vm1, %v15534_v52 }
 0x860   :  { %12693 = vmatmul.mubr.msk.bf16.gmra.mrb[116].mxu0 %vm258_vm1, %v15538_v53 }
 0x861   :  { %12696 = vmatprep.mubr.msk.bf16.mxu0 %vm258_vm1, %v15558_v62 }
 0x868   :  { %12697 = vmatmul.mubr.msk.bf16.gmra.mrb[120].mxu0 %vm258_vm1, %v15562_v63 }
 0x869   :  { %12700 = vmatprep.mubr.msk.bf16.mxu0 %vm258_vm1, %v15582_v8 }
 0x870   :  { %12701 = vmatmul.mubr.msk.bf16.gmra.mrb[124].mxu0 %vm258_vm1, %v15586_v9 }
 0x888   :  { %v3009_v58 = vpop.xlane.xlu1 %3008 }
 0x889   :  { %v3007_v7 = vpop.xlane.xlu0 %3006 }
 0x88a   :  { %14852 = vrcp.f32 %v3007_v7 }
 0x88b   :  { %14854 = vrcp.f32 %v3009_v58 }
 0x88c   :  { %v3013_v33 = vpop.xlane.xlu1 %3012 }
 0x88d   :  { %v3011_v11 = vpop.xlane.xlu0 %3010 }
 0x88e   :  { %14856 = vrcp.f32 %v3011_v11 }
 0x88f   :  { %14858 = vrcp.f32 %v3013_v33 }
 0x894   :  { %v14853_v27 = vpop.eup %14852 }
 0x895   :  { %v3054_v28 = vmul.f32 %v14853_v27, %v16499_v39  ;;  %v14855_v58 = vpop.eup %14854 }
 0x896   :  { %v3055_v33 = vmul.f32 %v14855_v58, %v16497_v26 }
 0x897   :  { %12792 = vmatprep.mubr.f32.mxu0 %v3054_v28  ;;  %v3015_v28 = vpop.xlane.xlu0 %3014 }
 0x898   :  { %14860 = vrcp.f32 %v3015_v28 }
 0x92b   :  { %v12690_v10 = vpop.f32.mrb[112].mxu0 }
 0x92c   :  { %v2622_v40 = vpop.f32.mrb[113].mxu0  ;;  %v2631_v55 = vadd.f32 %v12690_v10, %v10776_v45 }
 0x92d   :  { %v12691_v6 = vpop.f32.mrb[114].mxu0  ;;  %v2623_v2 = vadd.f32 %v10776_v45, %v2622_v40 }
 0x92e   :  { %v2634_v37 = vadd.f32 %v12691_v6, %v10776_v45  ;;  %v2625_v14 = vpop.f32.mrb[115].mxu0 }
 0x92f   :  { %v2626_v25 = vadd.f32 %v10776_v45, %v2625_v14  ;;  %v3017_v14 = vpop.xlane.xlu1 %3016 }
 0x930   :  { %v14096_v5 = vpack.c.bf16 %v2634_v37, %v2631_v55  ;;  %14862 = vrcp.f32 %v3017_v14 }
 0x931   :  { %v14092_v3 = vpack.c.bf16 %v2626_v25, %v2623_v2 }
 0x933   :  { %v12694_v21 = vpop.f32.mrb[116].mxu0  ;;  %14093 = vmatprep.subr.bf16.mxu0 %v14092_v3 }
 0x934   :  { %v2638_v32 = vpop.f32.mrb[117].mxu0  ;;  %14095 = vmatpush3.bf16.msra.mxu0 %v14092_v3  ;;  %v2647_v51 = vadd.f32 %v12694_v21, %v10776_v45 }
 0x935   :  { %v12695_v39 = vpop.f32.mrb[118].mxu0  ;;  %14097 = vmatprep.subr.bf16.mxu0 %v14096_v5  ;;  %v2639_v59 = vadd.f32 %v10776_v45, %v2638_v32 }
 0x936   :  { %v2650_v18 = vadd.f32 %v12695_v39, %v10776_v45  ;;  %v2641_v15 = vpop.f32.mrb[119].mxu0 }
 0x937   :  { %v2642_v19 = vadd.f32 %v10776_v45, %v2641_v15 }
 0x938   :  { %14099 = vmatpush3.bf16.msra.mxu0 %v14096_v5  ;;  %v14104_v12 = vpack.c.bf16 %v2650_v18, %v2647_v51  ;;  %v3019_v5 = vpop.xlane.xlu0 %3018  ;;  %v3021_v51 = vpop.xlane.xlu1 %3020 }
 0x939   :  { %v14100_v7 = vpack.c.bf16 %v2642_v19, %v2639_v59  ;;  %14864 = vrcp.f32 %v3019_v5 }
 0x93a   :  { %14866 = vrcp.f32 %v3021_v51 }
 0x93b   :  { %v12698_v27 = vpop.f32.mrb[120].mxu0  ;;  %14101 = vmatprep.subr.bf16.mxu0 %v14100_v7 }
 0x93c   :  { %v2654_v10 = vpop.f32.mrb[121].mxu0  ;;  %14103 = vmatpush3.bf16.msra.mxu0 %v14100_v7  ;;  %v2663_v6 = vadd.f32 %v12698_v27, %v10776_v45 }
 0x93d   :  { %v12699_v40 = vpop.f32.mrb[122].mxu0  ;;  %14105 = vmatprep.subr.bf16.mxu0 %v14104_v12  ;;  %v2655_v2 = vadd.f32 %v10776_v45, %v2654_v10  ;;  %v3023_v10 = vpop.xlane.xlu0 %3022 }
 0x93e   :  { %v2666_v55 = vadd.f32 %v12699_v40, %v10776_v45  ;;  %v2657_v37 = vpop.f32.mrb[123].mxu0  ;;  %14868 = vrcp.f32 %v3023_v10 }
 0x93f   :  { %v2658_v25 = vadd.f32 %v10776_v45, %v2657_v37  ;;  %v14857_v37 = vpop.eup %14856 }
 0x940   :  { %14107 = vmatpush3.bf16.msra.mxu0 %v14104_v12  ;;  %v14112_v3 = vpack.c.bf16 %v2666_v55, %v2663_v6  ;;  %v3025_v6 = vpop.xlane.xlu1 %3024  ;;  %v10819_v55 = vld [vmem:[%s19420_s5 + $0x8] sm:$0xf]  ;;  %v14859_v14 = vpop.eup %14858 }
 0x941   :  { %v14108_v21 = vpack.c.bf16 %v2658_v25, %v2655_v2  ;;  %v3027_v11 = vpop.xlane.xlu0 %3026  ;;  %v3250_v28 = vsel %vm2094_vm4, %v10819_v55, 0  ;;  %v3056_v2 = vmul.f32 %v14857_v37, %v16507_v38  ;;  %v14861_v25 = vpop.eup %14860  ;;  %14870 = vrcp.f32 %v3025_v6 }
 0x942   :  { %14872 = vrcp.f32 %v3027_v11  ;;  %v14863_v5 = vpop.eup %14862 }
 0x943   :  { %v12702_v32 = vpop.f32.mrb[124].mxu0  ;;  %14109 = vmatprep.subr.bf16.mxu0 %v14108_v21  ;;  %v14865_v26 = vpop.eup %14864  ;;  %v3059_v38 = vmul.f32 %v14863_v5, %v16513_v35 }
 0x944   :  { %v2670_v39 = vpop.f32.mrb[125].mxu0  ;;  %14111 = vmatpush3.bf16.msra.mxu0 %v14108_v21  ;;  %v2679_v15 = vadd.f32 %v12702_v32, %v10776_v45  ;;  %v3057_v21 = vmul.f32 %v14859_v14, %v16505_v20  ;;  %v3058_v32 = vmul.f32 %v14861_v25, %v16515_v57  ;;  %v14867_v51 = vpop.eup %14866 }
 0x945   :  { %v12703_v18 = vpop.f32.mrb[126].mxu0  ;;  %14113 = vmatprep.subr.bf16.mxu0 %v14112_v3  ;;  %v2671_v7 = vadd.f32 %v10776_v45, %v2670_v39  ;;  %v3061_v57 = vmul.f32 %v14867_v51, %v16521_v23 }
 0x946   :  { %v2682_v59 = vadd.f32 %v12703_v18, %v10776_v45  ;;  %v2673_v19 = vpop.f32.mrb[127].mxu0 }
 0x947   :  { %v2674_v27 = vadd.f32 %v10776_v45, %v2673_v19  ;;  %v3029_v45 = vpop.xlane.xlu1 %3028 }
 0x948   :  { %14115 = vmatpush3.bf16.msra.mxu0 %v14112_v3  ;;  %v14120_v12 = vpack.c.bf16 %v2682_v59, %v2679_v15  ;;  %v3031_v3 = vpop.xlane.xlu0 %3030  ;;  %14874 = vrcp.f32 %v3029_v45  ;;  %v3060_v15 = vmul.f32 %v14865_v26, %v16523_v16  ;;  %v14869_v59 = vpop.eup %14868 }
 0x949   :  { %v14116_v40 = vpack.c.bf16 %v2674_v27, %v2671_v7  ;;  %14876 = vrcp.f32 %v3031_v3  ;;  %v3062_v7 = vmul.f32 %v14869_v59, %v16531_v4 }
 0x94b   :  { %14117 = vmatprep.subr.bf16.mxu0 %v14116_v40  ;;  %v3033_v39 = vpop.xlane.xlu1 %3032  ;;  %v14871_v19 = vpop.eup %14870 }
 0x94c   :  { %14119 = vmatpush3.bf16.msra.mxu0 %v14116_v40  ;;  %v3035_v18 = vpop.xlane.xlu0 %3034  ;;  %14878 = vrcp.f32 %v3033_v39  ;;  %v14873_v27 = vpop.eup %14872  ;;  %v3063_v35 = vmul.f32 %v14871_v19, %v16529_v60 }
 0x94d   :  { %14121 = vmatprep.subr.bf16.mxu0 %v14120_v12  ;;  %14880 = vrcp.f32 %v3035_v18  ;;  %v3064_v16 = vmul.f32 %v14873_v27, %v16537_v30 }
 0x94f   :  { %v3037_v20 = vpop.xlane.xlu1 %3036 }
 0x950   :  { %14123 = vmatpush3.bf16.msra.mxu0 %v14120_v12  ;;  %14882 = vrcp.f32 %v3037_v20 }
 0x951   :  { %14622 = vmatprep.subr.msk.bf16.mxu0 %vm2094_vm4, %v10819_v55 }
 0x952   :  { %v14875_v10 = vpop.eup %14874 }
 0x953   :  { %12793 = vmatmul.mubr.f32.vlgmr.msra.gmra.mrb[128].mxu0 %v3055_v33  ;;  %v14877_v12 = vpop.eup %14876  ;;  %v3065_v40 = vmul.f32 %v14875_v10, %v16535_v22  ;;  %v14656_v22 = vld [vmem:[%s19418_s3 + $0x70] sm:$0xff]  }
 0x954   :  { %12795 = vmatprep.mubr.f32.mxu0 %v3056_v2  ;;  %12817 = vmatpush3.bf16.msra.mxu0 %v3250_v28  ;;  %v3066_v23 = vmul.f32 %v14877_v12, %v16543_v43 }
 0x955   :  { %12854 = vmatprep.subr.bf16.mxu0 %v14656_v22 }
 0x956   :  { %v14879_v6 = vpop.eup %14878 }
 0x957   :  { %12796 = vmatmul.mubr.f32.gmra.mrb[130].mxu0 %v3057_v21  ;;  %v14881_v58 = vpop.eup %14880  ;;  %v3067_v4 = vmul.f32 %v14879_v6, %v16541_v47 }
 0x958   :  { %12798 = vmatprep.mubr.f32.mxu0 %v3058_v32  ;;  %v3068_v55 = vmul.f32 %v14881_v58, %v16555_v48  ;;  %v14657_v48 = vld [vmem:[%s19418_s3 + $0x78] sm:$0xff]  }
 0x95a   :  { %v14883_v11 = vpop.eup %14882 }
 0x95b   :  { %12799 = vmatmul.mubr.f32.gmra.mrb[132].mxu0 %v3059_v38  ;;  %v3069_v60 = vmul.f32 %v14883_v11, %v16548_v0 }
 0x95c   :  { %12801 = vmatprep.mubr.f32.mxu0 %v3060_v15 }
 0x95f   :  { %12802 = vmatmul.mubr.f32.gmra.mrb[134].mxu0 %v3061_v57 }
 0x960   :  { %12804 = vmatprep.mubr.f32.mxu0 %v3062_v7 }
 0x963   :  { %12805 = vmatmul.mubr.f32.gmra.mrb[136].mxu0 %v3063_v35 }
 0x964   :  { %12807 = vmatprep.mubr.f32.mxu0 %v3064_v16 }
 0x967   :  { %12808 = vmatmul.mubr.f32.gmra.mrb[138].mxu0 %v3065_v40 }
 0x968   :  { %12810 = vmatprep.mubr.f32.mxu0 %v3066_v23 }
 0x96b   :  { %12811 = vmatmul.mubr.f32.gmra.mrb[140].mxu0 %v3067_v4 }
 0x96c   :  { %12813 = vmatprep.mubr.f32.mxu0 %v3068_v55 }
 0x96f   :  { %12814 = vmatmul.mubr.f32.gmra.mrb[142].mxu0 %v3069_v60 }
 0xa26   :  { %v12794_v30 = vpop.f32.mrb[128].mxu0 }
 0xa27   :  { %v3136_v43 = vpop.f32.mrb[129].mxu0 }
 0xa28   :  { %v3215_v37 = vpack.c.bf16 %v12794_v30, %v3136_v43 }
 0xa2a   :  { %v12797_v45 = vpop.f32.mrb[130].mxu0  ;;  %12818 = vmatprep.mubr.msk.bf16.mxu0 %vm624_vm2, %v3215_v37 }
 0xa2b   :  { %v3146_v47 = vpop.f32.mrb[131].mxu0 }
 0xa2c   :  { %v3216_v33 = vpack.c.bf16 %v12797_v45, %v3146_v47 }
 0xa2e   :  { %v12800_v28 = vpop.f32.mrb[132].mxu0  ;;  %12819 = vmatmul.mubr.msk.bf16.vlgmr.msra.gmra.mrb[96].mxu0 %vm624_vm2, %v3216_v33 }
 0xa2f   :  { %v3156_v0 = vpop.f32.mrb[133].mxu0  ;;  %12855 = vmatpush3.bf16.msra.mxu0 %v14656_v22 }
 0xa30   :  { %v3217_v14 = vpack.c.bf16 %v12800_v28, %v3156_v0  ;;  %12856 = vmatprep.subr.bf16.mxu0 %v14657_v48 }
 0xa32   :  { %v12803_v2 = vpop.f32.mrb[134].mxu0  ;;  %12822 = vmatprep.mubr.msk.bf16.mxu0 %vm624_vm2, %v3217_v14 }
 0xa33   :  { %v3166_v25 = vpop.f32.mrb[135].mxu0  ;;  %12857 = vmatpush3.bf16.msra.mxu0 %v14657_v48 }
 0xa34   :  { %v3218_v3 = vpack.c.bf16 %v12803_v2, %v3166_v25 }
 0xa36   :  { %v12806_v21 = vpop.f32.mrb[136].mxu0  ;;  %12823 = vmatmul.mubr.msk.bf16.gmra.mrb[100].mxu0 %vm624_vm2, %v3218_v3 }
 0xa37   :  { %v3176_v5 = vpop.f32.mrb[137].mxu0 }
 0xa38   :  { %v3219_v32 = vpack.c.bf16 %v12806_v21, %v3176_v5 }
 0xa3a   :  { %v12809_v26 = vpop.f32.mrb[138].mxu0  ;;  %12826 = vmatprep.mubr.msk.bf16.mxu0 %vm624_vm2, %v3219_v32 }
 0xa3b   :  { %v3186_v39 = vpop.f32.mrb[139].mxu0 }
 0xa3c   :  { %v3220_v38 = vpack.c.bf16 %v12809_v26, %v3186_v39 }
 0xa3e   :  { %v12812_v51 = vpop.f32.mrb[140].mxu0  ;;  %12827 = vmatmul.mubr.msk.bf16.gmra.mrb[104].mxu0 %vm624_vm2, %v3220_v38 }
 0xa3f   :  { %v3196_v18 = vpop.f32.mrb[141].mxu0 }
 0xa40   :  { %v3221_v15 = vpack.c.bf16 %v12812_v51, %v3196_v18 }
 0xa42   :  { %v12815_v59 = vpop.f32.mrb[142].mxu0  ;;  %12830 = vmatprep.mubr.msk.bf16.mxu0 %vm624_vm2, %v3221_v15 }
 0xa43   :  { %v3206_v20 = vpop.f32.mrb[143].mxu0 }
 0xa44   :  { %v3222_v57 = vpack.c.bf16 %v12815_v59, %v3206_v20 }
 0xa46   :  { %12831 = vmatmul.mubr.msk.bf16.gmra.mrb[108].mxu0 %vm624_vm2, %v3222_v57 }
 0xa47   :  { %12858 = vmatprep.mubr.msk.bf16.mxu0 %vm258_vm1, %v15507_v41  ;;  %v3425_v41 = vadd.f32 %v16425_v1, %v16435_v50 }
 0xa4e   :  { %12859 = vmatmul.mubr.msk.bf16.vlgmr.msra.gmra.mrb[144].mxu0 %vm258_vm1, %v15511_v42 }
 0xa4f   :  { %12862 = vmatprep.mubr.msk.bf16.mxu0 %vm258_vm1, %v15534_v52  ;;  %v10849_v52 = vld [vmem:[%s19419_s4 + $0x7] ss:$0 sm:$0xff] }
 0xa56   :  { %12863 = vmatmul.mubr.msk.bf16.gmra.mrb[148].mxu0 %vm258_vm1, %v15538_v53 }
 0xa57   :  { %12866 = vmatprep.mubr.msk.bf16.mxu0 %vm258_vm1, %v15558_v62 }
 0xa5e   :  { %12867 = vmatmul.mubr.msk.bf16.gmra.mrb[152].mxu0 %vm258_vm1, %v15562_v63 }
 0xa5f   :  { %12870 = vmatprep.mubr.msk.bf16.mxu0 %vm258_vm1, %v15582_v8 }
 0xa66   :  { %12871 = vmatmul.mubr.msk.bf16.gmra.mrb[156].mxu0 %vm258_vm1, %v15586_v9 }
 0xa67   :  { %12926 = vmatprep.mubr.msk.f32.mxu0 %vm624_vm2, %v3425_v41 }
 0xb21   :  { %v12860_v42 = vpop.f32.mrb[144].mxu0 }
 0xb22   :  { %v3546_v53 = vpop.f32.mrb[145].mxu0  ;;  %v3555_v19 = vadd.f32 %v12860_v42, %v10849_v52 }
 0xb23   :  { %v12861_v62 = vpop.f32.mrb[146].mxu0  ;;  %v3547_v27 = vadd.f32 %v10849_v52, %v3546_v53 }
 0xb24   :  { %v3558_v63 = vadd.f32 %v12861_v62, %v10849_v52  ;;  %v3549_v7 = vpop.f32.mrb[147].mxu0 }
 0xb25   :  { %v3550_v8 = vadd.f32 %v10849_v52, %v3549_v7 }
 0xb26   :  { %v14130_v35 = vpack.c.bf16 %v3558_v63, %v3555_v19 }
 0xb27   :  { %v14124_v10 = vpack.c.bf16 %v3550_v8, %v3547_v27 }
 0xb29   :  { %v12864_v1 = vpop.f32.mrb[148].mxu0  ;;  %14126 = vmatprep.subr.msk.bf16.mxu0 %vm15690_vm3, %v14124_v10 }
 0xb2a   :  { %v3562_v9 = vpop.f32.mrb[149].mxu0  ;;  %14129 = vmatpush3.bf16.xpose.msk.msra.mxu0 %vm15690_vm3, %v14124_v10  ;;  %v3571_v16 = vadd.f32 %v12864_v1, %v10849_v52 }
 0xb2b   :  { %v12865_v50 = vpop.f32.mrb[150].mxu0  ;;  %14132 = vmatprep.subr.msk.bf16.mxu0 %vm15690_vm3, %v14130_v35  ;;  %v3563_v6 = vadd.f32 %v10849_v52, %v3562_v9 }
 0xb2c   :  { %v3574_v12 = vadd.f32 %v12865_v50, %v10849_v52  ;;  %v3565_v40 = vpop.f32.mrb[151].mxu0 }
 0xb2d   :  { %v3566_v23 = vadd.f32 %v10849_v52, %v3565_v40 }
 0xb2e   :  { %v14142_v58 = vpack.c.bf16 %v3574_v12, %v3571_v16 }
 0xb2f   :  { %v14136_v4 = vpack.c.bf16 %v3566_v23, %v3563_v6 }
 0xb31   :  { %v12868_v11 = vpop.f32.mrb[152].mxu0 }
 0xb32   :  { %v3578_v55 = vpop.f32.mrb[153].mxu0  ;;  %14135 = vmatpush3.bf16.xpose.msk.msra.mxu0 %vm15690_vm3, %v14130_v35  ;;  %v3587_v22 = vadd.f32 %v12868_v11, %v10849_v52 }
 0xb33   :  { %v12869_v60 = vpop.f32.mrb[154].mxu0  ;;  %14138 = vmatprep.subr.msk.bf16.mxu0 %vm15690_vm3, %v14136_v4  ;;  %v3579_v37 = vadd.f32 %v10849_v52, %v3578_v55 }
 0xb34   :  { %v3590_v30 = vadd.f32 %v12869_v60, %v10849_v52  ;;  %v3581_v43 = vpop.f32.mrb[155].mxu0 }
 0xb35   :  { %v3582_v45 = vadd.f32 %v10849_v52, %v3581_v43 }
 0xb36   :  { %v14154_v47 = vpack.c.bf16 %v3590_v30, %v3587_v22 }
 0xb37   :  { %v14148_v33 = vpack.c.bf16 %v3582_v45, %v3579_v37 }
 0xb39   :  { %v12872_v48 = vpop.f32.mrb[156].mxu0 }
 0xb3a   :  { %v3594_v28 = vpop.f32.mrb[157].mxu0  ;;  %14141 = vmatpush3.bf16.xpose.msk.msra.mxu0 %vm15690_vm3, %v14136_v4  ;;  %v3603_v14 = vadd.f32 %v12872_v48, %v10849_v52 }
 0xb3b   :  { %v12873_v0 = vpop.f32.mrb[158].mxu0  ;;  %14144 = vmatprep.subr.msk.bf16.mxu0 %vm15690_vm3, %v14142_v58  ;;  %v3595_v3 = vadd.f32 %v10849_v52, %v3594_v28 }
 0xb3c   :  { %v3606_v2 = vadd.f32 %v12873_v0, %v10849_v52  ;;  %v3597_v25 = vpop.f32.mrb[159].mxu0 }
 0xb3d   :  { %v3598_v21 = vadd.f32 %v10849_v52, %v3597_v25 }
 0xb3e   :  { %v14166_v5 = vpack.c.bf16 %v3606_v2, %v3603_v14 }
 0xb3f   :  { %v14160_v32 = vpack.c.bf16 %v3598_v21, %v3595_v3 }
 0xb42   :  { %14147 = vmatpush3.bf16.xpose.msk.msra.mxu0 %vm15690_vm3, %v14142_v58 }
 0xb43   :  { %14150 = vmatprep.subr.msk.bf16.mxu0 %vm15690_vm3, %v14148_v33 }
 0xb4a   :  { %14153 = vmatpush3.bf16.xpose.msk.msra.mxu0 %vm15690_vm3, %v14148_v33 }
 0xb4b   :  { %14156 = vmatprep.subr.msk.bf16.mxu0 %vm15690_vm3, %v14154_v47 }
 0xb52   :  { %14159 = vmatpush3.bf16.xpose.msk.msra.mxu0 %vm15690_vm3, %v14154_v47 }
 0xb53   :  { %14162 = vmatprep.subr.msk.bf16.mxu0 %vm15690_vm3, %v14160_v32 }
 0xb5a   :  { %14165 = vmatpush3.bf16.xpose.msk.msra.mxu0 %vm15690_vm3, %v14160_v32 }
 0xb5b   :  { %14168 = vmatprep.subr.msk.bf16.mxu0 %vm15690_vm3, %v14166_v5 }
 0xb62   :  { %14171 = vmatpush3.bf16.xpose.msk.msra.mxu0 %vm15690_vm3, %v14166_v5 }
 0xb69   :  { %12927 = vmatmul.mubr.msk.f32.vlgmr.msra.gmra.mrb[160].mxu0 %vm624_vm2, %v16441_v49  ;;  %v19541_v49 = vld [vmem:[#allocation35_spill] sm:$0xff] }
 0xb6a   :  { %12929 = vmatprep.mubr.msk.f32.mxu0 %vm624_vm2, %v16433_v31  ;;  %v19539_v31 = vld [vmem:[#allocation36_spill] sm:$0xff] }
 0xb6d   :  { %12930 = vmatmul.mubr.msk.f32.gmra.mrb[162].mxu0 %vm624_vm2, %v16438_v34  ;;  %v19540_v34 = vld [vmem:[#allocation34_spill] sm:$0xff] }
 0xb6e   :  { %12932 = vmatprep.mubr.msk.f32.mxu0 %vm624_vm2, %v16447_v46 }
 0xb71   :  { %12933 = vmatmul.mubr.msk.f32.gmra.mrb[164].mxu0 %vm624_vm2, %v16453_v54 }
 0xb72   :  { %12935 = vmatprep.mubr.msk.f32.mxu0 %vm624_vm2, %v16444_v36 }
 0xb75   :  { %12936 = vmatmul.mubr.msk.f32.gmra.mrb[166].mxu0 %vm624_vm2, %v16450_v61 }
 0xb76   :  { %12938 = vmatprep.mubr.msk.f32.mxu0 %vm624_vm2, %v16459_v56 }
 0xb79   :  { %12939 = vmatmul.mubr.msk.f32.gmra.mrb[168].mxu0 %vm624_vm2, %v16465_v17 }
 0xb7a   :  { %12941 = vmatprep.mubr.msk.f32.mxu0 %vm624_vm2, %v16456_v29 }
 0xb7d   :  { %12942 = vmatmul.mubr.msk.f32.gmra.mrb[170].mxu0 %vm624_vm2, %v16462_v24 }
 0xb7e   :  { %12944 = vmatprep.mubr.msk.f32.mxu0 %vm624_vm2, %v16471_v44 }
 0xb81   :  { %12945 = vmatmul.mubr.msk.f32.gmra.mrb[172].mxu0 %vm624_vm2, %v19539_v31 }
 0xb82   :  { %12947 = vmatprep.mubr.msk.f32.mxu0 %vm624_vm2, %v19540_v34 }
 0xb85   :  { %12948 = vmatmul.mubr.msk.f32.gmra.mrb[174].mxu0 %vm624_vm2, %v19541_v49 }
 0xc3c   :  { %v12928_v36 = vpop.f32.mrb[160].mxu0 }
 0xc3d   :  { %3974 = vmax.xlane.f32.xlu1 %v12928_v36  ;;  %v3893_v46 = vpop.f32.mrb[161].mxu0 }
 0xc3e   :  { %3972 = vmax.xlane.f32.xlu0 %v3893_v46 }
 0xc40   :  { %v12931_v61 = vpop.f32.mrb[162].mxu0 }
 0xc41   :  { %3978 = vmax.xlane.f32.xlu1 %v12931_v61  ;;  %v3903_v54 = vpop.f32.mrb[163].mxu0 }
 0xc42   :  { %3976 = vmax.xlane.f32.xlu0 %v3903_v54 }
 0xc44   :  { %v12934_v29 = vpop.f32.mrb[164].mxu0 }
 0xc45   :  { %3982 = vmax.xlane.f32.xlu1 %v12934_v29  ;;  %v3913_v56 = vpop.f32.mrb[165].mxu0 }
 0xc46   :  { %3980 = vmax.xlane.f32.xlu0 %v3913_v56 }
 0xc48   :  { %v12937_v24 = vpop.f32.mrb[166].mxu0 }
 0xc49   :  { %3986 = vmax.xlane.f32.xlu1 %v12937_v24  ;;  %v3923_v17 = vpop.f32.mrb[167].mxu0 }
 0xc4a   :  { %3984 = vmax.xlane.f32.xlu0 %v3923_v17 }
 0xc4c   :  { %v12940_v44 = vpop.f32.mrb[168].mxu0 }
 0xc4d   :  { %3990 = vmax.xlane.f32.xlu1 %v12940_v44  ;;  %v3933_v26 = vpop.f32.mrb[169].mxu0 }
 0xc4e   :  { %3988 = vmax.xlane.f32.xlu0 %v3933_v26 }
 0xc50   :  { %v16739_v39 = vpop.f32.mrb[170].mxu0 }
 0xc51   :  { %3994 = vmax.xlane.f32.xlu1 %v16739_v39  ;;  %v16742_v38 = vpop.f32.mrb[171].mxu0 }
 0xc52   :  { %3992 = vmax.xlane.f32.xlu0 %v16742_v38 }
 0xc54   :  { %v16745_v51 = vpop.f32.mrb[172].mxu0 }
 0xc55   :  { %3998 = vmax.xlane.f32.xlu1 %v16745_v51  ;;  %v16748_v18 = vpop.f32.mrb[173].mxu0 }
 0xc56   :  { %3996 = vmax.xlane.f32.xlu0 %v16748_v18 }
 0xc58   :  { %v16751_v15 = vpop.f32.mrb[174].mxu0 }
 0xc59   :  { %4002 = vmax.xlane.f32.xlu1 %v16751_v15  ;;  %v16754_v59 = vpop.f32.mrb[175].mxu0 }
 0xc5a   :  { %4000 = vmax.xlane.f32.xlu0 %v16754_v59 }
 0xcca   :  { %v3975_v20 = vpop.xlane.xlu1 %3974 }
 0xccb   :  { %v4005_v57 = vsub.f32 %v12928_v36, %v3975_v20  ;;  %v3973_v41 = vpop.xlane.xlu0 %3972 }
 0xccc   :  { %v4004_v42 = vsub.f32 %v3893_v46, %v3973_v41 }
 0xccd   :  { %v4022_v52 = vmul.f32 1.442695, %v4005_v57  ;;  %v10908_v57 = vld [vmem:[%s19420_s5 + $0xc] sm:$0xf] }
 0xcce   :  { %v4020_v53 = vmul.f32 1.442695, %v4004_v42  ;;  %v3979_v62 = vpop.xlane.xlu1 %3978  ;;  %14623 = vmatprep.subr.msk.bf16.mxu0 %vm2094_vm4, %v10908_v57  ;;  %v4296_v41 = vsel %vm2094_vm4, %v10908_v57, 0 }
 0xccf   :  { %14884 = vpow2.f32 %v4022_v52  ;;  %v4007_v19 = vsub.f32 %v12931_v61, %v3979_v62  ;;  %v3977_v63 = vpop.xlane.xlu0 %3976  ;;  %13007 = vmatpush3.bf16.msra.mxu0 %v4296_v41 }
 0xcd0   :  { %14886 = vpow2.f32 %v4020_v53  ;;  %v4006_v7 = vsub.f32 %v3903_v54, %v3977_v63 }
 0xcd1   :  { %v4026_v27 = vmul.f32 1.442695, %v4007_v19 }
 0xcd2   :  { %v4024_v8 = vmul.f32 1.442695, %v4006_v7  ;;  %v3983_v35 = vpop.xlane.xlu1 %3982 }
 0xcd3   :  { %14888 = vpow2.f32 %v4026_v27  ;;  %v4009_v10 = vsub.f32 %v12934_v29, %v3983_v35  ;;  %v3981_v1 = vpop.xlane.xlu0 %3980 }
 0xcd4   :  { %14890 = vpow2.f32 %v4024_v8  ;;  %v4008_v9 = vsub.f32 %v3913_v56, %v3981_v1 }
 0xcd5   :  { %v4030_v50 = vmul.f32 1.442695, %v4009_v10 }
 0xcd6   :  { %v4028_v16 = vmul.f32 1.442695, %v4008_v9  ;;  %v3987_v12 = vpop.xlane.xlu1 %3986 }
 0xcd7   :  { %14892 = vpow2.f32 %v4030_v50  ;;  %v4011_v40 = vsub.f32 %v12937_v24, %v3987_v12  ;;  %v3985_v6 = vpop.xlane.xlu0 %3984 }
 0xcd8   :  { %14894 = vpow2.f32 %v4028_v16  ;;  %v4010_v23 = vsub.f32 %v3923_v17, %v3985_v6 }
 0xcd9   :  { %v16757_v58 = vpop.eup %14884  ;;  %v4034_v4 = vmul.f32 1.442695, %v4011_v40 }
 0xcda   :  { %v16759_v11 = vpop.eup %14886  ;;  %v4032_v55 = vmul.f32 1.442695, %v4010_v23  ;;  %v3991_v60 = vpop.xlane.xlu1 %3990  ;;  %4054 = vadd.xlane.f32.xlu1 %v16757_v58 }
 0xcdb   :  { %14896 = vpow2.f32 %v4034_v4  ;;  %v4013_v22 = vsub.f32 %v12940_v44, %v3991_v60  ;;  %v3989_v30 = vpop.xlane.xlu0 %3988  ;;  %4052 = vadd.xlane.f32.xlu0 %v16759_v11 }
 0xcdc   :  { %14898 = vpow2.f32 %v4032_v55  ;;  %v4012_v43 = vsub.f32 %v3933_v26, %v3989_v30 }
 0xcdd   :  { %v16763_v37 = vpop.eup %14888  ;;  %v4038_v45 = vmul.f32 1.442695, %v4013_v22 }
 0xcde   :  { %v16765_v47 = vpop.eup %14890  ;;  %v4036_v33 = vmul.f32 1.442695, %v4012_v43  ;;  %v3995_v48 = vpop.xlane.xlu1 %3994  ;;  %4058 = vadd.xlane.f32.xlu1 %v16763_v37 }
 0xcdf   :  { %14900 = vpow2.f32 %v4038_v45  ;;  %v4015_v28 = vsub.f32 %v16739_v39, %v3995_v48  ;;  %v3993_v0 = vpop.xlane.xlu0 %3992  ;;  %4056 = vadd.xlane.f32.xlu0 %v16765_v47 }
 0xce0   :  { %14902 = vpow2.f32 %v4036_v33  ;;  %v4014_v14 = vsub.f32 %v16742_v38, %v3993_v0 }
 0xce1   :  { %v16771_v2 = vpop.eup %14892  ;;  %v4042_v25 = vmul.f32 1.442695, %v4015_v28 }
 0xce2   :  { %v16773_v3 = vpop.eup %14894  ;;  %v4040_v21 = vmul.f32 1.442695, %v4014_v14  ;;  %v3999_v5 = vpop.xlane.xlu1 %3998  ;;  %4062 = vadd.xlane.f32.xlu1 %v16771_v2 }
 0xce3   :  { %14904 = vpow2.f32 %v4042_v25  ;;  %v4017_v32 = vsub.f32 %v16745_v51, %v3999_v5  ;;  %v3997_v31 = vpop.xlane.xlu0 %3996  ;;  %4060 = vadd.xlane.f32.xlu0 %v16773_v3 }
 0xce4   :  { %14906 = vpow2.f32 %v4040_v21  ;;  %v4016_v34 = vsub.f32 %v16748_v18, %v3997_v31 }
 0xce5   :  { %v16779_v49 = vpop.eup %14896  ;;  %v4046_v36 = vmul.f32 1.442695, %v4017_v32 }
 0xce6   :  { %v16781_v46 = vpop.eup %14898  ;;  %v4044_v61 = vmul.f32 1.442695, %v4016_v34  ;;  %4066 = vadd.xlane.f32.xlu1 %v16779_v49  ;;  %v4003_v54 = vpop.xlane.xlu1 %4002 }
 0xce7   :  { %14908 = vpow2.f32 %v4046_v36  ;;  %v4019_v29 = vsub.f32 %v16751_v15, %v4003_v54  ;;  %4064 = vadd.xlane.f32.xlu0 %v16781_v46  ;;  %v4001_v56 = vpop.xlane.xlu0 %4000 }
 0xce8   :  { %14910 = vpow2.f32 %v4044_v61  ;;  %v4018_v24 = vsub.f32 %v16754_v59, %v4001_v56 }
 0xce9   :  { %v16787_v17 = vpop.eup %14900  ;;  %v4050_v44 = vmul.f32 1.442695, %v4019_v29 }
 0xcea   :  { %v16789_v26 = vpop.eup %14902  ;;  %v4048_v39 = vmul.f32 1.442695, %v4018_v24  ;;  %4070 = vadd.xlane.f32.xlu1 %v16787_v17 }
 0xceb   :  { %14912 = vpow2.f32 %v4050_v44  ;;  %4068 = vadd.xlane.f32.xlu0 %v16789_v26 }
 0xcec   :  { %14914 = vpow2.f32 %v4048_v39 }
 0xced   :  { %v16793_v38 = vpop.eup %14904 }
 0xcee   :  { %v16795_v51 = vpop.eup %14906  ;;  %4074 = vadd.xlane.f32.xlu1 %v16793_v38 }
 0xcef   :  { %4072 = vadd.xlane.f32.xlu0 %v16795_v51 }
 0xcf1   :  { %v16799_v18 = vpop.eup %14908 }
 0xcf2   :  { %v16801_v15 = vpop.eup %14910  ;;  %4078 = vadd.xlane.f32.xlu1 %v16799_v18 }
 0xcf3   :  { %4076 = vadd.xlane.f32.xlu0 %v16801_v15 }
 0xcf5   :  { %v16805_v59 = vpop.eup %14912 }
 0xcf6   :  { %v16807_v20 = vpop.eup %14914  ;;  %4082 = vadd.xlane.f32.xlu1 %v16805_v59 }
 0xcf7   :  { %4080 = vadd.xlane.f32.xlu0 %v16807_v20 }
 0xd67   :  { %v4055_v42 = vpop.xlane.xlu1 %4054 }
 0xd68   :  { %14916 = vrcp.f32 %v4055_v42  ;;  %v4053_v52 = vpop.xlane.xlu0 %4052 }
 0xd69   :  { %14918 = vrcp.f32 %v4053_v52 }
 0xd6b   :  { %v4059_v53 = vpop.xlane.xlu1 %4058 }
 0xd6c   :  { %14920 = vrcp.f32 %v4059_v53  ;;  %v4057_v62 = vpop.xlane.xlu0 %4056 }
 0xd6d   :  { %14922 = vrcp.f32 %v4057_v62 }
 0xd6f   :  { %v4063_v19 = vpop.xlane.xlu1 %4062 }
 0xd70   :  { %14924 = vrcp.f32 %v4063_v19  ;;  %v4061_v63 = vpop.xlane.xlu0 %4060 }
 0xd71   :  { %14926 = vrcp.f32 %v4061_v63 }
 0xd72   :  { %v14917_v7 = vpop.eup %14916 }
 0xd73   :  { %v14919_v27 = vpop.eup %14918  ;;  %v4067_v8 = vpop.xlane.xlu1 %4066  ;;  %v4101_v1 = vmul.f32 %v14917_v7, %v16757_v58 }
 0xd74   :  { %14928 = vrcp.f32 %v4067_v8  ;;  %v4065_v35 = vpop.xlane.xlu0 %4064  ;;  %v4100_v10 = vmul.f32 %v14919_v27, %v16759_v11 }
 0xd75   :  { %14930 = vrcp.f32 %v4065_v35  ;;  %v16843_v35 = vld [vmem:[%s19422_s7] ss:$0 sm:$0xff] }
 0xd76   :  { %v14921_v9 = vpop.eup %14920  ;;  %12982 = vmatprep.mubr.f32.mxu1 %v4100_v10 }
 0xd77   :  { %v14923_v50 = vpop.eup %14922  ;;  %v4071_v16 = vpop.xlane.xlu1 %4070  ;;  %12983 = vmatmul.mubr.f32.vlgmr.msra.gmra.mrb[160].mxu1 %v4101_v1  ;;  %v4103_v6 = vmul.f32 %v14921_v9, %v16763_v37 }
 0xd78   :  { %14932 = vrcp.f32 %v4071_v16  ;;  %v4069_v12 = vpop.xlane.xlu0 %4068  ;;  %v4102_v40 = vmul.f32 %v14923_v50, %v16765_v47 }
 0xd79   :  { %14934 = vrcp.f32 %v4069_v12 }
 0xd7a   :  { %v14925_v23 = vpop.eup %14924  ;;  %12985 = vmatprep.mubr.f32.mxu1 %v4102_v40  ;;  %v19542_v40 = vld [vmem:[#allocation6_spill] sm:$0xff] }
 0xd7b   :  { %v14927_v4 = vpop.eup %14926  ;;  %v4075_v55 = vpop.xlane.xlu1 %4074  ;;  %12986 = vmatmul.mubr.f32.gmra.mrb[162].mxu1 %v4103_v6  ;;  %v4105_v60 = vmul.f32 %v14925_v23, %v16771_v2 }
 0xd7c   :  { %14936 = vrcp.f32 %v4075_v55  ;;  %v4073_v11 = vpop.xlane.xlu0 %4072  ;;  %v4104_v58 = vmul.f32 %v14927_v4, %v16773_v3  ;;  %v19543_v55 = vld [vmem:[#allocation8_spill] sm:$0xff] }
 0xd7d   :  { %14938 = vrcp.f32 %v4073_v11 }
 0xd7e   :  { %v14929_v22 = vpop.eup %14928  ;;  %12988 = vmatprep.mubr.f32.mxu1 %v4104_v58  ;;  %v19544_v58 = vld [vmem:[#allocation7_spill] sm:$0xff] }
 0xd7f   :  { %v14931_v30 = vpop.eup %14930  ;;  %v4079_v43 = vpop.xlane.xlu1 %4078  ;;  %12989 = vmatmul.mubr.f32.gmra.mrb[164].mxu1 %v4105_v60  ;;  %v4107_v47 = vmul.f32 %v14929_v22, %v16779_v49 }
 0xd80   :  { %14940 = vrcp.f32 %v4079_v43  ;;  %v4077_v45 = vpop.xlane.xlu0 %4076  ;;  %v4106_v37 = vmul.f32 %v14931_v30, %v16781_v46  ;;  %v19545_v30 = vld [vmem:[#allocation5_spill] sm:$0xff] }
 0xd81   :  { %14942 = vrcp.f32 %v4077_v45 }
 0xd82   :  { %v14933_v33 = vpop.eup %14932  ;;  %12991 = vmatprep.mubr.f32.mxu1 %v4106_v37 }
 0xd83   :  { %v14935_v48 = vpop.eup %14934  ;;  %v4083_v28 = vpop.xlane.xlu1 %4082  ;;  %12992 = vmatmul.mubr.f32.gmra.mrb[166].mxu1 %v4107_v47  ;;  %v4109_v2 = vmul.f32 %v14933_v33, %v16787_v17 }
 0xd84   :  { %14944 = vrcp.f32 %v4083_v28  ;;  %v4081_v0 = vpop.xlane.xlu0 %4080  ;;  %v4108_v14 = vmul.f32 %v14935_v48, %v16789_v26 }
 0xd85   :  { %14946 = vrcp.f32 %v4081_v0 }
 0xd86   :  { %v14937_v25 = vpop.eup %14936  ;;  %12994 = vmatprep.mubr.f32.mxu1 %v4108_v14 }
 0xd87   :  { %v14939_v3 = vpop.eup %14938  ;;  %12995 = vmatmul.mubr.f32.gmra.mrb[168].mxu1 %v4109_v2  ;;  %v4111_v5 = vmul.f32 %v14937_v25, %v16793_v38  ;;  %v19546_v2 = vld [vmem:[#allocation10_spill] sm:$0xff] }
 0xd88   :  { %v4110_v21 = vmul.f32 %v14939_v3, %v16795_v51 }
 0xd8a   :  { %v14941_v32 = vpop.eup %14940  ;;  %12997 = vmatprep.mubr.f32.mxu1 %v4110_v21 }
 0xd8b   :  { %v14943_v31 = vpop.eup %14942  ;;  %12998 = vmatmul.mubr.f32.gmra.mrb[170].mxu1 %v4111_v5  ;;  %v4113_v49 = vmul.f32 %v14941_v32, %v16799_v18  ;;  %v19547_v32 = vld [vmem:[#allocation12_spill] sm:$0xff] }
 0xd8c   :  { %v4112_v34 = vmul.f32 %v14943_v31, %v16801_v15 }
 0xd8e   :  { %v14945_v36 = vpop.eup %14944  ;;  %13000 = vmatprep.mubr.f32.mxu1 %v4112_v34  ;;  %v19548_v34 = vld [vmem:[#allocation11_spill] sm:$0xff] }
 0xd8f   :  { %v14947_v46 = vpop.eup %14946  ;;  %13001 = vmatmul.mubr.f32.gmra.mrb[172].mxu1 %v4113_v49  ;;  %v4115_v54 = vmul.f32 %v14945_v36, %v16805_v59 }
 0xd90   :  { %v4114_v61 = vmul.f32 %v14947_v46, %v16807_v20  ;;  %v19549_v46 = vld [vmem:[#allocation9_spill] sm:$0xff] }
 0xd92   :  { %13003 = vmatprep.mubr.f32.mxu1 %v4114_v61 }
 0xd93   :  { %13004 = vmatmul.mubr.f32.gmra.mrb[174].mxu1 %v4115_v54 }
 0xe4a   :  { %v12984_v29 = vpop.f32.mrb[160].mxu1 }
 0xe4b   :  { %v4182_v56 = vpop.f32.mrb[161].mxu1 }
 0xe4c   :  { %v4261_v24 = vpack.c.bf16 %v12984_v29, %v4182_v56 }
 0xe4e   :  { %v12987_v17 = vpop.f32.mrb[162].mxu1  ;;  %13008 = vmatprep.mubr.msk.bf16.mxu0 %vm624_vm2, %v4261_v24 }
 0xe4f   :  { %v4192_v44 = vpop.f32.mrb[163].mxu1 }
 0xe50   :  { %v4262_v26 = vpack.c.bf16 %v12987_v17, %v4192_v44 }
 0xe52   :  { %v12990_v39 = vpop.f32.mrb[164].mxu1  ;;  %13009 = vmatmul.mubr.msk.bf16.vlgmr.msra.gmra.mrb[96].mxu0 %vm624_vm2, %v4262_v26 }
 0xe53   :  { %v4202_v38 = vpop.f32.mrb[165].mxu1 }
 0xe54   :  { %v4263_v51 = vpack.c.bf16 %v12990_v39, %v4202_v38  ;;  %v19550_v38 = vld [vmem:[#allocation14_spill] sm:$0xff] }
 0xe56   :  { %v12993_v18 = vpop.f32.mrb[166].mxu1  ;;  %13012 = vmatprep.mubr.msk.bf16.mxu0 %vm624_vm2, %v4263_v51 }
 0xe57   :  { %v4212_v15 = vpop.f32.mrb[167].mxu1 }
 0xe58   :  { %v4264_v59 = vpack.c.bf16 %v12993_v18, %v4212_v15 }
 0xe5a   :  { %v12996_v20 = vpop.f32.mrb[168].mxu1  ;;  %13013 = vmatmul.mubr.msk.bf16.gmra.mrb[100].mxu0 %vm624_vm2, %v4264_v59 }
 0xe5b   :  { %v4222_v57 = vpop.f32.mrb[169].mxu1 }
 0xe5c   :  { %v4265_v41 = vpack.c.bf16 %v12996_v20, %v4222_v57  ;;  %v19551_v20 = vld [vmem:[#allocation16_spill] sm:$0xff] }
 0xe5e   :  { %v12999_v42 = vpop.f32.mrb[170].mxu1  ;;  %13016 = vmatprep.mubr.msk.bf16.mxu0 %vm624_vm2, %v4265_v41  ;;  %v19552_v41 = vld [vmem:[#allocation15_spill] sm:$0xff] }
 0xe5f   :  { %v4232_v52 = vpop.f32.mrb[171].mxu1 }
 0xe60   :  { %v4266_v53 = vpack.c.bf16 %v12999_v42, %v4232_v52 }
 0xe62   :  { %v13002_v62 = vpop.f32.mrb[172].mxu1  ;;  %13017 = vmatmul.mubr.msk.bf16.gmra.mrb[104].mxu0 %vm624_vm2, %v4266_v53  ;;  %v19553_v53 = vld [vmem:[#allocation13_spill] sm:$0xff] }
 0xe63   :  { %v4242_v19 = vpop.f32.mrb[173].mxu1 }
 0xe64   :  { %v4267_v63 = vpack.c.bf16 %v13002_v62, %v4242_v19 }
 0xe66   :  { %v13005_v7 = vpop.f32.mrb[174].mxu1  ;;  %13020 = vmatprep.mubr.msk.bf16.mxu0 %vm624_vm2, %v4267_v63 }
 0xe67   :  { %v4252_v27 = vpop.f32.mrb[175].mxu1 }
 0xe68   :  { %v4268_v8 = vpack.c.bf16 %v13005_v7, %v4252_v27 }
 0xe6a   :  { %13021 = vmatmul.mubr.msk.bf16.gmra.mrb[108].mxu0 %vm624_vm2, %v4268_v8 }
 0xf25   :  { %v13010_v10 = vpop.f32.mrb[96].mxu0 }
 0xf26   :  { %v4332_v1 = vpop.f32.mrb[97].mxu0  ;;  %v4419_v9 = vadd.f32 %v13010_v10, %v16843_v35 }
 0xf27   :  { %v4417_v50 = vadd.f32 %v16843_v35, %v4332_v1  ;;  %v13011_v16 = vpop.f32.mrb[98].mxu0 }
 0xf28   :  { %v4335_v12 = vpop.f32.mrb[99].mxu0  ;;  %v4420_v23 = vadd.f32 %v13011_v16, %v16843_v35  ;;  %v16853_v11 = vadd.f32 %v4419_v9, %v19543_v55 }
 0xf29   :  { %v16848_v6 = vadd.f32 %v4417_v50, %v19542_v40  ;;  %v4418_v4 = vadd.f32 %v16843_v35, %v4335_v12  ;;  %v19554_v50 = vld [vmem:[#allocation18_spill] sm:$0xff] }
 0xf2a   :  { %v16861_v43 = vadd.f32 %v4420_v23, %v19545_v30  ;;  %v4455_v0 = vsel %vm258_vm1, %v16853_v11, 0.0 }
 0xf2b   :  { %v16856_v60 = vadd.f32 %v4418_v4, %v19544_v58  ;;  %v4449_v22 = vsel %vm258_vm1, %v16848_v6, 0.0  ;;  %v19555_v4 = vld [vmem:[#allocation20_spill] sm:$0xff]  ;;  %v19556_v58 = vld [vmem:[#allocation19_spill] sm:$0xff] }
 0xf2c   :  { %4450 = vadd.xlane.f32.xlu0 %v4449_v22  ;;  %v4458_v5 = vsel %vm258_vm1, %v16861_v43, 0.0 }
 0xf2d   :  { %v13014_v45 = vpop.f32.mrb[100].mxu0  ;;  %v4452_v37 = vsel %vm258_vm1, %v16856_v60, 0.0 }
 0xf2e   :  { %4453 = vadd.xlane.f32.xlu1 %v4452_v37  ;;  %v4348_v47 = vpop.f32.mrb[101].mxu0  ;;  %v4423_v33 = vadd.f32 %v13014_v45, %v16843_v35  ;;  %v19557_v45 = vld [vmem:[#allocation17_spill] sm:$0xff] }
 0xf2f   :  { %v4421_v48 = vadd.f32 %v16843_v35, %v4348_v47  ;;  %v13015_v28 = vpop.f32.mrb[102].mxu0 }
 0xf30   :  { %4456 = vadd.xlane.f32.xlu0 %v4455_v0  ;;  %v4351_v14 = vpop.f32.mrb[103].mxu0  ;;  %v4424_v3 = vadd.f32 %v13015_v28, %v16843_v35  ;;  %v16877_v31 = vadd.f32 %v4423_v33, %v19547_v32 }
 0xf31   :  { %v16870_v25 = vadd.f32 %v4421_v48, %v19546_v2  ;;  %v4422_v21 = vadd.f32 %v16843_v35, %v4351_v14  ;;  %v14658_v48 = vld [vmem:[%s19421_s6] sm:$0xff]  }
 0xf32   :  { %4459 = vadd.xlane.f32.xlu1 %v4458_v5  ;;  %v16885_v61 = vadd.f32 %v4424_v3, %v19549_v46  ;;  %v4467_v26 = vsel %vm258_vm1, %v16877_v31, 0.0  ;;  %13024 = vmatprep.subr.bf16.mxu1 %v14658_v48 }
 0xf33   :  { %v16880_v49 = vadd.f32 %v4422_v21, %v19548_v34  ;;  %v4461_v36 = vsel %vm258_vm1, %v16870_v25, 0.0  ;;  %13025 = vmatpush3.bf16.msra.mxu1 %v14658_v48 }
 0xf34   :  { %4462 = vadd.xlane.f32.xlu0 %v4461_v36  ;;  %v4470_v59 = vsel %vm258_vm1, %v16885_v61, 0.0 }
 0xf35   :  { %v13018_v54 = vpop.f32.mrb[104].mxu0  ;;  %v4464_v29 = vsel %vm258_vm1, %v16880_v49, 0.0 }
 0xf36   :  { %4465 = vadd.xlane.f32.xlu1 %v4464_v29  ;;  %v4364_v56 = vpop.f32.mrb[105].mxu0  ;;  %v4427_v24 = vadd.f32 %v13018_v54, %v16843_v35 }
 0xf37   :  { %v4425_v17 = vadd.f32 %v16843_v35, %v4364_v56  ;;  %v13019_v44 = vpop.f32.mrb[106].mxu0 }
 0xf38   :  { %4468 = vadd.xlane.f32.xlu0 %v4467_v26  ;;  %v4367_v39 = vpop.f32.mrb[107].mxu0  ;;  %v4428_v18 = vadd.f32 %v13019_v44, %v16843_v35  ;;  %v16901_v57 = vadd.f32 %v4427_v24, %v19551_v20 }
 0xf39   :  { %v16894_v51 = vadd.f32 %v4425_v17, %v19550_v38  ;;  %v4426_v15 = vadd.f32 %v16843_v35, %v4367_v39 }
 0xf3a   :  { %4471 = vadd.xlane.f32.xlu1 %v4470_v59  ;;  %v16909_v62 = vadd.f32 %v4428_v18, %v19553_v53  ;;  %v4479_v1 = vsel %vm258_vm1, %v16901_v57, 0.0 }
 0xf3b   :  { %v16904_v42 = vadd.f32 %v4426_v15, %v19552_v41  ;;  %v4473_v52 = vsel %vm258_vm1, %v16894_v51, 0.0 }
 0xf3c   :  { %4474 = vadd.xlane.f32.xlu0 %v4473_v52  ;;  %v4482_v23 = vsel %vm258_vm1, %v16909_v62, 0.0 }
 0xf3d   :  { %v13022_v19 = vpop.f32.mrb[108].mxu0  ;;  %v4476_v63 = vsel %vm258_vm1, %v16904_v42, 0.0 }
 0xf3e   :  { %4477 = vadd.xlane.f32.xlu1 %v4476_v63  ;;  %v4380_v7 = vpop.f32.mrb[109].mxu0  ;;  %v4431_v27 = vadd.f32 %v13022_v19, %v16843_v35 }
 0xf3f   :  { %v4429_v8 = vadd.f32 %v16843_v35, %v4380_v7  ;;  %v13023_v10 = vpop.f32.mrb[110].mxu0 }
 0xf40   :  { %4480 = vadd.xlane.f32.xlu0 %v4479_v1  ;;  %v4383_v9 = vpop.f32.mrb[111].mxu0  ;;  %v4432_v12 = vadd.f32 %v13023_v10, %v16843_v35  ;;  %v16925_v55 = vadd.f32 %v4431_v27, %v19555_v4 }
 0xf41   :  { %v16918_v16 = vadd.f32 %v4429_v8, %v19554_v50  ;;  %v4430_v40 = vadd.f32 %v16843_v35, %v4383_v9 }
 0xf42   :  { %4483 = vadd.xlane.f32.xlu1 %v4482_v23  ;;  %v16933_v37 = vadd.f32 %v4432_v12, %v19557_v45  ;;  %v4491_v47 = vsel %vm258_vm1, %v16925_v55, 0.0 }
 0xf43   :  { %v16928_v22 = vadd.f32 %v4430_v40, %v19556_v58  ;;  %v4485_v30 = vsel %vm258_vm1, %v16918_v16, 0.0 }
 0xf44   :  { %4486 = vadd.xlane.f32.xlu0 %v4485_v30  ;;  %v4494_v33 = vsel %vm258_vm1, %v16933_v37, 0.0 }
 0xf45   :  { %v4488_v35 = vsel %vm258_vm1, %v16928_v22, 0.0 }
 0xf46   :  { %4489 = vadd.xlane.f32.xlu1 %v4488_v35 }
 0xf48   :  { %4492 = vadd.xlane.f32.xlu0 %v4491_v47 }
 0xf4a   :  { %4495 = vadd.xlane.f32.xlu1 %v4494_v33 }
 0xfb9   :  { %v4451_v28 = vpop.xlane.xlu0 %4450 }
 0xfba   :  { %v4498_v0 = vmul.f32 0.03125, %v4451_v28 }
 0xfbb   :  { %v4454_v14 = vpop.xlane.xlu1 %4453 }
 0xfbc   :  { %v16945_v2 = vsub.f32 %v16848_v6, %v4498_v0  ;;  %v4499_v3 = vmul.f32 0.03125, %v4454_v14 }
 0xfbd   :  { %v4457_v21 = vpop.xlane.xlu0 %4456 }
 0xfbe   :  { %v16948_v5 = vsub.f32 %v16856_v60, %v4499_v3  ;;  %v4500_v32 = vmul.f32 0.03125, %v4457_v21  ;;  %v4530_v34 = vmul.f32 %v16945_v2, %v16945_v2 }
 0xfbf   :  { %v4460_v36 = vpop.xlane.xlu1 %4459 }
 0xfc0   :  { %v16953_v46 = vsub.f32 %v16853_v11, %v4500_v32  ;;  %v4501_v54 = vmul.f32 0.03125, %v4460_v36  ;;  %v4546_v29 = vsel %vm258_vm1, %v4530_v34, 0.0  ;;  %v4531_v6 = vmul.f32 %v16948_v5, %v16948_v5 }
 0xfc1   :  { %4547 = vadd.xlane.f32.xlu0 %v4546_v29  ;;  %v4463_v56 = vpop.xlane.xlu0 %4462 }
 0xfc2   :  { %v16959_v24 = vsub.f32 %v16861_v43, %v4501_v54  ;;  %v4502_v60 = vmul.f32 0.03125, %v4463_v56  ;;  %v4549_v17 = vsel %vm258_vm1, %v4531_v6, 0.0  ;;  %v4532_v44 = vmul.f32 %v16953_v46, %v16953_v46 }
 0xfc3   :  { %v4466_v26 = vpop.xlane.xlu1 %4465  ;;  %4550 = vadd.xlane.f32.xlu1 %v4549_v17 }
 0xfc4   :  { %v16965_v11 = vsub.f32 %v16870_v25, %v4502_v60  ;;  %v4503_v39 = vmul.f32 0.03125, %v4466_v26  ;;  %v4552_v38 = vsel %vm258_vm1, %v4532_v44, 0.0  ;;  %v4533_v18 = vmul.f32 %v16959_v24, %v16959_v24 }
 0xfc5   :  { %4553 = vadd.xlane.f32.xlu0 %v4552_v38  ;;  %v4469_v43 = vpop.xlane.xlu0 %4468 }
 0xfc6   :  { %v16971_v15 = vsub.f32 %v16880_v49, %v4503_v39  ;;  %v4504_v59 = vmul.f32 0.03125, %v4469_v43  ;;  %v4555_v20 = vsel %vm258_vm1, %v4533_v18, 0.0  ;;  %v4534_v41 = vmul.f32 %v16965_v11, %v16965_v11  ;;  %v17046_v18 = vld [vmem:[%s19421_s6 + $0x10] sm:$0xff]  }
 0xfc7   :  { %v4472_v52 = vpop.xlane.xlu1 %4471  ;;  %4556 = vadd.xlane.f32.xlu1 %v4555_v20 }
 0xfc8   :  { %v16977_v25 = vsub.f32 %v16877_v31, %v4504_v59  ;;  %v4505_v53 = vmul.f32 0.03125, %v4472_v52  ;;  %v4558_v19 = vsel %vm258_vm1, %v4534_v41, 0.0  ;;  %v4535_v63 = vmul.f32 %v16971_v15, %v16971_v15 }
 0xfc9   :  { %4559 = vadd.xlane.f32.xlu0 %v4558_v19  ;;  %v4475_v49 = vpop.xlane.xlu0 %4474 }
 0xfca   :  { %v16983_v7 = vsub.f32 %v16885_v61, %v4505_v53  ;;  %v4506_v27 = vmul.f32 0.03125, %v4475_v49  ;;  %v4561_v8 = vsel %vm258_vm1, %v4535_v63, 0.0  ;;  %v4536_v10 = vmul.f32 %v16977_v25, %v16977_v25 }
 0xfcb   :  { %v4478_v1 = vpop.xlane.xlu1 %4477  ;;  %4562 = vadd.xlane.f32.xlu1 %v4561_v8 }
 0xfcc   :  { %v16989_v31 = vsub.f32 %v16894_v51, %v4506_v27  ;;  %v4507_v9 = vmul.f32 0.03125, %v4478_v1  ;;  %v4564_v50 = vsel %vm258_vm1, %v4536_v10, 0.0  ;;  %v4537_v12 = vmul.f32 %v16983_v7, %v16983_v7 }
 0xfcd   :  { %4565 = vadd.xlane.f32.xlu0 %v4564_v50  ;;  %v4481_v61 = vpop.xlane.xlu0 %4480 }
 0xfce   :  { %v16995_v40 = vsub.f32 %v16904_v42, %v4507_v9  ;;  %v4508_v23 = vmul.f32 0.03125, %v4481_v61  ;;  %v4567_v4 = vsel %vm258_vm1, %v4537_v12, 0.0  ;;  %v4538_v58 = vmul.f32 %v16989_v31, %v16989_v31 }
 0xfcf   :  { %v4484_v30 = vpop.xlane.xlu1 %4483  ;;  %4568 = vadd.xlane.f32.xlu1 %v4567_v4 }
 0xfd0   :  { %v17001_v51 = vsub.f32 %v16901_v57, %v4508_v23  ;;  %v4509_v45 = vmul.f32 0.03125, %v4484_v30  ;;  %v4570_v35 = vsel %vm258_vm1, %v4538_v58, 0.0  ;;  %v4539_v47 = vmul.f32 %v16995_v40, %v16995_v40 }
 0xfd1   :  { %4571 = vadd.xlane.f32.xlu0 %v4570_v35  ;;  %v4487_v42 = vpop.xlane.xlu0 %4486  ;;  %v17052_v35 = vld [vmem:[%s19422_s7 + $0x3] ss:$0 sm:$0xff] }
 0xfd2   :  { %v17007_v33 = vsub.f32 %v16909_v62, %v4509_v45  ;;  %v4510_v48 = vmul.f32 0.03125, %v4487_v42  ;;  %v4573_v28 = vsel %vm258_vm1, %v4539_v47, 0.0  ;;  %v4540_v0 = vmul.f32 %v17001_v51, %v17001_v51 }
 0xfd3   :  { %4574 = vadd.xlane.f32.xlu1 %v4573_v28  ;;  %v4490_v57 = vpop.xlane.xlu1 %4489 }
 0xfd4   :  { %v17013_v14 = vsub.f32 %v16918_v16, %v4510_v48  ;;  %v4511_v3 = vmul.f32 0.03125, %v4490_v57  ;;  %v4576_v21 = vsel %vm258_vm1, %v4540_v0, 0.0  ;;  %v4541_v32 = vmul.f32 %v17007_v33, %v17007_v33 }
 0xfd5   :  { %4577 = vadd.xlane.f32.xlu0 %v4576_v21  ;;  %v4493_v62 = vpop.xlane.xlu0 %4492 }
 0xfd6   :  { %v17019_v34 = vsub.f32 %v16928_v22, %v4511_v3  ;;  %v4512_v36 = vmul.f32 0.03125, %v4493_v62  ;;  %v4579_v54 = vsel %vm258_vm1, %v4541_v32, 0.0  ;;  %v4542_v29 = vmul.f32 %v17013_v14, %v17013_v14 }
 0xfd7   :  { %4580 = vadd.xlane.f32.xlu1 %v4579_v54  ;;  %v4496_v16 = vpop.xlane.xlu1 %4495  ;;  %v17060_v54 = vld [vmem:[%s19422_s7 + $0x4] ss:$0 sm:$0xff] }
 0xfd8   :  { %v17025_v6 = vsub.f32 %v16925_v55, %v4512_v36  ;;  %v4513_v56 = vmul.f32 0.03125, %v4496_v16  ;;  %v4582_v60 = vsel %vm258_vm1, %v4542_v29, 0.0  ;;  %v4543_v17 = vmul.f32 %v17019_v34, %v17019_v34 }
 0xfd9   :  { %4583 = vadd.xlane.f32.xlu0 %v4582_v60 }
 0xfda   :  { %v17031_v22 = vsub.f32 %v16933_v37, %v4513_v56  ;;  %v4585_v44 = vsel %vm258_vm1, %v4543_v17, 0.0  ;;  %v4544_v26 = vmul.f32 %v17025_v6, %v17025_v6  ;;  %v14659_v37 = vld [vmem:[%s19421_s6 + $0x8] sm:$0xff]  }
 0xfdb   :  { %4586 = vadd.xlane.f32.xlu1 %v4585_v44  ;;  %13026 = vmatprep.subr.bf16.mxu1 %v14659_v37 }
 0xfdc   :  { %v4588_v39 = vsel %vm258_vm1, %v4544_v26, 0.0  ;;  %v4545_v55 = vmul.f32 %v17031_v22, %v17031_v22  ;;  %13027 = vmatpush3.bf16.msra.mxu1 %v14659_v37 }
 0xfdd   :  { %4589 = vadd.xlane.f32.xlu0 %v4588_v39  ;;  %13044 = vmatprep.subr.bf16.mxu1 %v17046_v18 }
 0xfde   :  { %v4591_v38 = vsel %vm258_vm1, %v4545_v55, 0.0 }
 0xfdf   :  { %4592 = vadd.xlane.f32.xlu1 %v4591_v38 }
0x104e   :  { %v4548_v43 = vpop.xlane.xlu0 %4547 }
0x104f   :  { %v4594_v59 = vmul.f32 0.03125, %v4548_v43 }
0x1050   :  { %v4551_v20 = vpop.xlane.xlu1 %4550 }
0x1051   :  { %v4610_v41 = vadd.f32 1e-05, %v4594_v59  ;;  %v4595_v52 = vmul.f32 0.03125, %v4551_v20 }
0x1052   :  { %v4554_v53 = vpop.xlane.xlu0 %4553 }
0x1053   :  { %14948 = vrsqrt.f32 %v4610_v41  ;;  %v4611_v19 = vadd.f32 1e-05, %v4595_v52  ;;  %v4596_v63 = vmul.f32 0.03125, %v4554_v53 }
0x1054   :  { %v4557_v49 = vpop.xlane.xlu1 %4556 }
0x1055   :  { %14950 = vrsqrt.f32 %v4611_v19  ;;  %v4612_v27 = vadd.f32 1e-05, %v4596_v63  ;;  %v4597_v8 = vmul.f32 0.03125, %v4557_v49 }
0x1056   :  { %v4560_v10 = vpop.xlane.xlu0 %4559 }
0x1057   :  { %14952 = vrsqrt.f32 %v4612_v27  ;;  %v4613_v1 = vadd.f32 1e-05, %v4597_v8  ;;  %v4598_v9 = vmul.f32 0.03125, %v4560_v10 }
0x1058   :  { %v4563_v50 = vpop.xlane.xlu1 %4562 }
0x1059   :  { %14954 = vrsqrt.f32 %v4613_v1  ;;  %v4614_v12 = vadd.f32 1e-05, %v4598_v9  ;;  %v4599_v61 = vmul.f32 0.03125, %v4563_v50 }
0x105a   :  { %v4566_v23 = vpop.xlane.xlu0 %4565 }
0x105b   :  { %14956 = vrsqrt.f32 %v4614_v12  ;;  %v4615_v4 = vadd.f32 1e-05, %v4599_v61  ;;  %v4600_v58 = vmul.f32 0.03125, %v4566_v23 }
0x105c   :  { %v4569_v30 = vpop.xlane.xlu1 %4568 }
0x105d   :  { %v14949_v45 = vpop.eup %14948  ;;  %14958 = vrsqrt.f32 %v4615_v4  ;;  %v4616_v47 = vadd.f32 1e-05, %v4600_v58  ;;  %v4601_v42 = vmul.f32 0.03125, %v4569_v30  ;;  %v14661_v58 = vld [vmem:[%s19421_s6 + $0x18] sm:$0xff]  }
0x105e   :  { %v4572_v48 = vpop.xlane.xlu0 %4571  ;;  %v4642_v28 = vmul.f32 %v14949_v45, %v16945_v2 }
0x105f   :  { %v14951_v0 = vpop.eup %14950  ;;  %14960 = vrsqrt.f32 %v4616_v47  ;;  %v4617_v57 = vadd.f32 1e-05, %v4601_v42  ;;  %v4602_v3 = vmul.f32 0.03125, %v4572_v48 }
0x1060   :  { %v4575_v21 = vpop.xlane.xlu1 %4574  ;;  %v4643_v32 = vmul.f32 %v14951_v0, %v16948_v5  ;;  %v4664_v62 = vmul.f32 %v17052_v35, %v4642_v28 }
0x1061   :  { %v14953_v36 = vpop.eup %14952  ;;  %14962 = vrsqrt.f32 %v4617_v57  ;;  %v4618_v29 = vadd.f32 1e-05, %v4602_v3  ;;  %v4603_v16 = vmul.f32 0.03125, %v4575_v21 }
0x1062   :  { %v4644_v2 = vmul.f32 %v14953_v36, %v16953_v46  ;;  %v4578_v56 = vpop.xlane.xlu0 %4577  ;;  %v4665_v60 = vmul.f32 %v17052_v35, %v4643_v32  ;;  %v17067_v38 = vadd.f32 %v17060_v54, %v4664_v62 }
0x1063   :  { %v14955_v17 = vpop.eup %14954  ;;  %14964 = vrsqrt.f32 %v4618_v29  ;;  %v4619_v44 = vadd.f32 1e-05, %v4603_v16  ;;  %v4604_v5 = vmul.f32 0.03125, %v4578_v56 }
0x1064   :  { %v4666_v26 = vmul.f32 %v17052_v35, %v4644_v2  ;;  %v4645_v39 = vmul.f32 %v14955_v17, %v16959_v24  ;;  %v4581_v55 = vpop.xlane.xlu1 %4580  ;;  %v17070_v37 = vadd.f32 %v17060_v54, %v4665_v60 }
0x1065   :  { %v14957_v43 = vpop.eup %14956  ;;  %14966 = vrsqrt.f32 %v4619_v44  ;;  %v4620_v46 = vadd.f32 1e-05, %v4604_v5  ;;  %v4605_v59 = vmul.f32 0.03125, %v4581_v55 }
0x1066   :  { %v4667_v20 = vmul.f32 %v17052_v35, %v4645_v39  ;;  %v4584_v41 = vpop.xlane.xlu0 %4583  ;;  %v4702_v52 = vpack.c.bf16 %v17070_v37, %v17067_v38  ;;  %v4646_v53 = vmul.f32 %v14957_v43, %v16965_v11  ;;  %v17077_v49 = vadd.f32 %v17060_v54, %v4666_v26 }
0x1067   :  { %v14959_v24 = vpop.eup %14958  ;;  %14968 = vrsqrt.f32 %v4620_v46  ;;  %v4621_v19 = vadd.f32 1e-05, %v4605_v59  ;;  %v4606_v63 = vmul.f32 0.03125, %v4584_v41 }
0x1068   :  { %v17080_v27 = vadd.f32 %v17060_v54, %v4667_v20  ;;  %v4587_v8 = vpop.xlane.xlu1 %4586  ;;  %13028 = vmatprep.mubr.msk.bf16.mxu1 %vm258_vm1, %v4702_v52  ;;  %v4647_v10 = vmul.f32 %v14959_v24, %v16971_v15  ;;  %v4668_v1 = vmul.f32 %v17052_v35, %v4646_v53 }
0x1069   :  { %v14961_v9 = vpop.eup %14960  ;;  %14970 = vrsqrt.f32 %v4621_v19  ;;  %v4622_v11 = vadd.f32 1e-05, %v4606_v63  ;;  %v4607_v50 = vmul.f32 0.03125, %v4587_v8 }
0x106a   :  { %v4590_v12 = vpop.xlane.xlu0 %4589  ;;  %v4703_v61 = vpack.c.bf16 %v17080_v27, %v17077_v49  ;;  %v4669_v23 = vmul.f32 %v17052_v35, %v4647_v10  ;;  %v4648_v4 = vmul.f32 %v14961_v9, %v16977_v25  ;;  %v17094_v42 = vadd.f32 %v17060_v54, %v4668_v1 }
0x106b   :  { %v14963_v30 = vpop.eup %14962  ;;  %14972 = vrsqrt.f32 %v4622_v11  ;;  %v4623_v15 = vadd.f32 1e-05, %v4607_v50  ;;  %v4608_v45 = vmul.f32 0.03125, %v4590_v12 }
0x106c   :  { %v4593_v47 = vpop.xlane.xlu1 %4592  ;;  %13029 = vmatmul.mubr.msk.bf16.vlgmr.msra.gmra.mrb[176].mxu1 %vm258_vm1, %v4703_v61  ;;  %v17097_v48 = vadd.f32 %v17060_v54, %v4669_v23  ;;  %v4649_v28 = vmul.f32 %v14963_v30, %v16983_v7  ;;  %v4670_v25 = vmul.f32 %v17052_v35, %v4648_v4 }
0x106d   :  { %v14965_v0 = vpop.eup %14964  ;;  %14974 = vrsqrt.f32 %v4623_v15  ;;  %v4624_v57 = vadd.f32 1e-05, %v4608_v45  ;;  %v4609_v3 = vmul.f32 0.03125, %v4593_v47  ;;  %13045 = vmatpush3.bf16.msra.mxu1 %v17046_v18 }
0x106e   :  { %v4704_v21 = vpack.c.bf16 %v17097_v48, %v17094_v42  ;;  %v4671_v32 = vmul.f32 %v17052_v35, %v4649_v28  ;;  %v4650_v62 = vmul.f32 %v14965_v0, %v16989_v31  ;;  %13046 = vmatprep.subr.bf16.mxu1 %v14661_v58  ;;  %v17108_v7 = vadd.f32 %v17060_v54, %v4670_v25 }
0x106f   :  { %v14967_v36 = vpop.eup %14966  ;;  %14976 = vrsqrt.f32 %v4624_v57  ;;  %v4625_v29 = vadd.f32 1e-05, %v4609_v3 }
0x1070   :  { %13032 = vmatprep.mubr.msk.bf16.mxu1 %vm258_vm1, %v4704_v21  ;;  %v17111_v16 = vadd.f32 %v17060_v54, %v4671_v32  ;;  %v4651_v18 = vmul.f32 %v14967_v36, %v16995_v40  ;;  %v4672_v2 = vmul.f32 %v17052_v35, %v4650_v62 }
0x1071   :  { %v14969_v56 = vpop.eup %14968  ;;  %14978 = vrsqrt.f32 %v4625_v29  ;;  %13047 = vmatpush3.bf16.msra.mxu1 %v14661_v58 }
0x1072   :  { %v4705_v31 = vpack.c.bf16 %v17111_v16, %v17108_v7  ;;  %v4673_v60 = vmul.f32 %v17052_v35, %v4651_v18  ;;  %v4652_v17 = vmul.f32 %v14969_v56, %v17001_v51  ;;  %v17121_v5 = vadd.f32 %v17060_v54, %v4672_v2 }
0x1073   :  { %v14971_v44 = vpop.eup %14970 }
0x1074   :  { %13033 = vmatmul.mubr.msk.bf16.gmra.mrb[180].mxu1 %vm258_vm1, %v4705_v31  ;;  %v17124_v40 = vadd.f32 %v17060_v54, %v4673_v60  ;;  %v4653_v26 = vmul.f32 %v14971_v44, %v17007_v33  ;;  %v4674_v39 = vmul.f32 %v17052_v35, %v4652_v17 }
0x1075   :  { %v14973_v55 = vpop.eup %14972 }
0x1076   :  { %v4706_v43 = vpack.c.bf16 %v17124_v40, %v17121_v5  ;;  %v4675_v46 = vmul.f32 %v17052_v35, %v4653_v26  ;;  %v4654_v51 = vmul.f32 %v14973_v55, %v17013_v14  ;;  %v17134_v20 = vadd.f32 %v17060_v54, %v4674_v39 }
0x1077   :  { %v14975_v59 = vpop.eup %14974 }
0x1078   :  { %13036 = vmatprep.mubr.msk.bf16.mxu1 %vm258_vm1, %v4706_v43  ;;  %v17137_v41 = vadd.f32 %v17060_v54, %v4675_v46  ;;  %v4655_v33 = vmul.f32 %v14975_v59, %v17019_v34  ;;  %v4676_v52 = vmul.f32 %v17052_v35, %v4654_v51 }
0x1079   :  { %v14977_v53 = vpop.eup %14976 }
0x107a   :  { %v4707_v24 = vpack.c.bf16 %v17137_v41, %v17134_v20  ;;  %v4677_v19 = vmul.f32 %v17052_v35, %v4655_v33  ;;  %v4656_v14 = vmul.f32 %v14977_v53, %v17025_v6  ;;  %v17147_v8 = vadd.f32 %v17060_v54, %v4676_v52 }
0x107b   :  { %v14979_v63 = vpop.eup %14978 }
0x107c   :  { %13037 = vmatmul.mubr.msk.bf16.gmra.mrb[184].mxu1 %vm258_vm1, %v4707_v24  ;;  %v17150_v10 = vadd.f32 %v17060_v54, %v4677_v19  ;;  %v4657_v34 = vmul.f32 %v14979_v63, %v17031_v22  ;;  %v4678_v1 = vmul.f32 %v17052_v35, %v4656_v14  ;;  %v10920_v22 = vld [vmem:[%s19422_s7 + $0x1] ss:$0 sm:$0xff] }
0x107e   :  { %v4708_v9 = vpack.c.bf16 %v17150_v10, %v17147_v8  ;;  %v4679_v11 = vmul.f32 %v17052_v35, %v4657_v34  ;;  %v17159_v6 = vadd.f32 %v17060_v54, %v4678_v1 }
0x1080   :  { %13040 = vmatprep.mubr.msk.bf16.mxu1 %vm258_vm1, %v4708_v9  ;;  %v17162_v50 = vadd.f32 %v17060_v54, %v4679_v11 }
0x1082   :  { %v4709_v12 = vpack.c.bf16 %v17162_v50, %v17159_v6 }
0x1084   :  { %13041 = vmatmul.mubr.msk.bf16.gmra.mrb[188].mxu1 %vm258_vm1, %v4709_v12 }
0x113f   :  { %v13030_v61 = vpop.f32.mrb[176].mxu1 }
0x1140   :  { %v4799_v23 = vadd.f32 %v13030_v61, %v10920_v22  ;;  %v4790_v35 = vpop.f32.mrb[177].mxu1 }
0x1141   :  { %v4791_v4 = vadd.f32 %v10920_v22, %v4790_v35  ;;  %v13031_v58 = vpop.f32.mrb[178].mxu1 }
0x1142   :  { %v4802_v30 = vadd.f32 %v13031_v58, %v10920_v22  ;;  %v4793_v15 = vpop.f32.mrb[179].mxu1  ;;  %v4855_v47 = vmax.f32 %v4799_v23, 0.0 }
0x1143   :  { %v4794_v45 = vadd.f32 %v10920_v22, %v4793_v15  ;;  %v4853_v28 = vmax.f32 %v4791_v4, 0.0 }
0x1144   :  { %v4856_v54 = vmax.f32 %v4802_v30, 0.0 }
0x1145   :  { %v4854_v25 = vmax.f32 %v4794_v45, 0.0 }
0x1146   :  { %v4870_v0 = vpack.c.bf16 %v4856_v54, %v4855_v47 }
0x1147   :  { %v4869_v57 = vpack.c.bf16 %v4854_v25, %v4853_v28  ;;  %v13034_v3 = vpop.f32.mrb[180].mxu1  ;;  %v17181_v28 = vld [vmem:[%s19422_s7 + $0x2] ss:$0 sm:$0xff] }
0x1148   :  { %v4815_v21 = vadd.f32 %v13034_v3, %v10920_v22  ;;  %v4806_v32 = vpop.f32.mrb[181].mxu1 }
0x1149   :  { %v4807_v62 = vadd.f32 %v10920_v22, %v4806_v32  ;;  %v13035_v36 = vpop.f32.mrb[182].mxu1  ;;  %13048 = vmatprep.mubr.msk.bf16.mxu1 %vm258_vm1, %v4869_v57 }
0x114a   :  { %v4818_v29 = vadd.f32 %v13035_v36, %v10920_v22  ;;  %v4809_v18 = vpop.f32.mrb[183].mxu1  ;;  %13049 = vmatmul.mubr.msk.bf16.vlgmr.msra.gmra.mrb[192].mxu1 %vm258_vm1, %v4870_v0  ;;  %v4859_v56 = vmax.f32 %v4815_v21, 0.0 }
0x114b   :  { %v4810_v2 = vadd.f32 %v10920_v22, %v4809_v18  ;;  %v4857_v60 = vmax.f32 %v4807_v62, 0.0 }
0x114c   :  { %v4860_v31 = vmax.f32 %v4818_v29, 0.0 }
0x114d   :  { %v4858_v17 = vmax.f32 %v4810_v2, 0.0 }
0x114e   :  { %v4872_v44 = vpack.c.bf16 %v4860_v31, %v4859_v56 }
0x114f   :  { %v4871_v26 = vpack.c.bf16 %v4858_v17, %v4857_v60  ;;  %v13038_v39 = vpop.f32.mrb[184].mxu1 }
0x1150   :  { %v4831_v55 = vadd.f32 %v13038_v39, %v10920_v22  ;;  %v4822_v43 = vpop.f32.mrb[185].mxu1 }
0x1151   :  { %v4823_v46 = vadd.f32 %v10920_v22, %v4822_v43  ;;  %v13039_v51 = vpop.f32.mrb[186].mxu1  ;;  %13052 = vmatprep.mubr.msk.bf16.mxu1 %vm258_vm1, %v4871_v26 }
0x1152   :  { %v4834_v59 = vadd.f32 %v13039_v51, %v10920_v22  ;;  %v4825_v33 = vpop.f32.mrb[187].mxu1  ;;  %13053 = vmatmul.mubr.msk.bf16.gmra.mrb[196].mxu1 %vm258_vm1, %v4872_v44  ;;  %v4863_v53 = vmax.f32 %v4831_v55, 0.0 }
0x1153   :  { %v4826_v52 = vadd.f32 %v10920_v22, %v4825_v33  ;;  %v4861_v19 = vmax.f32 %v4823_v46, 0.0 }
0x1154   :  { %v4864_v24 = vmax.f32 %v4834_v59, 0.0 }
0x1155   :  { %v4862_v14 = vmax.f32 %v4826_v52, 0.0 }
0x1156   :  { %v4874_v63 = vpack.c.bf16 %v4864_v24, %v4863_v53 }
0x1157   :  { %v4873_v34 = vpack.c.bf16 %v4862_v14, %v4861_v19  ;;  %v13042_v1 = vpop.f32.mrb[188].mxu1 }
0x1158   :  { %v4847_v9 = vadd.f32 %v13042_v1, %v10920_v22  ;;  %v4838_v11 = vpop.f32.mrb[189].mxu1 }
0x1159   :  { %v4839_v12 = vadd.f32 %v10920_v22, %v4838_v11  ;;  %v13043_v61 = vpop.f32.mrb[190].mxu1  ;;  %13056 = vmatprep.mubr.msk.bf16.mxu1 %vm258_vm1, %v4873_v34 }
0x115a   :  { %v4850_v23 = vadd.f32 %v13043_v61, %v10920_v22  ;;  %v4841_v35 = vpop.f32.mrb[191].mxu1  ;;  %13057 = vmatmul.mubr.msk.bf16.gmra.mrb[200].mxu1 %vm258_vm1, %v4874_v63  ;;  %v4867_v58 = vmax.f32 %v4847_v9, 0.0 }
0x115b   :  { %v4842_v4 = vadd.f32 %v10920_v22, %v4841_v35  ;;  %v4865_v15 = vmax.f32 %v4839_v12, 0.0 }
0x115c   :  { %v4868_v30 = vmax.f32 %v4850_v23, 0.0 }
0x115d   :  { %v4866_v45 = vmax.f32 %v4842_v4, 0.0 }
0x115e   :  { %v4876_v47 = vpack.c.bf16 %v4868_v30, %v4867_v58 }
0x115f   :  { %v4875_v54 = vpack.c.bf16 %v4866_v45, %v4865_v15 }
0x1161   :  { %13060 = vmatprep.mubr.msk.bf16.mxu1 %vm258_vm1, %v4875_v54 }
0x1162   :  { %13061 = vmatmul.mubr.msk.bf16.gmra.mrb[204].mxu1 %vm258_vm1, %v4876_v47 }
0x121d   :  { %v13050_v25 = vpop.f32.mrb[192].mxu1 }
0x121e   :  { %v4958_v0 = vpop.f32.mrb[193].mxu1  ;;  %v4967_v57 = vadd.f32 %v13050_v25, %v17181_v28 }
0x121f   :  { %v4959_v22 = vadd.f32 %v17181_v28, %v4958_v0  ;;  %v13051_v3 = vpop.f32.mrb[194].mxu1 }
0x1220   :  { %v4961_v21 = vpop.f32.mrb[195].mxu1  ;;  %v4970_v62 = vadd.f32 %v13051_v3, %v17181_v28  ;;  %v17191_v29 = vadd.f32 %v4967_v57, %v17077_v49 }
0x1221   :  { %v17186_v32 = vadd.f32 %v4959_v22, %v17067_v38  ;;  %v4962_v36 = vadd.f32 %v17181_v28, %v4961_v21 }
0x1222   :  { %v17199_v56 = vadd.f32 %v4970_v62, %v17080_v27 }
0x1223   :  { %v17194_v18 = vadd.f32 %v4962_v36, %v17070_v37  ;;  %v5037_v2 = vsel %vm258_vm1, %v17186_v32, 0.0  ;;  %v5043_v37 = vsel %vm258_vm1, %v17191_v29, 0.0 }
0x1224   :  { %5038 = vadd.xlane.f32.xlu0 %v5037_v2  ;;  %v5046_v43 = vsel %vm258_vm1, %v17199_v56, 0.0 }
0x1225   :  { %v13054_v31 = vpop.f32.mrb[196].mxu1  ;;  %v5040_v38 = vsel %vm258_vm1, %v17194_v18, 0.0 }
0x1226   :  { %v4974_v60 = vpop.f32.mrb[197].mxu1  ;;  %5041 = vadd.xlane.f32.xlu1 %v5040_v38  ;;  %v4983_v17 = vadd.f32 %v13054_v31, %v17181_v28 }
0x1227   :  { %v4975_v49 = vadd.f32 %v17181_v28, %v4974_v60  ;;  %v13055_v44 = vpop.f32.mrb[198].mxu1 }
0x1228   :  { %v4977_v26 = vpop.f32.mrb[199].mxu1  ;;  %5044 = vadd.xlane.f32.xlu0 %v5043_v37  ;;  %v4986_v27 = vadd.f32 %v13055_v44, %v17181_v28  ;;  %v17215_v46 = vadd.f32 %v4983_v17, %v17108_v7 }
0x1229   :  { %v17208_v39 = vadd.f32 %v4975_v49, %v17094_v42  ;;  %v4978_v55 = vadd.f32 %v17181_v28, %v4977_v26 }
0x122a   :  { %5047 = vadd.xlane.f32.xlu1 %v5046_v43  ;;  %v17223_v42 = vadd.f32 %v4986_v27, %v17111_v16 }
0x122b   :  { %v17218_v51 = vadd.f32 %v4978_v55, %v17097_v48  ;;  %v5049_v59 = vsel %vm258_vm1, %v17208_v39, 0.0  ;;  %v5055_v48 = vsel %vm258_vm1, %v17215_v46, 0.0 }
0x122c   :  { %5050 = vadd.xlane.f32.xlu0 %v5049_v59  ;;  %v5058_v1 = vsel %vm258_vm1, %v17223_v42, 0.0 }
0x122d   :  { %v13058_v33 = vpop.f32.mrb[200].mxu1  ;;  %v5052_v52 = vsel %vm258_vm1, %v17218_v51, 0.0 }
0x122e   :  { %v4990_v53 = vpop.f32.mrb[201].mxu1  ;;  %5053 = vadd.xlane.f32.xlu1 %v5052_v52  ;;  %v4999_v24 = vadd.f32 %v13058_v33, %v17181_v28 }
0x122f   :  { %v4991_v7 = vadd.f32 %v17181_v28, %v4990_v53  ;;  %v13059_v19 = vpop.f32.mrb[202].mxu1 }
0x1230   :  { %v4993_v14 = vpop.f32.mrb[203].mxu1  ;;  %5056 = vadd.xlane.f32.xlu0 %v5055_v48  ;;  %v5002_v16 = vadd.f32 %v13059_v19, %v17181_v28  ;;  %v17239_v9 = vadd.f32 %v4999_v24, %v17134_v20 }
0x1231   :  { %v17232_v63 = vadd.f32 %v4991_v7, %v17121_v5  ;;  %v4994_v34 = vadd.f32 %v17181_v28, %v4993_v14 }
0x1232   :  { %5059 = vadd.xlane.f32.xlu1 %v5058_v1  ;;  %v17247_v5 = vadd.f32 %v5002_v16, %v17137_v41 }
0x1233   :  { %v17242_v11 = vadd.f32 %v4994_v34, %v17124_v40  ;;  %v5061_v12 = vsel %vm258_vm1, %v17232_v63, 0.0  ;;  %v5067_v40 = vsel %vm258_vm1, %v17239_v9, 0.0 }
0x1234   :  { %5062 = vadd.xlane.f32.xlu0 %v5061_v12  ;;  %v5070_v47 = vsel %vm258_vm1, %v17247_v5, 0.0 }
0x1235   :  { %v13062_v61 = vpop.f32.mrb[204].mxu1  ;;  %v5064_v23 = vsel %vm258_vm1, %v17242_v11, 0.0 }
0x1236   :  { %5065 = vadd.xlane.f32.xlu1 %v5064_v23  ;;  %v5006_v35 = vpop.f32.mrb[205].mxu1  ;;  %v5015_v4 = vadd.f32 %v13062_v61, %v17181_v28 }
0x1237   :  { %v5007_v20 = vadd.f32 %v17181_v28, %v5006_v35  ;;  %v13063_v58 = vpop.f32.mrb[206].mxu1 }
0x1238   :  { %5068 = vadd.xlane.f32.xlu0 %v5067_v40  ;;  %v5009_v30 = vpop.f32.mrb[207].mxu1  ;;  %v5018_v41 = vadd.f32 %v13063_v58, %v17181_v28  ;;  %v17263_v54 = vadd.f32 %v5015_v4, %v17159_v6 }
0x1239   :  { %v17256_v15 = vadd.f32 %v5007_v20, %v17147_v8  ;;  %v5010_v45 = vadd.f32 %v17181_v28, %v5009_v30 }
0x123a   :  { %5071 = vadd.xlane.f32.xlu1 %v5070_v47  ;;  %v17271_v8 = vadd.f32 %v5018_v41, %v17162_v50  ;;  %v5079_v57 = vsel %vm258_vm1, %v17263_v54, 0.0 }
0x123b   :  { %v17266_v25 = vadd.f32 %v5010_v45, %v17150_v10  ;;  %v5073_v0 = vsel %vm258_vm1, %v17256_v15, 0.0  ;;  %v14662_v10 = vld [vmem:[%s19418_s3 + $0x100] sm:$0xff]  }
0x123c   :  { %5074 = vadd.xlane.f32.xlu0 %v5073_v0  ;;  %v5082_v6 = vsel %vm258_vm1, %v17271_v8, 0.0  ;;  %13084 = vmatprep.subr.bf16.mxu1 %v14662_v10 }
0x123d   :  { %v5076_v28 = vsel %vm258_vm1, %v17266_v25, 0.0  ;;  %13085 = vmatpush3.bf16.msra.mxu1 %v14662_v10 }
0x123e   :  { %5077 = vadd.xlane.f32.xlu1 %v5076_v28 }
0x1240   :  { %5080 = vadd.xlane.f32.xlu0 %v5079_v57 }
0x1242   :  { %5083 = vadd.xlane.f32.xlu1 %v5082_v6 }
0x12b1   :  { %v5039_v50 = vpop.xlane.xlu0 %5038 }
0x12b2   :  { %v5085_v22 = vmul.f32 0.03125, %v5039_v50 }
0x12b3   :  { %v5042_v3 = vpop.xlane.xlu1 %5041 }
0x12b4   :  { %v17283_v21 = vsub.f32 %v17186_v32, %v5085_v22  ;;  %v5086_v62 = vmul.f32 0.03125, %v5042_v3 }
0x12b5   :  { %v5045_v36 = vpop.xlane.xlu0 %5044 }
0x12b6   :  { %v17286_v2 = vsub.f32 %v17194_v18, %v5086_v62  ;;  %v5087_v31 = vmul.f32 0.03125, %v5045_v36  ;;  %v5117_v38 = vmul.f32 %v17283_v21, %v17283_v21 }
0x12b7   :  { %v5048_v60 = vpop.xlane.xlu1 %5047 }
0x12b8   :  { %v17291_v17 = vsub.f32 %v17191_v29, %v5087_v31  ;;  %v5088_v49 = vmul.f32 0.03125, %v5048_v60  ;;  %v5133_v44 = vsel %vm258_vm1, %v5117_v38, 0.0  ;;  %v5118_v32 = vmul.f32 %v17286_v2, %v17286_v2 }
0x12b9   :  { %v5051_v37 = vpop.xlane.xlu0 %5050  ;;  %5134 = vadd.xlane.f32.xlu0 %v5133_v44 }
0x12ba   :  { %v17297_v26 = vsub.f32 %v17199_v56, %v5088_v49  ;;  %v5089_v18 = vmul.f32 0.03125, %v5051_v37  ;;  %v5136_v27 = vsel %vm258_vm1, %v5118_v32, 0.0  ;;  %v5119_v55 = vmul.f32 %v17291_v17, %v17291_v17 }
0x12bb   :  { %v5054_v43 = vpop.xlane.xlu1 %5053  ;;  %5137 = vadd.xlane.f32.xlu1 %v5136_v27 }
0x12bc   :  { %v17303_v29 = vsub.f32 %v17208_v39, %v5089_v18  ;;  %v5090_v59 = vmul.f32 0.03125, %v5054_v43  ;;  %v5139_v33 = vsel %vm258_vm1, %v5119_v55, 0.0  ;;  %v5120_v52 = vmul.f32 %v17297_v26, %v17297_v26 }
0x12bd   :  { %v5057_v53 = vpop.xlane.xlu0 %5056  ;;  %5140 = vadd.xlane.f32.xlu0 %v5139_v33 }
0x12be   :  { %v17309_v56 = vsub.f32 %v17218_v51, %v5090_v59  ;;  %v5091_v24 = vmul.f32 0.03125, %v5057_v53  ;;  %v5142_v7 = vsel %vm258_vm1, %v5120_v52, 0.0  ;;  %v5121_v19 = vmul.f32 %v17303_v29, %v17303_v29  ;;  %v14663_v52 = vld [vmem:[%s19418_s3 + $0x108] sm:$0xff]  }
0x12bf   :  { %v5060_v48 = vpop.xlane.xlu1 %5059  ;;  %5143 = vadd.xlane.f32.xlu1 %v5142_v7  ;;  %v14665_v53 = vld [vmem:[%s19418_s3 + $0xc8] sm:$0xff]   ;;  %13086 = vmatprep.subr.bf16.mxu1 %v14663_v52 }
0x12c0   :  { %v17315_v39 = vsub.f32 %v17215_v46, %v5091_v24  ;;  %v5092_v14 = vmul.f32 0.03125, %v5060_v48  ;;  %v5145_v16 = vsel %vm258_vm1, %v5121_v19, 0.0  ;;  %v5122_v34 = vmul.f32 %v17309_v56, %v17309_v56  ;;  %13087 = vmatpush3.bf16.msra.mxu1 %v14663_v52  ;;  %v17390_v24 = vld [vmem:[%s19418_s3 + $0x140] sm:$0xff]  }
0x12c1   :  { %v5063_v1 = vpop.xlane.xlu0 %5062  ;;  %5146 = vadd.xlane.f32.xlu0 %v5145_v16 }
0x12c2   :  { %v17321_v51 = vsub.f32 %v17223_v42, %v5092_v14  ;;  %v5093_v12 = vmul.f32 0.03125, %v5063_v1  ;;  %v5148_v61 = vsel %vm258_vm1, %v5122_v34, 0.0  ;;  %v5123_v23 = vmul.f32 %v17315_v39, %v17315_v39 }
0x12c3   :  { %v5066_v35 = vpop.xlane.xlu1 %5065  ;;  %5149 = vadd.xlane.f32.xlu1 %v5148_v61 }
0x12c4   :  { %v17327_v46 = vsub.f32 %v17232_v63, %v5093_v12  ;;  %v5094_v4 = vmul.f32 0.03125, %v5066_v35  ;;  %v5151_v20 = vsel %vm258_vm1, %v5123_v23, 0.0  ;;  %v5124_v58 = vmul.f32 %v17321_v51, %v17321_v51 }
0x12c5   :  { %v5069_v40 = vpop.xlane.xlu0 %5068  ;;  %5152 = vadd.xlane.f32.xlu0 %v5151_v20 }
0x12c6   :  { %v17333_v42 = vsub.f32 %v17242_v11, %v5094_v4  ;;  %v5095_v30 = vmul.f32 0.03125, %v5069_v40  ;;  %v5154_v41 = vsel %vm258_vm1, %v5124_v58, 0.0  ;;  %v5125_v45 = vmul.f32 %v17327_v46, %v17327_v46 }
0x12c7   :  { %v5072_v47 = vpop.xlane.xlu1 %5071  ;;  %5155 = vadd.xlane.f32.xlu1 %v5154_v41 }
0x12c8   :  { %v17339_v63 = vsub.f32 %v17239_v9, %v5095_v30  ;;  %v5096_v0 = vmul.f32 0.03125, %v5072_v47  ;;  %v5157_v28 = vsel %vm258_vm1, %v5125_v45, 0.0  ;;  %v5126_v57 = vmul.f32 %v17333_v42, %v17333_v42 }
0x12c9   :  { %5158 = vadd.xlane.f32.xlu0 %v5157_v28  ;;  %v5075_v11 = vpop.xlane.xlu0 %5074 }
0x12ca   :  { %v17345_v6 = vsub.f32 %v17247_v5, %v5096_v0  ;;  %v5097_v10 = vmul.f32 0.03125, %v5075_v11  ;;  %v5160_v50 = vsel %vm258_vm1, %v5126_v57, 0.0  ;;  %v5127_v22 = vmul.f32 %v17339_v63, %v17339_v63  ;;  %v17396_v11 = vld [vmem:[%s19422_s7 + $0x5] ss:$0 sm:$0xff] }
0x12cb   :  { %5161 = vadd.xlane.f32.xlu1 %v5160_v50  ;;  %v5078_v9 = vpop.xlane.xlu1 %5077 }
0x12cc   :  { %v17351_v3 = vsub.f32 %v17256_v15, %v5097_v10  ;;  %v5098_v62 = vmul.f32 0.03125, %v5078_v9  ;;  %v5163_v36 = vsel %vm258_vm1, %v5127_v22, 0.0  ;;  %v5128_v31 = vmul.f32 %v17345_v6, %v17345_v6 }
0x12cd   :  { %5164 = vadd.xlane.f32.xlu0 %v5163_v36  ;;  %v5081_v5 = vpop.xlane.xlu0 %5080 }
0x12ce   :  { %v17357_v38 = vsub.f32 %v17266_v25, %v5098_v62  ;;  %v5099_v60 = vmul.f32 0.03125, %v5081_v5  ;;  %v5166_v49 = vsel %vm258_vm1, %v5128_v31, 0.0  ;;  %v5129_v44 = vmul.f32 %v17351_v3, %v17351_v3 }
0x12cf   :  { %5167 = vadd.xlane.f32.xlu1 %v5166_v49  ;;  %v5084_v15 = vpop.xlane.xlu1 %5083 }
0x12d0   :  { %v17363_v32 = vsub.f32 %v17263_v54, %v5099_v60  ;;  %v5100_v37 = vmul.f32 0.03125, %v5084_v15  ;;  %v5169_v18 = vsel %vm258_vm1, %v5129_v44, 0.0  ;;  %v5130_v27 = vmul.f32 %v17357_v38, %v17357_v38  ;;  %v17404_v15 = vld [vmem:[%s19422_s7 + $0x6] ss:$0 sm:$0xff] }
0x12d1   :  { %5170 = vadd.xlane.f32.xlu0 %v5169_v18 }
0x12d2   :  { %v17369_v25 = vsub.f32 %v17271_v8, %v5100_v37  ;;  %v5172_v55 = vsel %vm258_vm1, %v5130_v27, 0.0  ;;  %v5131_v43 = vmul.f32 %v17363_v32, %v17363_v32  ;;  %v14664_v8 = vld [vmem:[%s19418_s3 + $0xc0] sm:$0xff]  }
0x12d3   :  { %5173 = vadd.xlane.f32.xlu1 %v5172_v55  ;;  %13064 = vmatprep.subr.bf16.mxu0 %v14664_v8 }
0x12d4   :  { %v5175_v59 = vsel %vm258_vm1, %v5131_v43, 0.0  ;;  %v5132_v54 = vmul.f32 %v17369_v25, %v17369_v25  ;;  %13065 = vmatpush3.bf16.msra.mxu0 %v14664_v8 }
0x12d5   :  { %5176 = vadd.xlane.f32.xlu0 %v5175_v59  ;;  %13066 = vmatprep.subr.bf16.mxu0 %v14665_v53 }
0x12d6   :  { %v5178_v33 = vsel %vm258_vm1, %v5132_v54, 0.0 }
0x12d7   :  { %5179 = vadd.xlane.f32.xlu1 %v5178_v33 }
0x12d8   :  { %13067 = vmatpush3.bf16.msra.mxu0 %v14665_v53 }
0x12d9   :  { %13104 = vmatprep.subr.bf16.mxu0 %v17390_v24 }
0x1346   :  { %v5135_v7 = vpop.xlane.xlu0 %5134 }
0x1347   :  { %v5181_v19 = vmul.f32 0.03125, %v5135_v7 }
0x1348   :  { %v5138_v48 = vpop.xlane.xlu1 %5137 }
0x1349   :  { %v5197_v14 = vadd.f32 1e-05, %v5181_v19  ;;  %v5182_v16 = vmul.f32 0.03125, %v5138_v48 }
0x134a   :  { %v5141_v34 = vpop.xlane.xlu0 %5140 }
0x134b   :  { %14980 = vrsqrt.f32 %v5197_v14  ;;  %v5198_v1 = vadd.f32 1e-05, %v5182_v16  ;;  %v5183_v12 = vmul.f32 0.03125, %v5141_v34 }
0x134c   :  { %v5144_v61 = vpop.xlane.xlu1 %5143 }
0x134d   :  { %14982 = vrsqrt.f32 %v5198_v1  ;;  %v5199_v23 = vadd.f32 1e-05, %v5183_v12  ;;  %v5184_v35 = vmul.f32 0.03125, %v5144_v61 }
0x134e   :  { %v5147_v4 = vpop.xlane.xlu0 %5146 }
0x134f   :  { %14984 = vrsqrt.f32 %v5199_v23  ;;  %v5200_v20 = vadd.f32 1e-05, %v5184_v35  ;;  %v5185_v58 = vmul.f32 0.03125, %v5147_v4 }
0x1350   :  { %v5150_v40 = vpop.xlane.xlu1 %5149 }
0x1351   :  { %14986 = vrsqrt.f32 %v5200_v20  ;;  %v5201_v30 = vadd.f32 1e-05, %v5185_v58  ;;  %v5186_v41 = vmul.f32 0.03125, %v5150_v40 }
0x1352   :  { %v5153_v45 = vpop.xlane.xlu0 %5152 }
0x1353   :  { %14988 = vrsqrt.f32 %v5201_v30  ;;  %v5202_v47 = vadd.f32 1e-05, %v5186_v41  ;;  %v5187_v0 = vmul.f32 0.03125, %v5153_v45 }
0x1354   :  { %v5156_v28 = vpop.xlane.xlu1 %5155 }
0x1355   :  { %v14981_v57 = vpop.eup %14980  ;;  %14990 = vrsqrt.f32 %v5202_v47  ;;  %v5203_v10 = vadd.f32 1e-05, %v5187_v0  ;;  %v5188_v50 = vmul.f32 0.03125, %v5156_v28  ;;  %v14667_v47 = vld [vmem:[%s19418_s3 + $0x148] sm:$0xff]  }
0x1356   :  { %v5229_v22 = vmul.f32 %v14981_v57, %v17283_v21  ;;  %v5159_v9 = vpop.xlane.xlu0 %5158 }
0x1357   :  { %v14983_v62 = vpop.eup %14982  ;;  %14992 = vrsqrt.f32 %v5203_v10  ;;  %v5204_v36 = vadd.f32 1e-05, %v5188_v50  ;;  %v5189_v31 = vmul.f32 0.03125, %v5159_v9 }
0x1358   :  { %v5251_v5 = vmul.f32 %v17396_v11, %v5229_v22  ;;  %v5230_v60 = vmul.f32 %v14983_v62, %v17286_v2  ;;  %v5162_v49 = vpop.xlane.xlu1 %5161 }
0x1359   :  { %v14985_v44 = vpop.eup %14984  ;;  %14994 = vrsqrt.f32 %v5204_v36  ;;  %v5205_v37 = vadd.f32 1e-05, %v5189_v31  ;;  %v5190_v18 = vmul.f32 0.03125, %v5162_v49 }
0x135a   :  { %v5252_v21 = vmul.f32 %v17396_v11, %v5230_v60  ;;  %v5231_v27 = vmul.f32 %v14985_v44, %v17291_v17  ;;  %v5165_v55 = vpop.xlane.xlu0 %5164  ;;  %v17409_v2 = vadd.f32 %v17404_v15, %v5251_v5 }
0x135b   :  { %v14987_v43 = vpop.eup %14986  ;;  %14996 = vrsqrt.f32 %v5205_v37  ;;  %v5206_v59 = vadd.f32 1e-05, %v5190_v18  ;;  %v5191_v54 = vmul.f32 0.03125, %v5165_v55 }
0x135c   :  { %19558 = vst [vmem:[#allocation21_spill] sm:$0xff] %v17409_v2  ;;  %v17412_v33 = vadd.f32 %v17404_v15, %v5252_v21  ;;  %v5253_v8 = vmul.f32 %v17396_v11, %v5231_v27  ;;  %v5232_v52 = vmul.f32 %v14987_v43, %v17297_v26  ;;  %v5168_v53 = vpop.xlane.xlu1 %5167 }
0x135d   :  { %v14989_v7 = vpop.eup %14988  ;;  %14998 = vrsqrt.f32 %v5206_v59  ;;  %v5207_v19 = vadd.f32 1e-05, %v5191_v54  ;;  %v5192_v17 = vmul.f32 0.03125, %v5168_v53 }
0x135e   :  { %19559 = vst [vmem:[#allocation22_spill] sm:$0xff] %v17412_v33  ;;  %v17418_v48 = vpack.c.bf16 %v17412_v33, %v17409_v2  ;;  %v5254_v14 = vmul.f32 %v17396_v11, %v5232_v52  ;;  %v5233_v16 = vmul.f32 %v14989_v7, %v17303_v29  ;;  %v5171_v34 = vpop.xlane.xlu0 %5170  ;;  %v17423_v12 = vadd.f32 %v17404_v15, %v5253_v8 }
0x135f   :  { %v14991_v1 = vpop.eup %14990  ;;  %15000 = vrsqrt.f32 %v5207_v19  ;;  %v5208_v26 = vadd.f32 1e-05, %v5192_v17  ;;  %v5193_v61 = vmul.f32 0.03125, %v5171_v34 }
0x1360   :  { %19560 = vst [vmem:[#allocation23_spill] sm:$0xff] %v17423_v12  ;;  %v17426_v23 = vadd.f32 %v17404_v15, %v5254_v14  ;;  %v5255_v35 = vmul.f32 %v17396_v11, %v5233_v16  ;;  %v5234_v4 = vmul.f32 %v14991_v1, %v17309_v56  ;;  %v5174_v20 = vpop.xlane.xlu1 %5173  ;;  %13068 = vmatprep.mubr.msk.bf16.mxu0 %vm258_vm1, %v17418_v48 }
0x1361   :  { %13088 = vmatprep.mubr.msk.bf16.mxu1 %vm258_vm1, %v17418_v48  ;;  %v14993_v29 = vpop.eup %14992  ;;  %15002 = vrsqrt.f32 %v5208_v26  ;;  %v5209_v58 = vadd.f32 1e-05, %v5193_v61  ;;  %v5194_v40 = vmul.f32 0.03125, %v5174_v20 }
0x1362   :  { %19561 = vst [vmem:[#allocation24_spill] sm:$0xff] %v17426_v23  ;;  %v17436_v30 = vpack.c.bf16 %v17426_v23, %v17423_v12  ;;  %v5256_v41 = vmul.f32 %v17396_v11, %v5234_v4  ;;  %v5235_v45 = vmul.f32 %v14993_v29, %v17315_v39  ;;  %v5177_v56 = vpop.xlane.xlu0 %5176  ;;  %v17444_v28 = vadd.f32 %v17404_v15, %v5255_v35 }
0x1363   :  { %v14995_v0 = vpop.eup %14994  ;;  %15004 = vrsqrt.f32 %v5209_v58  ;;  %v5210_v57 = vadd.f32 1e-05, %v5194_v40  ;;  %v5195_v10 = vmul.f32 0.03125, %v5177_v56  ;;  %v17575_v56 = vld [vmem:[%s19419_s4 + $0x10] ss:$0 sm:$0xff] }
0x1364   :  { %19562 = vst [vmem:[#allocation25_spill] sm:$0xff] %v17444_v28  ;;  %v17447_v50 = vadd.f32 %v17404_v15, %v5256_v41  ;;  %v5257_v22 = vmul.f32 %v17396_v11, %v5235_v45  ;;  %v5236_v9 = vmul.f32 %v14995_v0, %v17321_v51  ;;  %v5180_v39 = vpop.xlane.xlu1 %5179  ;;  %13069 = vmatmul.mubr.msk.bf16.vlgmr.msra.gmra.mrb[176].mxu0 %vm258_vm1, %v17436_v30 }
0x1365   :  { %13089 = vmatmul.mubr.msk.bf16.vlgmr.msra.gmra.mrb[208].mxu1 %vm258_vm1, %v17436_v30  ;;  %v14997_v62 = vpop.eup %14996  ;;  %15006 = vrsqrt.f32 %v5210_v57  ;;  %v5211_v36 = vadd.f32 1e-05, %v5195_v10  ;;  %v5196_v31 = vmul.f32 0.03125, %v5180_v39  ;;  %13105 = vmatpush3.bf16.msra.mxu0 %v17390_v24 }
0x1366   :  { %19563 = vst [vmem:[#allocation26_spill] sm:$0xff] %v17447_v50  ;;  %v17458_v5 = vpack.c.bf16 %v17447_v50, %v17444_v28  ;;  %v5258_v60 = vmul.f32 %v17396_v11, %v5236_v9  ;;  %v5237_v51 = vmul.f32 %v14997_v62, %v17327_v46  ;;  %13106 = vmatprep.subr.bf16.mxu0 %v14667_v47 }
0x1367   :  { %v14999_v49 = vpop.eup %14998  ;;  %v17463_v44 = vadd.f32 %v17404_v15, %v5257_v22  ;;  %15008 = vrsqrt.f32 %v5211_v36  ;;  %v5212_v37 = vadd.f32 1e-05, %v5196_v31 }
0x1368   :  { %v17466_v18 = vadd.f32 %v17404_v15, %v5258_v60  ;;  %v5259_v24 = vmul.f32 %v17396_v11, %v5237_v51  ;;  %v5238_v21 = vmul.f32 %v14999_v49, %v17333_v42  ;;  %13072 = vmatprep.mubr.msk.bf16.mxu0 %vm258_vm1, %v17458_v5  ;;  %13092 = vmatprep.mubr.msk.bf16.mxu1 %vm258_vm1, %v17458_v5 }
0x1369   :  { %19564 = vst [vmem:[#allocation27_spill] sm:$0xff] %v17463_v44  ;;  %v15001_v46 = vpop.eup %15000  ;;  %15010 = vrsqrt.f32 %v5212_v37  ;;  %13107 = vmatpush3.bf16.msra.mxu0 %v14667_v47 }
0x136a   :  { %19565 = vst [vmem:[#allocation28_spill] sm:$0xff] %v17466_v18  ;;  %v17476_v27 = vpack.c.bf16 %v17466_v18, %v17463_v44  ;;  %v5260_v55 = vmul.f32 %v17396_v11, %v5238_v21  ;;  %v5239_v43 = vmul.f32 %v15001_v46, %v17339_v63  ;;  %v17481_v42 = vadd.f32 %v17404_v15, %v5259_v24 }
0x136b   :  { %v15003_v59 = vpop.eup %15002 }
0x136c   :  { %19566 = vst [vmem:[#allocation29_spill] sm:$0xff] %v17481_v42  ;;  %v17484_v54 = vadd.f32 %v17404_v15, %v5260_v55  ;;  %v5261_v8 = vmul.f32 %v17396_v11, %v5239_v43  ;;  %v5240_v52 = vmul.f32 %v15003_v59, %v17345_v6  ;;  %13073 = vmatmul.mubr.msk.bf16.gmra.mrb[180].mxu0 %vm258_vm1, %v17476_v27 }
0x136d   :  { %13093 = vmatmul.mubr.msk.bf16.gmra.mrb[212].mxu1 %vm258_vm1, %v17476_v27  ;;  %v15005_v53 = vpop.eup %15004 }
0x136e   :  { %19567 = vst [vmem:[#allocation30_spill] sm:$0xff] %v17484_v54  ;;  %v17494_v63 = vpack.c.bf16 %v17484_v54, %v17481_v42  ;;  %v5262_v7 = vmul.f32 %v17396_v11, %v5240_v52  ;;  %v5241_v19 = vmul.f32 %v15005_v53, %v17351_v3  ;;  %v17499_v14 = vadd.f32 %v17404_v15, %v5261_v8 }
0x136f   :  { %v15007_v17 = vpop.eup %15006 }
0x1370   :  { %19568 = vst [vmem:[#allocation31_spill] sm:$0xff] %v17499_v14  ;;  %v17502_v6 = vadd.f32 %v17404_v15, %v5262_v7  ;;  %v5263_v16 = vmul.f32 %v17396_v11, %v5241_v19  ;;  %v5242_v34 = vmul.f32 %v15007_v17, %v17357_v38  ;;  %13076 = vmatprep.mubr.msk.bf16.mxu0 %vm258_vm1, %v17494_v63 }
0x1371   :  { %13096 = vmatprep.mubr.msk.bf16.mxu1 %vm258_vm1, %v17494_v63  ;;  %v15009_v1 = vpop.eup %15008 }
0x1372   :  { %19569 = vst [vmem:[#allocation32_spill] sm:$0xff] %v17502_v6  ;;  %v17512_v3 = vpack.c.bf16 %v17502_v6, %v17499_v14  ;;  %v5264_v26 = vmul.f32 %v17396_v11, %v5242_v34  ;;  %v5243_v61 = vmul.f32 %v15009_v1, %v17363_v32  ;;  %v17517_v4 = vadd.f32 %v17404_v15, %v5263_v16 }
0x1373   :  { %v15011_v35 = vpop.eup %15010 }
0x1374   :  { %19570 = vst [vmem:[#allocation33_spill] sm:$0xff] %v17517_v4  ;;  %v17520_v38 = vadd.f32 %v17404_v15, %v5264_v26  ;;  %v5265_v20 = vmul.f32 %v17396_v11, %v5243_v61  ;;  %v5244_v29 = vmul.f32 %v15011_v35, %v17369_v25  ;;  %13077 = vmatmul.mubr.msk.bf16.gmra.mrb[184].mxu0 %vm258_vm1, %v17512_v3 }
0x1375   :  { %13097 = vmatmul.mubr.msk.bf16.gmra.mrb[216].mxu1 %vm258_vm1, %v17512_v3 }
0x1376   :  { %19571 = vst [vmem:[#allocation36_spill] sm:$0xff] %v17520_v38  ;;  %v17530_v32 = vpack.c.bf16 %v17520_v38, %v17517_v4  ;;  %v5266_v58 = vmul.f32 %v17396_v11, %v5244_v29  ;;  %v17534_v40 = vadd.f32 %v17404_v15, %v5265_v20  ;;  %v17570_v11 = vld [vmem:[%s19419_s4 + $0xc] ss:$0 sm:$0xff] }
0x1378   :  { %19572 = vst [vmem:[#allocation34_spill] sm:$0xff] %v17534_v40  ;;  %v17537_v41 = vadd.f32 %v17404_v15, %v5266_v58  ;;  %13080 = vmatprep.mubr.msk.bf16.mxu0 %vm258_vm1, %v17530_v32  ;;  %13100 = vmatprep.mubr.msk.bf16.mxu1 %vm258_vm1, %v17530_v32 }
0x137a   :  { %19573 = vst [vmem:[#allocation35_spill] sm:$0xff] %v17537_v41  ;;  %v17545_v25 = vpack.c.bf16 %v17537_v41, %v17534_v40 }
0x137c   :  { %13081 = vmatmul.mubr.msk.bf16.gmra.mrb[188].mxu0 %vm258_vm1, %v17545_v25 }
0x137d   :  { %13101 = vmatmul.mubr.msk.bf16.gmra.mrb[220].mxu1 %vm258_vm1, %v17545_v25  ;;  %13108 = vmatprep.mubr.msk.bf16.mxu0 %vm258_vm1, %v17418_v48 }
0x1384   :  { %13109 = vmatmul.mubr.msk.bf16.vlgmr.msra.gmra.mrb[192].mxu0 %vm258_vm1, %v17436_v30 }
0x1385   :  { %13112 = vmatprep.mubr.msk.bf16.mxu0 %vm258_vm1, %v17458_v5 }
0x138c   :  { %13113 = vmatmul.mubr.msk.bf16.gmra.mrb[196].mxu0 %vm258_vm1, %v17476_v27 }
0x138d   :  { %13116 = vmatprep.mubr.msk.bf16.mxu0 %vm258_vm1, %v17494_v63 }
0x1394   :  { %13117 = vmatmul.mubr.msk.bf16.gmra.mrb[200].mxu0 %vm258_vm1, %v17512_v3 }
0x1395   :  { %13120 = vmatprep.mubr.msk.bf16.mxu0 %vm258_vm1, %v17530_v32 }
0x139c   :  { %13121 = vmatmul.mubr.msk.bf16.gmra.mrb[204].mxu0 %vm258_vm1, %v17545_v25 }
0x1437   :  { %v13070_v15 = vpop.f32.mrb[176].mxu0 }
0x1438   :  { %v13090_v45 = vpop.f32.mrb[208].mxu1  ;;  %v17578_v47 = vadd.f32 %v13070_v15, %v17570_v11  ;;  %v5394_v0 = vpop.f32.mrb[177].mxu0 }
0x1439   :  { %v5516_v57 = vpop.f32.mrb[209].mxu1  ;;  %v5395_v10 = vadd.f32 %v17570_v11, %v5394_v0  ;;  %v13071_v22 = vpop.f32.mrb[178].mxu0  ;;  %v5525_v39 = vadd.f32 %v13090_v45, %v17575_v56 }
0x143a   :  { %v13091_v9 = vpop.f32.mrb[210].mxu1  ;;  %v17583_v62 = vadd.f32 %v13071_v22, %v17570_v11  ;;  %v5397_v31 = vpop.f32.mrb[179].mxu0  ;;  %v5517_v51 = vadd.f32 %v17575_v56, %v5516_v57 }
0x143b   :  { %v5528_v36 = vadd.f32 %v13091_v9, %v17575_v56  ;;  %v5519_v60 = vpop.f32.mrb[211].mxu1  ;;  %v17588_v49 = vadd.f32 %v17570_v11, %v5397_v31  ;;  %13156 = vmatprep.mubr.msk.f32.mxu1 %vm624_vm2, %v5395_v10 }
0x143c   :  { %v5520_v37 = vadd.f32 %v17575_v56, %v5519_v60 }
0x143d   :  { %v14210_v24 = vpack.c.bf16 %v5528_v36, %v5525_v39 }
0x143e   :  { %v14204_v21 = vpack.c.bf16 %v5520_v37, %v5517_v51 }
0x143f   :  { %v13074_v46 = vpop.f32.mrb[180].mxu0 }
0x1440   :  { %v13094_v55 = vpop.f32.mrb[212].mxu1  ;;  %14206 = vmatprep.subr.msk.bf16.mxu1 %vm15690_vm3, %v14204_v21  ;;  %v17595_v43 = vadd.f32 %v13074_v46, %v17570_v11  ;;  %v5410_v59 = vpop.f32.mrb[181].mxu0 }
0x1441   :  { %v5532_v8 = vpop.f32.mrb[213].mxu1  ;;  %14209 = vmatpush3.bf16.xpose.msk.msra.mxu1 %vm15690_vm3, %v14204_v21  ;;  %v17600_v52 = vadd.f32 %v17570_v11, %v5410_v59  ;;  %v13075_v53 = vpop.f32.mrb[182].mxu0  ;;  %v5541_v19 = vadd.f32 %v13094_v55, %v17575_v56 }
0x1442   :  { %v13095_v7 = vpop.f32.mrb[214].mxu1  ;;  %14212 = vmatprep.subr.msk.bf16.mxu1 %vm15690_vm3, %v14210_v24  ;;  %v17606_v17 = vadd.f32 %v13075_v53, %v17570_v11  ;;  %v5413_v34 = vpop.f32.mrb[183].mxu0  ;;  %v5533_v26 = vadd.f32 %v17575_v56, %v5532_v8 }
0x1443   :  { %v5544_v16 = vadd.f32 %v13095_v7, %v17575_v56  ;;  %v5535_v1 = vpop.f32.mrb[215].mxu1  ;;  %v17611_v61 = vadd.f32 %v17570_v11, %v5413_v34 }
0x1444   :  { %v5536_v35 = vadd.f32 %v17575_v56, %v5535_v1 }
0x1445   :  { %v14222_v20 = vpack.c.bf16 %v5544_v16, %v5541_v19 }
0x1446   :  { %v14216_v29 = vpack.c.bf16 %v5536_v35, %v5533_v26 }
0x1447   :  { %v13078_v58 = vpop.f32.mrb[184].mxu0 }
0x1448   :  { %v13098_v15 = vpop.f32.mrb[216].mxu1  ;;  %v17615_v45 = vadd.f32 %v13078_v58, %v17570_v11  ;;  %v5426_v0 = vpop.f32.mrb[185].mxu0 }
0x1449   :  { %v5548_v57 = vpop.f32.mrb[217].mxu1  ;;  %14215 = vmatpush3.bf16.xpose.msk.msra.mxu1 %vm15690_vm3, %v14210_v24  ;;  %v17620_v10 = vadd.f32 %v17570_v11, %v5426_v0  ;;  %v13079_v22 = vpop.f32.mrb[186].mxu0  ;;  %v5557_v39 = vadd.f32 %v13098_v15, %v17575_v56 }
0x144a   :  { %v13099_v9 = vpop.f32.mrb[218].mxu1  ;;  %14218 = vmatprep.subr.msk.bf16.mxu1 %vm15690_vm3, %v14216_v29  ;;  %v17626_v36 = vadd.f32 %v13079_v22, %v17570_v11  ;;  %v5429_v60 = vpop.f32.mrb[187].mxu0  ;;  %v5549_v37 = vadd.f32 %v17575_v56, %v5548_v57 }
0x144b   :  { %v5560_v31 = vadd.f32 %v13099_v9, %v17575_v56  ;;  %v5551_v51 = vpop.f32.mrb[219].mxu1  ;;  %v17631_v24 = vadd.f32 %v17570_v11, %v5429_v60  ;;  %v10992_v60 = vld [vmem:[%s19419_s4 + $0x14] ss:$0 sm:$0xff] }
0x144c   :  { %v5552_v21 = vadd.f32 %v17575_v56, %v5551_v51 }
0x144d   :  { %v14234_v46 = vpack.c.bf16 %v5560_v31, %v5557_v39 }
0x144e   :  { %v14228_v55 = vpack.c.bf16 %v5552_v21, %v5549_v37 }
0x144f   :  { %v13082_v59 = vpop.f32.mrb[188].mxu0 }
0x1450   :  { %v13102_v8 = vpop.f32.mrb[220].mxu1  ;;  %v17635_v53 = vadd.f32 %v13082_v59, %v17570_v11  ;;  %v5442_v7 = vpop.f32.mrb[189].mxu0 }
0x1451   :  { %v5564_v19 = vpop.f32.mrb[221].mxu1  ;;  %14221 = vmatpush3.bf16.xpose.msk.msra.mxu1 %vm15690_vm3, %v14216_v29  ;;  %v17640_v16 = vadd.f32 %v17570_v11, %v5442_v7  ;;  %v13083_v34 = vpop.f32.mrb[190].mxu0  ;;  %v5573_v26 = vadd.f32 %v13102_v8, %v17575_v56 }
0x1452   :  { %v13103_v1 = vpop.f32.mrb[222].mxu1  ;;  %14224 = vmatprep.subr.msk.bf16.mxu1 %vm15690_vm3, %v14222_v20  ;;  %v17646_v35 = vadd.f32 %v13083_v34, %v17570_v11  ;;  %v5445_v15 = vpop.f32.mrb[191].mxu0  ;;  %v5565_v57 = vadd.f32 %v17575_v56, %v5564_v19 }
0x1453   :  { %v5576_v58 = vadd.f32 %v13103_v1, %v17575_v56  ;;  %v5567_v0 = vpop.f32.mrb[223].mxu1  ;;  %v17651_v29 = vadd.f32 %v17570_v11, %v5445_v15 }
0x1454   :  { %v5568_v22 = vadd.f32 %v17575_v56, %v5567_v0 }
0x1455   :  { %v17654_v9 = vpack.c.bf16 %v5576_v58, %v5573_v26 }
0x1456   :  { %v14240_v39 = vpack.c.bf16 %v5568_v22, %v5565_v57 }
0x1457   :  { %v13110_v31 = vpop.f32.mrb[192].mxu0 }
0x1458   :  { %v5638_v51 = vpop.f32.mrb[193].mxu0  ;;  %v5647_v11 = vadd.f32 %v13110_v31, %v10992_v60 }
0x1459   :  { %14227 = vmatpush3.bf16.xpose.msk.msra.mxu1 %vm15690_vm3, %v14222_v20  ;;  %v13111_v37 = vpop.f32.mrb[194].mxu0  ;;  %v5639_v56 = vadd.f32 %v10992_v60, %v5638_v51 }
0x145a   :  { %14230 = vmatprep.subr.msk.bf16.mxu1 %vm15690_vm3, %v14228_v55  ;;  %v5650_v21 = vadd.f32 %v13111_v37, %v10992_v60  ;;  %v5641_v59 = vpop.f32.mrb[195].mxu0 }
0x145b   :  { %v5642_v8 = vadd.f32 %v10992_v60, %v5641_v59 }
0x145c   :  { %v14256_v7 = vpack.c.bf16 %v5650_v21, %v5647_v11 }
0x145d   :  { %v14252_v19 = vpack.c.bf16 %v5642_v8, %v5639_v56 }
0x145f   :  { %v13114_v34 = vpop.f32.mrb[196].mxu0  ;;  %14253 = vmatprep.subr.bf16.mxu0 %v14252_v19 }
0x1460   :  { %v5654_v1 = vpop.f32.mrb[197].mxu0  ;;  %14255 = vmatpush3.bf16.msra.mxu0 %v14252_v19  ;;  %v5663_v20 = vadd.f32 %v13114_v34, %v10992_v60 }
0x1461   :  { %14233 = vmatpush3.bf16.xpose.msk.msra.mxu1 %vm15690_vm3, %v14228_v55  ;;  %v13115_v26 = vpop.f32.mrb[198].mxu0  ;;  %14257 = vmatprep.subr.bf16.mxu0 %v14256_v7  ;;  %v5655_v0 = vadd.f32 %v10992_v60, %v5654_v1 }
0x1462   :  { %14236 = vmatprep.subr.msk.bf16.mxu1 %vm15690_vm3, %v14234_v46  ;;  %v5666_v58 = vadd.f32 %v13115_v26, %v10992_v60  ;;  %v5657_v15 = vpop.f32.mrb[199].mxu0 }
0x1463   :  { %v5658_v57 = vadd.f32 %v10992_v60, %v5657_v15 }
0x1464   :  { %v14264_v22 = vpack.c.bf16 %v5666_v58, %v5663_v20  ;;  %14259 = vmatpush3.bf16.msra.mxu0 %v14256_v7 }
0x1465   :  { %v14260_v31 = vpack.c.bf16 %v5658_v57, %v5655_v0 }
0x1467   :  { %v13118_v51 = vpop.f32.mrb[200].mxu0  ;;  %14261 = vmatprep.subr.bf16.mxu0 %v14260_v31 }
0x1468   :  { %v5670_v37 = vpop.f32.mrb[201].mxu0  ;;  %14263 = vmatpush3.bf16.msra.mxu0 %v14260_v31  ;;  %v5679_v11 = vadd.f32 %v13118_v51, %v10992_v60  ;;  %v14668_v31 = vld [vmem:[%s19418_s3 + $0x110] sm:$0xff]  }
0x1469   :  { %14239 = vmatpush3.bf16.xpose.msk.msra.mxu1 %vm15690_vm3, %v14234_v46  ;;  %v13119_v55 = vpop.f32.mrb[202].mxu0  ;;  %14265 = vmatprep.subr.bf16.mxu0 %v14264_v22  ;;  %v5671_v56 = vadd.f32 %v10992_v60, %v5670_v37  ;;  %v11057_v51 = vld [vmem:[%s19419_s4 + $0x11] ss:$0 sm:$0xff] }
0x146a   :  { %14242 = vmatprep.subr.msk.bf16.mxu1 %vm15690_vm3, %v14240_v39  ;;  %v5682_v21 = vadd.f32 %v13119_v55, %v10992_v60  ;;  %v5673_v59 = vpop.f32.mrb[203].mxu0 }
0x146b   :  { %v5674_v8 = vadd.f32 %v10992_v60, %v5673_v59 }
0x146c   :  { %v14272_v19 = vpack.c.bf16 %v5682_v21, %v5679_v11  ;;  %14267 = vmatpush3.bf16.msra.mxu0 %v14264_v22 }
0x146d   :  { %v14268_v7 = vpack.c.bf16 %v5674_v8, %v5671_v56 }
0x146f   :  { %v13122_v34 = vpop.f32.mrb[204].mxu0  ;;  %14269 = vmatprep.subr.bf16.mxu0 %v14268_v7 }
0x1470   :  { %v5686_v1 = vpop.f32.mrb[205].mxu0  ;;  %14271 = vmatpush3.bf16.msra.mxu0 %v14268_v7  ;;  %v5695_v26 = vadd.f32 %v13122_v34, %v10992_v60 }
0x1471   :  { %14245 = vmatpush3.bf16.xpose.msk.msra.mxu1 %vm15690_vm3, %v14240_v39  ;;  %v13123_v46 = vpop.f32.mrb[206].mxu0  ;;  %14273 = vmatprep.subr.bf16.mxu0 %v14272_v19  ;;  %v5687_v15 = vadd.f32 %v10992_v60, %v5686_v1  ;;  %v14669_v39 = vld [vmem:[%s19418_s3 + $0x118] sm:$0xff]  }
0x1472   :  { %14248 = vmatprep.subr.msk.bf16.mxu1 %vm15690_vm3, %v17654_v9  ;;  %v5698_v20 = vadd.f32 %v13123_v46, %v10992_v60  ;;  %v5689_v58 = vpop.f32.mrb[207].mxu0 }
0x1473   :  { %v5690_v0 = vadd.f32 %v10992_v60, %v5689_v58 }
0x1474   :  { %v14280_v57 = vpack.c.bf16 %v5698_v20, %v5695_v26  ;;  %14275 = vmatpush3.bf16.msra.mxu0 %v14272_v19 }
0x1475   :  { %v14276_v22 = vpack.c.bf16 %v5690_v0, %v5687_v15 }
0x1477   :  { %14277 = vmatprep.subr.bf16.mxu0 %v14276_v22 }
0x1478   :  { %14279 = vmatpush3.bf16.msra.mxu0 %v14276_v22 }
0x1479   :  { %14251 = vmatpush3.bf16.xpose.msk.msra.mxu1 %vm15690_vm3, %v17654_v9  ;;  %14281 = vmatprep.subr.bf16.mxu0 %v14280_v57 }
0x147a   :  { %13256 = vmatprep.subr.bf16.mxu1 %v14668_v31 }
0x147c   :  { %14283 = vmatpush3.bf16.msra.mxu0 %v14280_v57 }
0x1480   :  { %13157 = vmatmul.mubr.msk.f32.vlgmr.msra.gmra.mrb[224].mxu1 %vm624_vm2, %v17588_v49 }
0x1481   :  { %13159 = vmatprep.mubr.msk.f32.mxu1 %vm624_vm2, %v17578_v47  ;;  %13257 = vmatpush3.bf16.msra.mxu1 %v14668_v31 }
0x1482   :  { %13258 = vmatprep.subr.bf16.mxu1 %v14669_v39 }
0x1484   :  { %13160 = vmatmul.mubr.msk.f32.gmra.mrb[226].mxu1 %vm624_vm2, %v17583_v62 }
0x1485   :  { %13162 = vmatprep.mubr.msk.f32.mxu1 %vm624_vm2, %v17600_v52  ;;  %13259 = vmatpush3.bf16.msra.mxu1 %v14669_v39 }
0x1488   :  { %13163 = vmatmul.mubr.msk.f32.gmra.mrb[228].mxu1 %vm624_vm2, %v17611_v61 }
0x1489   :  { %13165 = vmatprep.mubr.msk.f32.mxu1 %vm624_vm2, %v17595_v43 }
0x148c   :  { %13166 = vmatmul.mubr.msk.f32.gmra.mrb[230].mxu1 %vm624_vm2, %v17606_v17 }
0x148d   :  { %13168 = vmatprep.mubr.msk.f32.mxu1 %vm624_vm2, %v17620_v10 }
0x1490   :  { %13169 = vmatmul.mubr.msk.f32.gmra.mrb[232].mxu1 %vm624_vm2, %v17631_v24 }
0x1491   :  { %13171 = vmatprep.mubr.msk.f32.mxu1 %vm624_vm2, %v17615_v45 }
0x1494   :  { %13172 = vmatmul.mubr.msk.f32.gmra.mrb[234].mxu1 %vm624_vm2, %v17626_v36 }
0x1495   :  { %13174 = vmatprep.mubr.msk.f32.mxu1 %vm624_vm2, %v17640_v16 }
0x1498   :  { %13175 = vmatmul.mubr.msk.f32.gmra.mrb[236].mxu1 %vm624_vm2, %v17651_v29 }
0x1499   :  { %13177 = vmatprep.mubr.msk.f32.mxu1 %vm624_vm2, %v17635_v53 }
0x149c   :  { %13178 = vmatmul.mubr.msk.f32.gmra.mrb[238].mxu1 %vm624_vm2, %v17646_v35 }
0x149d   :  { %13260 = vmatprep.mubr.msk.bf16.mxu1 %vm258_vm1, %v17418_v48 }
0x14a0   :  { %13261 = vmatmul.mubr.msk.bf16.vlgmr.msra.gmra.mrb[240].mxu1 %vm258_vm1, %v17436_v30 }
0x14a1   :  { %13264 = vmatprep.mubr.msk.bf16.mxu1 %vm258_vm1, %v17458_v5 }
0x14a8   :  { %13265 = vmatmul.mubr.msk.bf16.gmra.mrb[244].mxu1 %vm258_vm1, %v17476_v27 }
0x14a9   :  { %13268 = vmatprep.mubr.msk.bf16.mxu1 %vm258_vm1, %v17494_v63 }
0x14b0   :  { %13269 = vmatmul.mubr.msk.bf16.gmra.mrb[248].mxu1 %vm258_vm1, %v17512_v3 }
0x14b1   :  { %13272 = vmatprep.mubr.msk.bf16.mxu1 %vm258_vm1, %v17530_v32 }
0x14b8   :  { %13273 = vmatmul.mubr.msk.bf16.gmra.mrb[252].mxu1 %vm258_vm1, %v17545_v25 }
0x1553   :  { %v17731_v47 = vpop.f32.mrb[224].mxu1 }
0x1554   :  { %5944 = vmax.xlane.f32.xlu1 %v17731_v47  ;;  %v17734_v62 = vpop.f32.mrb[225].mxu1 }
0x1555   :  { %5942 = vmax.xlane.f32.xlu0 %v17734_v62 }
0x1557   :  { %v17737_v49 = vpop.f32.mrb[226].mxu1 }
0x1558   :  { %5948 = vmax.xlane.f32.xlu1 %v17737_v49  ;;  %v17740_v43 = vpop.f32.mrb[227].mxu1 }
0x1559   :  { %5946 = vmax.xlane.f32.xlu0 %v17740_v43 }
0x155b   :  { %v17743_v52 = vpop.f32.mrb[228].mxu1 }
0x155c   :  { %5952 = vmax.xlane.f32.xlu1 %v17743_v52  ;;  %v17746_v17 = vpop.f32.mrb[229].mxu1 }
0x155d   :  { %5950 = vmax.xlane.f32.xlu0 %v17746_v17 }
0x155f   :  { %v17749_v61 = vpop.f32.mrb[230].mxu1 }
0x1560   :  { %5956 = vmax.xlane.f32.xlu1 %v17749_v61  ;;  %v17752_v45 = vpop.f32.mrb[231].mxu1 }
0x1561   :  { %5954 = vmax.xlane.f32.xlu0 %v17752_v45 }
0x1563   :  { %v17755_v10 = vpop.f32.mrb[232].mxu1 }
0x1564   :  { %5960 = vmax.xlane.f32.xlu1 %v17755_v10  ;;  %v17758_v36 = vpop.f32.mrb[233].mxu1 }
0x1565   :  { %5958 = vmax.xlane.f32.xlu0 %v17758_v36 }
0x1567   :  { %v17761_v24 = vpop.f32.mrb[234].mxu1 }
0x1568   :  { %5964 = vmax.xlane.f32.xlu1 %v17761_v24  ;;  %v17764_v53 = vpop.f32.mrb[235].mxu1 }
0x1569   :  { %5962 = vmax.xlane.f32.xlu0 %v17764_v53 }
0x156b   :  { %v17767_v16 = vpop.f32.mrb[236].mxu1 }
0x156c   :  { %5968 = vmax.xlane.f32.xlu1 %v17767_v16  ;;  %v17770_v35 = vpop.f32.mrb[237].mxu1 }
0x156d   :  { %5966 = vmax.xlane.f32.xlu0 %v17770_v35 }
0x156f   :  { %v17773_v29 = vpop.f32.mrb[238].mxu1 }
0x1570   :  { %5972 = vmax.xlane.f32.xlu1 %v17773_v29  ;;  %v17776_v9 = vpop.f32.mrb[239].mxu1 }
0x1571   :  { %5970 = vmax.xlane.f32.xlu0 %v17776_v9 }
0x1573   :  { %v13262_v60 = vpop.f32.mrb[240].mxu1 }
0x1574   :  { %v6422_v37 = vpop.f32.mrb[241].mxu1  ;;  %v6431_v11 = vadd.f32 %v13262_v60, %v11057_v51 }
0x1575   :  { %v13263_v55 = vpop.f32.mrb[242].mxu1  ;;  %v6423_v56 = vadd.f32 %v11057_v51, %v6422_v37 }
0x1576   :  { %v6434_v21 = vadd.f32 %v13263_v55, %v11057_v51  ;;  %v6425_v59 = vpop.f32.mrb[243].mxu1 }
0x1577   :  { %v6426_v8 = vadd.f32 %v11057_v51, %v6425_v59 }
0x1578   :  { %v14290_v19 = vpack.c.bf16 %v6434_v21, %v6431_v11 }
0x1579   :  { %v14284_v7 = vpack.c.bf16 %v6426_v8, %v6423_v56 }
0x157b   :  { %v13266_v34 = vpop.f32.mrb[244].mxu1  ;;  %14286 = vmatprep.subr.msk.bf16.mxu1 %vm15690_vm3, %v14284_v7 }
0x157c   :  { %v6438_v1 = vpop.f32.mrb[245].mxu1  ;;  %14289 = vmatpush3.bf16.xpose.msk.msra.mxu1 %vm15690_vm3, %v14284_v7  ;;  %v6447_v26 = vadd.f32 %v13266_v34, %v11057_v51 }
0x157d   :  { %v13267_v46 = vpop.f32.mrb[246].mxu1  ;;  %14292 = vmatprep.subr.msk.bf16.mxu1 %vm15690_vm3, %v14290_v19  ;;  %v6439_v15 = vadd.f32 %v11057_v51, %v6438_v1 }
0x157e   :  { %v6450_v20 = vadd.f32 %v13267_v46, %v11057_v51  ;;  %v6441_v58 = vpop.f32.mrb[247].mxu1 }
0x157f   :  { %v6442_v0 = vadd.f32 %v11057_v51, %v6441_v58 }
0x1580   :  { %v14302_v57 = vpack.c.bf16 %v6450_v20, %v6447_v26 }
0x1581   :  { %v14296_v22 = vpack.c.bf16 %v6442_v0, %v6439_v15 }
0x1583   :  { %v13270_v31 = vpop.f32.mrb[248].mxu1 }
0x1584   :  { %v6454_v39 = vpop.f32.mrb[249].mxu1  ;;  %14295 = vmatpush3.bf16.xpose.msk.msra.mxu1 %vm15690_vm3, %v14290_v19  ;;  %v6463_v37 = vadd.f32 %v13270_v31, %v11057_v51 }
0x1585   :  { %v13271_v60 = vpop.f32.mrb[250].mxu1  ;;  %14298 = vmatprep.subr.msk.bf16.mxu1 %vm15690_vm3, %v14296_v22  ;;  %v6455_v21 = vadd.f32 %v11057_v51, %v6454_v39 }
0x1586   :  { %v6466_v55 = vadd.f32 %v13271_v60, %v11057_v51  ;;  %v6457_v11 = vpop.f32.mrb[251].mxu1 }
0x1587   :  { %v6458_v59 = vadd.f32 %v11057_v51, %v6457_v11 }
0x1588   :  { %v14314_v56 = vpack.c.bf16 %v6466_v55, %v6463_v37 }
0x1589   :  { %v14308_v8 = vpack.c.bf16 %v6458_v59, %v6455_v21 }
0x158b   :  { %v13274_v7 = vpop.f32.mrb[252].mxu1 }
0x158c   :  { %v6470_v34 = vpop.f32.mrb[253].mxu1  ;;  %14301 = vmatpush3.bf16.xpose.msk.msra.mxu1 %vm15690_vm3, %v14296_v22  ;;  %v6479_v19 = vadd.f32 %v13274_v7, %v11057_v51 }
0x158d   :  { %v13275_v1 = vpop.f32.mrb[254].mxu1  ;;  %14304 = vmatprep.subr.msk.bf16.mxu1 %vm15690_vm3, %v14302_v57  ;;  %v6471_v20 = vadd.f32 %v11057_v51, %v6470_v34 }
0x158e   :  { %v6482_v46 = vadd.f32 %v13275_v1, %v11057_v51  ;;  %v6473_v26 = vpop.f32.mrb[255].mxu1 }
0x158f   :  { %v6474_v58 = vadd.f32 %v11057_v51, %v6473_v26 }
0x1590   :  { %v14326_v15 = vpack.c.bf16 %v6482_v46, %v6479_v19 }
0x1591   :  { %v14320_v0 = vpack.c.bf16 %v6474_v58, %v6471_v20 }
0x1594   :  { %14307 = vmatpush3.bf16.xpose.msk.msra.mxu1 %vm15690_vm3, %v14302_v57 }
0x1595   :  { %14310 = vmatprep.subr.msk.bf16.mxu1 %vm15690_vm3, %v14308_v8 }
0x159c   :  { %14313 = vmatpush3.bf16.xpose.msk.msra.mxu1 %vm15690_vm3, %v14308_v8 }
0x159d   :  { %14316 = vmatprep.subr.msk.bf16.mxu1 %vm15690_vm3, %v14314_v56 }
0x15a4   :  { %14319 = vmatpush3.bf16.xpose.msk.msra.mxu1 %vm15690_vm3, %v14314_v56 }
0x15a5   :  { %14322 = vmatprep.subr.msk.bf16.mxu1 %vm15690_vm3, %v14320_v0 }
0x15ac   :  { %14325 = vmatpush3.bf16.xpose.msk.msra.mxu1 %vm15690_vm3, %v14320_v0 }
0x15ad   :  { %14328 = vmatprep.subr.msk.bf16.mxu1 %vm15690_vm3, %v14326_v15 }
0x15b4   :  { %14331 = vmatpush3.bf16.xpose.msk.msra.mxu1 %vm15690_vm3, %v14326_v15 }
0x15e1   :  { %v5945_v51 = vpop.xlane.xlu1 %5944 }
0x15e2   :  { %v5975_v57 = vsub.f32 %v17731_v47, %v5945_v51  ;;  %v5943_v22 = vpop.xlane.xlu0 %5942 }
0x15e3   :  { %v5974_v31 = vsub.f32 %v17734_v62, %v5943_v22 }
0x15e4   :  { %v5992_v39 = vmul.f32 1.442695, %v5975_v57 }
0x15e5   :  { %v5990_v60 = vmul.f32 1.442695, %v5974_v31  ;;  %v5949_v37 = vpop.xlane.xlu1 %5948 }
0x15e6   :  { %15012 = vpow2.f32 %v5992_v39  ;;  %v5977_v55 = vsub.f32 %v17737_v49, %v5949_v37  ;;  %v5947_v11 = vpop.xlane.xlu0 %5946 }
0x15e7   :  { %15014 = vpow2.f32 %v5990_v60  ;;  %v5976_v21 = vsub.f32 %v17740_v43, %v5947_v11 }
0x15e8   :  { %v5996_v59 = vmul.f32 1.442695, %v5977_v55 }
0x15e9   :  { %v5994_v56 = vmul.f32 1.442695, %v5976_v21  ;;  %v5953_v8 = vpop.xlane.xlu1 %5952 }
0x15ea   :  { %15016 = vpow2.f32 %v5996_v59  ;;  %v5979_v7 = vsub.f32 %v17743_v52, %v5953_v8  ;;  %v5951_v47 = vpop.xlane.xlu0 %5950 }
0x15eb   :  { %15018 = vpow2.f32 %v5994_v56  ;;  %v5978_v62 = vsub.f32 %v17746_v17, %v5951_v47 }
0x15ec   :  { %v6000_v34 = vmul.f32 1.442695, %v5979_v7 }
0x15ed   :  { %v5998_v1 = vmul.f32 1.442695, %v5978_v62  ;;  %v5957_v19 = vpop.xlane.xlu1 %5956 }
0x15ee   :  { %15020 = vpow2.f32 %v6000_v34  ;;  %v5981_v49 = vsub.f32 %v17749_v61, %v5957_v19  ;;  %v5955_v46 = vpop.xlane.xlu0 %5954 }
0x15ef   :  { %15022 = vpow2.f32 %v5998_v1  ;;  %v5980_v43 = vsub.f32 %v17752_v45, %v5955_v46 }
0x15f0   :  { %v17822_v26 = vpop.eup %15012  ;;  %v6004_v20 = vmul.f32 1.442695, %v5981_v49 }
0x15f1   :  { %v17824_v58 = vpop.eup %15014  ;;  %v6002_v52 = vmul.f32 1.442695, %v5980_v43  ;;  %v5961_v15 = vpop.xlane.xlu1 %5960  ;;  %6024 = vadd.xlane.f32.xlu1 %v17822_v26 }
0x15f2   :  { %15024 = vpow2.f32 %v6004_v20  ;;  %v5983_v17 = vsub.f32 %v17755_v10, %v5961_v15  ;;  %v5959_v0 = vpop.xlane.xlu0 %5958  ;;  %6022 = vadd.xlane.f32.xlu0 %v17824_v58 }
0x15f3   :  { %15026 = vpow2.f32 %v6002_v52  ;;  %v5982_v61 = vsub.f32 %v17758_v36, %v5959_v0 }
0x15f4   :  { %v17830_v51 = vpop.eup %15016  ;;  %v6008_v45 = vmul.f32 1.442695, %v5983_v17  ;;  %v14670_v17 = vld [vmem:[%s19418_s3 + $0xd0] sm:$0xff]  }
0x15f5   :  { %v17832_v57 = vpop.eup %15018  ;;  %v6006_v22 = vmul.f32 1.442695, %v5982_v61  ;;  %v5965_v31 = vpop.xlane.xlu1 %5964  ;;  %6028 = vadd.xlane.f32.xlu1 %v17830_v51  ;;  %13236 = vmatprep.subr.bf16.mxu0 %v14670_v17 }
0x15f6   :  { %15028 = vpow2.f32 %v6008_v45  ;;  %v5985_v39 = vsub.f32 %v17761_v24, %v5965_v31  ;;  %v5963_v60 = vpop.xlane.xlu0 %5962  ;;  %6026 = vadd.xlane.f32.xlu0 %v17832_v57 }
0x15f7   :  { %15030 = vpow2.f32 %v6006_v22  ;;  %v5984_v10 = vsub.f32 %v17764_v53, %v5963_v60 }
0x15f8   :  { %v17838_v37 = vpop.eup %15020  ;;  %v6012_v36 = vmul.f32 1.442695, %v5985_v39 }
0x15f9   :  { %v17840_v55 = vpop.eup %15022  ;;  %v6010_v11 = vmul.f32 1.442695, %v5984_v10  ;;  %v5969_v21 = vpop.xlane.xlu1 %5968  ;;  %6032 = vadd.xlane.f32.xlu1 %v17838_v37 }
0x15fa   :  { %15032 = vpow2.f32 %v6012_v36  ;;  %v5987_v59 = vsub.f32 %v17767_v16, %v5969_v21  ;;  %v5967_v56 = vpop.xlane.xlu0 %5966  ;;  %6030 = vadd.xlane.f32.xlu0 %v17840_v55 }
0x15fb   :  { %15034 = vpow2.f32 %v6010_v11  ;;  %v5986_v24 = vsub.f32 %v17770_v35, %v5967_v56  ;;  %v14671_v56 = vld [vmem:[%s19418_s3 + $0xd8] sm:$0xff]  }
0x15fc   :  { %v17846_v8 = vpop.eup %15024  ;;  %v6016_v53 = vmul.f32 1.442695, %v5987_v59 }
0x15fd   :  { %v17848_v7 = vpop.eup %15026  ;;  %v6014_v47 = vmul.f32 1.442695, %v5986_v24  ;;  %6036 = vadd.xlane.f32.xlu1 %v17846_v8  ;;  %v5973_v62 = vpop.xlane.xlu1 %5972 }
0x15fe   :  { %15036 = vpow2.f32 %v6016_v53  ;;  %v5989_v34 = vsub.f32 %v17773_v29, %v5973_v62  ;;  %6034 = vadd.xlane.f32.xlu0 %v17848_v7  ;;  %v5971_v16 = vpop.xlane.xlu0 %5970 }
0x15ff   :  { %15038 = vpow2.f32 %v6014_v47  ;;  %v5988_v1 = vsub.f32 %v17776_v9, %v5971_v16 }
0x1600   :  { %v17854_v19 = vpop.eup %15028  ;;  %v6020_v35 = vmul.f32 1.442695, %v5989_v34 }
0x1601   :  { %v17856_v49 = vpop.eup %15030  ;;  %v6018_v46 = vmul.f32 1.442695, %v5988_v1  ;;  %6040 = vadd.xlane.f32.xlu1 %v17854_v19 }
0x1602   :  { %15040 = vpow2.f32 %v6020_v35  ;;  %6038 = vadd.xlane.f32.xlu0 %v17856_v49 }
0x1603   :  { %15042 = vpow2.f32 %v6018_v46 }
0x1604   :  { %v17860_v43 = vpop.eup %15032 }
0x1605   :  { %v17862_v29 = vpop.eup %15034  ;;  %6044 = vadd.xlane.f32.xlu1 %v17860_v43 }
0x1606   :  { %6042 = vadd.xlane.f32.xlu0 %v17862_v29 }
0x1608   :  { %v17866_v9 = vpop.eup %15036 }
0x1609   :  { %v17868_v20 = vpop.eup %15038  ;;  %6048 = vadd.xlane.f32.xlu1 %v17866_v9 }
0x160a   :  { %6046 = vadd.xlane.f32.xlu0 %v17868_v20 }
0x160c   :  { %v17872_v52 = vpop.eup %15040 }
0x160d   :  { %v17874_v15 = vpop.eup %15042  ;;  %6052 = vadd.xlane.f32.xlu1 %v17872_v52 }
0x160e   :  { %6050 = vadd.xlane.f32.xlu0 %v17874_v15 }
0x167e   :  { %v6025_v0 = vpop.xlane.xlu1 %6024 }
0x167f   :  { %15044 = vrcp.f32 %v6025_v0  ;;  %v6023_v61 = vpop.xlane.xlu0 %6022 }
0x1680   :  { %15046 = vrcp.f32 %v6023_v61 }
0x1682   :  { %v6029_v45 = vpop.xlane.xlu1 %6028 }
0x1683   :  { %15048 = vrcp.f32 %v6029_v45  ;;  %v6027_v22 = vpop.xlane.xlu0 %6026 }
0x1684   :  { %15050 = vrcp.f32 %v6027_v22 }
0x1686   :  { %v6033_v31 = vpop.xlane.xlu1 %6032 }
0x1687   :  { %15052 = vrcp.f32 %v6033_v31  ;;  %v6031_v39 = vpop.xlane.xlu0 %6030 }
0x1688   :  { %15054 = vrcp.f32 %v6031_v39 }
0x1689   :  { %v15045_v60 = vpop.eup %15044 }
0x168a   :  { %v15047_v10 = vpop.eup %15046  ;;  %v6037_v36 = vpop.xlane.xlu1 %6036  ;;  %v6071_v59 = vmul.f32 %v15045_v60, %v17822_v26  ;;  %v14672_v26 = vld [vmem:[%s19418_s3 + $0x150] sm:$0xff]  }
0x168b   :  { %15056 = vrcp.f32 %v6037_v36  ;;  %v6035_v11 = vpop.xlane.xlu0 %6034  ;;  %v6070_v21 = vmul.f32 %v15047_v10, %v17824_v58 }
0x168c   :  { %15058 = vrcp.f32 %v6035_v11 }
0x168d   :  { %v15049_v24 = vpop.eup %15048  ;;  %13212 = vmatprep.mubr.f32.mxu0 %v6070_v21 }
0x168e   :  { %v15051_v53 = vpop.eup %15050  ;;  %v6041_v47 = vpop.xlane.xlu1 %6040  ;;  %13213 = vmatmul.mubr.f32.vlgmr.msra.gmra.mrb[208].mxu0 %v6071_v59  ;;  %v6073_v58 = vmul.f32 %v15049_v24, %v17830_v51 }
0x168f   :  { %15060 = vrcp.f32 %v6041_v47  ;;  %13237 = vmatpush3.bf16.msra.mxu0 %v14670_v17  ;;  %v6039_v62 = vpop.xlane.xlu0 %6038  ;;  %v6072_v34 = vmul.f32 %v15051_v53, %v17832_v57 }
0x1690   :  { %15062 = vrcp.f32 %v6039_v62  ;;  %13238 = vmatprep.subr.bf16.mxu0 %v14671_v56 }
0x1691   :  { %v15053_v16 = vpop.eup %15052  ;;  %13215 = vmatprep.mubr.f32.mxu0 %v6072_v34 }
0x1692   :  { %v15055_v1 = vpop.eup %15054  ;;  %v6045_v35 = vpop.xlane.xlu1 %6044  ;;  %13216 = vmatmul.mubr.f32.gmra.mrb[210].mxu0 %v6073_v58  ;;  %v6075_v57 = vmul.f32 %v15053_v16, %v17838_v37 }
0x1693   :  { %15064 = vrcp.f32 %v6045_v35  ;;  %v6043_v46 = vpop.xlane.xlu0 %6042  ;;  %v6074_v17 = vmul.f32 %v15055_v1, %v17840_v55  ;;  %13239 = vmatpush3.bf16.msra.mxu0 %v14671_v56 }
0x1694   :  { %15066 = vrcp.f32 %v6043_v46  ;;  %13276 = vmatprep.subr.bf16.mxu0 %v14672_v26 }
0x1695   :  { %v15057_v51 = vpop.eup %15056  ;;  %13218 = vmatprep.mubr.f32.mxu0 %v6074_v17 }
0x1696   :  { %v15059_v0 = vpop.eup %15058  ;;  %v6049_v61 = vpop.xlane.xlu1 %6048  ;;  %13219 = vmatmul.mubr.f32.gmra.mrb[212].mxu0 %v6075_v57  ;;  %v6077_v31 = vmul.f32 %v15057_v51, %v17846_v8 }
0x1697   :  { %15068 = vrcp.f32 %v6049_v61  ;;  %v6047_v45 = vpop.xlane.xlu0 %6046  ;;  %v6076_v22 = vmul.f32 %v15059_v0, %v17848_v7 }
0x1698   :  { %15070 = vrcp.f32 %v6047_v45 }
0x1699   :  { %v15061_v39 = vpop.eup %15060  ;;  %13221 = vmatprep.mubr.f32.mxu0 %v6076_v22 }
0x169a   :  { %v15063_v55 = vpop.eup %15062  ;;  %v6053_v60 = vpop.xlane.xlu1 %6052  ;;  %13222 = vmatmul.mubr.f32.gmra.mrb[214].mxu0 %v6077_v31  ;;  %v6079_v36 = vmul.f32 %v15061_v39, %v17854_v19 }
0x169b   :  { %15072 = vrcp.f32 %v6053_v60  ;;  %v6051_v37 = vpop.xlane.xlu0 %6050  ;;  %v6078_v10 = vmul.f32 %v15063_v55, %v17856_v49  ;;  %v11138_v55 = vld [vmem:[%s19419_s4 + $0xe] ss:$0 sm:$0xff] }
0x169c   :  { %15074 = vrcp.f32 %v6051_v37 }
0x169d   :  { %v15065_v11 = vpop.eup %15064  ;;  %13224 = vmatprep.mubr.f32.mxu0 %v6078_v10 }
0x169e   :  { %v15067_v21 = vpop.eup %15066  ;;  %13225 = vmatmul.mubr.f32.gmra.mrb[216].mxu0 %v6079_v36  ;;  %v6081_v8 = vmul.f32 %v15065_v11, %v17860_v43  ;;  %v14673_v43 = vld [vmem:[%s19418_s3 + $0x158] sm:$0xff]   ;;  %v11041_v36 = vld [vmem:[%s19419_s4 + $0xd] ss:$0 sm:$0xff] }
0x169f   :  { %v6080_v7 = vmul.f32 %v15067_v21, %v17862_v29  ;;  %v14674_v29 = vld [vmem:[%s19418_s3 + $0xe0] sm:$0xff]  }
0x16a0   :  { %13444 = vmatprep.subr.bf16.mxu1 %v14674_v29 }
0x16a1   :  { %v15069_v59 = vpop.eup %15068  ;;  %13227 = vmatprep.mubr.f32.mxu0 %v6080_v7 }
0x16a2   :  { %v15071_v56 = vpop.eup %15070  ;;  %13228 = vmatmul.mubr.f32.gmra.mrb[218].mxu0 %v6081_v8  ;;  %v6083_v53 = vmul.f32 %v15069_v59, %v17866_v9 }
0x16a3   :  { %v6082_v24 = vmul.f32 %v15071_v56, %v17868_v20 }
0x16a5   :  { %v15073_v49 = vpop.eup %15072  ;;  %13230 = vmatprep.mubr.f32.mxu0 %v6082_v24  ;;  %v14675_v24 = vld [vmem:[%s19418_s3 + $0xe8] sm:$0xff]  }
0x16a6   :  { %v15075_v47 = vpop.eup %15074  ;;  %13231 = vmatmul.mubr.f32.gmra.mrb[220].mxu0 %v6083_v53  ;;  %v6085_v62 = vmul.f32 %v15073_v49, %v17872_v52 }
0x16a7   :  { %v6084_v19 = vmul.f32 %v15075_v47, %v17874_v15 }
0x16a9   :  { %13233 = vmatprep.mubr.f32.mxu0 %v6084_v19  ;;  %v14676_v19 = vld [vmem:[%s19418_s3 + $0x120] sm:$0xff]  }
0x16aa   :  { %13234 = vmatmul.mubr.f32.gmra.mrb[222].mxu0 %v6085_v62 }
0x16ab   :  { %13240 = vmatprep.mubr.msk.bf16.mxu0 %vm258_vm1, %v17418_v48 }
0x16ae   :  { %13241 = vmatmul.mubr.msk.bf16.vlgmr.msra.gmra.mrb[224].mxu0 %vm258_vm1, %v17436_v30 }
0x16af   :  { %13244 = vmatprep.mubr.msk.bf16.mxu0 %vm258_vm1, %v17458_v5  ;;  %13277 = vmatpush3.bf16.msra.mxu0 %v14672_v26 }
0x16b0   :  { %13278 = vmatprep.subr.bf16.mxu0 %v14673_v43 }
0x16b3   :  { %13279 = vmatpush3.bf16.msra.mxu0 %v14673_v43 }
0x16b6   :  { %13245 = vmatmul.mubr.msk.bf16.gmra.mrb[228].mxu0 %vm258_vm1, %v17476_v27 }
0x16b7   :  { %13248 = vmatprep.mubr.msk.bf16.mxu0 %vm258_vm1, %v17494_v63 }
0x16be   :  { %13249 = vmatmul.mubr.msk.bf16.gmra.mrb[232].mxu0 %vm258_vm1, %v17512_v3 }
0x16bf   :  { %13252 = vmatprep.mubr.msk.bf16.mxu0 %vm258_vm1, %v17530_v32 }
0x16c6   :  { %13253 = vmatmul.mubr.msk.bf16.gmra.mrb[236].mxu0 %vm258_vm1, %v17545_v25 }
0x16c7   :  { %13280 = vmatprep.mubr.msk.bf16.mxu0 %vm258_vm1, %v17418_v48 }
0x16ce   :  { %13281 = vmatmul.mubr.msk.bf16.vlgmr.msra.gmra.mrb[240].mxu0 %vm258_vm1, %v17436_v30 }
0x16cf   :  { %13284 = vmatprep.mubr.msk.bf16.mxu0 %vm258_vm1, %v17458_v5 }
0x16d6   :  { %13285 = vmatmul.mubr.msk.bf16.gmra.mrb[244].mxu0 %vm258_vm1, %v17476_v27 }
0x16d7   :  { %13288 = vmatprep.mubr.msk.bf16.mxu0 %vm258_vm1, %v17494_v63 }
0x16de   :  { %13289 = vmatmul.mubr.msk.bf16.gmra.mrb[248].mxu0 %vm258_vm1, %v17512_v3 }
0x16df   :  { %13292 = vmatprep.mubr.msk.bf16.mxu0 %vm258_vm1, %v17530_v32 }
0x16e6   :  { %13293 = vmatmul.mubr.msk.bf16.gmra.mrb[252].mxu0 %vm258_vm1, %v17545_v25 }
0x1761   :  { %v17941_v9 = vpop.f32.mrb[208].mxu0 }
0x1762   :  { %v17943_v20 = vpop.f32.mrb[209].mxu0 }
0x1765   :  { %v17947_v15 = vpop.f32.mrb[210].mxu0 }
0x1766   :  { %v17949_v34 = vpop.f32.mrb[211].mxu0 }
0x1767   :  { %19574 = vst [vmem:[#allocation6_spill] sm:$0xff] %v17949_v34 }
0x1769   :  { %v17953_v26 = vpop.f32.mrb[212].mxu0 }
0x176a   :  { %19575 = vst [vmem:[#allocation8_spill] sm:$0xff] %v17953_v26  ;;  %v17955_v16 = vpop.f32.mrb[213].mxu0 }
0x176b   :  { %19576 = vst [vmem:[#allocation7_spill] sm:$0xff] %v17955_v16 }
0x176d   :  { %v17959_v35 = vpop.f32.mrb[214].mxu0 }
0x176e   :  { %19577 = vst [vmem:[#allocation5_spill] sm:$0xff] %v17959_v35  ;;  %v17961_v46 = vpop.f32.mrb[215].mxu0 }
0x176f   :  { %19578 = vst [vmem:[#allocation10_spill] sm:$0xff] %v17961_v46 }
0x1771   :  { %v17965_v57 = vpop.f32.mrb[216].mxu0 }
0x1772   :  { %19579 = vst [vmem:[#allocation12_spill] sm:$0xff] %v17965_v57  ;;  %v17967_v51 = vpop.f32.mrb[217].mxu0 }
0x1773   :  { %19580 = vst [vmem:[#allocation11_spill] sm:$0xff] %v17967_v51 }
0x1775   :  { %v17971_v61 = vpop.f32.mrb[218].mxu0 }
0x1776   :  { %19581 = vst [vmem:[#allocation9_spill] sm:$0xff] %v17971_v61  ;;  %v17973_v45 = vpop.f32.mrb[219].mxu0 }
0x1777   :  { %19582 = vst [vmem:[#allocation14_spill] sm:$0xff] %v17973_v45 }
0x1779   :  { %v17977_v31 = vpop.f32.mrb[220].mxu0 }
0x177a   :  { %19583 = vst [vmem:[#allocation16_spill] sm:$0xff] %v17977_v31  ;;  %v17979_v39 = vpop.f32.mrb[221].mxu0 }
0x177b   :  { %19584 = vst [vmem:[#allocation15_spill] sm:$0xff] %v17979_v39 }
0x177d   :  { %v17983_v60 = vpop.f32.mrb[222].mxu0 }
0x177e   :  { %19585 = vst [vmem:[#allocation13_spill] sm:$0xff] %v17983_v60  ;;  %v17985_v37 = vpop.f32.mrb[223].mxu0 }
0x177f   :  { %19586 = vst [vmem:[#allocation18_spill] sm:$0xff] %v17985_v37 }
0x1781   :  { %v13242_v11 = vpop.f32.mrb[224].mxu0 }
0x1782   :  { %v6300_v21 = vpop.f32.mrb[225].mxu0  ;;  %v6309_v53 = vadd.f32 %v13242_v11, %v11041_v36 }
0x1783   :  { %v6301_v7 = vadd.f32 %v11041_v36, %v6300_v21  ;;  %v13243_v8 = vpop.f32.mrb[226].mxu0 }
0x1784   :  { %v6303_v59 = vpop.f32.mrb[227].mxu0  ;;  %v6312_v49 = vadd.f32 %v13243_v8, %v11041_v36 }
0x1785   :  { %v6304_v56 = vadd.f32 %v11041_v36, %v6303_v59  ;;  %13328 = vmatprep.mubr.msk.f32.mxu1 %vm624_vm2, %v6301_v7 }
0x1787   :  { %13329 = vmatmul.mubr.msk.f32.vlgmr.msra.gmra.mrb[0].mxu1 %vm624_vm2, %v6304_v56 }
0x1788   :  { %13331 = vmatprep.mubr.msk.f32.mxu1 %vm624_vm2, %v6309_v53  ;;  %13445 = vmatpush3.bf16.msra.mxu1 %v14674_v29 }
0x1789   :  { %v13246_v47 = vpop.f32.mrb[228].mxu0  ;;  %13446 = vmatprep.subr.bf16.mxu1 %v14675_v24 }
0x178a   :  { %v6316_v62 = vpop.f32.mrb[229].mxu0  ;;  %v6325_v59 = vadd.f32 %v13246_v47, %v11041_v36 }
0x178b   :  { %v6317_v43 = vadd.f32 %v11041_v36, %v6316_v62  ;;  %v13247_v21 = vpop.f32.mrb[230].mxu0  ;;  %13332 = vmatmul.mubr.msk.f32.gmra.mrb[2].mxu1 %vm624_vm2, %v6312_v49 }
0x178c   :  { %v6319_v7 = vpop.f32.mrb[231].mxu0  ;;  %13447 = vmatpush3.bf16.msra.mxu1 %v14675_v24  ;;  %v6328_v29 = vadd.f32 %v13247_v21, %v11041_v36 }
0x178d   :  { %v6320_v11 = vadd.f32 %v11041_v36, %v6319_v7  ;;  %13334 = vmatprep.mubr.msk.f32.mxu1 %vm624_vm2, %v6317_v43  ;;  %13464 = vmatprep.subr.bf16.mxu1 %v14676_v19 }
0x178f   :  { %13335 = vmatmul.mubr.msk.f32.gmra.mrb[4].mxu1 %vm624_vm2, %v6320_v11 }
0x1790   :  { %13337 = vmatprep.mubr.msk.f32.mxu1 %vm624_vm2, %v6325_v59 }
0x1791   :  { %v13250_v8 = vpop.f32.mrb[232].mxu0 }
0x1792   :  { %v6332_v56 = vpop.f32.mrb[233].mxu0  ;;  %v6341_v24 = vadd.f32 %v13250_v8, %v11041_v36 }
0x1793   :  { %v6333_v53 = vadd.f32 %v11041_v36, %v6332_v56  ;;  %v13251_v10 = vpop.f32.mrb[234].mxu0  ;;  %13338 = vmatmul.mubr.msk.f32.gmra.mrb[6].mxu1 %vm624_vm2, %v6328_v29 }
0x1794   :  { %v6335_v62 = vpop.f32.mrb[235].mxu0  ;;  %v6344_v47 = vadd.f32 %v13251_v10, %v11041_v36  ;;  %v11073_v10 = vld [vmem:[%s19419_s4 + $0x15] ss:$0 sm:$0xff] }
0x1795   :  { %v6336_v49 = vadd.f32 %v11041_v36, %v6335_v62  ;;  %13340 = vmatprep.mubr.msk.f32.mxu1 %vm624_vm2, %v6333_v53 }
0x1797   :  { %13341 = vmatmul.mubr.msk.f32.gmra.mrb[8].mxu1 %vm624_vm2, %v6336_v49 }
0x1798   :  { %13343 = vmatprep.mubr.msk.f32.mxu1 %vm624_vm2, %v6341_v24 }
0x1799   :  { %v13254_v43 = vpop.f32.mrb[236].mxu0 }
0x179a   :  { %v6348_v7 = vpop.f32.mrb[237].mxu0  ;;  %v6357_v29 = vadd.f32 %v13254_v43, %v11041_v36 }
0x179b   :  { %v6349_v11 = vadd.f32 %v11041_v36, %v6348_v7  ;;  %v13255_v21 = vpop.f32.mrb[238].mxu0  ;;  %13344 = vmatmul.mubr.msk.f32.gmra.mrb[10].mxu1 %vm624_vm2, %v6344_v47 }
0x179c   :  { %v6351_v59 = vpop.f32.mrb[239].mxu0  ;;  %v6360_v8 = vadd.f32 %v13255_v21, %v11041_v36 }
0x179d   :  { %v6352_v56 = vadd.f32 %v11041_v36, %v6351_v59  ;;  %13346 = vmatprep.mubr.msk.f32.mxu1 %vm624_vm2, %v6349_v11  ;;  %v14677_v36 = vld [vmem:[%s19418_s3 + $0x128] sm:$0xff]  }
0x179f   :  { %13347 = vmatmul.mubr.msk.f32.gmra.mrb[12].mxu1 %vm624_vm2, %v6352_v56 }
0x17a0   :  { %13349 = vmatprep.mubr.msk.f32.mxu1 %vm624_vm2, %v6357_v29 }
0x17a1   :  { %v13282_v53 = vpop.f32.mrb[240].mxu0 }
0x17a2   :  { %v6544_v62 = vpop.f32.mrb[241].mxu0  ;;  %v6553_v24 = vadd.f32 %v13282_v53, %v11073_v10 }
0x17a3   :  { %v13283_v49 = vpop.f32.mrb[242].mxu0  ;;  %13350 = vmatmul.mubr.msk.f32.gmra.mrb[14].mxu1 %vm624_vm2, %v6360_v8  ;;  %v6545_v43 = vadd.f32 %v11073_v10, %v6544_v62 }
0x17a4   :  { %v6556_v47 = vadd.f32 %v13283_v49, %v11073_v10  ;;  %v6547_v7 = vpop.f32.mrb[243].mxu0  ;;  %13448 = vmatprep.mubr.msk.bf16.mxu1 %vm258_vm1, %v17418_v48 }
0x17a5   :  { %v6548_v11 = vadd.f32 %v11073_v10, %v6547_v7 }
0x17a6   :  { %v14336_v21 = vpack.c.bf16 %v6556_v47, %v6553_v24 }
0x17a7   :  { %v14332_v59 = vpack.c.bf16 %v6548_v11, %v6545_v43  ;;  %13449 = vmatmul.mubr.msk.bf16.vlgmr.msra.gmra.mrb[16].mxu1 %vm258_vm1, %v17436_v30 }
0x17a8   :  { %13452 = vmatprep.mubr.msk.bf16.mxu1 %vm258_vm1, %v17458_v5  ;;  %13465 = vmatpush3.bf16.msra.mxu1 %v14676_v19 }
0x17a9   :  { %v13286_v56 = vpop.f32.mrb[244].mxu0  ;;  %14333 = vmatprep.subr.bf16.mxu0 %v14332_v59  ;;  %13466 = vmatprep.subr.bf16.mxu1 %v14677_v36 }
0x17aa   :  { %v6560_v29 = vpop.f32.mrb[245].mxu0  ;;  %14335 = vmatpush3.bf16.msra.mxu0 %v14332_v59  ;;  %v6569_v53 = vadd.f32 %v13286_v56, %v11073_v10 }
0x17ab   :  { %v13287_v8 = vpop.f32.mrb[246].mxu0  ;;  %14337 = vmatprep.subr.bf16.mxu0 %v14336_v21  ;;  %v6561_v24 = vadd.f32 %v11073_v10, %v6560_v29 }
0x17ac   :  { %v6572_v62 = vadd.f32 %v13287_v8, %v11073_v10  ;;  %v6563_v49 = vpop.f32.mrb[247].mxu0  ;;  %13467 = vmatpush3.bf16.msra.mxu1 %v14677_v36 }
0x17ad   :  { %v6564_v47 = vadd.f32 %v11073_v10, %v6563_v49 }
0x17ae   :  { %v14344_v7 = vpack.c.bf16 %v6572_v62, %v6569_v53  ;;  %14339 = vmatpush3.bf16.msra.mxu0 %v14336_v21 }
0x17af   :  { %v14340_v43 = vpack.c.bf16 %v6564_v47, %v6561_v24  ;;  %13453 = vmatmul.mubr.msk.bf16.gmra.mrb[20].mxu1 %vm258_vm1, %v17476_v27 }
0x17b0   :  { %13456 = vmatprep.mubr.msk.bf16.mxu1 %vm258_vm1, %v17494_v63 }
0x17b1   :  { %v13290_v19 = vpop.f32.mrb[248].mxu0  ;;  %14341 = vmatprep.subr.bf16.mxu0 %v14340_v43 }
0x17b2   :  { %v6576_v11 = vpop.f32.mrb[249].mxu0  ;;  %14343 = vmatpush3.bf16.msra.mxu0 %v14340_v43  ;;  %v6585_v56 = vadd.f32 %v13290_v19, %v11073_v10 }
0x17b3   :  { %v13291_v59 = vpop.f32.mrb[250].mxu0  ;;  %14345 = vmatprep.subr.bf16.mxu0 %v14344_v7  ;;  %v6577_v29 = vadd.f32 %v11073_v10, %v6576_v11 }
0x17b4   :  { %v6588_v8 = vadd.f32 %v13291_v59, %v11073_v10  ;;  %v6579_v36 = vpop.f32.mrb[251].mxu0 }
0x17b5   :  { %v6580_v49 = vadd.f32 %v11073_v10, %v6579_v36 }
0x17b6   :  { %v14352_v53 = vpack.c.bf16 %v6588_v8, %v6585_v56  ;;  %14347 = vmatpush3.bf16.msra.mxu0 %v14344_v7 }
0x17b7   :  { %v14348_v21 = vpack.c.bf16 %v6580_v49, %v6577_v29  ;;  %13457 = vmatmul.mubr.msk.bf16.gmra.mrb[24].mxu1 %vm258_vm1, %v17512_v3 }
0x17b8   :  { %13460 = vmatprep.mubr.msk.bf16.mxu1 %vm258_vm1, %v17530_v32 }
0x17b9   :  { %v13294_v62 = vpop.f32.mrb[252].mxu0  ;;  %14349 = vmatprep.subr.bf16.mxu0 %v14348_v21 }
0x17ba   :  { %v6592_v24 = vpop.f32.mrb[253].mxu0  ;;  %14351 = vmatpush3.bf16.msra.mxu0 %v14348_v21  ;;  %v6601_v43 = vadd.f32 %v13294_v62, %v11073_v10 }
0x17bb   :  { %v13295_v47 = vpop.f32.mrb[254].mxu0  ;;  %14353 = vmatprep.subr.bf16.mxu0 %v14352_v53  ;;  %v6593_v11 = vadd.f32 %v11073_v10, %v6592_v24 }
0x17bc   :  { %v6604_v19 = vadd.f32 %v13295_v47, %v11073_v10  ;;  %v6595_v59 = vpop.f32.mrb[255].mxu0 }
0x17bd   :  { %v6596_v36 = vadd.f32 %v11073_v10, %v6595_v59 }
0x17be   :  { %v14360_v56 = vpack.c.bf16 %v6604_v19, %v6601_v43  ;;  %14355 = vmatpush3.bf16.msra.mxu0 %v14352_v53 }
0x17bf   :  { %v14356_v7 = vpack.c.bf16 %v6596_v36, %v6593_v11  ;;  %13461 = vmatmul.mubr.msk.bf16.gmra.mrb[28].mxu1 %vm258_vm1, %v17545_v25 }
0x17c0   :  { %13468 = vmatprep.mubr.msk.bf16.mxu1 %vm258_vm1, %v17418_v48 }
0x17c1   :  { %14357 = vmatprep.subr.bf16.mxu0 %v14356_v7 }
0x17c2   :  { %14359 = vmatpush3.bf16.msra.mxu0 %v14356_v7 }
0x17c3   :  { %14361 = vmatprep.subr.bf16.mxu0 %v14360_v56 }
0x17c6   :  { %14363 = vmatpush3.bf16.msra.mxu0 %v14360_v56 }
0x17c7   :  { %13469 = vmatmul.mubr.msk.bf16.vlgmr.msra.gmra.mrb[32].mxu1 %vm258_vm1, %v17436_v30 }
0x17c8   :  { %13472 = vmatprep.mubr.msk.bf16.mxu1 %vm258_vm1, %v17458_v5 }
0x17cf   :  { %13473 = vmatmul.mubr.msk.bf16.gmra.mrb[36].mxu1 %vm258_vm1, %v17476_v27 }
0x17d0   :  { %13476 = vmatprep.mubr.msk.bf16.mxu1 %vm258_vm1, %v17494_v63 }
0x17d7   :  { %13477 = vmatmul.mubr.msk.bf16.gmra.mrb[40].mxu1 %vm258_vm1, %v17512_v3 }
0x17d8   :  { %13480 = vmatprep.mubr.msk.bf16.mxu1 %vm258_vm1, %v17530_v32 }
0x17df   :  { %13481 = vmatmul.mubr.msk.bf16.gmra.mrb[44].mxu1 %vm258_vm1, %v17545_v25 }
0x185a   :  { %v18052_v10 = vpop.f32.mrb[0].mxu1 }
0x185b   :  { %6850 = vmax.xlane.f32.xlu1 %v18052_v10  ;;  %v18055_v8 = vpop.f32.mrb[1].mxu1 }
0x185c   :  { %6848 = vmax.xlane.f32.xlu0 %v18055_v8 }
0x185e   :  { %v18058_v29 = vpop.f32.mrb[2].mxu1 }
0x185f   :  { %6854 = vmax.xlane.f32.xlu1 %v18058_v29  ;;  %v18061_v49 = vpop.f32.mrb[3].mxu1 }
0x1860   :  { %6852 = vmax.xlane.f32.xlu0 %v18061_v49 }
0x1862   :  { %v18064_v53 = vpop.f32.mrb[4].mxu1 }
0x1863   :  { %6858 = vmax.xlane.f32.xlu1 %v18064_v53  ;;  %v18067_v21 = vpop.f32.mrb[5].mxu1 }
0x1864   :  { %6856 = vmax.xlane.f32.xlu0 %v18067_v21 }
0x1866   :  { %v18070_v62 = vpop.f32.mrb[6].mxu1 }
0x1867   :  { %6862 = vmax.xlane.f32.xlu1 %v18070_v62  ;;  %v18073_v24 = vpop.f32.mrb[7].mxu1 }
0x1868   :  { %6860 = vmax.xlane.f32.xlu0 %v18073_v24 }
0x186a   :  { %v18076_v47 = vpop.f32.mrb[8].mxu1 }
0x186b   :  { %6866 = vmax.xlane.f32.xlu1 %v18076_v47  ;;  %v18079_v43 = vpop.f32.mrb[9].mxu1 }
0x186c   :  { %6864 = vmax.xlane.f32.xlu0 %v18079_v43 }
0x186e   :  { %v18082_v19 = vpop.f32.mrb[10].mxu1 }
0x186f   :  { %6870 = vmax.xlane.f32.xlu1 %v18082_v19  ;;  %v18085_v59 = vpop.f32.mrb[11].mxu1 }
0x1870   :  { %6868 = vmax.xlane.f32.xlu0 %v18085_v59 }
0x1872   :  { %v18088_v11 = vpop.f32.mrb[12].mxu1 }
0x1873   :  { %6874 = vmax.xlane.f32.xlu1 %v18088_v11  ;;  %v18091_v36 = vpop.f32.mrb[13].mxu1 }
0x1874   :  { %6872 = vmax.xlane.f32.xlu0 %v18091_v36 }
0x1876   :  { %v18094_v56 = vpop.f32.mrb[14].mxu1 }
0x1877   :  { %6878 = vmax.xlane.f32.xlu1 %v18094_v56  ;;  %v18097_v7 = vpop.f32.mrb[15].mxu1 }
0x1878   :  { %6876 = vmax.xlane.f32.xlu0 %v18097_v7 }
0x187a   :  { %v13450_v22 = vpop.f32.mrb[16].mxu1 }
0x187b   :  { %v18103_v0 = vadd.f32 %v13450_v22, %v11138_v55  ;;  %v7454_v17 = vpop.f32.mrb[17].mxu1 }
0x187c   :  { %v7455_v1 = vadd.f32 %v11138_v55, %v7454_v17  ;;  %v13451_v58 = vpop.f32.mrb[18].mxu1 }
0x187d   :  { %v18105_v52 = vadd.f32 %v13451_v58, %v11138_v55  ;;  %v7457_v41 = vpop.f32.mrb[19].mxu1 }
0x187e   :  { %v18107_v38 = vadd.f32 %v11138_v55, %v7457_v41  ;;  %13536 = vmatprep.mubr.msk.f32.mxu1 %vm624_vm2, %v7455_v1 }
0x1882   :  { %v13454_v40 = vpop.f32.mrb[20].mxu1 }
0x1883   :  { %v18110_v4 = vadd.f32 %v13454_v40, %v11138_v55  ;;  %v7470_v6 = vpop.f32.mrb[21].mxu1 }
0x1884   :  { %v18112_v54 = vadd.f32 %v11138_v55, %v7470_v6  ;;  %v13455_v14 = vpop.f32.mrb[22].mxu1 }
0x1885   :  { %v18114_v42 = vadd.f32 %v13455_v14, %v11138_v55  ;;  %v7473_v22 = vpop.f32.mrb[23].mxu1 }
0x1886   :  { %v18116_v18 = vadd.f32 %v11138_v55, %v7473_v22 }
0x188a   :  { %v13458_v17 = vpop.f32.mrb[24].mxu1 }
0x188b   :  { %v18118_v58 = vadd.f32 %v13458_v17, %v11138_v55  ;;  %v7486_v50 = vpop.f32.mrb[25].mxu1 }
0x188c   :  { %v18120_v41 = vadd.f32 %v11138_v55, %v7486_v50  ;;  %v13459_v44 = vpop.f32.mrb[26].mxu1 }
0x188d   :  { %v18122_v1 = vadd.f32 %v13459_v44, %v11138_v55  ;;  %v7489_v40 = vpop.f32.mrb[27].mxu1  ;;  %v11154_v44 = vld [vmem:[%s19419_s4 + $0x12] ss:$0 sm:$0xff] }
0x188e   :  { %v18124_v28 = vadd.f32 %v11138_v55, %v7489_v40 }
0x1892   :  { %v13462_v6 = vpop.f32.mrb[28].mxu1 }
0x1893   :  { %v18126_v23 = vadd.f32 %v13462_v6, %v11138_v55  ;;  %v7502_v14 = vpop.f32.mrb[29].mxu1 }
0x1894   :  { %v18128_v33 = vadd.f32 %v11138_v55, %v7502_v14  ;;  %v13463_v22 = vpop.f32.mrb[30].mxu1 }
0x1895   :  { %v18130_v12 = vadd.f32 %v13463_v22, %v11138_v55  ;;  %v7505_v17 = vpop.f32.mrb[31].mxu1 }
0x1896   :  { %v18132_v2 = vadd.f32 %v11138_v55, %v7505_v17 }
0x189a   :  { %v13470_v50 = vpop.f32.mrb[32].mxu1 }
0x189b   :  { %v7576_v37 = vpop.f32.mrb[33].mxu1  ;;  %v7585_v60 = vadd.f32 %v13470_v50, %v11154_v44 }
0x189c   :  { %v13471_v40 = vpop.f32.mrb[34].mxu1  ;;  %v7577_v31 = vadd.f32 %v11154_v44, %v7576_v37 }
0x189d   :  { %v7588_v39 = vadd.f32 %v13471_v40, %v11154_v44  ;;  %v7579_v6 = vpop.f32.mrb[35].mxu1 }
0x189e   :  { %v7580_v45 = vadd.f32 %v11154_v44, %v7579_v6 }
0x189f   :  { %v14370_v14 = vpack.c.bf16 %v7588_v39, %v7585_v60 }
0x18a0   :  { %v14364_v61 = vpack.c.bf16 %v7580_v45, %v7577_v31 }
0x18a2   :  { %v13474_v51 = vpop.f32.mrb[36].mxu1  ;;  %14366 = vmatprep.subr.msk.bf16.mxu1 %vm15690_vm3, %v14364_v61 }
0x18a3   :  { %v7592_v55 = vpop.f32.mrb[37].mxu1  ;;  %14369 = vmatpush3.bf16.xpose.msk.msra.mxu1 %vm15690_vm3, %v14364_v61  ;;  %v7601_v17 = vadd.f32 %v13474_v51, %v11154_v44 }
0x18a4   :  { %v13475_v22 = vpop.f32.mrb[38].mxu1  ;;  %14372 = vmatprep.subr.msk.bf16.mxu1 %vm15690_vm3, %v14370_v14  ;;  %v7593_v57 = vadd.f32 %v11154_v44, %v7592_v55 }
0x18a5   :  { %v7604_v50 = vadd.f32 %v13475_v22, %v11154_v44  ;;  %v7595_v40 = vpop.f32.mrb[39].mxu1 }
0x18a6   :  { %v7596_v37 = vadd.f32 %v11154_v44, %v7595_v40 }
0x18a7   :  { %v14382_v6 = vpack.c.bf16 %v7604_v50, %v7601_v17 }
0x18a8   :  { %v14376_v39 = vpack.c.bf16 %v7596_v37, %v7593_v57 }
0x18aa   :  { %v13478_v45 = vpop.f32.mrb[40].mxu1 }
0x18ab   :  { %v7608_v31 = vpop.f32.mrb[41].mxu1  ;;  %14375 = vmatpush3.bf16.xpose.msk.msra.mxu1 %vm15690_vm3, %v14370_v14  ;;  %v7617_v61 = vadd.f32 %v13478_v45, %v11154_v44 }
0x18ac   :  { %v13479_v60 = vpop.f32.mrb[42].mxu1  ;;  %14378 = vmatprep.subr.msk.bf16.mxu1 %vm15690_vm3, %v14376_v39  ;;  %v7609_v16 = vadd.f32 %v11154_v44, %v7608_v31 }
0x18ad   :  { %v7620_v46 = vadd.f32 %v13479_v60, %v11154_v44  ;;  %v7611_v35 = vpop.f32.mrb[43].mxu1 }
0x18ae   :  { %v7612_v51 = vadd.f32 %v11154_v44, %v7611_v35 }
0x18af   :  { %v14394_v22 = vpack.c.bf16 %v7620_v46, %v7617_v61 }
0x18b0   :  { %v14388_v26 = vpack.c.bf16 %v7612_v51, %v7609_v16  ;;  %v14678_v16 = vld [vmem:[%s19418_s3 + $0xf0] sm:$0xff]  }
0x18b2   :  { %v13482_v55 = vpop.f32.mrb[44].mxu1 }
0x18b3   :  { %v7624_v40 = vpop.f32.mrb[45].mxu1  ;;  %14381 = vmatpush3.bf16.xpose.msk.msra.mxu1 %vm15690_vm3, %v14376_v39  ;;  %v7633_v14 = vadd.f32 %v13482_v55, %v11154_v44 }
0x18b4   :  { %v13483_v57 = vpop.f32.mrb[46].mxu1  ;;  %14384 = vmatprep.subr.msk.bf16.mxu1 %vm15690_vm3, %v14382_v6  ;;  %v7625_v37 = vadd.f32 %v11154_v44, %v7624_v40 }
0x18b5   :  { %v7636_v17 = vadd.f32 %v13483_v57, %v11154_v44  ;;  %v7627_v50 = vpop.f32.mrb[47].mxu1 }
0x18b6   :  { %v7628_v45 = vadd.f32 %v11154_v44, %v7627_v50 }
0x18b7   :  { %v14406_v60 = vpack.c.bf16 %v7636_v17, %v7633_v14 }
0x18b8   :  { %v14400_v34 = vpack.c.bf16 %v7628_v45, %v7625_v37 }
0x18bb   :  { %14387 = vmatpush3.bf16.xpose.msk.msra.mxu1 %vm15690_vm3, %v14382_v6 }
0x18bc   :  { %14390 = vmatprep.subr.msk.bf16.mxu1 %vm15690_vm3, %v14388_v26 }
0x18c3   :  { %14393 = vmatpush3.bf16.xpose.msk.msra.mxu1 %vm15690_vm3, %v14388_v26  ;;  %v14679_v26 = vld [vmem:[%s19418_s3 + $0xf8] sm:$0xff]  }
0x18c4   :  { %14396 = vmatprep.subr.msk.bf16.mxu1 %vm15690_vm3, %v14394_v22 }
0x18cb   :  { %14399 = vmatpush3.bf16.xpose.msk.msra.mxu1 %vm15690_vm3, %v14394_v22 }
0x18cc   :  { %14402 = vmatprep.subr.msk.bf16.mxu1 %vm15690_vm3, %v14400_v34 }
0x18d3   :  { %14405 = vmatpush3.bf16.xpose.msk.msra.mxu1 %vm15690_vm3, %v14400_v34  ;;  %v18182_v34 = vld [vmem:[%s19418_s3 + $0x170] sm:$0xff]  }
0x18d4   :  { %14408 = vmatprep.subr.msk.bf16.mxu1 %vm15690_vm3, %v14406_v60 }
0x18db   :  { %14411 = vmatpush3.bf16.xpose.msk.msra.mxu1 %vm15690_vm3, %v14406_v60 }
0x18dc   :  { %13634 = vmatprep.subr.bf16.mxu1 %v14678_v16 }
0x18e2   :  { %13537 = vmatmul.mubr.msk.f32.vlgmr.msra.gmra.mrb[48].mxu1 %vm624_vm2, %v18107_v38 }
0x18e3   :  { %13539 = vmatprep.mubr.msk.f32.mxu1 %vm624_vm2, %v18103_v0  ;;  %13635 = vmatpush3.bf16.msra.mxu1 %v14678_v16 }
0x18e4   :  { %13636 = vmatprep.subr.bf16.mxu1 %v14679_v26 }
0x18e6   :  { %13540 = vmatmul.mubr.msk.f32.gmra.mrb[50].mxu1 %vm624_vm2, %v18105_v52 }
0x18e7   :  { %13542 = vmatprep.mubr.msk.f32.mxu1 %vm624_vm2, %v18112_v54  ;;  %13637 = vmatpush3.bf16.msra.mxu1 %v14679_v26 }
0x18e8   :  { %v6851_v35 = vpop.xlane.xlu1 %6850  ;;  %13674 = vmatprep.subr.bf16.mxu1 %v18182_v34 }
0x18e9   :  { %v6881_v38 = vsub.f32 %v18052_v10, %v6851_v35  ;;  %v6849_v46 = vpop.xlane.xlu0 %6848 }
0x18ea   :  { %v6880_v0 = vsub.f32 %v18055_v8, %v6849_v46  ;;  %13543 = vmatmul.mubr.msk.f32.gmra.mrb[52].mxu1 %vm624_vm2, %v18116_v18 }
0x18eb   :  { %v6898_v44 = vmul.f32 1.442695, %v6881_v38  ;;  %13545 = vmatprep.mubr.msk.f32.mxu1 %vm624_vm2, %v18110_v4 }
0x18ec   :  { %v6896_v52 = vmul.f32 1.442695, %v6880_v0  ;;  %v6855_v6 = vpop.xlane.xlu1 %6854 }
0x18ed   :  { %15076 = vpow2.f32 %v6898_v44  ;;  %v6883_v54 = vsub.f32 %v18058_v29, %v6855_v6  ;;  %v6853_v39 = vpop.xlane.xlu0 %6852 }
0x18ee   :  { %15078 = vpow2.f32 %v6896_v52  ;;  %v6882_v31 = vsub.f32 %v18061_v49, %v6853_v39  ;;  %13546 = vmatmul.mubr.msk.f32.gmra.mrb[54].mxu1 %vm624_vm2, %v18114_v42 }
0x18ef   :  { %v6902_v10 = vmul.f32 1.442695, %v6883_v54  ;;  %13548 = vmatprep.mubr.msk.f32.mxu1 %vm624_vm2, %v18120_v41 }
0x18f0   :  { %v6900_v18 = vmul.f32 1.442695, %v6882_v31  ;;  %v6859_v8 = vpop.xlane.xlu1 %6858 }
0x18f1   :  { %15080 = vpow2.f32 %v6902_v10  ;;  %v6885_v4 = vsub.f32 %v18064_v53, %v6859_v8  ;;  %v6857_v61 = vpop.xlane.xlu0 %6856 }
0x18f2   :  { %15082 = vpow2.f32 %v6900_v18  ;;  %v6884_v29 = vsub.f32 %v18067_v21, %v6857_v61  ;;  %13549 = vmatmul.mubr.msk.f32.gmra.mrb[56].mxu1 %vm624_vm2, %v18124_v28 }
0x18f3   :  { %v6906_v49 = vmul.f32 1.442695, %v6885_v4  ;;  %13551 = vmatprep.mubr.msk.f32.mxu1 %vm624_vm2, %v18118_v58 }
0x18f4   :  { %v6904_v42 = vmul.f32 1.442695, %v6884_v29  ;;  %v6863_v51 = vpop.xlane.xlu1 %6862 }
0x18f5   :  { %15084 = vpow2.f32 %v6906_v49  ;;  %v6887_v41 = vsub.f32 %v18070_v62, %v6863_v51  ;;  %v6861_v22 = vpop.xlane.xlu0 %6860 }
0x18f6   :  { %15086 = vpow2.f32 %v6904_v42  ;;  %v6886_v53 = vsub.f32 %v18073_v24, %v6861_v22  ;;  %13552 = vmatmul.mubr.msk.f32.gmra.mrb[58].mxu1 %vm624_vm2, %v18122_v1 }
0x18f7   :  { %v18211_v21 = vpop.eup %15076  ;;  %v6910_v55 = vmul.f32 1.442695, %v6887_v41  ;;  %13554 = vmatprep.mubr.msk.f32.mxu1 %vm624_vm2, %v18128_v33 }
0x18f8   :  { %v18215_v28 = vpop.eup %15078  ;;  %v6908_v58 = vmul.f32 1.442695, %v6886_v53  ;;  %v6867_v40 = vpop.xlane.xlu1 %6866  ;;  %6930 = vadd.xlane.f32.xlu1 %v18211_v21 }
0x18f9   :  { %15088 = vpow2.f32 %v6910_v55  ;;  %v6889_v62 = vsub.f32 %v18076_v47, %v6867_v40  ;;  %v6865_v57 = vpop.xlane.xlu0 %6864  ;;  %6928 = vadd.xlane.f32.xlu0 %v18215_v28 }
0x18fa   :  { %15090 = vpow2.f32 %v6908_v58  ;;  %v6888_v24 = vsub.f32 %v18079_v43, %v6865_v57  ;;  %13555 = vmatmul.mubr.msk.f32.gmra.mrb[60].mxu1 %vm624_vm2, %v18132_v2 }
0x18fb   :  { %v18223_v1 = vpop.eup %15080  ;;  %v6914_v33 = vmul.f32 1.442695, %v6889_v62  ;;  %13557 = vmatprep.mubr.msk.f32.mxu1 %vm624_vm2, %v18126_v23 }
0x18fc   :  { %v18227_v14 = vpop.eup %15082  ;;  %v6912_v17 = vmul.f32 1.442695, %v6888_v24  ;;  %v6871_v50 = vpop.xlane.xlu1 %6870  ;;  %6934 = vadd.xlane.f32.xlu1 %v18223_v1 }
0x18fd   :  { %15092 = vpow2.f32 %v6914_v33  ;;  %v6891_v47 = vsub.f32 %v18082_v19, %v6871_v50  ;;  %v6869_v37 = vpop.xlane.xlu0 %6868  ;;  %6932 = vadd.xlane.f32.xlu0 %v18227_v14  ;;  %v14681_v19 = vld [vmem:[%s19418_s3 + $0x178] sm:$0xff]  }
0x18fe   :  { %15094 = vpow2.f32 %v6912_v17  ;;  %v6890_v2 = vsub.f32 %v18085_v59, %v6869_v37  ;;  %13558 = vmatmul.mubr.msk.f32.gmra.mrb[62].mxu1 %vm624_vm2, %v18130_v12 }
0x18ff   :  { %v18235_v43 = vpop.eup %15084  ;;  %v6918_v23 = vmul.f32 1.442695, %v6891_v47  ;;  %13638 = vmatprep.mubr.msk.bf16.mxu1 %vm258_vm1, %v17418_v48 }
0x1900   :  { %v18239_v45 = vpop.eup %15086  ;;  %v6916_v60 = vmul.f32 1.442695, %v6890_v2  ;;  %v6875_v16 = vpop.xlane.xlu1 %6874  ;;  %6938 = vadd.xlane.f32.xlu1 %v18235_v43 }
0x1901   :  { %15096 = vpow2.f32 %v6918_v23  ;;  %v6893_v59 = vsub.f32 %v18088_v11, %v6875_v16  ;;  %v6873_v12 = vpop.xlane.xlu0 %6872  ;;  %6936 = vadd.xlane.f32.xlu0 %v18239_v45 }
0x1902   :  { %15098 = vpow2.f32 %v6916_v60  ;;  %v6892_v26 = vsub.f32 %v18091_v36, %v6873_v12  ;;  %13639 = vmatmul.mubr.msk.bf16.vlgmr.msra.gmra.mrb[64].mxu1 %vm258_vm1, %v17436_v30 }
0x1903   :  { %v18250_v35 = vpop.eup %15088  ;;  %v6922_v38 = vmul.f32 1.442695, %v6893_v59  ;;  %13642 = vmatprep.mubr.msk.bf16.mxu1 %vm258_vm1, %v17458_v5  ;;  %13675 = vmatpush3.bf16.msra.mxu1 %v18182_v34 }
0x1904   :  { %v18255_v46 = vpop.eup %15090  ;;  %v6920_v11 = vmul.f32 1.442695, %v6892_v26  ;;  %6942 = vadd.xlane.f32.xlu1 %v18250_v35  ;;  %v6879_v0 = vpop.xlane.xlu1 %6878  ;;  %13676 = vmatprep.subr.bf16.mxu1 %v14681_v19 }
0x1905   :  { %15100 = vpow2.f32 %v6922_v38  ;;  %v6895_v36 = vsub.f32 %v18094_v56, %v6879_v0  ;;  %6940 = vadd.xlane.f32.xlu0 %v18255_v46  ;;  %v6877_v44 = vpop.xlane.xlu0 %6876 }
0x1906   :  { %15102 = vpow2.f32 %v6920_v11  ;;  %v6894_v52 = vsub.f32 %v18097_v7, %v6877_v44 }
0x1907   :  { %v18261_v6 = vpop.eup %15092  ;;  %v6926_v54 = vmul.f32 1.442695, %v6895_v36  ;;  %13677 = vmatpush3.bf16.msra.mxu1 %v14681_v19 }
0x1908   :  { %v18263_v34 = vpop.eup %15094  ;;  %v6924_v39 = vmul.f32 1.442695, %v6894_v52  ;;  %6946 = vadd.xlane.f32.xlu1 %v18261_v6 }
0x1909   :  { %15104 = vpow2.f32 %v6926_v54  ;;  %6944 = vadd.xlane.f32.xlu0 %v18263_v34 }
0x190a   :  { %15106 = vpow2.f32 %v6924_v39  ;;  %13643 = vmatmul.mubr.msk.bf16.gmra.mrb[68].mxu1 %vm258_vm1, %v17476_v27 }
0x190b   :  { %v18269_v56 = vpop.eup %15096  ;;  %13646 = vmatprep.mubr.msk.bf16.mxu1 %vm258_vm1, %v17494_v63 }
0x190c   :  { %v18273_v7 = vpop.eup %15098  ;;  %6950 = vadd.xlane.f32.xlu1 %v18269_v56 }
0x190d   :  { %6948 = vadd.xlane.f32.xlu0 %v18273_v7 }
0x190f   :  { %v18277_v31 = vpop.eup %15100 }
0x1910   :  { %v18279_v10 = vpop.eup %15102  ;;  %6954 = vadd.xlane.f32.xlu1 %v18277_v31 }
0x1911   :  { %6952 = vadd.xlane.f32.xlu0 %v18279_v10 }
0x1912   :  { %13647 = vmatmul.mubr.msk.bf16.gmra.mrb[72].mxu1 %vm258_vm1, %v17512_v3 }
0x1913   :  { %v18285_v18 = vpop.eup %15104  ;;  %13650 = vmatprep.mubr.msk.bf16.mxu1 %vm258_vm1, %v17530_v32 }
0x1914   :  { %v18289_v8 = vpop.eup %15106  ;;  %6958 = vadd.xlane.f32.xlu1 %v18285_v18 }
0x1915   :  { %6956 = vadd.xlane.f32.xlu0 %v18289_v8 }
0x191a   :  { %13651 = vmatmul.mubr.msk.bf16.gmra.mrb[76].mxu1 %vm258_vm1, %v17545_v25 }
0x191b   :  { %13678 = vmatprep.mubr.msk.bf16.mxu1 %vm258_vm1, %v17418_v48 }
0x1922   :  { %13679 = vmatmul.mubr.msk.bf16.vlgmr.msra.gmra.mrb[80].mxu1 %vm258_vm1, %v17436_v30 }
0x1923   :  { %13682 = vmatprep.mubr.msk.bf16.mxu1 %vm258_vm1, %v17458_v5 }
0x192a   :  { %13683 = vmatmul.mubr.msk.bf16.gmra.mrb[84].mxu1 %vm258_vm1, %v17476_v27 }
0x192b   :  { %13686 = vmatprep.mubr.msk.bf16.mxu1 %vm258_vm1, %v17494_v63 }
0x1932   :  { %13687 = vmatmul.mubr.msk.bf16.gmra.mrb[88].mxu1 %vm258_vm1, %v17512_v3 }
0x1933   :  { %13690 = vmatprep.mubr.msk.bf16.mxu1 %vm258_vm1, %v17530_v32 }
0x193a   :  { %13691 = vmatmul.mubr.msk.bf16.gmra.mrb[92].mxu1 %vm258_vm1, %v17545_v25 }
0x1985   :  { %v6931_v4 = vpop.xlane.xlu1 %6930 }
0x1986   :  { %15108 = vrcp.f32 %v6931_v4  ;;  %v6929_v61 = vpop.xlane.xlu0 %6928 }
0x1987   :  { %15110 = vrcp.f32 %v6929_v61 }
0x1989   :  { %v6935_v29 = vpop.xlane.xlu1 %6934 }
0x198a   :  { %15112 = vrcp.f32 %v6935_v29  ;;  %v6933_v49 = vpop.xlane.xlu0 %6932 }
0x198b   :  { %15114 = vrcp.f32 %v6933_v49 }
0x198d   :  { %v6939_v42 = vpop.xlane.xlu1 %6938 }
0x198e   :  { %15116 = vrcp.f32 %v6939_v42  ;;  %v6937_v51 = vpop.xlane.xlu0 %6936 }
0x198f   :  { %15118 = vrcp.f32 %v6937_v51 }
0x1990   :  { %v15109_v41 = vpop.eup %15108 }
0x1991   :  { %v15111_v22 = vpop.eup %15110  ;;  %v6943_v53 = vpop.xlane.xlu1 %6942  ;;  %v6977_v40 = vmul.f32 %v15109_v41, %v18211_v21 }
0x1992   :  { %15120 = vrcp.f32 %v6943_v53  ;;  %v6941_v55 = vpop.xlane.xlu0 %6940  ;;  %v6976_v58 = vmul.f32 %v15111_v22, %v18215_v28 }
0x1993   :  { %15122 = vrcp.f32 %v6941_v55 }
0x1994   :  { %v15113_v62 = vpop.eup %15112  ;;  %13384 = vmatprep.mubr.f32.mxu0 %v6976_v58 }
0x1995   :  { %v15115_v57 = vpop.eup %15114  ;;  %v6947_v24 = vpop.xlane.xlu1 %6946  ;;  %13385 = vmatmul.mubr.f32.vlgmr.msra.gmra.mrb[0].mxu0 %v6977_v40  ;;  %v6979_v50 = vmul.f32 %v15113_v62, %v18223_v1  ;;  %v18378_v62 = vld [vmem:[%s19419_s4 + $0xf] ss:$0 sm:$0xff] }
0x1996   :  { %15124 = vrcp.f32 %v6947_v24  ;;  %v6945_v33 = vpop.xlane.xlu0 %6944  ;;  %v6978_v17 = vmul.f32 %v15115_v57, %v18227_v14  ;;  %v11116_v57 = vld [vmem:[%s19420_s5 + $0x14] sm:$0xf] }
0x1997   :  { %15126 = vrcp.f32 %v6945_v33  ;;  %14624 = vmatprep.subr.msk.bf16.mxu0 %vm2094_vm4, %v11116_v57  ;;  %v7172_v33 = vsel %vm2094_vm4, %v11116_v57, 0  ;;  %v11259_v57 = vld [vmem:[%s19419_s4 + $0x17] ss:$0 sm:$0xff] }
0x1998   :  { %v15117_v47 = vpop.eup %15116  ;;  %13387 = vmatprep.mubr.f32.mxu0 %v6978_v17  ;;  %13409 = vmatpush3.bf16.msra.mxu0 %v7172_v33 }
0x1999   :  { %v15119_v37 = vpop.eup %15118  ;;  %v6951_v2 = vpop.xlane.xlu1 %6950  ;;  %13388 = vmatmul.mubr.f32.gmra.mrb[2].mxu0 %v6979_v50  ;;  %v6981_v23 = vmul.f32 %v15117_v47, %v18235_v43 }
0x199a   :  { %15128 = vrcp.f32 %v6951_v2  ;;  %v6949_v21 = vpop.xlane.xlu0 %6948  ;;  %v6980_v28 = vmul.f32 %v15119_v37, %v18239_v45 }
0x199b   :  { %15130 = vrcp.f32 %v6949_v21 }
0x199c   :  { %v15121_v60 = vpop.eup %15120  ;;  %13390 = vmatprep.mubr.f32.mxu0 %v6980_v28 }
0x199d   :  { %v15123_v16 = vpop.eup %15122  ;;  %v6955_v19 = vpop.xlane.xlu1 %6954  ;;  %13391 = vmatmul.mubr.f32.gmra.mrb[4].mxu0 %v6981_v23  ;;  %v6983_v59 = vmul.f32 %v15121_v60, %v18250_v35 }
0x199e   :  { %15132 = vrcp.f32 %v6955_v19  ;;  %v6953_v14 = vpop.xlane.xlu0 %6952  ;;  %v6982_v1 = vmul.f32 %v15123_v16, %v18255_v46 }
0x199f   :  { %15134 = vrcp.f32 %v6953_v14 }
0x19a0   :  { %v15125_v12 = vpop.eup %15124  ;;  %13393 = vmatprep.mubr.f32.mxu0 %v6982_v1 }
0x19a1   :  { %v15127_v26 = vpop.eup %15126  ;;  %v6959_v38 = vpop.xlane.xlu1 %6958  ;;  %13394 = vmatmul.mubr.f32.gmra.mrb[6].mxu0 %v6983_v59  ;;  %v6985_v11 = vmul.f32 %v15125_v12, %v18261_v6 }
0x19a2   :  { %15136 = vrcp.f32 %v6959_v38  ;;  %v6957_v45 = vpop.xlane.xlu0 %6956  ;;  %v6984_v43 = vmul.f32 %v15127_v26, %v18263_v34 }
0x19a3   :  { %15138 = vrcp.f32 %v6957_v45 }
0x19a4   :  { %v15129_v0 = vpop.eup %15128  ;;  %13396 = vmatprep.mubr.f32.mxu0 %v6984_v43 }
0x19a5   :  { %v15131_v36 = vpop.eup %15130  ;;  %13397 = vmatmul.mubr.f32.gmra.mrb[8].mxu0 %v6985_v11  ;;  %v6987_v35 = vmul.f32 %v15129_v0, %v18269_v56 }
0x19a6   :  { %v6986_v46 = vmul.f32 %v15131_v36, %v18273_v7 }
0x19a8   :  { %v15133_v44 = vpop.eup %15132  ;;  %13399 = vmatprep.mubr.f32.mxu0 %v6986_v46 }
0x19a9   :  { %v15135_v52 = vpop.eup %15134  ;;  %13400 = vmatmul.mubr.f32.gmra.mrb[10].mxu0 %v6987_v35  ;;  %v6989_v39 = vmul.f32 %v15133_v44, %v18277_v31 }
0x19aa   :  { %v6988_v54 = vmul.f32 %v15135_v52, %v18279_v10 }
0x19ac   :  { %v15137_v34 = vpop.eup %15136  ;;  %13402 = vmatprep.mubr.f32.mxu0 %v6988_v54 }
0x19ad   :  { %v15139_v4 = vpop.eup %15138  ;;  %13403 = vmatmul.mubr.f32.gmra.mrb[12].mxu0 %v6989_v39  ;;  %v6991_v61 = vmul.f32 %v15137_v34, %v18285_v18 }
0x19ae   :  { %v6990_v6 = vmul.f32 %v15139_v4, %v18289_v8  ;;  %v18432_v4 = vld [vmem:[%s19420_s5 + $0x10] sm:$0xf] }
0x19af   :  { %14625 = vmatprep.subr.msk.bf16.mxu0 %vm2094_vm4, %v18432_v4 }
0x19b0   :  { %13405 = vmatprep.mubr.f32.mxu0 %v6990_v6 }
0x19b1   :  { %13406 = vmatmul.mubr.f32.gmra.mrb[14].mxu0 %v6991_v61 }
0x19b5   :  { %v18327_v7 = vpop.f32.mrb[48].mxu1 }
0x19b6   :  { %8004 = vmax.xlane.f32.xlu1 %v18327_v7  ;;  %v18330_v56 = vpop.f32.mrb[49].mxu1 }
0x19b7   :  { %8002 = vmax.xlane.f32.xlu0 %v18330_v56 }
0x19b9   :  { %v18333_v10 = vpop.f32.mrb[50].mxu1 }
0x19ba   :  { %8008 = vmax.xlane.f32.xlu1 %v18333_v10  ;;  %v18336_v31 = vpop.f32.mrb[51].mxu1 }
0x19bb   :  { %8006 = vmax.xlane.f32.xlu0 %v18336_v31 }
0x19bd   :  { %v18339_v8 = vpop.f32.mrb[52].mxu1 }
0x19be   :  { %8012 = vmax.xlane.f32.xlu1 %v18339_v8  ;;  %v18342_v18 = vpop.f32.mrb[53].mxu1 }
0x19bf   :  { %8010 = vmax.xlane.f32.xlu0 %v18342_v18 }
0x19c1   :  { %v18345_v29 = vpop.f32.mrb[54].mxu1 }
0x19c2   :  { %8016 = vmax.xlane.f32.xlu1 %v18345_v29  ;;  %v18348_v49 = vpop.f32.mrb[55].mxu1 }
0x19c3   :  { %8014 = vmax.xlane.f32.xlu0 %v18348_v49 }
0x19c5   :  { %v18351_v42 = vpop.f32.mrb[56].mxu1 }
0x19c6   :  { %8020 = vmax.xlane.f32.xlu1 %v18351_v42  ;;  %v18354_v51 = vpop.f32.mrb[57].mxu1 }
0x19c7   :  { %8018 = vmax.xlane.f32.xlu0 %v18354_v51 }
0x19c9   :  { %v18357_v41 = vpop.f32.mrb[58].mxu1 }
0x19ca   :  { %8024 = vmax.xlane.f32.xlu1 %v18357_v41  ;;  %v18360_v22 = vpop.f32.mrb[59].mxu1 }
0x19cb   :  { %8022 = vmax.xlane.f32.xlu0 %v18360_v22 }
0x19cd   :  { %v18363_v53 = vpop.f32.mrb[60].mxu1 }
0x19ce   :  { %8028 = vmax.xlane.f32.xlu1 %v18363_v53  ;;  %v18366_v55 = vpop.f32.mrb[61].mxu1 }
0x19cf   :  { %8026 = vmax.xlane.f32.xlu0 %v18366_v55 }
0x19d1   :  { %v18369_v58 = vpop.f32.mrb[62].mxu1 }
0x19d2   :  { %8032 = vmax.xlane.f32.xlu1 %v18369_v58  ;;  %v18372_v40 = vpop.f32.mrb[63].mxu1 }
0x19d3   :  { %8030 = vmax.xlane.f32.xlu0 %v18372_v40 }
0x19d5   :  { %v13640_v24 = vpop.f32.mrb[64].mxu1 }
0x19d6   :  { %v18386_v17 = vadd.f32 %v13640_v24, %v18378_v62  ;;  %v18388_v50 = vpop.f32.mrb[65].mxu1 }
0x19d7   :  { %v13641_v47 = vpop.f32.mrb[66].mxu1 }
0x19d8   :  { %v18391_v37 = vadd.f32 %v13641_v47, %v18378_v62  ;;  %v8503_v2 = vpop.f32.mrb[67].mxu1 }
0x19d9   :  { %v18394_v21 = vadd.f32 %v18378_v62, %v8503_v2 }
0x19dd   :  { %v13644_v28 = vpop.f32.mrb[68].mxu1 }
0x19de   :  { %v18397_v23 = vadd.f32 %v13644_v28, %v18378_v62  ;;  %v8516_v60 = vpop.f32.mrb[69].mxu1 }
0x19df   :  { %v18400_v16 = vadd.f32 %v18378_v62, %v8516_v60  ;;  %v13645_v19 = vpop.f32.mrb[70].mxu1 }
0x19e0   :  { %v18403_v14 = vadd.f32 %v13645_v19, %v18378_v62  ;;  %v8519_v1 = vpop.f32.mrb[71].mxu1 }
0x19e1   :  { %v18406_v59 = vadd.f32 %v18378_v62, %v8519_v1 }
0x19e5   :  { %v13648_v12 = vpop.f32.mrb[72].mxu1 }
0x19e6   :  { %v18409_v26 = vadd.f32 %v13648_v12, %v18378_v62  ;;  %v8532_v38 = vpop.f32.mrb[73].mxu1 }
0x19e7   :  { %v18412_v45 = vadd.f32 %v18378_v62, %v8532_v38  ;;  %v13649_v43 = vpop.f32.mrb[74].mxu1 }
0x19e8   :  { %v18415_v11 = vadd.f32 %v13649_v43, %v18378_v62  ;;  %v8535_v0 = vpop.f32.mrb[75].mxu1 }
0x19e9   :  { %v18418_v36 = vadd.f32 %v18378_v62, %v8535_v0 }
0x19ed   :  { %v13652_v46 = vpop.f32.mrb[76].mxu1 }
0x19ee   :  { %v18421_v35 = vadd.f32 %v13652_v46, %v18378_v62  ;;  %v8548_v44 = vpop.f32.mrb[77].mxu1 }
0x19ef   :  { %v18424_v52 = vadd.f32 %v18378_v62, %v8548_v44  ;;  %v13653_v54 = vpop.f32.mrb[78].mxu1 }
0x19f0   :  { %19587 = vst [vmem:[#allocation20_spill] sm:$0xff] %v18421_v35  ;;  %v18427_v39 = vadd.f32 %v13653_v54, %v18378_v62  ;;  %v8551_v34 = vpop.f32.mrb[79].mxu1 }
0x19f1   :  { %v18435_v6 = vadd.f32 %v18378_v62, %v8551_v34 }
0x19f2   :  { %19588 = vst [vmem:[#allocation19_spill] sm:$0xff] %v18427_v39 }
0x19f3   :  { %19589 = vst [vmem:[#allocation17_spill] sm:$0xff] %v18435_v6 }
0x19f5   :  { %v13680_v61 = vpop.f32.mrb[80].mxu1 }
0x19f6   :  { %v8744_v24 = vpop.f32.mrb[81].mxu1  ;;  %v8753_v47 = vadd.f32 %v13680_v61, %v11259_v57 }
0x19f7   :  { %v13681_v33 = vpop.f32.mrb[82].mxu1  ;;  %v8745_v60 = vadd.f32 %v11259_v57, %v8744_v24 }
0x19f8   :  { %v8756_v2 = vadd.f32 %v13681_v33, %v11259_v57  ;;  %v8747_v28 = vpop.f32.mrb[83].mxu1 }
0x19f9   :  { %v8748_v19 = vadd.f32 %v11259_v57, %v8747_v28 }
0x19fa   :  { %v14496_v1 = vpack.c.bf16 %v8756_v2, %v8753_v47  ;;  %v19611_v13 = vld [vmem:[#allocation17_spill] sm:$0xff] }
0x19fb   :  { %v14492_v12 = vpack.c.bf16 %v8748_v19, %v8745_v60 }
0x19fd   :  { %v13684_v38 = vpop.f32.mrb[84].mxu1  ;;  %14493 = vmatprep.subr.bf16.mxu1 %v14492_v12 }
0x19fe   :  { %v8760_v43 = vpop.f32.mrb[85].mxu1  ;;  %14495 = vmatpush3.bf16.msra.mxu1 %v14492_v12  ;;  %v8769_v46 = vadd.f32 %v13684_v38, %v11259_v57 }
0x19ff   :  { %v13685_v0 = vpop.f32.mrb[86].mxu1  ;;  %14497 = vmatprep.subr.bf16.mxu1 %v14496_v1  ;;  %v8761_v34 = vadd.f32 %v11259_v57, %v8760_v43 }
0x1a00   :  { %v8772_v44 = vadd.f32 %v13685_v0, %v11259_v57  ;;  %v8763_v54 = vpop.f32.mrb[87].mxu1 }
0x1a01   :  { %v8764_v39 = vadd.f32 %v11259_v57, %v8763_v54 }
0x1a02   :  { %v14504_v35 = vpack.c.bf16 %v8772_v44, %v8769_v46  ;;  %14499 = vmatpush3.bf16.msra.mxu1 %v14496_v1 }
0x1a03   :  { %v14500_v61 = vpack.c.bf16 %v8764_v39, %v8761_v34 }
0x1a05   :  { %v13688_v33 = vpop.f32.mrb[88].mxu1  ;;  %14501 = vmatprep.subr.bf16.mxu1 %v14500_v61 }
0x1a06   :  { %v8776_v24 = vpop.f32.mrb[89].mxu1  ;;  %14503 = vmatpush3.bf16.msra.mxu1 %v14500_v61  ;;  %v8785_v2 = vadd.f32 %v13688_v33, %v11259_v57 }
0x1a07   :  { %v13689_v47 = vpop.f32.mrb[90].mxu1  ;;  %14505 = vmatprep.subr.bf16.mxu1 %v14504_v35  ;;  %v8777_v19 = vadd.f32 %v11259_v57, %v8776_v24 }
0x1a08   :  { %v8788_v28 = vadd.f32 %v13689_v47, %v11259_v57  ;;  %v8779_v60 = vpop.f32.mrb[91].mxu1 }
0x1a09   :  { %v8780_v12 = vadd.f32 %v11259_v57, %v8779_v60 }
0x1a0a   :  { %v14512_v6 = vpack.c.bf16 %v8788_v28, %v8785_v2  ;;  %14507 = vmatpush3.bf16.msra.mxu1 %v14504_v35 }
0x1a0b   :  { %v14508_v38 = vpack.c.bf16 %v8780_v12, %v8777_v19 }
0x1a0d   :  { %v13692_v0 = vpop.f32.mrb[92].mxu1  ;;  %14509 = vmatprep.subr.bf16.mxu1 %v14508_v38 }
0x1a0e   :  { %v8792_v43 = vpop.f32.mrb[93].mxu1  ;;  %14511 = vmatpush3.bf16.msra.mxu1 %v14508_v38  ;;  %v8801_v39 = vadd.f32 %v13692_v0, %v11259_v57 }
0x1a0f   :  { %v13693_v1 = vpop.f32.mrb[94].mxu1  ;;  %14513 = vmatprep.subr.bf16.mxu1 %v14512_v6  ;;  %v8793_v54 = vadd.f32 %v11259_v57, %v8792_v43 }
0x1a10   :  { %v8804_v46 = vadd.f32 %v13693_v1, %v11259_v57  ;;  %v8795_v44 = vpop.f32.mrb[95].mxu1 }
0x1a11   :  { %v8796_v34 = vadd.f32 %v11259_v57, %v8795_v44 }
0x1a12   :  { %v14520_v61 = vpack.c.bf16 %v8804_v46, %v8801_v39  ;;  %14515 = vmatpush3.bf16.msra.mxu1 %v14512_v6 }
0x1a13   :  { %v14516_v33 = vpack.c.bf16 %v8796_v34, %v8793_v54 }
0x1a15   :  { %14517 = vmatprep.subr.bf16.mxu1 %v14516_v33 }
0x1a16   :  { %14519 = vmatpush3.bf16.msra.mxu1 %v14516_v33 }
0x1a17   :  { %14521 = vmatprep.subr.bf16.mxu1 %v14520_v61 }
0x1a1a   :  { %14523 = vmatpush3.bf16.msra.mxu1 %v14520_v61 }
0x1a43   :  { %v8005_v35 = vpop.xlane.xlu1 %8004 }
0x1a44   :  { %v8035_v24 = vsub.f32 %v18327_v7, %v8005_v35  ;;  %v8003_v47 = vpop.xlane.xlu0 %8002 }
0x1a45   :  { %v8034_v2 = vsub.f32 %v18330_v56, %v8003_v47 }
0x1a46   :  { %v8052_v28 = vmul.f32 1.442695, %v8035_v24 }
0x1a47   :  { %v8050_v60 = vmul.f32 1.442695, %v8034_v2  ;;  %v8009_v19 = vpop.xlane.xlu1 %8008 }
0x1a48   :  { %15140 = vpow2.f32 %v8052_v28  ;;  %v8037_v12 = vsub.f32 %v18333_v10, %v8009_v19  ;;  %v8007_v57 = vpop.xlane.xlu0 %8006 }
0x1a49   :  { %15142 = vpow2.f32 %v8050_v60  ;;  %v8036_v6 = vsub.f32 %v18336_v31, %v8007_v57 }
0x1a4a   :  { %v8056_v38 = vmul.f32 1.442695, %v8037_v12 }
0x1a4b   :  { %v8054_v0 = vmul.f32 1.442695, %v8036_v6  ;;  %v8013_v43 = vpop.xlane.xlu1 %8012 }
0x1a4c   :  { %15144 = vpow2.f32 %v8056_v38  ;;  %v8039_v1 = vsub.f32 %v18339_v8, %v8013_v43  ;;  %v8011_v7 = vpop.xlane.xlu0 %8010 }
0x1a4d   :  { %15146 = vpow2.f32 %v8054_v0  ;;  %v8038_v56 = vsub.f32 %v18342_v18, %v8011_v7 }
0x1a4e   :  { %v8060_v39 = vmul.f32 1.442695, %v8039_v1 }
0x1a4f   :  { %v8058_v46 = vmul.f32 1.442695, %v8038_v56  ;;  %v8017_v44 = vpop.xlane.xlu1 %8016 }
0x1a50   :  { %15148 = vpow2.f32 %v8060_v39  ;;  %v8041_v10 = vsub.f32 %v18345_v29, %v8017_v44  ;;  %v8015_v54 = vpop.xlane.xlu0 %8014 }
0x1a51   :  { %15150 = vpow2.f32 %v8058_v46  ;;  %v8040_v31 = vsub.f32 %v18348_v49, %v8015_v54 }
0x1a52   :  { %v18450_v34 = vpop.eup %15140  ;;  %v8064_v61 = vmul.f32 1.442695, %v8041_v10 }
0x1a53   :  { %v18452_v33 = vpop.eup %15142  ;;  %v8062_v8 = vmul.f32 1.442695, %v8040_v31  ;;  %v8021_v35 = vpop.xlane.xlu1 %8020  ;;  %8084 = vadd.xlane.f32.xlu1 %v18450_v34 }
0x1a54   :  { %15152 = vpow2.f32 %v8064_v61  ;;  %v8043_v18 = vsub.f32 %v18351_v42, %v8021_v35  ;;  %v8019_v24 = vpop.xlane.xlu0 %8018  ;;  %8082 = vadd.xlane.f32.xlu0 %v18452_v33 }
0x1a55   :  { %15154 = vpow2.f32 %v8062_v8  ;;  %v8042_v29 = vsub.f32 %v18354_v51, %v8019_v24 }
0x1a56   :  { %v18458_v47 = vpop.eup %15144  ;;  %v8068_v49 = vmul.f32 1.442695, %v8043_v18 }
0x1a57   :  { %v18460_v2 = vpop.eup %15146  ;;  %v8066_v28 = vmul.f32 1.442695, %v8042_v29  ;;  %v8025_v60 = vpop.xlane.xlu1 %8024  ;;  %8088 = vadd.xlane.f32.xlu1 %v18458_v47 }
0x1a58   :  { %15156 = vpow2.f32 %v8068_v49  ;;  %v8045_v19 = vsub.f32 %v18357_v41, %v8025_v60  ;;  %v8023_v12 = vpop.xlane.xlu0 %8022  ;;  %8086 = vadd.xlane.f32.xlu0 %v18460_v2 }
0x1a59   :  { %15158 = vpow2.f32 %v8066_v28  ;;  %v8044_v42 = vsub.f32 %v18360_v22, %v8023_v12  ;;  %v7296_v12 = vsel %vm2094_vm4, %v18432_v4, 0 }
0x1a5a   :  { %v18466_v57 = vpop.eup %15148  ;;  %v8072_v51 = vmul.f32 1.442695, %v8045_v19 }
0x1a5b   :  { %v18468_v6 = vpop.eup %15150  ;;  %v8070_v38 = vmul.f32 1.442695, %v8044_v42  ;;  %v8029_v0 = vpop.xlane.xlu1 %8028  ;;  %8092 = vadd.xlane.f32.xlu1 %v18466_v57  ;;  %v14682_v42 = vld [vmem:[%s19418_s3 + $0x160] sm:$0xff]  }
0x1a5c   :  { %15160 = vpow2.f32 %v8072_v51  ;;  %v8047_v43 = vsub.f32 %v18363_v53, %v8029_v0  ;;  %v8027_v1 = vpop.xlane.xlu0 %8026  ;;  %8090 = vadd.xlane.f32.xlu0 %v18468_v6 }
0x1a5d   :  { %15162 = vpow2.f32 %v8070_v38  ;;  %v8046_v41 = vsub.f32 %v18366_v55, %v8027_v1 }
0x1a5e   :  { %v18474_v7 = vpop.eup %15152  ;;  %v8076_v22 = vmul.f32 1.442695, %v8047_v43 }
0x1a5f   :  { %v18476_v56 = vpop.eup %15154  ;;  %v8074_v39 = vmul.f32 1.442695, %v8046_v41  ;;  %8096 = vadd.xlane.f32.xlu1 %v18474_v7  ;;  %v8033_v46 = vpop.xlane.xlu1 %8032 }
0x1a60   :  { %15164 = vpow2.f32 %v8076_v22  ;;  %v8049_v44 = vsub.f32 %v18369_v58, %v8033_v46  ;;  %8094 = vadd.xlane.f32.xlu0 %v18476_v56  ;;  %v8031_v53 = vpop.xlane.xlu0 %8030 }
0x1a61   :  { %15166 = vpow2.f32 %v8074_v39  ;;  %v8048_v10 = vsub.f32 %v18372_v40, %v8031_v53 }
0x1a62   :  { %v18482_v54 = vpop.eup %15156  ;;  %v8080_v55 = vmul.f32 1.442695, %v8049_v44 }
0x1a63   :  { %v18484_v31 = vpop.eup %15158  ;;  %v8078_v61 = vmul.f32 1.442695, %v8048_v10  ;;  %8100 = vadd.xlane.f32.xlu1 %v18482_v54 }
0x1a64   :  { %15168 = vpow2.f32 %v8080_v55  ;;  %8098 = vadd.xlane.f32.xlu0 %v18484_v31 }
0x1a65   :  { %15170 = vpow2.f32 %v8078_v61 }
0x1a66   :  { %v18488_v8 = vpop.eup %15160 }
0x1a67   :  { %v18490_v58 = vpop.eup %15162  ;;  %8104 = vadd.xlane.f32.xlu1 %v18488_v8 }
0x1a68   :  { %v13386_v35 = vpop.f32.mrb[0].mxu0  ;;  %8102 = vadd.xlane.f32.xlu0 %v18490_v58 }
0x1a69   :  { %v7058_v40 = vpop.f32.mrb[1].mxu0 }
0x1a6a   :  { %v18494_v18 = vpop.eup %15164  ;;  %v7137_v24 = vpack.c.bf16 %v13386_v35, %v7058_v40 }
0x1a6b   :  { %v18496_v29 = vpop.eup %15166  ;;  %8108 = vadd.xlane.f32.xlu1 %v18494_v18 }
0x1a6c   :  { %v13389_v49 = vpop.f32.mrb[2].mxu0  ;;  %13410 = vmatprep.mubr.msk.bf16.mxu0 %vm624_vm2, %v7137_v24  ;;  %8106 = vadd.xlane.f32.xlu0 %v18496_v29 }
0x1a6d   :  { %v7068_v28 = vpop.f32.mrb[3].mxu0 }
0x1a6e   :  { %v18501_v60 = vpop.eup %15168  ;;  %v7138_v19 = vpack.c.bf16 %v13389_v49, %v7068_v28  ;;  %v19590_v28 = vpack.c.bf16 %v17941_v9, %v17943_v20  ;;  %v19596_v9 = vld [vmem:[#allocation5_spill] sm:$0xff]  ;;  %v19597_v20 = vld [vmem:[#allocation10_spill] sm:$0xff] }
0x1a6f   :  { %v18508_v51 = vpop.eup %15170  ;;  %8112 = vadd.xlane.f32.xlu1 %v18501_v60 }
0x1a70   :  { %v13392_v38 = vpop.f32.mrb[4].mxu0  ;;  %13411 = vmatmul.mubr.msk.bf16.vlgmr.msra.gmra.mrb[16].mxu0 %vm624_vm2, %v7138_v19  ;;  %8110 = vadd.xlane.f32.xlu0 %v18508_v51  ;;  %v14683_v19 = vld [vmem:[%s19418_s3 + $0x168] sm:$0xff]  }
0x1a71   :  { %v7078_v0 = vpop.f32.mrb[5].mxu0  ;;  %13427 = vmatpush3.bf16.msra.mxu0 %v7296_v12  ;;  %v19591_v12 = vld [vmem:[#allocation6_spill] sm:$0xff] }
0x1a72   :  { %v7139_v43 = vpack.c.bf16 %v13392_v38, %v7078_v0  ;;  %13484 = vmatprep.subr.bf16.mxu0 %v14682_v42  ;;  %v19592_v38 = vpack.c.bf16 %v17947_v15, %v19591_v12  ;;  %v19593_v0 = vld [vmem:[#allocation8_spill] sm:$0xff]  ;;  %v19602_v15 = vld [vmem:[#allocation9_spill] sm:$0xff] }
0x1a74   :  { %v13395_v1 = vpop.f32.mrb[6].mxu0  ;;  %13414 = vmatprep.mubr.msk.bf16.mxu0 %vm624_vm2, %v7139_v43  ;;  %v19594_v43 = vld [vmem:[#allocation7_spill] sm:$0xff] }
0x1a75   :  { %v7088_v4 = vpop.f32.mrb[7].mxu0 }
0x1a76   :  { %v7140_v41 = vpack.c.bf16 %v13395_v1, %v7088_v4  ;;  %v19595_v1 = vpack.c.bf16 %v19593_v0, %v19594_v43  ;;  %v19598_v4 = vpack.c.bf16 %v19596_v9, %v19597_v20 }
0x1a78   :  { %v13398_v22 = vpop.f32.mrb[8].mxu0  ;;  %13415 = vmatmul.mubr.msk.bf16.gmra.mrb[20].mxu0 %vm624_vm2, %v7140_v41  ;;  %v19599_v41 = vld [vmem:[#allocation12_spill] sm:$0xff] }
0x1a79   :  { %v7098_v39 = vpop.f32.mrb[9].mxu0 }
0x1a7a   :  { %v7141_v46 = vpack.c.bf16 %v13398_v22, %v7098_v39  ;;  %v19600_v22 = vld [vmem:[#allocation11_spill] sm:$0xff] }
0x1a7b   :  { %v19601_v39 = vpack.c.bf16 %v19599_v41, %v19600_v22 }
0x1a7c   :  { %v13401_v44 = vpop.f32.mrb[10].mxu0  ;;  %13418 = vmatprep.mubr.msk.bf16.mxu0 %vm624_vm2, %v7141_v46  ;;  %v19603_v46 = vld [vmem:[#allocation14_spill] sm:$0xff] }
0x1a7d   :  { %v7108_v53 = vpop.f32.mrb[11].mxu0 }
0x1a7e   :  { %v7142_v10 = vpack.c.bf16 %v13401_v44, %v7108_v53  ;;  %v19604_v44 = vpack.c.bf16 %v19602_v15, %v19603_v46  ;;  %v19605_v53 = vld [vmem:[#allocation16_spill] sm:$0xff] }
0x1a80   :  { %v13404_v55 = vpop.f32.mrb[12].mxu0  ;;  %13419 = vmatmul.mubr.msk.bf16.gmra.mrb[24].mxu0 %vm624_vm2, %v7142_v10  ;;  %v19606_v10 = vld [vmem:[#allocation15_spill] sm:$0xff] }
0x1a81   :  { %v7118_v61 = vpop.f32.mrb[13].mxu0 }
0x1a82   :  { %v7143_v35 = vpack.c.bf16 %v13404_v55, %v7118_v61  ;;  %v19608_v55 = vld [vmem:[#allocation13_spill] sm:$0xff]  ;;  %v19609_v61 = vld [vmem:[#allocation18_spill] sm:$0xff] }
0x1a84   :  { %v13407_v40 = vpop.f32.mrb[14].mxu0  ;;  %13422 = vmatprep.mubr.msk.bf16.mxu0 %vm624_vm2, %v7143_v35  ;;  %v19610_v35 = vpack.c.bf16 %v19608_v55, %v19609_v61 }
0x1a85   :  { %v7128_v24 = vpop.f32.mrb[15].mxu0 }
0x1a86   :  { %v7144_v49 = vpack.c.bf16 %v13407_v40, %v7128_v24 }
0x1a88   :  { %13423 = vmatmul.mubr.msk.bf16.gmra.mrb[28].mxu0 %vm624_vm2, %v7144_v49 }
0x1a89   :  { %13428 = vmatprep.mubr.msk.bf16.mxu0 %vm624_vm2, %v19590_v28 }
0x1a90   :  { %13429 = vmatmul.mubr.msk.bf16.vlgmr.msra.gmra.mrb[16].mxu0 %vm624_vm2, %v19592_v38 }
0x1a91   :  { %13432 = vmatprep.mubr.msk.bf16.mxu0 %vm624_vm2, %v19595_v1  ;;  %13485 = vmatpush3.bf16.msra.mxu0 %v14682_v42  ;;  %v19607_v42 = vpack.c.bf16 %v19605_v53, %v19606_v10 }
0x1a92   :  { %13486 = vmatprep.subr.bf16.mxu0 %v14683_v19 }
0x1a95   :  { %13487 = vmatpush3.bf16.msra.mxu0 %v14683_v19  ;;  %v11170_v19 = vld [vmem:[%s19419_s4 + $0x16] ss:$0 sm:$0xff] }
0x1a98   :  { %13433 = vmatmul.mubr.msk.bf16.gmra.mrb[20].mxu0 %vm624_vm2, %v19598_v4 }
0x1a99   :  { %13436 = vmatprep.mubr.msk.bf16.mxu0 %vm624_vm2, %v19601_v39 }
0x1aa0   :  { %13437 = vmatmul.mubr.msk.bf16.gmra.mrb[24].mxu0 %vm624_vm2, %v19604_v44 }
0x1aa1   :  { %13440 = vmatprep.mubr.msk.bf16.mxu0 %vm624_vm2, %v19607_v42 }
0x1aa8   :  { %13441 = vmatmul.mubr.msk.bf16.gmra.mrb[28].mxu0 %vm624_vm2, %v19610_v35 }
0x1aa9   :  { %13488 = vmatprep.mubr.msk.bf16.mxu0 %vm258_vm1, %v17418_v48 }
0x1ab0   :  { %13489 = vmatmul.mubr.msk.bf16.vlgmr.msra.gmra.mrb[32].mxu0 %vm258_vm1, %v17436_v30 }
0x1ab1   :  { %13492 = vmatprep.mubr.msk.bf16.mxu0 %vm258_vm1, %v17458_v5 }
0x1ab8   :  { %13493 = vmatmul.mubr.msk.bf16.gmra.mrb[36].mxu0 %vm258_vm1, %v17476_v27 }
0x1ab9   :  { %13496 = vmatprep.mubr.msk.bf16.mxu0 %vm258_vm1, %v17494_v63 }
0x1ac0   :  { %13497 = vmatmul.mubr.msk.bf16.gmra.mrb[40].mxu0 %vm258_vm1, %v17512_v3 }
0x1ac1   :  { %13500 = vmatprep.mubr.msk.bf16.mxu0 %vm258_vm1, %v17530_v32 }
0x1ac8   :  { %13501 = vmatmul.mubr.msk.bf16.gmra.mrb[44].mxu0 %vm258_vm1, %v17545_v25 }
0x1ae0   :  { %v8085_v22 = vpop.xlane.xlu1 %8084 }
0x1ae1   :  { %v8083_v40 = vpop.xlane.xlu0 %8082 }
0x1ae2   :  { %15172 = vrcp.f32 %v8083_v40 }
0x1ae3   :  { %15174 = vrcp.f32 %v8085_v22 }
0x1ae4   :  { %v8089_v35 = vpop.xlane.xlu1 %8088 }
0x1ae5   :  { %v8087_v46 = vpop.xlane.xlu0 %8086 }
0x1ae6   :  { %15176 = vrcp.f32 %v8087_v46 }
0x1ae7   :  { %15178 = vrcp.f32 %v8089_v35 }
0x1aec   :  { %v15173_v24 = vpop.eup %15172 }
0x1aed   :  { %v8130_v49 = vmul.f32 %v15173_v24, %v18452_v33  ;;  %v15175_v22 = vpop.eup %15174 }
0x1aef   :  { %13592 = vmatprep.mubr.f32.mxu0 %v8130_v49  ;;  %v8091_v49 = vpop.xlane.xlu0 %8090 }
0x1af0   :  { %15180 = vrcp.f32 %v8091_v49 }
0x1b83   :  { %v13490_v28 = vpop.f32.mrb[32].mxu0 }
0x1b84   :  { %v7698_v12 = vpop.f32.mrb[33].mxu0  ;;  %v7707_v0 = vadd.f32 %v13490_v28, %v11170_v19 }
0x1b85   :  { %v13491_v38 = vpop.f32.mrb[34].mxu0  ;;  %v7699_v9 = vadd.f32 %v11170_v19, %v7698_v12 }
0x1b86   :  { %v7710_v43 = vadd.f32 %v13491_v38, %v11170_v19  ;;  %v7701_v1 = vpop.f32.mrb[35].mxu0 }
0x1b87   :  { %v7702_v20 = vadd.f32 %v11170_v19, %v7701_v1  ;;  %v8093_v1 = vpop.xlane.xlu1 %8092 }
0x1b88   :  { %v14416_v4 = vpack.c.bf16 %v7710_v43, %v7707_v0  ;;  %15182 = vrcp.f32 %v8093_v1 }
0x1b89   :  { %v14412_v41 = vpack.c.bf16 %v7702_v20, %v7699_v9 }
0x1b8b   :  { %v13494_v39 = vpop.f32.mrb[36].mxu0  ;;  %14413 = vmatprep.subr.bf16.mxu0 %v14412_v41 }
0x1b8c   :  { %v7714_v15 = vpop.f32.mrb[37].mxu0  ;;  %14415 = vmatpush3.bf16.msra.mxu0 %v14412_v41  ;;  %v7723_v44 = vadd.f32 %v13494_v39, %v11170_v19 }
0x1b8d   :  { %v13495_v33 = vpop.f32.mrb[38].mxu0  ;;  %14417 = vmatprep.subr.bf16.mxu0 %v14416_v4  ;;  %v7715_v42 = vadd.f32 %v11170_v19, %v7714_v15  ;;  %v8095_v15 = vpop.xlane.xlu0 %8094 }
0x1b8e   :  { %v7726_v53 = vadd.f32 %v13495_v33, %v11170_v19  ;;  %v7717_v10 = vpop.f32.mrb[39].mxu0  ;;  %15184 = vrcp.f32 %v8095_v15 }
0x1b8f   :  { %v7718_v55 = vadd.f32 %v11170_v19, %v7717_v10 }
0x1b90   :  { %v14424_v61 = vpack.c.bf16 %v7726_v53, %v7723_v44  ;;  %14419 = vmatpush3.bf16.msra.mxu0 %v14416_v4  ;;  %v8097_v44 = vpop.xlane.xlu1 %8096 }
0x1b91   :  { %v14420_v40 = vpack.c.bf16 %v7718_v55, %v7715_v42  ;;  %15186 = vrcp.f32 %v8097_v44 }
0x1b93   :  { %v13498_v24 = vpop.f32.mrb[40].mxu0  ;;  %14421 = vmatprep.subr.bf16.mxu0 %v14420_v40 }
0x1b94   :  { %v7730_v28 = vpop.f32.mrb[41].mxu0  ;;  %14423 = vmatpush3.bf16.msra.mxu0 %v14420_v40  ;;  %v7739_v38 = vadd.f32 %v13498_v24, %v11170_v19 }
0x1b95   :  { %v13499_v12 = vpop.f32.mrb[42].mxu0  ;;  %14425 = vmatprep.subr.bf16.mxu0 %v14424_v61  ;;  %v7731_v9 = vadd.f32 %v11170_v19, %v7730_v28  ;;  %v8099_v28 = vpop.xlane.xlu0 %8098 }
0x1b96   :  { %v7742_v0 = vadd.f32 %v13499_v12, %v11170_v19  ;;  %v7733_v43 = vpop.f32.mrb[43].mxu0  ;;  %15188 = vrcp.f32 %v8099_v28 }
0x1b97   :  { %v7734_v20 = vadd.f32 %v11170_v19, %v7733_v43  ;;  %v15177_v43 = vpop.eup %15176 }
0x1b98   :  { %v14432_v41 = vpack.c.bf16 %v7742_v0, %v7739_v38  ;;  %14427 = vmatpush3.bf16.msra.mxu0 %v14424_v61  ;;  %v8101_v38 = vpop.xlane.xlu1 %8100  ;;  %v11213_v0 = vld [vmem:[%s19420_s5 + $0x18] sm:$0xf]  ;;  %v15179_v1 = vpop.eup %15178 }
0x1b99   :  { %v14428_v39 = vpack.c.bf16 %v7734_v20, %v7731_v9  ;;  %v8103_v46 = vpop.xlane.xlu0 %8102  ;;  %v8326_v49 = vsel %vm2094_vm4, %v11213_v0, 0  ;;  %v8132_v9 = vmul.f32 %v15177_v43, %v18460_v2  ;;  %v15181_v20 = vpop.eup %15180  ;;  %15190 = vrcp.f32 %v8101_v38 }
0x1b9a   :  { %15192 = vrcp.f32 %v8103_v46  ;;  %v15183_v15 = vpop.eup %15182 }
0x1b9b   :  { %v13502_v4 = vpop.f32.mrb[44].mxu0  ;;  %14429 = vmatprep.subr.bf16.mxu0 %v14428_v39  ;;  %v8135_v2 = vmul.f32 %v15183_v15, %v18466_v57 }
0x1b9c   :  { %v7746_v33 = vpop.f32.mrb[45].mxu0  ;;  %14431 = vmatpush3.bf16.msra.mxu0 %v14428_v39  ;;  %v7755_v10 = vadd.f32 %v13502_v4, %v11170_v19  ;;  %v8105_v35 = vpop.xlane.xlu1 %8104  ;;  %v8133_v39 = vmul.f32 %v15179_v1, %v18458_v47 }
0x1b9d   :  { %v13503_v53 = vpop.f32.mrb[46].mxu0  ;;  %14433 = vmatprep.subr.bf16.mxu0 %v14432_v41  ;;  %v7747_v40 = vadd.f32 %v11170_v19, %v7746_v33  ;;  %v15185_v4 = vpop.eup %15184  ;;  %15194 = vrcp.f32 %v8105_v35 }
0x1b9e   :  { %v7758_v42 = vadd.f32 %v13503_v53, %v11170_v19  ;;  %v7749_v55 = vpop.f32.mrb[47].mxu0  ;;  %v15187_v44 = vpop.eup %15186 }
0x1b9f   :  { %v7750_v24 = vadd.f32 %v11170_v19, %v7749_v55  ;;  %v8131_v19 = vmul.f32 %v15175_v22, %v18450_v34  ;;  %v8134_v34 = vmul.f32 %v15181_v20, %v18468_v6  ;;  %v8137_v6 = vmul.f32 %v15187_v44, %v18474_v7 }
0x1ba0   :  { %v14440_v12 = vpack.c.bf16 %v7758_v42, %v7755_v10  ;;  %14435 = vmatpush3.bf16.msra.mxu0 %v14432_v41  ;;  %v8107_v41 = vpop.xlane.xlu0 %8106  ;;  %v8109_v33 = vpop.xlane.xlu1 %8108  ;;  %v8136_v10 = vmul.f32 %v15185_v4, %v18476_v56 }
0x1ba1   :  { %v14436_v61 = vpack.c.bf16 %v7750_v24, %v7747_v40  ;;  %15196 = vrcp.f32 %v8107_v41  ;;  %v15189_v42 = vpop.eup %15188 }
0x1ba2   :  { %15198 = vrcp.f32 %v8109_v33  ;;  %v8138_v40 = vmul.f32 %v15189_v42, %v18484_v31 }
0x1ba3   :  { %14437 = vmatprep.subr.bf16.mxu0 %v14436_v61  ;;  %v15191_v55 = vpop.eup %15190 }
0x1ba4   :  { %14439 = vmatpush3.bf16.msra.mxu0 %v14436_v61  ;;  %v8111_v53 = vpop.xlane.xlu0 %8110  ;;  %v8113_v47 = vpop.xlane.xlu1 %8112  ;;  %v8139_v57 = vmul.f32 %v15191_v55, %v18482_v54 }
0x1ba5   :  { %14441 = vmatprep.subr.bf16.mxu0 %v14440_v12  ;;  %15200 = vrcp.f32 %v8111_v53  ;;  %v15193_v24 = vpop.eup %15192 }
0x1ba6   :  { %15202 = vrcp.f32 %v8113_v47  ;;  %v8140_v56 = vmul.f32 %v15193_v24, %v18490_v58 }
0x1ba7   :  { %v15195_v28 = vpop.eup %15194 }
0x1ba8   :  { %14443 = vmatpush3.bf16.msra.mxu0 %v14440_v12  ;;  %v8141_v61 = vmul.f32 %v15195_v28, %v18488_v8  ;;  %v14684_v8 = vld [vmem:[%s19418_s3 + $0x130] sm:$0xff]  }
0x1ba9   :  { %14626 = vmatprep.subr.msk.bf16.mxu0 %vm2094_vm4, %v11213_v0 }
0x1bab   :  { %13593 = vmatmul.mubr.f32.vlgmr.msra.gmra.mrb[48].mxu0 %v8131_v19  ;;  %v15197_v12 = vpop.eup %15196 }
0x1bac   :  { %13595 = vmatprep.mubr.f32.mxu0 %v8132_v9  ;;  %13617 = vmatpush3.bf16.msra.mxu0 %v8326_v49  ;;  %v15199_v38 = vpop.eup %15198  ;;  %v8142_v7 = vmul.f32 %v15197_v12, %v18496_v29 }
0x1bad   :  { %v8143_v31 = vmul.f32 %v15199_v38, %v18494_v18  ;;  %13654 = vmatprep.subr.bf16.mxu0 %v14684_v8 }
0x1baf   :  { %13596 = vmatmul.mubr.f32.gmra.mrb[50].mxu0 %v8133_v39  ;;  %v15201_v22 = vpop.eup %15200 }
0x1bb0   :  { %13598 = vmatprep.mubr.f32.mxu0 %v8134_v34  ;;  %v15203_v46 = vpop.eup %15202  ;;  %v8144_v0 = vmul.f32 %v15201_v22, %v18508_v51  ;;  %v14685_v51 = vld [vmem:[%s19418_s3 + $0x138] sm:$0xff]  }
0x1bb1   :  { %v8145_v54 = vmul.f32 %v15203_v46, %v18501_v60 }
0x1bb3   :  { %13599 = vmatmul.mubr.f32.gmra.mrb[52].mxu0 %v8135_v2 }
0x1bb4   :  { %13601 = vmatprep.mubr.f32.mxu0 %v8136_v10 }
0x1bb7   :  { %13602 = vmatmul.mubr.f32.gmra.mrb[54].mxu0 %v8137_v6 }
0x1bb8   :  { %13604 = vmatprep.mubr.f32.mxu0 %v8138_v40 }
0x1bbb   :  { %13605 = vmatmul.mubr.f32.gmra.mrb[56].mxu0 %v8139_v57 }
0x1bbc   :  { %13607 = vmatprep.mubr.f32.mxu0 %v8140_v56 }
0x1bbf   :  { %13608 = vmatmul.mubr.f32.gmra.mrb[58].mxu0 %v8141_v61 }
0x1bc0   :  { %13610 = vmatprep.mubr.f32.mxu0 %v8142_v7 }
0x1bc3   :  { %13611 = vmatmul.mubr.f32.gmra.mrb[60].mxu0 %v8143_v31 }
0x1bc4   :  { %13613 = vmatprep.mubr.f32.mxu0 %v8144_v0 }
0x1bc7   :  { %13614 = vmatmul.mubr.f32.gmra.mrb[62].mxu0 %v8145_v54 }
0x1c7e   :  { %v13594_v58 = vpop.f32.mrb[48].mxu0 }
0x1c7f   :  { %v8212_v29 = vpop.f32.mrb[49].mxu0 }
0x1c80   :  { %v8291_v43 = vpack.c.bf16 %v13594_v58, %v8212_v29 }
0x1c82   :  { %v13597_v19 = vpop.f32.mrb[50].mxu0  ;;  %13618 = vmatprep.mubr.msk.bf16.mxu0 %vm624_vm2, %v8291_v43 }
0x1c83   :  { %v8222_v18 = vpop.f32.mrb[51].mxu0 }
0x1c84   :  { %v8292_v35 = vpack.c.bf16 %v13597_v19, %v8222_v18 }
0x1c86   :  { %v13600_v49 = vpop.f32.mrb[52].mxu0  ;;  %13619 = vmatmul.mubr.msk.bf16.vlgmr.msra.gmra.mrb[16].mxu0 %vm624_vm2, %v8292_v35 }
0x1c87   :  { %v8232_v60 = vpop.f32.mrb[53].mxu0  ;;  %13655 = vmatpush3.bf16.msra.mxu0 %v14684_v8 }
0x1c88   :  { %v8293_v1 = vpack.c.bf16 %v13600_v49, %v8232_v60  ;;  %13656 = vmatprep.subr.bf16.mxu0 %v14685_v51 }
0x1c8a   :  { %v13603_v9 = vpop.f32.mrb[54].mxu0  ;;  %13622 = vmatprep.mubr.msk.bf16.mxu0 %vm624_vm2, %v8293_v1 }
0x1c8b   :  { %v8242_v20 = vpop.f32.mrb[55].mxu0  ;;  %13657 = vmatpush3.bf16.msra.mxu0 %v14685_v51 }
0x1c8c   :  { %v8294_v41 = vpack.c.bf16 %v13603_v9, %v8242_v20 }
0x1c8e   :  { %v13606_v39 = vpop.f32.mrb[56].mxu0  ;;  %13623 = vmatmul.mubr.msk.bf16.gmra.mrb[20].mxu0 %vm624_vm2, %v8294_v41 }
0x1c8f   :  { %v8252_v15 = vpop.f32.mrb[57].mxu0 }
0x1c90   :  { %v8295_v34 = vpack.c.bf16 %v13606_v39, %v8252_v15 }
0x1c92   :  { %v13609_v4 = vpop.f32.mrb[58].mxu0  ;;  %13626 = vmatprep.mubr.msk.bf16.mxu0 %vm624_vm2, %v8295_v34 }
0x1c93   :  { %v8262_v33 = vpop.f32.mrb[59].mxu0 }
0x1c94   :  { %v8296_v2 = vpack.c.bf16 %v13609_v4, %v8262_v33 }
0x1c96   :  { %v13612_v44 = vpop.f32.mrb[60].mxu0  ;;  %13627 = vmatmul.mubr.msk.bf16.gmra.mrb[24].mxu0 %vm624_vm2, %v8296_v2 }
0x1c97   :  { %v8272_v53 = vpop.f32.mrb[61].mxu0 }
0x1c98   :  { %v8297_v10 = vpack.c.bf16 %v13612_v44, %v8272_v53 }
0x1c9a   :  { %v13615_v42 = vpop.f32.mrb[62].mxu0  ;;  %13630 = vmatprep.mubr.msk.bf16.mxu0 %vm624_vm2, %v8297_v10 }
0x1c9b   :  { %v8282_v47 = vpop.f32.mrb[63].mxu0 }
0x1c9c   :  { %v8298_v6 = vpack.c.bf16 %v13615_v42, %v8282_v47 }
0x1c9e   :  { %13631 = vmatmul.mubr.msk.bf16.gmra.mrb[28].mxu0 %vm624_vm2, %v8298_v6 }
0x1c9f   :  { %13658 = vmatprep.mubr.msk.bf16.mxu0 %vm258_vm1, %v17418_v48  ;;  %v8501_v48 = vadd.f32 %v18378_v62, %v18388_v50 }
0x1ca6   :  { %13659 = vmatmul.mubr.msk.bf16.vlgmr.msra.gmra.mrb[64].mxu0 %vm258_vm1, %v17436_v30 }
0x1ca7   :  { %13662 = vmatprep.mubr.msk.bf16.mxu0 %vm258_vm1, %v17458_v5  ;;  %v11243_v5 = vld [vmem:[%s19419_s4 + $0x13] ss:$0 sm:$0xff] }
0x1cae   :  { %13663 = vmatmul.mubr.msk.bf16.gmra.mrb[68].mxu0 %vm258_vm1, %v17476_v27 }
0x1caf   :  { %13666 = vmatprep.mubr.msk.bf16.mxu0 %vm258_vm1, %v17494_v63 }
0x1cb6   :  { %13667 = vmatmul.mubr.msk.bf16.gmra.mrb[72].mxu0 %vm258_vm1, %v17512_v3 }
0x1cb7   :  { %13670 = vmatprep.mubr.msk.bf16.mxu0 %vm258_vm1, %v17530_v32 }
0x1cbe   :  { %13671 = vmatmul.mubr.msk.bf16.gmra.mrb[76].mxu0 %vm258_vm1, %v17545_v25 }
0x1cbf   :  { %13726 = vmatprep.mubr.msk.f32.mxu0 %vm624_vm2, %v8501_v48 }
0x1d79   :  { %v13660_v30 = vpop.f32.mrb[64].mxu0 }
0x1d7a   :  { %v8622_v27 = vpop.f32.mrb[65].mxu0  ;;  %v8631_v55 = vadd.f32 %v13660_v30, %v11243_v5 }
0x1d7b   :  { %v13661_v63 = vpop.f32.mrb[66].mxu0  ;;  %v8623_v24 = vadd.f32 %v11243_v5, %v8622_v27 }
0x1d7c   :  { %v8634_v3 = vadd.f32 %v13661_v63, %v11243_v5  ;;  %v8625_v40 = vpop.f32.mrb[67].mxu0 }
0x1d7d   :  { %v8626_v32 = vadd.f32 %v11243_v5, %v8625_v40 }
0x1d7e   :  { %v14450_v57 = vpack.c.bf16 %v8634_v3, %v8631_v55 }
0x1d7f   :  { %v14444_v28 = vpack.c.bf16 %v8626_v32, %v8623_v24 }
0x1d81   :  { %v13664_v62 = vpop.f32.mrb[68].mxu0  ;;  %14446 = vmatprep.subr.msk.bf16.mxu0 %vm15690_vm3, %v14444_v28 }
0x1d82   :  { %v8638_v25 = vpop.f32.mrb[69].mxu0  ;;  %14449 = vmatpush3.bf16.xpose.msk.msra.mxu0 %vm15690_vm3, %v14444_v28  ;;  %v8647_v56 = vadd.f32 %v13664_v62, %v11243_v5 }
0x1d83   :  { %v13665_v50 = vpop.f32.mrb[70].mxu0  ;;  %14452 = vmatprep.subr.msk.bf16.mxu0 %vm15690_vm3, %v14450_v57  ;;  %v8639_v38 = vadd.f32 %v11243_v5, %v8638_v25 }
0x1d84   :  { %v8650_v12 = vadd.f32 %v13665_v50, %v11243_v5  ;;  %v8641_v61 = vpop.f32.mrb[71].mxu0 }
0x1d85   :  { %v8642_v7 = vadd.f32 %v11243_v5, %v8641_v61 }
0x1d86   :  { %v14462_v22 = vpack.c.bf16 %v8650_v12, %v8647_v56 }
0x1d87   :  { %v14456_v31 = vpack.c.bf16 %v8642_v7, %v8639_v38 }
0x1d89   :  { %v13668_v46 = vpop.f32.mrb[72].mxu0 }
0x1d8a   :  { %v8654_v0 = vpop.f32.mrb[73].mxu0  ;;  %14455 = vmatpush3.bf16.xpose.msk.msra.mxu0 %vm15690_vm3, %v14450_v57  ;;  %v8663_v8 = vadd.f32 %v13668_v46, %v11243_v5 }
0x1d8b   :  { %v13669_v54 = vpop.f32.mrb[74].mxu0  ;;  %14458 = vmatprep.subr.msk.bf16.mxu0 %vm15690_vm3, %v14456_v31  ;;  %v8655_v43 = vadd.f32 %v11243_v5, %v8654_v0 }
0x1d8c   :  { %v8666_v58 = vadd.f32 %v13669_v54, %v11243_v5  ;;  %v8657_v29 = vpop.f32.mrb[75].mxu0 }
0x1d8d   :  { %v8658_v19 = vadd.f32 %v11243_v5, %v8657_v29 }
0x1d8e   :  { %v14474_v18 = vpack.c.bf16 %v8666_v58, %v8663_v8 }
0x1d8f   :  { %v14468_v35 = vpack.c.bf16 %v8658_v19, %v8655_v43 }
0x1d91   :  { %v13672_v51 = vpop.f32.mrb[76].mxu0 }
0x1d92   :  { %v8670_v49 = vpop.f32.mrb[77].mxu0  ;;  %14461 = vmatpush3.bf16.xpose.msk.msra.mxu0 %vm15690_vm3, %v14456_v31  ;;  %v8679_v1 = vadd.f32 %v13672_v51, %v11243_v5 }
0x1d93   :  { %v13673_v60 = vpop.f32.mrb[78].mxu0  ;;  %14464 = vmatprep.subr.msk.bf16.mxu0 %vm15690_vm3, %v14462_v22  ;;  %v8671_v41 = vadd.f32 %v11243_v5, %v8670_v49 }
0x1d94   :  { %v8682_v9 = vadd.f32 %v13673_v60, %v11243_v5  ;;  %v8673_v20 = vpop.f32.mrb[79].mxu0 }
0x1d95   :  { %v8674_v39 = vadd.f32 %v11243_v5, %v8673_v20 }
0x1d96   :  { %v14486_v15 = vpack.c.bf16 %v8682_v9, %v8679_v1 }
0x1d97   :  { %v14480_v34 = vpack.c.bf16 %v8674_v39, %v8671_v41 }
0x1d9a   :  { %14467 = vmatpush3.bf16.xpose.msk.msra.mxu0 %vm15690_vm3, %v14462_v22 }
0x1d9b   :  { %14470 = vmatprep.subr.msk.bf16.mxu0 %vm15690_vm3, %v14468_v35 }
0x1da2   :  { %14473 = vmatpush3.bf16.xpose.msk.msra.mxu0 %vm15690_vm3, %v14468_v35 }
0x1da3   :  { %14476 = vmatprep.subr.msk.bf16.mxu0 %vm15690_vm3, %v14474_v18 }
0x1daa   :  { %14479 = vmatpush3.bf16.xpose.msk.msra.mxu0 %vm15690_vm3, %v14474_v18 }
0x1dab   :  { %14482 = vmatprep.subr.msk.bf16.mxu0 %vm15690_vm3, %v14480_v34 }
0x1db2   :  { %14485 = vmatpush3.bf16.xpose.msk.msra.mxu0 %vm15690_vm3, %v14480_v34 }
0x1db3   :  { %14488 = vmatprep.subr.msk.bf16.mxu0 %vm15690_vm3, %v14486_v15 }
0x1dba   :  { %14491 = vmatpush3.bf16.xpose.msk.msra.mxu0 %vm15690_vm3, %v14486_v15 }
0x1dc1   :  { %13727 = vmatmul.mubr.msk.f32.vlgmr.msra.gmra.mrb[80].mxu0 %vm624_vm2, %v18394_v21 }
0x1dc2   :  { %13729 = vmatprep.mubr.msk.f32.mxu0 %vm624_vm2, %v18386_v17  ;;  %v19612_v17 = vld [vmem:[#allocation20_spill] sm:$0xff] }
0x1dc5   :  { %13730 = vmatmul.mubr.msk.f32.gmra.mrb[82].mxu0 %vm624_vm2, %v18391_v37  ;;  %v19613_v37 = vld [vmem:[#allocation19_spill] sm:$0xff] }
0x1dc6   :  { %13732 = vmatprep.mubr.msk.f32.mxu0 %vm624_vm2, %v18400_v16 }
0x1dc9   :  { %13733 = vmatmul.mubr.msk.f32.gmra.mrb[84].mxu0 %vm624_vm2, %v18406_v59 }
0x1dca   :  { %13735 = vmatprep.mubr.msk.f32.mxu0 %vm624_vm2, %v18397_v23 }
0x1dcd   :  { %13736 = vmatmul.mubr.msk.f32.gmra.mrb[86].mxu0 %vm624_vm2, %v18403_v14 }
0x1dce   :  { %13738 = vmatprep.mubr.msk.f32.mxu0 %vm624_vm2, %v18412_v45 }
0x1dd1   :  { %13739 = vmatmul.mubr.msk.f32.gmra.mrb[88].mxu0 %vm624_vm2, %v18418_v36 }
0x1dd2   :  { %13741 = vmatprep.mubr.msk.f32.mxu0 %vm624_vm2, %v18409_v26 }
0x1dd5   :  { %13742 = vmatmul.mubr.msk.f32.gmra.mrb[90].mxu0 %vm624_vm2, %v18415_v11 }
0x1dd6   :  { %13744 = vmatprep.mubr.msk.f32.mxu0 %vm624_vm2, %v18424_v52 }
0x1dd9   :  { %13745 = vmatmul.mubr.msk.f32.gmra.mrb[92].mxu0 %vm624_vm2, %v19611_v13 }
0x1dda   :  { %13747 = vmatprep.mubr.msk.f32.mxu0 %vm624_vm2, %v19612_v17 }
0x1ddd   :  { %13748 = vmatmul.mubr.msk.f32.gmra.mrb[94].mxu0 %vm624_vm2, %v19613_v37 }
0x1e94   :  { %v13728_v21 = vpop.f32.mrb[80].mxu0 }
0x1e95   :  { %9050 = vmax.xlane.f32.xlu1 %v13728_v21  ;;  %v8969_v23 = vpop.f32.mrb[81].mxu0 }
0x1e96   :  { %9048 = vmax.xlane.f32.xlu0 %v8969_v23 }
0x1e98   :  { %v13731_v16 = vpop.f32.mrb[82].mxu0 }
0x1e99   :  { %9054 = vmax.xlane.f32.xlu1 %v13731_v16  ;;  %v8979_v14 = vpop.f32.mrb[83].mxu0 }
0x1e9a   :  { %9052 = vmax.xlane.f32.xlu0 %v8979_v14 }
0x1e9c   :  { %v13734_v59 = vpop.f32.mrb[84].mxu0 }
0x1e9d   :  { %9058 = vmax.xlane.f32.xlu1 %v13734_v59  ;;  %v8989_v26 = vpop.f32.mrb[85].mxu0 }
0x1e9e   :  { %9056 = vmax.xlane.f32.xlu0 %v8989_v26 }
0x1ea0   :  { %v13737_v45 = vpop.f32.mrb[86].mxu0 }
0x1ea1   :  { %9062 = vmax.xlane.f32.xlu1 %v13737_v45  ;;  %v8999_v11 = vpop.f32.mrb[87].mxu0 }
0x1ea2   :  { %9060 = vmax.xlane.f32.xlu0 %v8999_v11 }
0x1ea4   :  { %v13740_v36 = vpop.f32.mrb[88].mxu0 }
0x1ea5   :  { %9066 = vmax.xlane.f32.xlu1 %v13740_v36  ;;  %v9009_v52 = vpop.f32.mrb[89].mxu0 }
0x1ea6   :  { %9064 = vmax.xlane.f32.xlu0 %v9009_v52 }
0x1ea8   :  { %v18692_v4 = vpop.f32.mrb[90].mxu0 }
0x1ea9   :  { %9070 = vmax.xlane.f32.xlu1 %v18692_v4  ;;  %v18695_v33 = vpop.f32.mrb[91].mxu0 }
0x1eaa   :  { %9068 = vmax.xlane.f32.xlu0 %v18695_v33 }
0x1eac   :  { %v18698_v2 = vpop.f32.mrb[92].mxu0 }
0x1ead   :  { %9074 = vmax.xlane.f32.xlu1 %v18698_v2  ;;  %v18701_v44 = vpop.f32.mrb[93].mxu0 }
0x1eae   :  { %9072 = vmax.xlane.f32.xlu0 %v18701_v44 }
0x1eb0   :  { %v18704_v53 = vpop.f32.mrb[94].mxu0 }
0x1eb1   :  { %9078 = vmax.xlane.f32.xlu1 %v18704_v53  ;;  %v18707_v10 = vpop.f32.mrb[95].mxu0 }
0x1eb2   :  { %9076 = vmax.xlane.f32.xlu0 %v18707_v10 }
0x1f22   :  { %v9051_v42 = vpop.xlane.xlu1 %9050 }
0x1f23   :  { %v9081_v47 = vsub.f32 %v13728_v21, %v9051_v42  ;;  %v9049_v6 = vpop.xlane.xlu0 %9048  ;;  %v11302_v42 = vld [vmem:[%s19420_s5 + $0x1c] sm:$0xf] }
0x1f24   :  { %v9080_v48 = vsub.f32 %v8969_v23, %v9049_v6  ;;  %14627 = vmatprep.subr.msk.bf16.mxu0 %vm2094_vm4, %v11302_v42 }
0x1f25   :  { %v9098_v30 = vmul.f32 1.442695, %v9081_v47  ;;  %v9372_v47 = vsel %vm2094_vm4, %v11302_v42, 0 }
0x1f26   :  { %v9096_v5 = vmul.f32 1.442695, %v9080_v48  ;;  %v9055_v27 = vpop.xlane.xlu1 %9054  ;;  %13807 = vmatpush3.bf16.msra.mxu0 %v9372_v47 }
0x1f27   :  { %15204 = vpow2.f32 %v9098_v30  ;;  %v9083_v63 = vsub.f32 %v13731_v16, %v9055_v27  ;;  %v9053_v55 = vpop.xlane.xlu0 %9052 }
0x1f28   :  { %15206 = vpow2.f32 %v9096_v5  ;;  %v9082_v3 = vsub.f32 %v8979_v14, %v9053_v55 }
0x1f29   :  { %v9102_v40 = vmul.f32 1.442695, %v9083_v63 }
0x1f2a   :  { %v9100_v24 = vmul.f32 1.442695, %v9082_v3  ;;  %v9059_v32 = vpop.xlane.xlu1 %9058 }
0x1f2b   :  { %15208 = vpow2.f32 %v9102_v40  ;;  %v9085_v57 = vsub.f32 %v13734_v59, %v9059_v32  ;;  %v9057_v28 = vpop.xlane.xlu0 %9056 }
0x1f2c   :  { %15210 = vpow2.f32 %v9100_v24  ;;  %v9084_v62 = vsub.f32 %v8989_v26, %v9057_v28 }
0x1f2d   :  { %v9106_v25 = vmul.f32 1.442695, %v9085_v57 }
0x1f2e   :  { %v9104_v50 = vmul.f32 1.442695, %v9084_v62  ;;  %v9063_v56 = vpop.xlane.xlu1 %9062 }
0x1f2f   :  { %15212 = vpow2.f32 %v9106_v25  ;;  %v9087_v12 = vsub.f32 %v13737_v45, %v9063_v56  ;;  %v9061_v61 = vpop.xlane.xlu0 %9060 }
0x1f30   :  { %15214 = vpow2.f32 %v9104_v50  ;;  %v9086_v38 = vsub.f32 %v8999_v11, %v9061_v61 }
0x1f31   :  { %v18710_v7 = vpop.eup %15204  ;;  %v9110_v22 = vmul.f32 1.442695, %v9087_v12 }
0x1f32   :  { %v18712_v31 = vpop.eup %15206  ;;  %v9108_v46 = vmul.f32 1.442695, %v9086_v38  ;;  %v9067_v0 = vpop.xlane.xlu1 %9066  ;;  %9130 = vadd.xlane.f32.xlu1 %v18710_v7 }
0x1f33   :  { %15216 = vpow2.f32 %v9110_v22  ;;  %v9089_v54 = vsub.f32 %v13740_v36, %v9067_v0  ;;  %v9065_v8 = vpop.xlane.xlu0 %9064  ;;  %9128 = vadd.xlane.f32.xlu0 %v18712_v31 }
0x1f34   :  { %15218 = vpow2.f32 %v9108_v46  ;;  %v9088_v58 = vsub.f32 %v9009_v52, %v9065_v8 }
0x1f35   :  { %v18716_v29 = vpop.eup %15208  ;;  %v9114_v43 = vmul.f32 1.442695, %v9089_v54 }
0x1f36   :  { %v18718_v19 = vpop.eup %15210  ;;  %v9112_v18 = vmul.f32 1.442695, %v9088_v58  ;;  %v9071_v35 = vpop.xlane.xlu1 %9070  ;;  %9134 = vadd.xlane.f32.xlu1 %v18716_v29 }
0x1f37   :  { %15220 = vpow2.f32 %v9114_v43  ;;  %v9091_v51 = vsub.f32 %v18692_v4, %v9071_v35  ;;  %v9069_v49 = vpop.xlane.xlu0 %9068  ;;  %9132 = vadd.xlane.f32.xlu0 %v18718_v19 }
0x1f38   :  { %15222 = vpow2.f32 %v9112_v18  ;;  %v9090_v60 = vsub.f32 %v18695_v33, %v9069_v49 }
0x1f39   :  { %v18724_v1 = vpop.eup %15212  ;;  %v9118_v9 = vmul.f32 1.442695, %v9091_v51 }
0x1f3a   :  { %v18726_v20 = vpop.eup %15214  ;;  %v9116_v41 = vmul.f32 1.442695, %v9090_v60  ;;  %v9075_v39 = vpop.xlane.xlu1 %9074  ;;  %9138 = vadd.xlane.f32.xlu1 %v18724_v1 }
0x1f3b   :  { %15224 = vpow2.f32 %v9118_v9  ;;  %v9093_v15 = vsub.f32 %v18698_v2, %v9075_v39  ;;  %v9073_v34 = vpop.xlane.xlu0 %9072  ;;  %9136 = vadd.xlane.f32.xlu0 %v18726_v20 }
0x1f3c   :  { %15226 = vpow2.f32 %v9116_v41  ;;  %v9092_v13 = vsub.f32 %v18701_v44, %v9073_v34 }
0x1f3d   :  { %v18732_v17 = vpop.eup %15216  ;;  %v9122_v37 = vmul.f32 1.442695, %v9093_v15 }
0x1f3e   :  { %v18734_v21 = vpop.eup %15218  ;;  %v9120_v23 = vmul.f32 1.442695, %v9092_v13  ;;  %9142 = vadd.xlane.f32.xlu1 %v18732_v17  ;;  %v9079_v16 = vpop.xlane.xlu1 %9078 }
0x1f3f   :  { %15228 = vpow2.f32 %v9122_v37  ;;  %v9095_v14 = vsub.f32 %v18704_v53, %v9079_v16  ;;  %9140 = vadd.xlane.f32.xlu0 %v18734_v21  ;;  %v9077_v59 = vpop.xlane.xlu0 %9076 }
0x1f40   :  { %15230 = vpow2.f32 %v9120_v23  ;;  %v9094_v26 = vsub.f32 %v18707_v10, %v9077_v59 }
0x1f41   :  { %v18740_v45 = vpop.eup %15220  ;;  %v9126_v11 = vmul.f32 1.442695, %v9095_v14 }
0x1f42   :  { %v18742_v36 = vpop.eup %15222  ;;  %v9124_v52 = vmul.f32 1.442695, %v9094_v26  ;;  %9146 = vadd.xlane.f32.xlu1 %v18740_v45 }
0x1f43   :  { %15232 = vpow2.f32 %v9126_v11  ;;  %9144 = vadd.xlane.f32.xlu0 %v18742_v36 }
0x1f44   :  { %15234 = vpow2.f32 %v9124_v52 }
0x1f45   :  { %v18746_v4 = vpop.eup %15224 }
0x1f46   :  { %v18748_v33 = vpop.eup %15226  ;;  %9150 = vadd.xlane.f32.xlu1 %v18746_v4 }
0x1f47   :  { %9148 = vadd.xlane.f32.xlu0 %v18748_v33 }
0x1f49   :  { %v18752_v2 = vpop.eup %15228 }
0x1f4a   :  { %v18754_v44 = vpop.eup %15230  ;;  %9154 = vadd.xlane.f32.xlu1 %v18752_v2 }
0x1f4b   :  { %9152 = vadd.xlane.f32.xlu0 %v18754_v44 }
0x1f4d   :  { %v18758_v53 = vpop.eup %15232 }
0x1f4e   :  { %v18760_v10 = vpop.eup %15234  ;;  %9158 = vadd.xlane.f32.xlu1 %v18758_v53 }
0x1f4f   :  { %9156 = vadd.xlane.f32.xlu0 %v18760_v10 }
0x1fbf   :  { %v9131_v6 = vpop.xlane.xlu1 %9130 }
0x1fc0   :  { %15236 = vrcp.f32 %v9131_v6  ;;  %v9129_v48 = vpop.xlane.xlu0 %9128 }
0x1fc1   :  { %15238 = vrcp.f32 %v9129_v48 }
0x1fc3   :  { %v9135_v30 = vpop.xlane.xlu1 %9134 }
0x1fc4   :  { %15240 = vrcp.f32 %v9135_v30  ;;  %v9133_v5 = vpop.xlane.xlu0 %9132 }
0x1fc5   :  { %15242 = vrcp.f32 %v9133_v5 }
0x1fc7   :  { %v9139_v27 = vpop.xlane.xlu1 %9138 }
0x1fc8   :  { %15244 = vrcp.f32 %v9139_v27  ;;  %v9137_v63 = vpop.xlane.xlu0 %9136 }
0x1fc9   :  { %15246 = vrcp.f32 %v9137_v63 }
0x1fca   :  { %v15237_v55 = vpop.eup %15236 }
0x1fcb   :  { %v15239_v3 = vpop.eup %15238  ;;  %v9143_v40 = vpop.xlane.xlu1 %9142  ;;  %v9177_v57 = vmul.f32 %v15237_v55, %v18710_v7 }
0x1fcc   :  { %15248 = vrcp.f32 %v9143_v40  ;;  %v9141_v24 = vpop.xlane.xlu0 %9140  ;;  %v9176_v32 = vmul.f32 %v15239_v3, %v18712_v31  ;;  %v18796_v40 = vld [vmem:[%s19422_s7 + $0x7] ss:$0 sm:$0xff] }
0x1fcd   :  { %15250 = vrcp.f32 %v9141_v24 }
0x1fce   :  { %v15241_v28 = vpop.eup %15240  ;;  %13782 = vmatprep.mubr.f32.mxu1 %v9176_v32 }
0x1fcf   :  { %v15243_v62 = vpop.eup %15242  ;;  %v9147_v25 = vpop.xlane.xlu1 %9146  ;;  %13783 = vmatmul.mubr.f32.vlgmr.msra.gmra.mrb[96].mxu1 %v9177_v57  ;;  %v9179_v12 = vmul.f32 %v15241_v28, %v18716_v29 }
0x1fd0   :  { %15252 = vrcp.f32 %v9147_v25  ;;  %v9145_v50 = vpop.xlane.xlu0 %9144  ;;  %v9178_v56 = vmul.f32 %v15243_v62, %v18718_v19 }
0x1fd1   :  { %15254 = vrcp.f32 %v9145_v50  ;;  %v19614_v50 = vld [vmem:[#allocation21_spill] sm:$0xff] }
0x1fd2   :  { %v15245_v61 = vpop.eup %15244  ;;  %13785 = vmatprep.mubr.f32.mxu1 %v9178_v56 }
0x1fd3   :  { %v15247_v38 = vpop.eup %15246  ;;  %v9151_v22 = vpop.xlane.xlu1 %9150  ;;  %13786 = vmatmul.mubr.f32.gmra.mrb[98].mxu1 %v9179_v12  ;;  %v9181_v46 = vmul.f32 %v15245_v61, %v18724_v1 }
0x1fd4   :  { %15256 = vrcp.f32 %v9151_v22  ;;  %v9149_v7 = vpop.xlane.xlu0 %9148  ;;  %v9180_v31 = vmul.f32 %v15247_v38, %v18726_v20  ;;  %v19615_v38 = vld [vmem:[#allocation23_spill] sm:$0xff] }
0x1fd5   :  { %15258 = vrcp.f32 %v9149_v7  ;;  %v19616_v7 = vld [vmem:[#allocation22_spill] sm:$0xff] }
0x1fd6   :  { %v15249_v0 = vpop.eup %15248  ;;  %13788 = vmatprep.mubr.f32.mxu1 %v9180_v31 }
0x1fd7   :  { %v15251_v54 = vpop.eup %15250  ;;  %v9155_v8 = vpop.xlane.xlu1 %9154  ;;  %13789 = vmatmul.mubr.f32.gmra.mrb[100].mxu1 %v9181_v46  ;;  %v9183_v43 = vmul.f32 %v15249_v0, %v18732_v17  ;;  %v19617_v0 = vld [vmem:[#allocation24_spill] sm:$0xff] }
0x1fd8   :  { %15260 = vrcp.f32 %v9155_v8  ;;  %v9153_v58 = vpop.xlane.xlu0 %9152  ;;  %v9182_v29 = vmul.f32 %v15251_v54, %v18734_v21 }
0x1fd9   :  { %15262 = vrcp.f32 %v9153_v58 }
0x1fda   :  { %v15253_v19 = vpop.eup %15252  ;;  %13791 = vmatprep.mubr.f32.mxu1 %v9182_v29 }
0x1fdb   :  { %v15255_v18 = vpop.eup %15254  ;;  %v9159_v35 = vpop.xlane.xlu1 %9158  ;;  %13792 = vmatmul.mubr.f32.gmra.mrb[102].mxu1 %v9183_v43  ;;  %v9185_v60 = vmul.f32 %v15253_v19, %v18740_v45 }
0x1fdc   :  { %15264 = vrcp.f32 %v9159_v35  ;;  %v9157_v51 = vpop.xlane.xlu0 %9156  ;;  %v9184_v49 = vmul.f32 %v15255_v18, %v18742_v36 }
0x1fdd   :  { %15266 = vrcp.f32 %v9157_v51 }
0x1fde   :  { %v15257_v1 = vpop.eup %15256  ;;  %13794 = vmatprep.mubr.f32.mxu1 %v9184_v49  ;;  %v19618_v49 = vld [vmem:[#allocation25_spill] sm:$0xff] }
0x1fdf   :  { %v15259_v9 = vpop.eup %15258  ;;  %13795 = vmatmul.mubr.f32.gmra.mrb[104].mxu1 %v9185_v60  ;;  %v9187_v41 = vmul.f32 %v15257_v1, %v18746_v4 }
0x1fe0   :  { %v9186_v20 = vmul.f32 %v15259_v9, %v18748_v33 }
0x1fe2   :  { %v15261_v39 = vpop.eup %15260  ;;  %13797 = vmatprep.mubr.f32.mxu1 %v9186_v20 }
0x1fe3   :  { %v15263_v15 = vpop.eup %15262  ;;  %13798 = vmatmul.mubr.f32.gmra.mrb[106].mxu1 %v9187_v41  ;;  %v9189_v13 = vmul.f32 %v15261_v39, %v18752_v2  ;;  %v19619_v41 = vld [vmem:[#allocation27_spill] sm:$0xff] }
0x1fe4   :  { %v9188_v34 = vmul.f32 %v15263_v15, %v18754_v44  ;;  %v19620_v15 = vld [vmem:[#allocation26_spill] sm:$0xff] }
0x1fe6   :  { %v15265_v17 = vpop.eup %15264  ;;  %13800 = vmatprep.mubr.f32.mxu1 %v9188_v34 }
0x1fe7   :  { %v15267_v37 = vpop.eup %15266  ;;  %13801 = vmatmul.mubr.f32.gmra.mrb[108].mxu1 %v9189_v13  ;;  %v9191_v23 = vmul.f32 %v15265_v17, %v18758_v53  ;;  %v19621_v17 = vld [vmem:[#allocation28_spill] sm:$0xff] }
0x1fe8   :  { %v9190_v21 = vmul.f32 %v15267_v37, %v18760_v10 }
0x1fea   :  { %13803 = vmatprep.mubr.f32.mxu1 %v9190_v21 }
0x1feb   :  { %13804 = vmatmul.mubr.f32.gmra.mrb[110].mxu1 %v9191_v23 }
0x20a2   :  { %v13784_v16 = vpop.f32.mrb[96].mxu1 }
0x20a3   :  { %v9258_v14 = vpop.f32.mrb[97].mxu1 }
0x20a4   :  { %v9337_v59 = vpack.c.bf16 %v13784_v16, %v9258_v14 }
0x20a6   :  { %v13787_v26 = vpop.f32.mrb[98].mxu1  ;;  %13808 = vmatprep.mubr.msk.bf16.mxu0 %vm624_vm2, %v9337_v59 }
0x20a7   :  { %v9268_v45 = vpop.f32.mrb[99].mxu1 }
0x20a8   :  { %v9338_v11 = vpack.c.bf16 %v13787_v26, %v9268_v45 }
0x20aa   :  { %v13790_v36 = vpop.f32.mrb[100].mxu1  ;;  %13809 = vmatmul.mubr.msk.bf16.vlgmr.msra.gmra.mrb[16].mxu0 %vm624_vm2, %v9338_v11 }
0x20ab   :  { %v9278_v52 = vpop.f32.mrb[101].mxu1 }
0x20ac   :  { %v9339_v4 = vpack.c.bf16 %v13790_v36, %v9278_v52  ;;  %v19622_v36 = vld [vmem:[#allocation29_spill] sm:$0xff] }
0x20ae   :  { %v13793_v33 = vpop.f32.mrb[102].mxu1  ;;  %13812 = vmatprep.mubr.msk.bf16.mxu0 %vm624_vm2, %v9339_v4 }
0x20af   :  { %v9288_v2 = vpop.f32.mrb[103].mxu1 }
0x20b0   :  { %v9340_v44 = vpack.c.bf16 %v13793_v33, %v9288_v2 }
0x20b2   :  { %v13796_v53 = vpop.f32.mrb[104].mxu1  ;;  %13813 = vmatmul.mubr.msk.bf16.gmra.mrb[20].mxu0 %vm624_vm2, %v9340_v44  ;;  %v19623_v44 = vld [vmem:[#allocation31_spill] sm:$0xff] }
0x20b3   :  { %v9298_v10 = vpop.f32.mrb[105].mxu1 }
0x20b4   :  { %v9341_v42 = vpack.c.bf16 %v13796_v53, %v9298_v10  ;;  %v19624_v10 = vld [vmem:[#allocation30_spill] sm:$0xff] }
0x20b6   :  { %v13799_v47 = vpop.f32.mrb[106].mxu1  ;;  %13816 = vmatprep.mubr.msk.bf16.mxu0 %vm624_vm2, %v9341_v42 }
0x20b7   :  { %v9308_v6 = vpop.f32.mrb[107].mxu1 }
0x20b8   :  { %v9342_v48 = vpack.c.bf16 %v13799_v47, %v9308_v6  ;;  %v19625_v6 = vld [vmem:[#allocation32_spill] sm:$0xff] }
0x20ba   :  { %v13802_v30 = vpop.f32.mrb[108].mxu1  ;;  %13817 = vmatmul.mubr.msk.bf16.gmra.mrb[24].mxu0 %vm624_vm2, %v9342_v48 }
0x20bb   :  { %v9318_v5 = vpop.f32.mrb[109].mxu1 }
0x20bc   :  { %v9343_v27 = vpack.c.bf16 %v13802_v30, %v9318_v5 }
0x20be   :  { %v13805_v63 = vpop.f32.mrb[110].mxu1  ;;  %13820 = vmatprep.mubr.msk.bf16.mxu0 %vm624_vm2, %v9343_v27 }
0x20bf   :  { %v9328_v55 = vpop.f32.mrb[111].mxu1 }
0x20c0   :  { %v9344_v3 = vpack.c.bf16 %v13805_v63, %v9328_v55 }
0x20c2   :  { %13821 = vmatmul.mubr.msk.bf16.gmra.mrb[28].mxu0 %vm624_vm2, %v9344_v3 }
0x217d   :  { %v13810_v24 = vpop.f32.mrb[16].mxu0 }
0x217e   :  { %v9408_v32 = vpop.f32.mrb[17].mxu0  ;;  %v9495_v57 = vadd.f32 %v13810_v24, %v18796_v40 }
0x217f   :  { %v9493_v28 = vadd.f32 %v18796_v40, %v9408_v32  ;;  %v13811_v62 = vpop.f32.mrb[18].mxu0 }
0x2180   :  { %v9411_v25 = vpop.f32.mrb[19].mxu0  ;;  %v9496_v12 = vadd.f32 %v13811_v62, %v18796_v40  ;;  %v18806_v22 = vadd.f32 %v9495_v57, %v19615_v38  ;;  %v19626_v57 = vld [vmem:[#allocation33_spill] sm:$0xff]  ;;  %v19628_v38 = vld [vmem:[#allocation36_spill] sm:$0xff] }
0x2181   :  { %v18801_v56 = vadd.f32 %v9493_v28, %v19614_v50  ;;  %v9494_v61 = vadd.f32 %v18796_v40, %v9411_v25 }
0x2182   :  { %v18814_v54 = vadd.f32 %v9496_v12, %v19617_v0  ;;  %v9531_v35 = vsel %vm258_vm1, %v18806_v22, 0.0  ;;  %v19627_v12 = vld [vmem:[#allocation34_spill] sm:$0xff]  ;;  %v19629_v0 = vld [vmem:[#allocation35_spill] sm:$0xff] }
0x2183   :  { %v18809_v31 = vadd.f32 %v9494_v61, %v19616_v7  ;;  %v9525_v46 = vsel %vm258_vm1, %v18801_v56, 0.0 }
0x2184   :  { %9526 = vadd.xlane.f32.xlu0 %v9525_v46  ;;  %v9534_v20 = vsel %vm258_vm1, %v18814_v54, 0.0 }
0x2185   :  { %v13814_v8 = vpop.f32.mrb[20].mxu0  ;;  %v9528_v58 = vsel %vm258_vm1, %v18809_v31, 0.0 }
0x2186   :  { %9529 = vadd.xlane.f32.xlu1 %v9528_v58  ;;  %v9424_v29 = vpop.f32.mrb[21].mxu0  ;;  %v9499_v43 = vadd.f32 %v13814_v8, %v18796_v40 }
0x2187   :  { %v9497_v19 = vadd.f32 %v18796_v40, %v9424_v29  ;;  %v13815_v18 = vpop.f32.mrb[22].mxu0 }
0x2188   :  { %9532 = vadd.xlane.f32.xlu0 %v9531_v35  ;;  %v9427_v51 = vpop.f32.mrb[23].mxu0  ;;  %v9500_v1 = vadd.f32 %v13815_v18, %v18796_v40  ;;  %v18830_v39 = vadd.f32 %v9499_v43, %v19619_v41  ;;  %v14686_v43 = vld [vmem:[%s19421_s6 + $0x20] sm:$0xff]  }
0x2189   :  { %v18823_v60 = vadd.f32 %v9497_v19, %v19618_v49  ;;  %v9498_v9 = vadd.f32 %v18796_v40, %v9427_v51  ;;  %13824 = vmatprep.subr.bf16.mxu1 %v14686_v43 }
0x218a   :  { %9535 = vadd.xlane.f32.xlu1 %v9534_v20  ;;  %v18838_v37 = vadd.f32 %v9500_v1, %v19621_v17  ;;  %v9543_v45 = vsel %vm258_vm1, %v18830_v39, 0.0  ;;  %13825 = vmatpush3.bf16.msra.mxu1 %v14686_v43 }
0x218b   :  { %v18833_v34 = vadd.f32 %v9498_v9, %v19620_v15  ;;  %v9537_v13 = vsel %vm258_vm1, %v18823_v60, 0.0 }
0x218c   :  { %9538 = vadd.xlane.f32.xlu0 %v9537_v13  ;;  %v9546_v2 = vsel %vm258_vm1, %v18838_v37, 0.0 }
0x218d   :  { %v13818_v21 = vpop.f32.mrb[24].mxu0  ;;  %v9540_v23 = vsel %vm258_vm1, %v18833_v34, 0.0 }
0x218e   :  { %9541 = vadd.xlane.f32.xlu1 %v9540_v23  ;;  %v9440_v16 = vpop.f32.mrb[25].mxu0  ;;  %v9503_v14 = vadd.f32 %v13818_v21, %v18796_v40 }
0x218f   :  { %v9501_v59 = vadd.f32 %v18796_v40, %v9440_v16  ;;  %v13819_v26 = vpop.f32.mrb[26].mxu0 }
0x2190   :  { %9544 = vadd.xlane.f32.xlu0 %v9543_v45  ;;  %v9443_v11 = vpop.f32.mrb[27].mxu0  ;;  %v9504_v4 = vadd.f32 %v13819_v26, %v18796_v40  ;;  %v18854_v53 = vadd.f32 %v9503_v14, %v19623_v44 }
0x2191   :  { %v18847_v52 = vadd.f32 %v9501_v59, %v19622_v36  ;;  %v9502_v33 = vadd.f32 %v18796_v40, %v9443_v11 }
0x2192   :  { %9547 = vadd.xlane.f32.xlu1 %v9546_v2  ;;  %v18862_v48 = vadd.f32 %v9504_v4, %v19625_v6  ;;  %v9555_v24 = vsel %vm258_vm1, %v18854_v53, 0.0 }
0x2193   :  { %v18857_v42 = vadd.f32 %v9502_v33, %v19624_v10  ;;  %v9549_v47 = vsel %vm258_vm1, %v18847_v52, 0.0 }
0x2194   :  { %9550 = vadd.xlane.f32.xlu0 %v9549_v47  ;;  %v9558_v50 = vsel %vm258_vm1, %v18862_v48, 0.0 }
0x2195   :  { %v13822_v30 = vpop.f32.mrb[28].mxu0  ;;  %v9552_v5 = vsel %vm258_vm1, %v18857_v42, 0.0 }
0x2196   :  { %9553 = vadd.xlane.f32.xlu1 %v9552_v5  ;;  %v9456_v27 = vpop.f32.mrb[29].mxu0  ;;  %v9507_v63 = vadd.f32 %v13822_v30, %v18796_v40 }
0x2197   :  { %v9505_v55 = vadd.f32 %v18796_v40, %v9456_v27  ;;  %v13823_v3 = vpop.f32.mrb[30].mxu0 }
0x2198   :  { %9556 = vadd.xlane.f32.xlu0 %v9555_v24  ;;  %v9459_v32 = vpop.f32.mrb[31].mxu0  ;;  %v9508_v62 = vadd.f32 %v13823_v3, %v18796_v40  ;;  %v18878_v61 = vadd.f32 %v9507_v63, %v19627_v12 }
0x2199   :  { %v18871_v28 = vadd.f32 %v9505_v55, %v19626_v57  ;;  %v9506_v25 = vadd.f32 %v18796_v40, %v9459_v32 }
0x219a   :  { %9559 = vadd.xlane.f32.xlu1 %v9558_v50  ;;  %v18886_v8 = vadd.f32 %v9508_v62, %v19629_v0  ;;  %v9567_v58 = vsel %vm258_vm1, %v18878_v61, 0.0 }
0x219b   :  { %v18881_v7 = vadd.f32 %v9506_v25, %v19628_v38  ;;  %v9561_v46 = vsel %vm258_vm1, %v18871_v28, 0.0 }
0x219c   :  { %9562 = vadd.xlane.f32.xlu0 %v9561_v46  ;;  %v9570_v29 = vsel %vm258_vm1, %v18886_v8, 0.0 }
0x219d   :  { %v9564_v40 = vsel %vm258_vm1, %v18881_v7, 0.0 }
0x219e   :  { %9565 = vadd.xlane.f32.xlu1 %v9564_v40 }
0x21a0   :  { %9568 = vadd.xlane.f32.xlu0 %v9567_v58 }
0x21a2   :  { %9571 = vadd.xlane.f32.xlu1 %v9570_v29 }
0x2211   :  { %v9527_v19 = vpop.xlane.xlu0 %9526 }
0x2212   :  { %v9573_v18 = vmul.f32 0.03125, %v9527_v19 }
0x2213   :  { %v9530_v35 = vpop.xlane.xlu1 %9529 }
0x2214   :  { %v18898_v51 = vsub.f32 %v18801_v56, %v9573_v18  ;;  %v9574_v49 = vmul.f32 0.03125, %v9530_v35 }
0x2215   :  { %v9533_v1 = vpop.xlane.xlu0 %9532 }
0x2216   :  { %v18901_v9 = vsub.f32 %v18809_v31, %v9574_v49  ;;  %v9575_v20 = vmul.f32 0.03125, %v9533_v1  ;;  %v9605_v41 = vmul.f32 %v18898_v51, %v18898_v51 }
0x2217   :  { %v9536_v15 = vpop.xlane.xlu1 %9535 }
0x2218   :  { %v18906_v13 = vsub.f32 %v18806_v22, %v9575_v20  ;;  %v9576_v17 = vmul.f32 0.03125, %v9536_v15  ;;  %v9621_v21 = vsel %vm258_vm1, %v9605_v41, 0.0  ;;  %v9606_v56 = vmul.f32 %v18901_v9, %v18901_v9 }
0x2219   :  { %9622 = vadd.xlane.f32.xlu0 %v9621_v21  ;;  %v9539_v23 = vpop.xlane.xlu0 %9538 }
0x221a   :  { %v18912_v16 = vsub.f32 %v18814_v54, %v9576_v17  ;;  %v9577_v31 = vmul.f32 0.03125, %v9539_v23  ;;  %v9624_v14 = vsel %vm258_vm1, %v9606_v56, 0.0  ;;  %v9607_v59 = vmul.f32 %v18906_v13, %v18906_v13 }
0x221b   :  { %v9542_v26 = vpop.xlane.xlu1 %9541  ;;  %9625 = vadd.xlane.f32.xlu1 %v9624_v14 }
0x221c   :  { %v18918_v22 = vsub.f32 %v18823_v60, %v9577_v31  ;;  %v9578_v45 = vmul.f32 0.03125, %v9542_v26  ;;  %v9627_v11 = vsel %vm258_vm1, %v9607_v59, 0.0  ;;  %v9608_v36 = vmul.f32 %v18912_v16, %v18912_v16 }
0x221d   :  { %9628 = vadd.xlane.f32.xlu0 %v9627_v11  ;;  %v9545_v54 = vpop.xlane.xlu0 %9544  ;;  %v18999_v11 = vld [vmem:[%s19421_s6 + $0x30] sm:$0xff]  }
0x221e   :  { %v18924_v4 = vsub.f32 %v18833_v34, %v9578_v45  ;;  %v9579_v33 = vmul.f32 0.03125, %v9545_v54  ;;  %v9630_v2 = vsel %vm258_vm1, %v9608_v36, 0.0  ;;  %v9609_v44 = vmul.f32 %v18918_v22, %v18918_v22 }
0x221f   :  { %v9548_v10 = vpop.xlane.xlu1 %9547  ;;  %9631 = vadd.xlane.f32.xlu1 %v9630_v2 }
0x2220   :  { %v18930_v60 = vsub.f32 %v18830_v39, %v9579_v33  ;;  %v9580_v47 = vmul.f32 0.03125, %v9548_v10  ;;  %v9633_v6 = vsel %vm258_vm1, %v9609_v44, 0.0  ;;  %v9610_v30 = vmul.f32 %v18924_v4, %v18924_v4 }
0x2221   :  { %9634 = vadd.xlane.f32.xlu0 %v9633_v6  ;;  %v9551_v34 = vpop.xlane.xlu0 %9550 }
0x2222   :  { %v18936_v5 = vsub.f32 %v18838_v37, %v9580_v47  ;;  %v9581_v27 = vmul.f32 0.03125, %v9551_v34  ;;  %v9636_v63 = vsel %vm258_vm1, %v9610_v30, 0.0  ;;  %v9611_v55 = vmul.f32 %v18930_v60, %v18930_v60 }
0x2223   :  { %v9554_v3 = vpop.xlane.xlu1 %9553  ;;  %9637 = vadd.xlane.f32.xlu1 %v9636_v63 }
0x2224   :  { %v18942_v39 = vsub.f32 %v18847_v52, %v9581_v27  ;;  %v9582_v24 = vmul.f32 0.03125, %v9554_v3  ;;  %v9639_v32 = vsel %vm258_vm1, %v9611_v55, 0.0  ;;  %v9612_v57 = vmul.f32 %v18936_v5, %v18936_v5 }
0x2225   :  { %9640 = vadd.xlane.f32.xlu0 %v9639_v32  ;;  %v9557_v37 = vpop.xlane.xlu0 %9556 }
0x2226   :  { %v18948_v62 = vsub.f32 %v18857_v42, %v9582_v24  ;;  %v9583_v25 = vmul.f32 0.03125, %v9557_v37  ;;  %v9642_v50 = vsel %vm258_vm1, %v9612_v57, 0.0  ;;  %v9613_v12 = vmul.f32 %v18942_v39, %v18942_v39 }
0x2227   :  { %v9560_v38 = vpop.xlane.xlu1 %9559  ;;  %9643 = vadd.xlane.f32.xlu1 %v9642_v50 }
0x2228   :  { %v18954_v52 = vsub.f32 %v18854_v53, %v9583_v25  ;;  %v9584_v46 = vmul.f32 0.03125, %v9560_v38  ;;  %v9645_v0 = vsel %vm258_vm1, %v9613_v12, 0.0  ;;  %v9614_v40 = vmul.f32 %v18948_v62, %v18948_v62 }
0x2229   :  { %9646 = vadd.xlane.f32.xlu0 %v9645_v0  ;;  %v9563_v42 = vpop.xlane.xlu0 %9562 }
0x222a   :  { %v18960_v58 = vsub.f32 %v18862_v48, %v9584_v46  ;;  %v9585_v29 = vmul.f32 0.03125, %v9563_v42  ;;  %v9648_v43 = vsel %vm258_vm1, %v9614_v40, 0.0  ;;  %v9615_v19 = vmul.f32 %v18954_v52, %v18954_v52  ;;  %v19005_v46 = vld [vmem:[%s19422_s7 + $0xa] ss:$0 sm:$0xff] }
0x222b   :  { %9649 = vadd.xlane.f32.xlu1 %v9648_v43  ;;  %v9566_v53 = vpop.xlane.xlu1 %9565 }
0x222c   :  { %v18966_v18 = vsub.f32 %v18871_v28, %v9585_v29  ;;  %v9586_v35 = vmul.f32 0.03125, %v9566_v53  ;;  %v9651_v49 = vsel %vm258_vm1, %v9615_v19, 0.0  ;;  %v9616_v1 = vmul.f32 %v18960_v58, %v18960_v58 }
0x222d   :  { %9652 = vadd.xlane.f32.xlu0 %v9651_v49  ;;  %v9569_v48 = vpop.xlane.xlu0 %9568 }
0x222e   :  { %v18972_v20 = vsub.f32 %v18881_v7, %v9586_v35  ;;  %v9587_v41 = vmul.f32 0.03125, %v9569_v48  ;;  %v9654_v15 = vsel %vm258_vm1, %v9616_v1, 0.0  ;;  %v9617_v17 = vmul.f32 %v18966_v18, %v18966_v18 }
0x222f   :  { %9655 = vadd.xlane.f32.xlu1 %v9654_v15  ;;  %v9572_v28 = vpop.xlane.xlu1 %9571 }
0x2230   :  { %v18978_v21 = vsub.f32 %v18878_v61, %v9587_v41  ;;  %v9588_v56 = vmul.f32 0.03125, %v9572_v28  ;;  %v9657_v23 = vsel %vm258_vm1, %v9617_v17, 0.0  ;;  %v9618_v31 = vmul.f32 %v18972_v20, %v18972_v20  ;;  %v19013_v41 = vld [vmem:[%s19422_s7 + $0xb] ss:$0 sm:$0xff] }
0x2231   :  { %9658 = vadd.xlane.f32.xlu0 %v9657_v23 }
0x2232   :  { %v18984_v7 = vsub.f32 %v18886_v8, %v9588_v56  ;;  %v9660_v14 = vsel %vm258_vm1, %v9618_v31, 0.0  ;;  %v9619_v59 = vmul.f32 %v18978_v21, %v18978_v21  ;;  %v14687_v8 = vld [vmem:[%s19421_s6 + $0x28] sm:$0xff]  }
0x2233   :  { %9661 = vadd.xlane.f32.xlu1 %v9660_v14  ;;  %13826 = vmatprep.subr.bf16.mxu1 %v14687_v8 }
0x2234   :  { %v9663_v26 = vsel %vm258_vm1, %v9619_v59, 0.0  ;;  %v9620_v61 = vmul.f32 %v18984_v7, %v18984_v7  ;;  %13827 = vmatpush3.bf16.msra.mxu1 %v14687_v8 }
0x2235   :  { %9664 = vadd.xlane.f32.xlu0 %v9663_v26  ;;  %13844 = vmatprep.subr.bf16.mxu1 %v18999_v11 }
0x2236   :  { %v9666_v45 = vsel %vm258_vm1, %v9620_v61, 0.0 }
0x2237   :  { %9667 = vadd.xlane.f32.xlu1 %v9666_v45 }
0x22a6   :  { %v9623_v36 = vpop.xlane.xlu0 %9622 }
0x22a7   :  { %v9669_v54 = vmul.f32 0.03125, %v9623_v36 }
0x22a8   :  { %v9626_v33 = vpop.xlane.xlu1 %9625 }
0x22a9   :  { %v9685_v2 = vadd.f32 1e-05, %v9669_v54  ;;  %v9670_v44 = vmul.f32 0.03125, %v9626_v33 }
0x22aa   :  { %v9629_v10 = vpop.xlane.xlu0 %9628 }
0x22ab   :  { %15268 = vrsqrt.f32 %v9685_v2  ;;  %v9686_v47 = vadd.f32 1e-05, %v9670_v44  ;;  %v9671_v6 = vmul.f32 0.03125, %v9629_v10 }
0x22ac   :  { %v9632_v30 = vpop.xlane.xlu1 %9631 }
0x22ad   :  { %15270 = vrsqrt.f32 %v9686_v47  ;;  %v9687_v34 = vadd.f32 1e-05, %v9671_v6  ;;  %v9672_v27 = vmul.f32 0.03125, %v9632_v30 }
0x22ae   :  { %v9635_v63 = vpop.xlane.xlu0 %9634 }
0x22af   :  { %15272 = vrsqrt.f32 %v9687_v34  ;;  %v9688_v55 = vadd.f32 1e-05, %v9672_v27  ;;  %v9673_v3 = vmul.f32 0.03125, %v9635_v63 }
0x22b0   :  { %v9638_v24 = vpop.xlane.xlu1 %9637 }
0x22b1   :  { %15274 = vrsqrt.f32 %v9688_v55  ;;  %v9689_v32 = vadd.f32 1e-05, %v9673_v3  ;;  %v9674_v57 = vmul.f32 0.03125, %v9638_v24 }
0x22b2   :  { %v9641_v37 = vpop.xlane.xlu0 %9640 }
0x22b3   :  { %15276 = vrsqrt.f32 %v9689_v32  ;;  %v9690_v25 = vadd.f32 1e-05, %v9674_v57  ;;  %v9675_v50 = vmul.f32 0.03125, %v9641_v37 }
0x22b4   :  { %v9644_v12 = vpop.xlane.xlu1 %9643 }
0x22b5   :  { %v15269_v38 = vpop.eup %15268  ;;  %15278 = vrsqrt.f32 %v9690_v25  ;;  %v9691_v0 = vadd.f32 1e-05, %v9675_v50  ;;  %v9676_v40 = vmul.f32 0.03125, %v9644_v12 }
0x22b6   :  { %v9717_v42 = vmul.f32 %v15269_v38, %v18898_v51  ;;  %v9647_v29 = vpop.xlane.xlu0 %9646 }
0x22b7   :  { %v15271_v43 = vpop.eup %15270  ;;  %15280 = vrsqrt.f32 %v9691_v0  ;;  %v9692_v19 = vadd.f32 1e-05, %v9676_v40  ;;  %v9677_v53 = vmul.f32 0.03125, %v9647_v29 }
0x22b8   :  { %v9718_v35 = vmul.f32 %v15271_v43, %v18901_v9  ;;  %v9650_v49 = vpop.xlane.xlu1 %9649  ;;  %v9739_v1 = vmul.f32 %v19005_v46, %v9717_v42 }
0x22b9   :  { %v15273_v48 = vpop.eup %15272  ;;  %15282 = vrsqrt.f32 %v9692_v19  ;;  %v9693_v15 = vadd.f32 1e-05, %v9677_v53  ;;  %v9678_v17 = vmul.f32 0.03125, %v9650_v49 }
0x22ba   :  { %v9719_v51 = vmul.f32 %v15273_v48, %v18906_v13  ;;  %v9653_v28 = vpop.xlane.xlu0 %9652  ;;  %v9740_v56 = vmul.f32 %v19005_v46, %v9718_v35  ;;  %v19020_v61 = vadd.f32 %v19013_v41, %v9739_v1 }
0x22bb   :  { %v15275_v23 = vpop.eup %15274  ;;  %15284 = vrsqrt.f32 %v9693_v15  ;;  %v9694_v9 = vadd.f32 1e-05, %v9678_v17  ;;  %v9679_v31 = vmul.f32 0.03125, %v9653_v28 }
0x22bc   :  { %v9741_v14 = vmul.f32 %v19005_v46, %v9719_v51  ;;  %v9720_v59 = vmul.f32 %v15275_v23, %v18912_v16  ;;  %v9656_v26 = vpop.xlane.xlu1 %9655  ;;  %v19023_v45 = vadd.f32 %v19013_v41, %v9740_v56 }
0x22bd   :  { %v15277_v8 = vpop.eup %15276  ;;  %15286 = vrsqrt.f32 %v9694_v9  ;;  %v9695_v13 = vadd.f32 1e-05, %v9679_v31  ;;  %v9680_v36 = vmul.f32 0.03125, %v9656_v26 }
0x22be   :  { %v9742_v54 = vmul.f32 %v19005_v46, %v9720_v59  ;;  %v9721_v33 = vmul.f32 %v15277_v8, %v18918_v22  ;;  %v9659_v2 = vpop.xlane.xlu0 %9658  ;;  %v9777_v44 = vpack.c.bf16 %v19023_v45, %v19020_v61  ;;  %v19030_v6 = vadd.f32 %v19013_v41, %v9741_v14 }
0x22bf   :  { %v15279_v16 = vpop.eup %15278  ;;  %15288 = vrsqrt.f32 %v9695_v13  ;;  %v9696_v10 = vadd.f32 1e-05, %v9680_v36  ;;  %v9681_v47 = vmul.f32 0.03125, %v9659_v2 }
0x22c0   :  { %v19033_v30 = vadd.f32 %v19013_v41, %v9742_v54  ;;  %v9722_v34 = vmul.f32 %v15279_v16, %v18924_v4  ;;  %v9662_v27 = vpop.xlane.xlu1 %9661  ;;  %13828 = vmatprep.mubr.msk.bf16.mxu1 %vm258_vm1, %v9777_v44  ;;  %v9743_v22 = vmul.f32 %v19005_v46, %v9721_v33  ;;  %v14689_v4 = vld [vmem:[%s19421_s6 + $0x38] sm:$0xff]  }
0x22c1   :  { %v15281_v63 = vpop.eup %15280  ;;  %15290 = vrsqrt.f32 %v9696_v10  ;;  %v9697_v55 = vadd.f32 1e-05, %v9681_v47  ;;  %v9682_v3 = vmul.f32 0.03125, %v9662_v27 }
0x22c2   :  { %v9778_v24 = vpack.c.bf16 %v19033_v30, %v19030_v6  ;;  %v9723_v32 = vmul.f32 %v15281_v63, %v18930_v60  ;;  %v9665_v57 = vpop.xlane.xlu0 %9664  ;;  %v9744_v37 = vmul.f32 %v19005_v46, %v9722_v34  ;;  %v19049_v60 = vadd.f32 %v19013_v41, %v9743_v22 }
0x22c3   :  { %v15283_v25 = vpop.eup %15282  ;;  %15292 = vrsqrt.f32 %v9697_v55  ;;  %v9698_v50 = vadd.f32 1e-05, %v9682_v3  ;;  %v9683_v12 = vmul.f32 0.03125, %v9665_v57 }
0x22c4   :  { %v9745_v38 = vmul.f32 %v19005_v46, %v9723_v32  ;;  %v9724_v0 = vmul.f32 %v15283_v25, %v18936_v5  ;;  %v9668_v40 = vpop.xlane.xlu1 %9667  ;;  %13829 = vmatmul.mubr.msk.bf16.vlgmr.msra.gmra.mrb[112].mxu1 %vm258_vm1, %v9778_v24  ;;  %v19052_v42 = vadd.f32 %v19013_v41, %v9744_v37 }
0x22c5   :  { %v15285_v29 = vpop.eup %15284  ;;  %15294 = vrsqrt.f32 %v9698_v50  ;;  %v9699_v43 = vadd.f32 1e-05, %v9683_v12  ;;  %v9684_v19 = vmul.f32 0.03125, %v9668_v40  ;;  %13845 = vmatpush3.bf16.msra.mxu1 %v18999_v11 }
0x22c6   :  { %v9746_v53 = vmul.f32 %v19005_v46, %v9724_v0  ;;  %v9725_v35 = vmul.f32 %v15285_v29, %v18942_v39  ;;  %v9779_v5 = vpack.c.bf16 %v19052_v42, %v19049_v60  ;;  %13846 = vmatprep.subr.bf16.mxu1 %v14689_v4  ;;  %v19060_v48 = vadd.f32 %v19013_v41, %v9745_v38 }
0x22c7   :  { %v15287_v49 = vpop.eup %15286  ;;  %15296 = vrsqrt.f32 %v9699_v43  ;;  %v9700_v1 = vadd.f32 1e-05, %v9684_v19 }
0x22c8   :  { %v19063_v15 = vadd.f32 %v19013_v41, %v9746_v53  ;;  %v9726_v17 = vmul.f32 %v15287_v49, %v18948_v62  ;;  %13832 = vmatprep.mubr.msk.bf16.mxu1 %vm258_vm1, %v9779_v5  ;;  %v9747_v11 = vmul.f32 %v19005_v46, %v9725_v35 }
0x22c9   :  { %v15289_v39 = vpop.eup %15288  ;;  %15298 = vrsqrt.f32 %v9700_v1  ;;  %13847 = vmatpush3.bf16.msra.mxu1 %v14689_v4 }
0x22ca   :  { %v9780_v51 = vpack.c.bf16 %v19063_v15, %v19060_v48  ;;  %v9727_v28 = vmul.f32 %v15289_v39, %v18954_v52  ;;  %v9748_v56 = vmul.f32 %v19005_v46, %v9726_v17  ;;  %v19076_v62 = vadd.f32 %v19013_v41, %v9747_v11 }
0x22cb   :  { %v15291_v23 = vpop.eup %15290 }
0x22cc   :  { %v9749_v9 = vmul.f32 %v19005_v46, %v9727_v28  ;;  %v9728_v31 = vmul.f32 %v15291_v23, %v18960_v58  ;;  %13833 = vmatmul.mubr.msk.bf16.gmra.mrb[116].mxu1 %vm258_vm1, %v9780_v51  ;;  %v19079_v14 = vadd.f32 %v19013_v41, %v9748_v56 }
0x22cd   :  { %v15293_v59 = vpop.eup %15292 }
0x22ce   :  { %v9750_v26 = vmul.f32 %v19005_v46, %v9728_v31  ;;  %v9729_v52 = vmul.f32 %v15293_v59, %v18966_v18  ;;  %v9781_v8 = vpack.c.bf16 %v19079_v14, %v19076_v62  ;;  %v19086_v36 = vadd.f32 %v19013_v41, %v9749_v9 }
0x22cf   :  { %v15295_v13 = vpop.eup %15294 }
0x22d0   :  { %v19089_v58 = vadd.f32 %v19013_v41, %v9750_v26  ;;  %v9730_v54 = vmul.f32 %v15295_v13, %v18972_v20  ;;  %13836 = vmatprep.mubr.msk.bf16.mxu1 %vm258_vm1, %v9781_v8  ;;  %v9751_v33 = vmul.f32 %v19005_v46, %v9729_v52 }
0x22d1   :  { %v15297_v2 = vpop.eup %15296 }
0x22d2   :  { %v9782_v18 = vpack.c.bf16 %v19089_v58, %v19086_v36  ;;  %v9731_v44 = vmul.f32 %v15297_v2, %v18978_v21  ;;  %v9752_v16 = vmul.f32 %v19005_v46, %v9730_v54  ;;  %v19102_v20 = vadd.f32 %v19013_v41, %v9751_v33 }
0x22d3   :  { %v15299_v10 = vpop.eup %15298 }
0x22d4   :  { %v9753_v47 = vmul.f32 %v19005_v46, %v9731_v44  ;;  %v9732_v34 = vmul.f32 %v15299_v10, %v18984_v7  ;;  %13837 = vmatmul.mubr.msk.bf16.gmra.mrb[120].mxu1 %vm258_vm1, %v9782_v18  ;;  %v19105_v27 = vadd.f32 %v19013_v41, %v9752_v16 }
0x22d6   :  { %v9754_v22 = vmul.f32 %v19005_v46, %v9732_v34  ;;  %v9783_v21 = vpack.c.bf16 %v19105_v27, %v19102_v20  ;;  %v19111_v63 = vadd.f32 %v19013_v41, %v9753_v47  ;;  %v11318_v46 = vld [vmem:[%s19422_s7 + $0x8] ss:$0 sm:$0xff] }
0x22d8   :  { %v19114_v55 = vadd.f32 %v19013_v41, %v9754_v22  ;;  %13840 = vmatprep.mubr.msk.bf16.mxu1 %vm258_vm1, %v9783_v21 }
0x22da   :  { %v9784_v7 = vpack.c.bf16 %v19114_v55, %v19111_v63 }
0x22dc   :  { %13841 = vmatmul.mubr.msk.bf16.gmra.mrb[124].mxu1 %vm258_vm1, %v9784_v7 }
0x2397   :  { %v13830_v3 = vpop.f32.mrb[112].mxu1 }
0x2398   :  { %v9875_v24 = vadd.f32 %v13830_v3, %v11318_v46  ;;  %v9866_v32 = vpop.f32.mrb[113].mxu1 }
0x2399   :  { %v9867_v57 = vadd.f32 %v11318_v46, %v9866_v32  ;;  %v13831_v37 = vpop.f32.mrb[114].mxu1 }
0x239a   :  { %v9878_v4 = vadd.f32 %v13831_v37, %v11318_v46  ;;  %v9869_v25 = vpop.f32.mrb[115].mxu1  ;;  %v9931_v50 = vmax.f32 %v9875_v24, 0.0 }
0x239b   :  { %v9870_v41 = vadd.f32 %v11318_v46, %v9869_v25  ;;  %v9929_v38 = vmax.f32 %v9867_v57, 0.0 }
0x239c   :  { %v9932_v12 = vmax.f32 %v9878_v4, 0.0 }
0x239d   :  { %v9930_v0 = vmax.f32 %v9870_v41, 0.0 }
0x239e   :  { %v9946_v40 = vpack.c.bf16 %v9932_v12, %v9931_v50  ;;  %v19134_v12 = vld [vmem:[%s19422_s7 + $0x9] ss:$0 sm:$0xff] }
0x239f   :  { %v9945_v29 = vpack.c.bf16 %v9930_v0, %v9929_v38  ;;  %v13834_v43 = vpop.f32.mrb[116].mxu1 }
0x23a0   :  { %v9891_v19 = vadd.f32 %v13834_v43, %v11318_v46  ;;  %v9882_v53 = vpop.f32.mrb[117].mxu1 }
0x23a1   :  { %v9883_v35 = vadd.f32 %v11318_v46, %v9882_v53  ;;  %v13835_v5 = vpop.f32.mrb[118].mxu1  ;;  %13848 = vmatprep.mubr.msk.bf16.mxu1 %vm258_vm1, %v9945_v29 }
0x23a2   :  { %v9894_v49 = vadd.f32 %v13835_v5, %v11318_v46  ;;  %v9885_v1 = vpop.f32.mrb[119].mxu1  ;;  %13849 = vmatmul.mubr.msk.bf16.vlgmr.msra.gmra.mrb[128].mxu1 %vm258_vm1, %v9946_v40  ;;  %v9935_v11 = vmax.f32 %v9891_v19, 0.0 }
0x23a3   :  { %v9886_v17 = vadd.f32 %v11318_v46, %v9885_v1  ;;  %v9933_v51 = vmax.f32 %v9883_v35, 0.0 }
0x23a4   :  { %v9936_v39 = vmax.f32 %v9894_v49, 0.0 }
0x23a5   :  { %v9934_v28 = vmax.f32 %v9886_v17, 0.0 }
0x23a6   :  { %v9948_v56 = vpack.c.bf16 %v9936_v39, %v9935_v11 }
0x23a7   :  { %v9947_v23 = vpack.c.bf16 %v9934_v28, %v9933_v51  ;;  %v13838_v9 = vpop.f32.mrb[120].mxu1 }
0x23a8   :  { %v9907_v31 = vadd.f32 %v13838_v9, %v11318_v46  ;;  %v9898_v59 = vpop.f32.mrb[121].mxu1 }
0x23a9   :  { %v9899_v26 = vadd.f32 %v11318_v46, %v9898_v59  ;;  %v13839_v52 = vpop.f32.mrb[122].mxu1  ;;  %13852 = vmatprep.mubr.msk.bf16.mxu1 %vm258_vm1, %v9947_v23 }
0x23aa   :  { %v9910_v8 = vadd.f32 %v13839_v52, %v11318_v46  ;;  %v9901_v13 = vpop.f32.mrb[123].mxu1  ;;  %13853 = vmatmul.mubr.msk.bf16.gmra.mrb[132].mxu1 %vm258_vm1, %v9948_v56  ;;  %v9939_v33 = vmax.f32 %v9907_v31, 0.0 }
0x23ab   :  { %v9902_v54 = vadd.f32 %v11318_v46, %v9901_v13  ;;  %v9937_v18 = vmax.f32 %v9899_v26, 0.0 }
0x23ac   :  { %v9940_v2 = vmax.f32 %v9910_v8, 0.0 }
0x23ad   :  { %v9938_v44 = vmax.f32 %v9902_v54, 0.0 }
0x23ae   :  { %v9950_v16 = vpack.c.bf16 %v9940_v2, %v9939_v33 }
0x23af   :  { %v9949_v10 = vpack.c.bf16 %v9938_v44, %v9937_v18  ;;  %v13842_v47 = vpop.f32.mrb[124].mxu1 }
0x23b0   :  { %v9923_v34 = vadd.f32 %v13842_v47, %v11318_v46  ;;  %v9914_v22 = vpop.f32.mrb[125].mxu1 }
0x23b1   :  { %v9915_v21 = vadd.f32 %v11318_v46, %v9914_v22  ;;  %v13843_v7 = vpop.f32.mrb[126].mxu1  ;;  %13856 = vmatprep.mubr.msk.bf16.mxu1 %vm258_vm1, %v9949_v10 }
0x23b2   :  { %v9926_v3 = vadd.f32 %v13843_v7, %v11318_v46  ;;  %v9917_v24 = vpop.f32.mrb[127].mxu1  ;;  %13857 = vmatmul.mubr.msk.bf16.gmra.mrb[136].mxu1 %vm258_vm1, %v9950_v16  ;;  %v9943_v57 = vmax.f32 %v9923_v34, 0.0 }
0x23b3   :  { %v9918_v32 = vadd.f32 %v11318_v46, %v9917_v24  ;;  %v9941_v4 = vmax.f32 %v9915_v21, 0.0 }
0x23b4   :  { %v9944_v37 = vmax.f32 %v9926_v3, 0.0 }
0x23b5   :  { %v9942_v25 = vmax.f32 %v9918_v32, 0.0 }
0x23b6   :  { %v9952_v41 = vpack.c.bf16 %v9944_v37, %v9943_v57 }
0x23b7   :  { %v9951_v50 = vpack.c.bf16 %v9942_v25, %v9941_v4 }
0x23b9   :  { %13860 = vmatprep.mubr.msk.bf16.mxu1 %vm258_vm1, %v9951_v50 }
0x23ba   :  { %13861 = vmatmul.mubr.msk.bf16.gmra.mrb[140].mxu1 %vm258_vm1, %v9952_v41 }
0x2475   :  { %v13850_v38 = vpop.f32.mrb[128].mxu1 }
0x2476   :  { %v10034_v0 = vpop.f32.mrb[129].mxu1  ;;  %v10043_v40 = vadd.f32 %v13850_v38, %v19134_v12 }
0x2477   :  { %v10035_v46 = vadd.f32 %v19134_v12, %v10034_v0  ;;  %v13851_v29 = vpop.f32.mrb[130].mxu1 }
0x2478   :  { %v10037_v43 = vpop.f32.mrb[131].mxu1  ;;  %v10046_v53 = vadd.f32 %v13851_v29, %v19134_v12  ;;  %v19144_v5 = vadd.f32 %v10043_v40, %v19030_v6 }
0x2479   :  { %v19139_v19 = vadd.f32 %v10035_v46, %v19020_v61  ;;  %v10038_v35 = vadd.f32 %v19134_v12, %v10037_v43 }
0x247a   :  { %v19152_v17 = vadd.f32 %v10046_v53, %v19033_v30 }
0x247b   :  { %v19147_v49 = vadd.f32 %v10038_v35, %v19023_v45  ;;  %v10113_v1 = vsel %vm258_vm1, %v19139_v19, 0.0  ;;  %v10119_v45 = vsel %vm258_vm1, %v19144_v5, 0.0 }
0x247c   :  { %10114 = vadd.xlane.f32.xlu0 %v10113_v1  ;;  %v10122_v31 = vsel %vm258_vm1, %v19152_v17, 0.0 }
0x247d   :  { %v13854_v11 = vpop.f32.mrb[132].mxu1  ;;  %v10116_v61 = vsel %vm258_vm1, %v19147_v49, 0.0 }
0x247e   :  { %v10050_v39 = vpop.f32.mrb[133].mxu1  ;;  %10117 = vadd.xlane.f32.xlu1 %v10116_v61  ;;  %v10059_v51 = vadd.f32 %v13854_v11, %v19134_v12 }
0x247f   :  { %v10051_v6 = vadd.f32 %v19134_v12, %v10050_v39  ;;  %v13855_v28 = vpop.f32.mrb[134].mxu1 }
0x2480   :  { %v10053_v56 = vpop.f32.mrb[135].mxu1  ;;  %10120 = vadd.xlane.f32.xlu0 %v10119_v45  ;;  %v10062_v30 = vadd.f32 %v13855_v28, %v19134_v12  ;;  %v19168_v59 = vadd.f32 %v10059_v51, %v19060_v48 }
0x2481   :  { %v19161_v23 = vadd.f32 %v10051_v6, %v19049_v60  ;;  %v10054_v9 = vadd.f32 %v19134_v12, %v10053_v56 }
0x2482   :  { %10123 = vadd.xlane.f32.xlu1 %v10122_v31  ;;  %v19176_v60 = vadd.f32 %v10062_v30, %v19063_v15 }
0x2483   :  { %v19171_v26 = vadd.f32 %v10054_v9, %v19052_v42  ;;  %v10125_v52 = vsel %vm258_vm1, %v19161_v23, 0.0  ;;  %v10131_v42 = vsel %vm258_vm1, %v19168_v59, 0.0 }
0x2484   :  { %10126 = vadd.xlane.f32.xlu0 %v10125_v52  ;;  %v10134_v10 = vsel %vm258_vm1, %v19176_v60, 0.0 }
0x2485   :  { %v13858_v8 = vpop.f32.mrb[136].mxu1  ;;  %v10128_v13 = vsel %vm258_vm1, %v19171_v26, 0.0 }
0x2486   :  { %v10066_v54 = vpop.f32.mrb[137].mxu1  ;;  %10129 = vadd.xlane.f32.xlu1 %v10128_v13  ;;  %v10075_v33 = vadd.f32 %v13858_v8, %v19134_v12 }
0x2487   :  { %v10067_v48 = vadd.f32 %v19134_v12, %v10066_v54  ;;  %v13859_v2 = vpop.f32.mrb[138].mxu1 }
0x2488   :  { %v10069_v18 = vpop.f32.mrb[139].mxu1  ;;  %10132 = vadd.xlane.f32.xlu0 %v10131_v42  ;;  %v10078_v15 = vadd.f32 %v13859_v2, %v19134_v12  ;;  %v19192_v47 = vadd.f32 %v10075_v33, %v19086_v36 }
0x2489   :  { %v19185_v44 = vadd.f32 %v10067_v48, %v19076_v62  ;;  %v10070_v16 = vadd.f32 %v19134_v12, %v10069_v18 }
0x248a   :  { %10135 = vadd.xlane.f32.xlu1 %v10134_v10  ;;  %v19200_v62 = vadd.f32 %v10078_v15, %v19089_v58 }
0x248b   :  { %v19195_v34 = vadd.f32 %v10070_v16, %v19079_v14  ;;  %v10137_v22 = vsel %vm258_vm1, %v19185_v44, 0.0  ;;  %v10143_v14 = vsel %vm258_vm1, %v19192_v47, 0.0 }
0x248c   :  { %10138 = vadd.xlane.f32.xlu0 %v10137_v22  ;;  %v10146_v25 = vsel %vm258_vm1, %v19200_v62, 0.0 }
0x248d   :  { %v13862_v21 = vpop.f32.mrb[140].mxu1  ;;  %v10140_v7 = vsel %vm258_vm1, %v19195_v34, 0.0 }
0x248e   :  { %10141 = vadd.xlane.f32.xlu1 %v10140_v7  ;;  %v10082_v3 = vpop.f32.mrb[141].mxu1  ;;  %v10091_v24 = vadd.f32 %v13862_v21, %v19134_v12 }
0x248f   :  { %v10083_v36 = vadd.f32 %v19134_v12, %v10082_v3  ;;  %v13863_v32 = vpop.f32.mrb[142].mxu1 }
0x2490   :  { %10144 = vadd.xlane.f32.xlu0 %v10143_v14  ;;  %v10085_v57 = vpop.f32.mrb[143].mxu1  ;;  %v10094_v58 = vadd.f32 %v13863_v32, %v19134_v12  ;;  %v19216_v41 = vadd.f32 %v10091_v24, %v19111_v63 }
0x2491   :  { %v19209_v37 = vadd.f32 %v10083_v36, %v19102_v20  ;;  %v10086_v4 = vadd.f32 %v19134_v12, %v10085_v57 }
0x2492   :  { %10147 = vadd.xlane.f32.xlu1 %v10146_v25  ;;  %v19224_v20 = vadd.f32 %v10094_v58, %v19114_v55  ;;  %v10155_v0 = vsel %vm258_vm1, %v19216_v41, 0.0 }
0x2493   :  { %v19219_v50 = vadd.f32 %v10086_v4, %v19105_v27  ;;  %v10149_v38 = vsel %vm258_vm1, %v19209_v37, 0.0  ;;  %v14690_v27 = vld [vmem:[%s19423_s8] sm:$0xff]  }
0x2494   :  { %10150 = vadd.xlane.f32.xlu0 %v10149_v38  ;;  %v10158_v63 = vsel %vm258_vm1, %v19224_v20, 0.0  ;;  %13864 = vmatprep.subr.bf16.mxu0 %v14690_v27 }
0x2495   :  { %v10152_v12 = vsel %vm258_vm1, %v19219_v50, 0.0  ;;  %13865 = vmatpush3.bf16.msra.mxu0 %v14690_v27 }
0x2496   :  { %10153 = vadd.xlane.f32.xlu1 %v10152_v12 }
0x2498   :  { %10156 = vadd.xlane.f32.xlu0 %v10155_v0 }
0x249a   :  { %10159 = vadd.xlane.f32.xlu1 %v10158_v63 }
0x2509   :  { %v10115_v55 = vpop.xlane.xlu0 %10114 }
0x250a   :  { %v10161_v40 = vmul.f32 0.03125, %v10115_v55 }
0x250b   :  { %v10118_v46 = vpop.xlane.xlu1 %10117 }
0x250c   :  { %v19236_v29 = vsub.f32 %v19139_v19, %v10161_v40  ;;  %v10162_v43 = vmul.f32 0.03125, %v10118_v46 }
0x250d   :  { %v10121_v53 = vpop.xlane.xlu0 %10120 }
0x250e   :  { %v19239_v35 = vsub.f32 %v19147_v49, %v10162_v43  ;;  %v10163_v1 = vmul.f32 0.03125, %v10121_v53  ;;  %v10193_v11 = vmul.f32 %v19236_v29, %v19236_v29 }
0x250f   :  { %v10124_v61 = vpop.xlane.xlu1 %10123 }
0x2510   :  { %v19244_v39 = vsub.f32 %v19144_v5, %v10163_v1  ;;  %v10164_v51 = vmul.f32 0.03125, %v10124_v61  ;;  %v10209_v6 = vsel %vm258_vm1, %v10193_v11, 0.0  ;;  %v10194_v19 = vmul.f32 %v19239_v35, %v19239_v35 }
0x2511   :  { %v10127_v28 = vpop.xlane.xlu0 %10126  ;;  %10210 = vadd.xlane.f32.xlu0 %v10209_v6 }
0x2512   :  { %v19250_v45 = vsub.f32 %v19152_v17, %v10164_v51  ;;  %v10165_v49 = vmul.f32 0.03125, %v10127_v28  ;;  %v10212_v56 = vsel %vm258_vm1, %v10194_v19, 0.0  ;;  %v10195_v30 = vmul.f32 %v19244_v39, %v19244_v39 }
0x2513   :  { %v10130_v9 = vpop.xlane.xlu1 %10129  ;;  %10213 = vadd.xlane.f32.xlu1 %v10212_v56 }
0x2514   :  { %v19256_v5 = vsub.f32 %v19161_v23, %v10165_v49  ;;  %v10166_v31 = vmul.f32 0.03125, %v10130_v9  ;;  %v10215_v52 = vsel %vm258_vm1, %v10195_v30, 0.0  ;;  %v10196_v8 = vmul.f32 %v19250_v45, %v19250_v45 }
0x2515   :  { %v10133_v13 = vpop.xlane.xlu0 %10132  ;;  %10216 = vadd.xlane.f32.xlu0 %v10215_v52 }
0x2516   :  { %v19262_v17 = vsub.f32 %v19171_v26, %v10166_v31  ;;  %v10167_v54 = vmul.f32 0.03125, %v10133_v13  ;;  %v10218_v33 = vsel %vm258_vm1, %v10196_v8, 0.0  ;;  %v10197_v48 = vmul.f32 %v19256_v5, %v19256_v5 }
0x2517   :  { %v10136_v2 = vpop.xlane.xlu1 %10135  ;;  %10219 = vadd.xlane.f32.xlu1 %v10218_v33 }
0x2518   :  { %v19268_v23 = vsub.f32 %v19168_v59, %v10167_v54  ;;  %v10168_v42 = vmul.f32 0.03125, %v10136_v2  ;;  %v10221_v18 = vsel %vm258_vm1, %v10197_v48, 0.0  ;;  %v10198_v15 = vmul.f32 %v19262_v17, %v19262_v17 }
0x2519   :  { %v10139_v16 = vpop.xlane.xlu0 %10138  ;;  %10222 = vadd.xlane.f32.xlu0 %v10221_v18 }
0x251a   :  { %v19274_v26 = vsub.f32 %v19176_v60, %v10168_v42  ;;  %v10169_v10 = vmul.f32 0.03125, %v10139_v16  ;;  %v10224_v22 = vsel %vm258_vm1, %v10198_v15, 0.0  ;;  %v10199_v21 = vmul.f32 %v19268_v23, %v19268_v23 }
0x251b   :  { %v10142_v7 = vpop.xlane.xlu1 %10141  ;;  %10225 = vadd.xlane.f32.xlu1 %v10224_v22 }
0x251c   :  { %v19280_v59 = vsub.f32 %v19185_v44, %v10169_v10  ;;  %v10170_v3 = vmul.f32 0.03125, %v10142_v7  ;;  %v10227_v24 = vsel %vm258_vm1, %v10199_v21, 0.0  ;;  %v10200_v36 = vmul.f32 %v19274_v26, %v19274_v26 }
0x251d   :  { %v10145_v32 = vpop.xlane.xlu0 %10144  ;;  %10228 = vadd.xlane.f32.xlu0 %v10227_v24 }
0x251e   :  { %v19286_v60 = vsub.f32 %v19195_v34, %v10170_v3  ;;  %v10171_v14 = vmul.f32 0.03125, %v10145_v32  ;;  %v10230_v57 = vsel %vm258_vm1, %v10200_v36, 0.0  ;;  %v10201_v58 = vmul.f32 %v19280_v59, %v19280_v59 }
0x251f   :  { %v10148_v4 = vpop.xlane.xlu1 %10147  ;;  %10231 = vadd.xlane.f32.xlu1 %v10230_v57 }
0x2520   :  { %v19292_v44 = vsub.f32 %v19192_v47, %v10171_v14  ;;  %v10172_v25 = vmul.f32 0.03125, %v10148_v4  ;;  %v10233_v38 = vsel %vm258_vm1, %v10201_v58, 0.0  ;;  %v10202_v12 = vmul.f32 %v19286_v60, %v19286_v60  ;;  %v19337_v4 = vld [vmem:[%s19422_s7 + $0xc] ss:$0 sm:$0xff] }
0x2521   :  { %10234 = vadd.xlane.f32.xlu0 %v10233_v38  ;;  %v10151_v34 = vpop.xlane.xlu0 %10150 }
0x2522   :  { %v19298_v0 = vsub.f32 %v19200_v62, %v10172_v25  ;;  %v10173_v63 = vmul.f32 0.03125, %v10151_v34  ;;  %v10236_v27 = vsel %vm258_vm1, %v10202_v12, 0.0  ;;  %v10203_v55 = vmul.f32 %v19292_v44, %v19292_v44 }
0x2523   :  { %10237 = vadd.xlane.f32.xlu1 %v10236_v27  ;;  %v10154_v47 = vpop.xlane.xlu1 %10153 }
0x2524   :  { %v19304_v40 = vsub.f32 %v19209_v37, %v10173_v63  ;;  %v10174_v46 = vmul.f32 0.03125, %v10154_v47  ;;  %v10239_v43 = vsel %vm258_vm1, %v10203_v55, 0.0  ;;  %v10204_v53 = vmul.f32 %v19298_v0, %v19298_v0 }
0x2525   :  { %10240 = vadd.xlane.f32.xlu0 %v10239_v43  ;;  %v10157_v62 = vpop.xlane.xlu0 %10156 }
0x2526   :  { %v19310_v1 = vsub.f32 %v19219_v50, %v10174_v46  ;;  %v10175_v11 = vmul.f32 0.03125, %v10157_v62  ;;  %v10242_v61 = vsel %vm258_vm1, %v10204_v53, 0.0  ;;  %v10205_v51 = vmul.f32 %v19304_v40, %v19304_v40  ;;  %v19345_v62 = vld [vmem:[%s19422_s7 + $0xd] ss:$0 sm:$0xff] }
0x2527   :  { %10243 = vadd.xlane.f32.xlu1 %v10242_v61  ;;  %v10160_v37 = vpop.xlane.xlu1 %10159 }
0x2528   :  { %v19316_v6 = vsub.f32 %v19216_v41, %v10175_v11  ;;  %v10176_v19 = vmul.f32 0.03125, %v10160_v37  ;;  %v10245_v28 = vsel %vm258_vm1, %v10205_v51, 0.0  ;;  %v10206_v49 = vmul.f32 %v19310_v1, %v19310_v1 }
0x2529   :  { %10246 = vadd.xlane.f32.xlu0 %v10245_v28 }
0x252a   :  { %v19322_v50 = vsub.f32 %v19224_v20, %v10176_v19  ;;  %v10248_v56 = vsel %vm258_vm1, %v10206_v49, 0.0  ;;  %v10207_v30 = vmul.f32 %v19316_v6, %v19316_v6  ;;  %v14691_v20 = vld [vmem:[%s19423_s8 + $0x8] sm:$0xff]  }
0x252b   :  { %10249 = vadd.xlane.f32.xlu1 %v10248_v56  ;;  %13866 = vmatprep.subr.bf16.mxu0 %v14691_v20 }
0x252c   :  { %v10251_v9 = vsel %vm258_vm1, %v10207_v30, 0.0  ;;  %v10208_v41 = vmul.f32 %v19322_v50, %v19322_v50  ;;  %13867 = vmatpush3.bf16.msra.mxu0 %v14691_v20 }
0x252d   :  { %10252 = vadd.xlane.f32.xlu0 %v10251_v9 }
0x252e   :  { %v10254_v31 = vsel %vm258_vm1, %v10208_v41, 0.0 }
0x252f   :  { %10255 = vadd.xlane.f32.xlu1 %v10254_v31 }
0x259e   :  { %v10211_v52 = vpop.xlane.xlu0 %10210 }
0x259f   :  { %v10257_v8 = vmul.f32 0.03125, %v10211_v52 }
0x25a0   :  { %v10214_v13 = vpop.xlane.xlu1 %10213 }
0x25a1   :  { %v10273_v54 = vadd.f32 1e-05, %v10257_v8  ;;  %v10258_v33 = vmul.f32 0.03125, %v10214_v13 }
0x25a2   :  { %v10217_v48 = vpop.xlane.xlu0 %10216 }
0x25a3   :  { %15300 = vrsqrt.f32 %v10273_v54  ;;  %v10274_v2 = vadd.f32 1e-05, %v10258_v33  ;;  %v10259_v42 = vmul.f32 0.03125, %v10217_v48 }
0x25a4   :  { %v10220_v18 = vpop.xlane.xlu1 %10219 }
0x25a5   :  { %15302 = vrsqrt.f32 %v10274_v2  ;;  %v10275_v15 = vadd.f32 1e-05, %v10259_v42  ;;  %v10260_v16 = vmul.f32 0.03125, %v10220_v18 }
0x25a6   :  { %v10223_v10 = vpop.xlane.xlu0 %10222 }
0x25a7   :  { %15304 = vrsqrt.f32 %v10275_v15  ;;  %v10276_v22 = vadd.f32 1e-05, %v10260_v16  ;;  %v10261_v21 = vmul.f32 0.03125, %v10223_v10 }
0x25a8   :  { %v10226_v7 = vpop.xlane.xlu1 %10225 }
0x25a9   :  { %15306 = vrsqrt.f32 %v10276_v22  ;;  %v10277_v3 = vadd.f32 1e-05, %v10261_v21  ;;  %v10262_v24 = vmul.f32 0.03125, %v10226_v7 }
0x25aa   :  { %v10229_v36 = vpop.xlane.xlu0 %10228 }
0x25ab   :  { %15308 = vrsqrt.f32 %v10277_v3  ;;  %v10278_v32 = vadd.f32 1e-05, %v10262_v24  ;;  %v10263_v14 = vmul.f32 0.03125, %v10229_v36 }
0x25ac   :  { %v10232_v57 = vpop.xlane.xlu1 %10231 }
0x25ad   :  { %v15301_v58 = vpop.eup %15300  ;;  %15310 = vrsqrt.f32 %v10278_v32  ;;  %v10279_v25 = vadd.f32 1e-05, %v10263_v14  ;;  %v10264_v38 = vmul.f32 0.03125, %v10232_v57 }
0x25ae   :  { %v10305_v12 = vmul.f32 %v15301_v58, %v19236_v29  ;;  %v10235_v34 = vpop.xlane.xlu0 %10234 }
0x25af   :  { %v15303_v63 = vpop.eup %15302  ;;  %15312 = vrsqrt.f32 %v10279_v25  ;;  %v10280_v27 = vadd.f32 1e-05, %v10264_v38  ;;  %v10265_v55 = vmul.f32 0.03125, %v10235_v34 }
0x25b0   :  { %v10306_v47 = vmul.f32 %v15303_v63, %v19239_v35  ;;  %v10238_v46 = vpop.xlane.xlu1 %10237  ;;  %v10327_v43 = vmul.f32 %v19337_v4, %v10305_v12 }
0x25b1   :  { %v15305_v53 = vpop.eup %15304  ;;  %15314 = vrsqrt.f32 %v10280_v27  ;;  %v10281_v11 = vadd.f32 1e-05, %v10265_v55  ;;  %v10266_v61 = vmul.f32 0.03125, %v10238_v46 }
0x25b2   :  { %v10307_v29 = vmul.f32 %v15305_v53, %v19244_v39  ;;  %v10241_v51 = vpop.xlane.xlu0 %10240  ;;  %v10328_v37 = vmul.f32 %v19337_v4, %v10306_v47  ;;  %v10349_v9 = vadd.f32 %v19345_v62, %v10327_v43 }
0x25b3   :  { %v15307_v19 = vpop.eup %15306  ;;  %15316 = vrsqrt.f32 %v10281_v11  ;;  %v10282_v35 = vadd.f32 1e-05, %v10266_v61  ;;  %v10267_v28 = vmul.f32 0.03125, %v10241_v51 }
0x25b4   :  { %v10329_v49 = vmul.f32 %v19337_v4, %v10307_v29  ;;  %v10308_v56 = vmul.f32 %v15307_v19, %v19250_v45  ;;  %v10244_v30 = vpop.xlane.xlu1 %10243  ;;  %v10350_v41 = vadd.f32 %v19345_v62, %v10328_v37 }
0x25b5   :  { %v15309_v31 = vpop.eup %15308  ;;  %15318 = vrsqrt.f32 %v10282_v35  ;;  %v10283_v20 = vadd.f32 1e-05, %v10267_v28  ;;  %v10268_v39 = vmul.f32 0.03125, %v10244_v30 }
0x25b6   :  { %v10330_v52 = vmul.f32 %v19337_v4, %v10308_v56  ;;  %v10309_v8 = vmul.f32 %v15309_v31, %v19256_v5  ;;  %v10247_v13 = vpop.xlane.xlu0 %10246  ;;  %v10365_v54 = vpack.c.bf16 %v10350_v41, %v10349_v9  ;;  %v10351_v45 = vadd.f32 %v19345_v62, %v10329_v49 }
0x25b7   :  { %v15311_v33 = vpop.eup %15310  ;;  %15320 = vrsqrt.f32 %v10283_v20  ;;  %v10284_v48 = vadd.f32 1e-05, %v10268_v39  ;;  %v10269_v2 = vmul.f32 0.03125, %v10247_v13 }
0x25b8   :  { %v10352_v42 = vadd.f32 %v19345_v62, %v10330_v52  ;;  %v10310_v18 = vmul.f32 %v15311_v33, %v19262_v17  ;;  %v10250_v15 = vpop.xlane.xlu1 %10249  ;;  %13868 = vmatprep.mubr.msk.bf16.mxu0 %vm258_vm1, %v10365_v54  ;;  %v10331_v16 = vmul.f32 %v19337_v4, %v10309_v8 }
0x25b9   :  { %v15313_v10 = vpop.eup %15312  ;;  %15322 = vrsqrt.f32 %v10284_v48  ;;  %v10285_v5 = vadd.f32 1e-05, %v10269_v2  ;;  %v10270_v22 = vmul.f32 0.03125, %v10250_v15 }
0x25ba   :  { %v10366_v21 = vpack.c.bf16 %v10352_v42, %v10351_v45  ;;  %v10311_v7 = vmul.f32 %v15313_v10, %v19268_v23  ;;  %v10253_v3 = vpop.xlane.xlu0 %10252  ;;  %v10332_v24 = vmul.f32 %v19337_v4, %v10310_v18  ;;  %v10353_v25 = vadd.f32 %v19345_v62, %v10331_v16 }
0x25bb   :  { %v15315_v36 = vpop.eup %15314  ;;  %15324 = vrsqrt.f32 %v10285_v5  ;;  %v10286_v32 = vadd.f32 1e-05, %v10270_v22  ;;  %v10271_v14 = vmul.f32 0.03125, %v10253_v3 }
0x25bc   :  { %v10333_v17 = vmul.f32 %v19337_v4, %v10311_v7  ;;  %v10312_v57 = vmul.f32 %v15315_v36, %v19274_v26  ;;  %v10256_v58 = vpop.xlane.xlu1 %10255  ;;  %13869 = vmatmul.mubr.msk.bf16.vlgmr.msra.gmra.mrb[112].mxu0 %vm258_vm1, %v10366_v21  ;;  %v10354_v38 = vadd.f32 %v19345_v62, %v10332_v24 }
0x25bd   :  { %v15317_v12 = vpop.eup %15316  ;;  %15326 = vrsqrt.f32 %v10286_v32  ;;  %v10287_v23 = vadd.f32 1e-05, %v10271_v14  ;;  %v10272_v34 = vmul.f32 0.03125, %v10256_v58 }
0x25be   :  { %v10334_v63 = vmul.f32 %v19337_v4, %v10312_v57  ;;  %v10313_v27 = vmul.f32 %v15317_v12, %v19280_v59  ;;  %v10367_v55 = vpack.c.bf16 %v10354_v38, %v10353_v25  ;;  %v10355_v26 = vadd.f32 %v19345_v62, %v10333_v17 }
0x25bf   :  { %v15319_v47 = vpop.eup %15318  ;;  %15328 = vrsqrt.f32 %v10287_v23  ;;  %v10288_v46 = vadd.f32 1e-05, %v10272_v34 }
0x25c0   :  { %v10356_v43 = vadd.f32 %v19345_v62, %v10334_v63  ;;  %v10314_v53 = vmul.f32 %v15319_v47, %v19286_v60  ;;  %13872 = vmatprep.mubr.msk.bf16.mxu0 %vm258_vm1, %v10367_v55  ;;  %v10335_v11 = vmul.f32 %v19337_v4, %v10313_v27 }
0x25c1   :  { %v15321_v61 = vpop.eup %15320  ;;  %15330 = vrsqrt.f32 %v10288_v46 }
0x25c2   :  { %v10368_v29 = vpack.c.bf16 %v10356_v43, %v10355_v26  ;;  %v10315_v51 = vmul.f32 %v15321_v61, %v19292_v44  ;;  %v10336_v59 = vmul.f32 %v19337_v4, %v10314_v53  ;;  %v10357_v60 = vadd.f32 %v19345_v62, %v10335_v11 }
0x25c3   :  { %v15323_v37 = vpop.eup %15322 }
0x25c4   :  { %v10337_v19 = vmul.f32 %v19337_v4, %v10315_v51  ;;  %v10316_v35 = vmul.f32 %v15323_v37, %v19298_v0  ;;  %13873 = vmatmul.mubr.msk.bf16.gmra.mrb[116].mxu0 %vm258_vm1, %v10368_v29  ;;  %v10358_v28 = vadd.f32 %v19345_v62, %v10336_v59 }
0x25c5   :  { %v15325_v49 = vpop.eup %15324 }
0x25c6   :  { %v10338_v56 = vmul.f32 %v19337_v4, %v10316_v35  ;;  %v10317_v30 = vmul.f32 %v15325_v49, %v19304_v40  ;;  %v10369_v9 = vpack.c.bf16 %v10358_v28, %v10357_v60  ;;  %v10359_v41 = vadd.f32 %v19345_v62, %v10337_v19 }
0x25c7   :  { %v15327_v44 = vpop.eup %15326 }
0x25c8   :  { %v10360_v31 = vadd.f32 %v19345_v62, %v10338_v56  ;;  %v10318_v20 = vmul.f32 %v15327_v44, %v19310_v1  ;;  %13876 = vmatprep.mubr.msk.bf16.mxu0 %vm258_vm1, %v10369_v9  ;;  %v10339_v0 = vmul.f32 %v19337_v4, %v10317_v30 }
0x25c9   :  { %v15329_v39 = vpop.eup %15328 }
0x25ca   :  { %v10370_v52 = vpack.c.bf16 %v10360_v31, %v10359_v41  ;;  %v10319_v8 = vmul.f32 %v15329_v39, %v19316_v6  ;;  %v10340_v13 = vmul.f32 %v19337_v4, %v10318_v20  ;;  %v10361_v48 = vadd.f32 %v19345_v62, %v10339_v0 }
0x25cb   :  { %v15331_v54 = vpop.eup %15330 }
0x25cc   :  { %v10341_v40 = vmul.f32 %v19337_v4, %v10319_v8  ;;  %v10320_v33 = vmul.f32 %v15331_v54, %v19322_v50  ;;  %13877 = vmatmul.mubr.msk.bf16.gmra.mrb[120].mxu0 %vm258_vm1, %v10370_v52  ;;  %v10362_v1 = vadd.f32 %v19345_v62, %v10340_v13  ;;  %v11346_v50 = vld [vmem:[%s19424_s9] ss:$0 sm:$0xff]  ;;  %s15356_s9 = smov [#allocation2]  }
0x25cd   :  { %s10538_s27 = sshll.u32 %s15356_s9, 4  ;;  %s10539_s27 = int_to_ptr.vmem [resolvable:$true] %s10538_s27 }
0x25ce   :  { %v10342_v2 = vmul.f32 %v19337_v4, %v10320_v33  ;;  %v10371_v45 = vpack.c.bf16 %v10362_v1, %v10361_v48  ;;  %v10363_v42 = vadd.f32 %v19345_v62, %v10341_v40  ;;  %s15332_s5 = scalar_lea.vmem %s10539_s27, 2048  ;;  %p15337_p1 = scmp.lt.s32.totalorder %s10539_s27, %s10539_s27 }
0x25cf   :  { %p15333_p0 = scmp.ne.s32.totalorder %s10539_s27, %s15332_s5  ;;  %p15338_p2 = scmp.lt.s32.totalorder %s15332_s5, %s15332_s5 }
0x25d0   :  { %v10364_v6 = vadd.f32 %v19345_v62, %v10342_v2  ;;  %13880 = vmatprep.mubr.msk.bf16.mxu0 %vm258_vm1, %v10371_v45 }
0x25d1   :  { %p15339_p3 = por %p15338_p2, %p15337_p1 }
0x25d2   :  { %v10372_v18 = vpack.c.bf16 %v10364_v6, %v10363_v42 }
0x25d3   :  { %p15340_p4 = pnand %p15339_p3, %p15333_p0 }
0x25d4   :  { %13881 = vmatmul.mubr.msk.bf16.gmra.mrb[124].mxu0 %vm258_vm1, %v10372_v18 }
0x268f   :  { %v13870_v15 = vpop.f32.mrb[112].mxu0 }
0x2690   :  { %v10463_v16 = vadd.f32 %v13870_v15, %v11346_v50  ;;  %v10454_v10 = vpop.f32.mrb[113].mxu0 }
0x2691   :  { %v10455_v5 = vadd.f32 %v11346_v50, %v10454_v10  ;;  %v13871_v22 = vpop.f32.mrb[114].mxu0 }
0x2692   :  { %10519 = vst [vmem:[#allocation2 + $0x10] sm:$0xff] %v10463_v16  ;;  %v10466_v4 = vadd.f32 %v13871_v22, %v11346_v50  ;;  %v10457_v21 = vpop.f32.mrb[115].mxu0 }
0x2693   :  { %10517 = vst [vmem:[#allocation2] sm:$0xff] %v10455_v5  ;;  %v10458_v7 = vadd.f32 %v11346_v50, %v10457_v21 }
0x2694   :  { %10520 = vst [vmem:[#allocation2 + $0x18] sm:$0xff] %v10466_v4 }
0x2695   :  { %10518 = vst [vmem:[#allocation2 + $0x8] sm:$0xff] %v10458_v7 }
0x2697   :  { %v13874_v62 = vpop.f32.mrb[116].mxu0 }
0x2698   :  { %v10479_v3 = vadd.f32 %v13874_v62, %v11346_v50  ;;  %v10470_v24 = vpop.f32.mrb[117].mxu0 }
0x2699   :  { %v10471_v36 = vadd.f32 %v11346_v50, %v10470_v24  ;;  %v13875_v32 = vpop.f32.mrb[118].mxu0 }
0x269a   :  { %10523 = vst [vmem:[#allocation2 + $0x30] sm:$0xff] %v10479_v3  ;;  %v10482_v14 = vadd.f32 %v13875_v32, %v11346_v50  ;;  %v10473_v17 = vpop.f32.mrb[119].mxu0 }
0x269b   :  { %10521 = vst [vmem:[#allocation2 + $0x20] sm:$0xff] %v10471_v36  ;;  %v10474_v57 = vadd.f32 %v11346_v50, %v10473_v17 }
0x269c   :  { %10524 = vst [vmem:[#allocation2 + $0x38] sm:$0xff] %v10482_v14 }
0x269d   :  { %10522 = vst [vmem:[#allocation2 + $0x28] sm:$0xff] %v10474_v57 }
0x269f   :  { %v13878_v58 = vpop.f32.mrb[120].mxu0 }
0x26a0   :  { %v10495_v25 = vadd.f32 %v13878_v58, %v11346_v50  ;;  %v10486_v38 = vpop.f32.mrb[121].mxu0 }
0x26a1   :  { %v10487_v12 = vadd.f32 %v11346_v50, %v10486_v38  ;;  %v13879_v23 = vpop.f32.mrb[122].mxu0 }
0x26a2   :  { %10527 = vst [vmem:[#allocation2 + $0x50] sm:$0xff] %v10495_v25  ;;  %v10498_v34 = vadd.f32 %v13879_v23, %v11346_v50  ;;  %v10489_v63 = vpop.f32.mrb[123].mxu0 }
0x26a3   :  { %10525 = vst [vmem:[#allocation2 + $0x40] sm:$0xff] %v10487_v12  ;;  %v10490_v27 = vadd.f32 %v11346_v50, %v10489_v63 }
0x26a4   :  { %10528 = vst [vmem:[#allocation2 + $0x58] sm:$0xff] %v10498_v34 }
0x26a5   :  { %10526 = vst [vmem:[#allocation2 + $0x48] sm:$0xff] %v10490_v27 }
0x26a7   :  { %v13882_v55 = vpop.f32.mrb[124].mxu0 }
0x26a8   :  { %v10511_v47 = vadd.f32 %v13882_v55, %v11346_v50  ;;  %v10502_v46 = vpop.f32.mrb[125].mxu0 }
0x26a9   :  { %v10503_v26 = vadd.f32 %v11346_v50, %v10502_v46  ;;  %v13883_v43 = vpop.f32.mrb[126].mxu0 }
0x26aa   :  { %10531 = vst [vmem:[#allocation2 + $0x70] sm:$0xff] %v10511_v47  ;;  %v10514_v53 = vadd.f32 %v13883_v43, %v11346_v50  ;;  %v10505_v11 = vpop.f32.mrb[127].mxu0 }
0x26ab   :  { %10529 = vst [vmem:[#allocation2 + $0x60] sm:$0xff] %v10503_v26  ;;  %v10506_v61 = vadd.f32 %v11346_v50, %v10505_v11 }
0x26ac   :  { %10532 = vst [vmem:[#allocation2 + $0x78] sm:$0xff] %v10514_v53 }
0x26ad   :  { %10530 = vst [vmem:[#allocation2 + $0x68] sm:$0xff] %v10506_v61 }
0x26ae   :  { %15343 = shalt.err (!%p15340_p4)
}
0x26af   :  { %s15344_s30 = scalar_lea.hbm %s19425_s10, 2048 }
0x26b0   :  { %p15345_p5 = scmp.ne.s32.totalorder %s19425_s10, %s15344_s30  ;;  %p15348_p6 = scmp.lt.u32.totalorder %s15344_s30, %s19425_s10 }
0x26b2   :  { %p15350_p7 = pnand %p15348_p6, %p15345_p5 }
0x26b4   :  { %15353 = shalt.err (!%p15350_p7)
}
0x26b5   :  { %s15357_s13 = smov 128   ;;  %s15358_s14 = smov 8  }
0x26b6   :  { %10544 = dma.vmem_to_hbm [thread:$0]  %s10539_s27, 2048, %s19425_s10, [#allocation3], %s15357_s13, %s15357_s13, %s15358_s14  }
0x26b7   :  { %15354 = dma.done.wait [#allocation3], 2048  }
0x26b8   :  { %15355 = vsyncadd [#allocation3], 4294965248 }
0x26b9   :  { %10548 = vsyncpa [#allocation3], 1 }

</bundles_post_ra>
